<compile_context>
chip_gen: v6e
topology: v6e:2x2x1
jax: 0.10.0
libtpu: 0.0.40
codegen_flags: <defaults>
</compile_context>

<pallas_src>
import jax
import jax.numpy as jnp
from jax.experimental import pallas as pl
from jax.experimental.pallas import tpu as pltpu

# ---- hyper-parameters implied by the module (small, synthetic) --------------
N_CLASSES  = 10
LATENT_DIM = 32
OUT_SIZE   = 48
OUT_PAD    = 128        # lane-dense padded width of the final Linear
FUSED_IN   = 64         # fused first-layer K: [onehot(pad 32) || noise(32)]
NOISE_OFF  = 32
BATCH      = 128        # one MXU-filling tile; BN couples the batch -> single tile
BN_EPS     = 0.8        # nn.BatchNorm1d(out_feat, 0.8) -> eps = 0.8
LEAKY      = 0.2

# ---- packed layout of the small per-feature vectors (one slab, one DMA) -----
# Every segment is a multiple of 128 lanes, so all static slices are vreg-aligned.
_SEG = (("b1", 128), ("b5", OUT_PAD),
        ("b2", 256), ("g2", 256), ("be2", 256),
        ("b3", 512), ("g3", 512), ("be3", 512),
        ("b4", 1024), ("g4", 1024), ("be4", 1024))
_OFF = {}
_o = 0
for _n, _w in _SEG:
    _OFF[_n] = (_o, _o + _w)
    _o += _w
VEC_LEN = _o            # 5632


def _leaky_relu(x):
    return jnp.where(x > 0, x, LEAKY * x)


def _batchnorm_train(z, gamma, beta):
    # Training-mode BatchNorm1d (biased batch stats), folded to scale/shift so
    # the apply pass over the big [B, N] tensor is a single mul + add.
    # NOTE: variance via E[x^2]-E[x]^2 (fine in f32 with O(1) activations and
    # eps=0.8; switch to the two-pass form if activation magnitudes grow).
    mean = jnp.mean(z, axis=0, keepdims=True)
    var = jnp.mean(z * z, axis=0, keepdims=True) - mean * mean
    scale = gamma * jax.lax.rsqrt(var + BN_EPS)
    shift = beta - mean * scale
    return z * scale + shift


def generator_kernel(gen_in_ref, w1f_ref, w2_ref, w3_ref, w4_hbm, w5_hbm, vec_ref,
                     img_ref, f_ref,
                     w4_buf, w5_buf, sem):
    # ---- kick off the two large weight DMAs so they overlap layers 1..3 -----
    w4_cp = pltpu.make_async_copy(w4_hbm, w4_buf, sem.at[0])
    w5_cp = pltpu.make_async_copy(w5_hbm, w5_buf, sem.at[1])
    w4_cp.start()
    w5_cp.start()

    def vec(name):
        lo, hi = _OFF[name]
        return vec_ref[:, lo:hi]

    # ---- encode: fused (one-hot || noise) @ w1f -> LeakyReLU (no BN) --------
    f = _leaky_relu(jnp.dot(gen_in_ref[...], w1f_ref[...],
                            preferred_element_type=jnp.float32) + vec("b1"))
    f_ref[...] = f

    # ---- decode block 1: 128 -> 256 ------------------------------------------
    z = jnp.dot(f.astype(jnp.bfloat16), w2_ref[...],
                preferred_element_type=jnp.float32) + vec("b2")
    h = _leaky_relu(_batchnorm_train(z, vec("g2"), vec("be2")))

    # ---- decode block 2: 256 -> 512 ------------------------------------------
    z = jnp.dot(h.astype(jnp.bfloat16), w3_ref[...],
                preferred_element_type=jnp.float32) + vec("b3")
    h = _leaky_relu(_batchnorm_train(z, vec("g3"), vec("be3")))

    # ---- decode block 3: 512 -> 1024 (needs w4; its DMA has been in flight) --
    w4_cp.wait()
    z = jnp.dot(h.astype(jnp.bfloat16), w4_buf[...],
                preferred_element_type=jnp.float32) + vec("b4")
    h = _leaky_relu(_batchnorm_train(z, vec("g4"), vec("be4")))

    # ---- final Linear (padded to 128 lanes) -> Tanh ---------------------------
    w5_cp.wait()
    img_ref[...] = jnp.tanh(jnp.dot(h.astype(jnp.bfloat16), w5_buf[...],
                                    preferred_element_type=jnp.float32) + vec("b5"))


def prepare_generator_params(params):
    """One-time parameter preprocessing (outside the per-call hot path):
       * fold the embedding table through the first-layer weights and fuse the
         class / noise halves into one [64, 128] weight,
       * cast matmul weights to bf16,
       * zero-pad the 48-wide final layer to 128 lanes,
       * pack all [1, N] bias / BN-affine vectors into a single f32 slab."""
    w1 = params["w1"]                                              # [NC+LAT, 128]
    cls_w1 = params["label_emb"] @ w1[:N_CLASSES]                  # [NC, 128]
    w1f = jnp.zeros((FUSED_IN, 128), jnp.float32)
    w1f = w1f.at[:N_CLASSES].set(cls_w1)
    w1f = w1f.at[NOISE_OFF:NOISE_OFF + LATENT_DIM].set(w1[N_CLASSES:])

    w5p = jnp.zeros((1024, OUT_PAD), jnp.float32).at[:, :OUT_SIZE].set(params["w5"])
    b5p = jnp.zeros((1, OUT_PAD), jnp.float32).at[:, :OUT_SIZE].set(params["b5"])

    segs = {"b1": params["b1"], "b5": b5p,
            "b2": params["b2"], "g2": params["g2"], "be2": params["be2"],
            "b3": params["b3"], "g3": params["g3"], "be3": params["be3"],
            "b4": params["b4"], "g4": params["g4"], "be4": params["be4"]}
    vec = jnp.concatenate([segs[name] for name, _ in _SEG], axis=-1)  # [1, VEC_LEN]
    assert vec.shape == (1, VEC_LEN)

    return {
        "w1f": w1f.astype(jnp.bfloat16),
        "w2": params["w2"].astype(jnp.bfloat16),
        "w3": params["w3"].astype(jnp.bfloat16),
        "w4": params["w4"].astype(jnp.bfloat16),
        "w5": w5p.astype(jnp.bfloat16),
        "vec": vec,
    }


# Advisory cost for XLA's scheduler (matmul flops dominate; ~1.9 MB HBM traffic).
_COST = pl.CostEstimate(flops=212_000_000, transcendentals=22_000,
                        bytes_accessed=1_900_000)


@jax.jit
def generator_forward(noise, labels, kp):
    """noise: [B, latent_dim] f32, labels: [B] int32. Returns (img, f)."""
    B = noise.shape[0]

    # Fused first-layer input: [one-hot(labels) padded to 32 || noise] in bf16.
    onehot = (labels[:, None] == jnp.arange(N_CLASSES, dtype=jnp.int32)
              ).astype(jnp.float32)                                # [B, NC]
    gen_in = jnp.concatenate(
        [onehot, jnp.zeros((B, NOISE_OFF - N_CLASSES), jnp.float32), noise],
        axis=-1).astype(jnp.bfloat16)                              # [B, 64]

    vmem = pl.BlockSpec(memory_space=pltpu.MemorySpace.VMEM)
    hbm = pl.BlockSpec(memory_space=pl.ANY)

    # TODO(synk): for >128 samples, add a "parallel" grid axis over independent
    # 128-row BN groups (changes BN group size => semantic decision).
    img_pad, f = pl.pallas_call(
        generator_kernel,
        out_shape=(jax.ShapeDtypeStruct((B, OUT_PAD), jnp.float32),
                   jax.ShapeDtypeStruct((B, 128), jnp.float32)),
        in_specs=[vmem, vmem, vmem, vmem, hbm, hbm, vmem],
        out_specs=(vmem, vmem),
        scratch_shapes=[pltpu.VMEM((512, 1024), jnp.bfloat16),   # w4 landing buffer
                        pltpu.VMEM((1024, OUT_PAD), jnp.bfloat16),  # w5 landing buffer
                        pltpu.SemaphoreType.DMA((2,))],
        cost_estimate=_COST,
    )(gen_in, kp["w1f"], kp["w2"], kp["w3"], kp["w4"], kp["w5"], kp["vec"])

    return img_pad[:, :OUT_SIZE], f


def init_params(key):
    """Deterministic synthetic parameters with the shapes implied by __init__."""
    dims = [(N_CLASSES + LATENT_DIM, 128), (128, 256), (256, 512),
            (512, 1024), (1024, OUT_SIZE)]
    keys = jax.random.split(key, 1 + 2 * len(dims))
    params = {"label_emb": jax.random.normal(keys[0], (N_CLASSES, N_CLASSES),
                                             jnp.float32) * 0.5}
    for i, (din, dout) in enumerate(dims):
        scale = 1.0 / jnp.sqrt(jnp.float32(din))
        params[f"w{i+1}"] = jax.random.normal(keys[1 + 2 * i], (din, dout),
                                              jnp.float32) * scale
        params[f"b{i+1}"] = jax.random.normal(keys[2 + 2 * i], (1, dout),
                                              jnp.float32) * 0.01
    # BatchNorm affine params for decode blocks 1..3 (layers 2..4).
    for i, dout in zip((2, 3, 4), (256, 512, 1024)):
        params[f"g{i}"] = jnp.ones((1, dout), jnp.float32)
        params[f"be{i}"] = jnp.zeros((1, dout), jnp.float32)
    return params


def reference_forward(noise, labels, params):
    """Pure-JAX f32 reference (exact module semantics) for correctness checking."""
    emb = params["label_emb"][labels]
    x = jnp.concatenate([emb, noise], axis=-1)
    f = _leaky_relu(x @ params["w1"] + params["b1"])
    h = f
    for i in (2, 3, 4):
        z = h @ params[f"w{i}"] + params[f"b{i}"]
        mean = jnp.mean(z, axis=0, keepdims=True)
        var = jnp.mean((z - mean) ** 2, axis=0, keepdims=True)
        h = _leaky_relu((z - mean) * jax.lax.rsqrt(var + BN_EPS)
                        * params[f"g{i}"] + params[f"be{i}"])
    img = jnp.tanh(h @ params["w5"] + params["b5"])
    return img, f


if __name__ == "__main__":
    key = jax.random.PRNGKey(0)
    k_par, k_noise, k_lab = jax.random.split(key, 3)

    params = init_params(k_par)
    kp = prepare_generator_params(params)

    noise = jax.random.normal(k_noise, (BATCH, LATENT_DIM), jnp.float32)
    labels = jax.random.randint(k_lab, (BATCH,), 0, N_CLASSES, jnp.int32)

    img, f = jax.block_until_ready(generator_forward(noise, labels, kp))

    img_ref, f_ref = reference_forward(noise, labels, params)
    assert img.shape == (BATCH, OUT_SIZE) and f.shape == (BATCH, 128)
    # bf16 matmul operands (f32 accumulate) vs. a pure-f32 reference -> loose tolerance.
    f_err = float(jnp.max(jnp.abs(f - f_ref)))
    img_err = float(jnp.max(jnp.abs(img - img_ref)))
    assert f_err < 0.1, f"f max abs err {f_err}"
    assert img_err < 0.15, f"img max abs err {img_err}"

    print("KERNEL_OK")
</pallas_src>

<mosaic_0001>
module attributes {stable_mosaic.version = 11 : i64} {
  func.func @generator_kernel(%arg0: memref<128x64xbf16, #tpu.memory_space<vmem>>, %arg1: memref<64x128xbf16, #tpu.memory_space<vmem>>, %arg2: memref<128x256xbf16, #tpu.memory_space<vmem>>, %arg3: memref<256x512xbf16, #tpu.memory_space<vmem>>, %arg4: memref<512x1024xbf16, #tpu.memory_space<any>>, %arg5: memref<1024x128xbf16, #tpu.memory_space<any>>, %arg6: memref<1x5632xf32, #tpu.memory_space<vmem>>, %arg7: memref<128x128xf32, #tpu.memory_space<vmem>>, %arg8: memref<128x128xf32, #tpu.memory_space<vmem>>, %arg9: memref<512x1024xbf16, #tpu.memory_space<vmem>>, %arg10: memref<1024x128xbf16, #tpu.memory_space<vmem>>, %arg11: memref<2x!tpu.dma_semaphore, #tpu.memory_space<semaphore_mem>>) attributes {dimension_semantics = [], scalar_prefetch = 0 : i64, scratch_operands = 3 : i64, tpu.core_type = #tpu.core_type<tc>} {
    %c0_i32 = arith.constant 0 : i32
    %0 = tpu.memref_slice %arg11[%c0_i32] : memref<2x!tpu.dma_semaphore, #tpu.memory_space<semaphore_mem>> -> memref<1x!tpu.dma_semaphore, #tpu.memory_space<semaphore_mem>>
    %1 = tpu.memref_squeeze %0 : memref<1x!tpu.dma_semaphore, #tpu.memory_space<semaphore_mem>> -> memref<!tpu.dma_semaphore, #tpu.memory_space<semaphore_mem>>
    tpu.enqueue_dma source(%arg4 : memref<512x1024xbf16, #tpu.memory_space<any>>) target(%arg9 : memref<512x1024xbf16, #tpu.memory_space<vmem>>) target_semaphore(%1 : memref<!tpu.dma_semaphore, #tpu.memory_space<semaphore_mem>>)
    %c1_i32 = arith.constant 1 : i32
    %2 = tpu.memref_slice %arg11[%c1_i32] : memref<2x!tpu.dma_semaphore, #tpu.memory_space<semaphore_mem>> -> memref<1x!tpu.dma_semaphore, #tpu.memory_space<semaphore_mem>>
    %3 = tpu.memref_squeeze %2 : memref<1x!tpu.dma_semaphore, #tpu.memory_space<semaphore_mem>> -> memref<!tpu.dma_semaphore, #tpu.memory_space<semaphore_mem>>
    tpu.enqueue_dma source(%arg5 : memref<1024x128xbf16, #tpu.memory_space<any>>) target(%arg10 : memref<1024x128xbf16, #tpu.memory_space<vmem>>) target_semaphore(%3 : memref<!tpu.dma_semaphore, #tpu.memory_space<semaphore_mem>>)
    %c0 = arith.constant 0 : index
    %c0_0 = arith.constant 0 : index
    %4 = vector.load %arg0[%c0, %c0_0] : memref<128x64xbf16, #tpu.memory_space<vmem>>, vector<128x64xbf16>
    %c0_1 = arith.constant 0 : index
    %c0_2 = arith.constant 0 : index
    %5 = vector.load %arg1[%c0_1, %c0_2] : memref<64x128xbf16, #tpu.memory_space<vmem>>, vector<64x128xbf16>
    %cst = arith.constant dense<0.000000e+00> : vector<128x128xf32>
    %6 = tpu.matmul %4, %5, %cst {dimension_numbers = #tpu.dot_dimension_numbers<[1], [0], [0], [1], [0, 0, 1, 1], [], []>} : vector<128x64xbf16>, vector<64x128xbf16>, vector<128x128xf32> -> vector<128x128xf32>
    %c0_3 = arith.constant 0 : index
    %c0_4 = arith.constant 0 : index
    %7 = vector.load %arg6[%c0_3, %c0_4] : memref<1x5632xf32, #tpu.memory_space<vmem>>, vector<1x128xf32>
    %8 = vector.broadcast %7 : vector<1x128xf32> to vector<128x128xf32>
    %9 = arith.addf %6, %8 : vector<128x128xf32>
    %cst_5 = arith.constant 0.000000e+00 : f32
    %10 = vector.broadcast %cst_5 : f32 to vector<128x128xf32>
    %11 = arith.cmpf ogt, %9, %10 : vector<128x128xf32>
    %cst_6 = arith.constant 2.000000e-01 : f32
    %12 = vector.broadcast %cst_6 : f32 to vector<128x128xf32>
    %13 = arith.mulf %12, %9 : vector<128x128xf32>
    %14 = arith.select %11, %9, %13 : vector<128x128xi1>, vector<128x128xf32>
    %c0_7 = arith.constant 0 : index
    %c0_8 = arith.constant 0 : index
    %15 = vector.load %arg8[%c0_7, %c0_8] : memref<128x128xf32, #tpu.memory_space<vmem>>, vector<128x128xf32>
    tpu.vector_store %arg8[%c0_7, %c0_8], %14 {strides = array<i32>} : memref<128x128xf32, #tpu.memory_space<vmem>>, vector<128x128xf32>,
    %16 = arith.truncf %14 : vector<128x128xf32> to vector<128x128xbf16>
    %c0_9 = arith.constant 0 : index
    %c0_10 = arith.constant 0 : index
    %17 = vector.load %arg2[%c0_9, %c0_10] : memref<128x256xbf16, #tpu.memory_space<vmem>>, vector<128x256xbf16>
    %cst_11 = arith.constant dense<0.000000e+00> : vector<128x256xf32>
    %18 = tpu.matmul %16, %17, %cst_11 {dimension_numbers = #tpu.dot_dimension_numbers<[1], [0], [0], [1], [0, 0, 1, 1], [], []>} : vector<128x128xbf16>, vector<128x256xbf16>, vector<128x256xf32> -> vector<128x256xf32>
    %c0_12 = arith.constant 0 : index
    %c256 = arith.constant 256 : index
    %19 = vector.load %arg6[%c0_12, %c256] : memref<1x5632xf32, #tpu.memory_space<vmem>>, vector<1x256xf32>
    %20 = vector.broadcast %19 : vector<1x256xf32> to vector<128x256xf32>
    %21 = arith.addf %18, %20 : vector<128x256xf32>
    %c0_13 = arith.constant 0 : index
    %c512 = arith.constant 512 : index
    %22 = vector.load %arg6[%c0_13, %c512] : memref<1x5632xf32, #tpu.memory_space<vmem>>, vector<1x256xf32>
    %c0_14 = arith.constant 0 : index
    %c768 = arith.constant 768 : index
    %23 = vector.load %arg6[%c0_14, %c768] : memref<1x5632xf32, #tpu.memory_space<vmem>>, vector<1x256xf32>
    %cst_15 = arith.constant dense<0.000000e+00> : vector<256xf32>
    %24 = vector.multi_reduction <add>, %21, %cst_15 [0] : vector<128x256xf32> to vector<256xf32>
    %25 = vector.shape_cast %24 : vector<256xf32> to vector<1x256xf32>
    %cst_16 = arith.constant 1.280000e+02 : f32
    %26 = vector.broadcast %cst_16 : f32 to vector<1x256xf32>
    %27 = arith.divf %25, %26 : vector<1x256xf32>
    %28 = arith.mulf %21, %21 : vector<128x256xf32>
    %cst_17 = arith.constant dense<0.000000e+00> : vector<256xf32>
    %29 = vector.multi_reduction <add>, %28, %cst_17 [0] : vector<128x256xf32> to vector<256xf32>
    %30 = vector.shape_cast %29 : vector<256xf32> to vector<1x256xf32>
    %cst_18 = arith.constant 1.280000e+02 : f32
    %31 = vector.broadcast %cst_18 : f32 to vector<1x256xf32>
    %32 = arith.divf %30, %31 : vector<1x256xf32>
    %33 = arith.mulf %27, %27 : vector<1x256xf32>
    %34 = arith.subf %32, %33 : vector<1x256xf32>
    %cst_19 = arith.constant 8.000000e-01 : f32
    %35 = vector.broadcast %cst_19 : f32 to vector<1x256xf32>
    %36 = arith.addf %34, %35 : vector<1x256xf32>
    %37 = math.rsqrt %36 : vector<1x256xf32>
    %38 = arith.mulf %22, %37 : vector<1x256xf32>
    %39 = arith.mulf %27, %38 : vector<1x256xf32>
    %40 = arith.subf %23, %39 : vector<1x256xf32>
    %41 = vector.broadcast %38 : vector<1x256xf32> to vector<128x256xf32>
    %42 = arith.mulf %21, %41 : vector<128x256xf32>
    %43 = vector.broadcast %40 : vector<1x256xf32> to vector<128x256xf32>
    %44 = arith.addf %42, %43 : vector<128x256xf32>
    %cst_20 = arith.constant 0.000000e+00 : f32
    %45 = vector.broadcast %cst_20 : f32 to vector<128x256xf32>
    %46 = arith.cmpf ogt, %44, %45 : vector<128x256xf32>
    %cst_21 = arith.constant 2.000000e-01 : f32
    %47 = vector.broadcast %cst_21 : f32 to vector<128x256xf32>
    %48 = arith.mulf %47, %44 : vector<128x256xf32>
    %49 = arith.select %46, %44, %48 : vector<128x256xi1>, vector<128x256xf32>
    %50 = arith.truncf %49 : vector<128x256xf32> to vector<128x256xbf16>
    %c0_22 = arith.constant 0 : index
    %c0_23 = arith.constant 0 : index
    %51 = vector.load %arg3[%c0_22, %c0_23] : memref<256x512xbf16, #tpu.memory_space<vmem>>, vector<256x512xbf16>
    %cst_24 = arith.constant dense<0.000000e+00> : vector<128x512xf32>
    %52 = tpu.matmul %50, %51, %cst_24 {dimension_numbers = #tpu.dot_dimension_numbers<[1], [0], [0], [1], [0, 0, 1, 1], [], []>} : vector<128x256xbf16>, vector<256x512xbf16>, vector<128x512xf32> -> vector<128x512xf32>
    %c0_25 = arith.constant 0 : index
    %c1024 = arith.constant 1024 : index
    %53 = vector.load %arg6[%c0_25, %c1024] : memref<1x5632xf32, #tpu.memory_space<vmem>>, vector<1x512xf32>
    %54 = vector.broadcast %53 : vector<1x512xf32> to vector<128x512xf32>
    %55 = arith.addf %52, %54 : vector<128x512xf32>
    %c0_26 = arith.constant 0 : index
    %c1536 = arith.constant 1536 : index
    %56 = vector.load %arg6[%c0_26, %c1536] : memref<1x5632xf32, #tpu.memory_space<vmem>>, vector<1x512xf32>
    %c0_27 = arith.constant 0 : index
    %c2048 = arith.constant 2048 : index
    %57 = vector.load %arg6[%c0_27, %c2048] : memref<1x5632xf32, #tpu.memory_space<vmem>>, vector<1x512xf32>
    %cst_28 = arith.constant dense<0.000000e+00> : vector<512xf32>
    %58 = vector.multi_reduction <add>, %55, %cst_28 [0] : vector<128x512xf32> to vector<512xf32>
    %59 = vector.shape_cast %58 : vector<512xf32> to vector<1x512xf32>
    %cst_29 = arith.constant 1.280000e+02 : f32
    %60 = vector.broadcast %cst_29 : f32 to vector<1x512xf32>
    %61 = arith.divf %59, %60 : vector<1x512xf32>
    %62 = arith.mulf %55, %55 : vector<128x512xf32>
    %cst_30 = arith.constant dense<0.000000e+00> : vector<512xf32>
    %63 = vector.multi_reduction <add>, %62, %cst_30 [0] : vector<128x512xf32> to vector<512xf32>
    %64 = vector.shape_cast %63 : vector<512xf32> to vector<1x512xf32>
    %cst_31 = arith.constant 1.280000e+02 : f32
    %65 = vector.broadcast %cst_31 : f32 to vector<1x512xf32>
    %66 = arith.divf %64, %65 : vector<1x512xf32>
    %67 = arith.mulf %61, %61 : vector<1x512xf32>
    %68 = arith.subf %66, %67 : vector<1x512xf32>
    %cst_32 = arith.constant 8.000000e-01 : f32
    %69 = vector.broadcast %cst_32 : f32 to vector<1x512xf32>
    %70 = arith.addf %68, %69 : vector<1x512xf32>
    %71 = math.rsqrt %70 : vector<1x512xf32>
    %72 = arith.mulf %56, %71 : vector<1x512xf32>
    %73 = arith.mulf %61, %72 : vector<1x512xf32>
    %74 = arith.subf %57, %73 : vector<1x512xf32>
    %75 = vector.broadcast %72 : vector<1x512xf32> to vector<128x512xf32>
    %76 = arith.mulf %55, %75 : vector<128x512xf32>
    %77 = vector.broadcast %74 : vector<1x512xf32> to vector<128x512xf32>
    %78 = arith.addf %76, %77 : vector<128x512xf32>
    %cst_33 = arith.constant 0.000000e+00 : f32
    %79 = vector.broadcast %cst_33 : f32 to vector<128x512xf32>
    %80 = arith.cmpf ogt, %78, %79 : vector<128x512xf32>
    %cst_34 = arith.constant 2.000000e-01 : f32
    %81 = vector.broadcast %cst_34 : f32 to vector<128x512xf32>
    %82 = arith.mulf %81, %78 : vector<128x512xf32>
    %83 = arith.select %80, %78, %82 : vector<128x512xi1>, vector<128x512xf32>
    %c0_i32_35 = arith.constant 0 : i32
    %84 = tpu.memref_slice %arg11[%c0_i32_35] : memref<2x!tpu.dma_semaphore, #tpu.memory_space<semaphore_mem>> -> memref<1x!tpu.dma_semaphore, #tpu.memory_space<semaphore_mem>>
    %85 = tpu.memref_squeeze %84 : memref<1x!tpu.dma_semaphore, #tpu.memory_space<semaphore_mem>> -> memref<!tpu.dma_semaphore, #tpu.memory_space<semaphore_mem>>
    tpu.wait_dma2 semaphore(%85 : memref<!tpu.dma_semaphore, #tpu.memory_space<semaphore_mem>>) src(%arg4 : memref<512x1024xbf16, #tpu.memory_space<any>>) dst(%arg9 : memref<512x1024xbf16, #tpu.memory_space<vmem>>)
    %86 = arith.truncf %83 : vector<128x512xf32> to vector<128x512xbf16>
    %c0_36 = arith.constant 0 : index
    %c0_37 = arith.constant 0 : index
    %87 = vector.load %arg9[%c0_36, %c0_37] : memref<512x1024xbf16, #tpu.memory_space<vmem>>, vector<512x1024xbf16>
    %cst_38 = arith.constant dense<0.000000e+00> : vector<128x1024xf32>
    %88 = tpu.matmul %86, %87, %cst_38 {dimension_numbers = #tpu.dot_dimension_numbers<[1], [0], [0], [1], [0, 0, 1, 1], [], []>} : vector<128x512xbf16>, vector<512x1024xbf16>, vector<128x1024xf32> -> vector<128x1024xf32>
    %c0_39 = arith.constant 0 : index
    %c2560 = arith.constant 2560 : index
    %89 = vector.load %arg6[%c0_39, %c2560] : memref<1x5632xf32, #tpu.memory_space<vmem>>, vector<1x1024xf32>
    %90 = vector.broadcast %89 : vector<1x1024xf32> to vector<128x1024xf32>
    %91 = arith.addf %88, %90 : vector<128x1024xf32>
    %c0_40 = arith.constant 0 : index
    %c3584 = arith.constant 3584 : index
    %92 = vector.load %arg6[%c0_40, %c3584] : memref<1x5632xf32, #tpu.memory_space<vmem>>, vector<1x1024xf32>
    %c0_41 = arith.constant 0 : index
    %c4608 = arith.constant 4608 : index
    %93 = vector.load %arg6[%c0_41, %c4608] : memref<1x5632xf32, #tpu.memory_space<vmem>>, vector<1x1024xf32>
    %cst_42 = arith.constant dense<0.000000e+00> : vector<1024xf32>
    %94 = vector.multi_reduction <add>, %91, %cst_42 [0] : vector<128x1024xf32> to vector<1024xf32>
    %95 = vector.shape_cast %94 : vector<1024xf32> to vector<1x1024xf32>
    %cst_43 = arith.constant 1.280000e+02 : f32
    %96 = vector.broadcast %cst_43 : f32 to vector<1x1024xf32>
    %97 = arith.divf %95, %96 : vector<1x1024xf32>
    %98 = arith.mulf %91, %91 : vector<128x1024xf32>
    %cst_44 = arith.constant dense<0.000000e+00> : vector<1024xf32>
    %99 = vector.multi_reduction <add>, %98, %cst_44 [0] : vector<128x1024xf32> to vector<1024xf32>
    %100 = vector.shape_cast %99 : vector<1024xf32> to vector<1x1024xf32>
    %cst_45 = arith.constant 1.280000e+02 : f32
    %101 = vector.broadcast %cst_45 : f32 to vector<1x1024xf32>
    %102 = arith.divf %100, %101 : vector<1x1024xf32>
    %103 = arith.mulf %97, %97 : vector<1x1024xf32>
    %104 = arith.subf %102, %103 : vector<1x1024xf32>
    %cst_46 = arith.constant 8.000000e-01 : f32
    %105 = vector.broadcast %cst_46 : f32 to vector<1x1024xf32>
    %106 = arith.addf %104, %105 : vector<1x1024xf32>
    %107 = math.rsqrt %106 : vector<1x1024xf32>
    %108 = arith.mulf %92, %107 : vector<1x1024xf32>
    %109 = arith.mulf %97, %108 : vector<1x1024xf32>
    %110 = arith.subf %93, %109 : vector<1x1024xf32>
    %111 = vector.broadcast %108 : vector<1x1024xf32> to vector<128x1024xf32>
    %112 = arith.mulf %91, %111 : vector<128x1024xf32>
    %113 = vector.broadcast %110 : vector<1x1024xf32> to vector<128x1024xf32>
    %114 = arith.addf %112, %113 : vector<128x1024xf32>
    %cst_47 = arith.constant 0.000000e+00 : f32
    %115 = vector.broadcast %cst_47 : f32 to vector<128x1024xf32>
    %116 = arith.cmpf ogt, %114, %115 : vector<128x1024xf32>
    %cst_48 = arith.constant 2.000000e-01 : f32
    %117 = vector.broadcast %cst_48 : f32 to vector<128x1024xf32>
    %118 = arith.mulf %117, %114 : vector<128x1024xf32>
    %119 = arith.select %116, %114, %118 : vector<128x1024xi1>, vector<128x1024xf32>
    %c1_i32_49 = arith.constant 1 : i32
    %120 = tpu.memref_slice %arg11[%c1_i32_49] : memref<2x!tpu.dma_semaphore, #tpu.memory_space<semaphore_mem>> -> memref<1x!tpu.dma_semaphore, #tpu.memory_space<semaphore_mem>>
    %121 = tpu.memref_squeeze %120 : memref<1x!tpu.dma_semaphore, #tpu.memory_space<semaphore_mem>> -> memref<!tpu.dma_semaphore, #tpu.memory_space<semaphore_mem>>
    tpu.wait_dma2 semaphore(%121 : memref<!tpu.dma_semaphore, #tpu.memory_space<semaphore_mem>>) src(%arg5 : memref<1024x128xbf16, #tpu.memory_space<any>>) dst(%arg10 : memref<1024x128xbf16, #tpu.memory_space<vmem>>)
    %122 = arith.truncf %119 : vector<128x1024xf32> to vector<128x1024xbf16>
    %c0_50 = arith.constant 0 : index
    %c0_51 = arith.constant 0 : index
    %123 = vector.load %arg10[%c0_50, %c0_51] : memref<1024x128xbf16, #tpu.memory_space<vmem>>, vector<1024x128xbf16>
    %cst_52 = arith.constant dense<0.000000e+00> : vector<128x128xf32>
    %124 = tpu.matmul %122, %123, %cst_52 {dimension_numbers = #tpu.dot_dimension_numbers<[1], [0], [0], [1], [0, 0, 1, 1], [], []>} : vector<128x1024xbf16>, vector<1024x128xbf16>, vector<128x128xf32> -> vector<128x128xf32>
    %c0_53 = arith.constant 0 : index
    %c128 = arith.constant 128 : index
    %125 = vector.load %arg6[%c0_53, %c128] : memref<1x5632xf32, #tpu.memory_space<vmem>>, vector<1x128xf32>
    %126 = vector.broadcast %125 : vector<1x128xf32> to vector<128x128xf32>
    %127 = arith.addf %124, %126 : vector<128x128xf32>
    %128 = math.tanh %127 : vector<128x128xf32>
    %c0_54 = arith.constant 0 : index
    %c0_55 = arith.constant 0 : index
    %129 = vector.load %arg7[%c0_54, %c0_55] : memref<128x128xf32, #tpu.memory_space<vmem>>, vector<128x128xf32>
    tpu.vector_store %arg7[%c0_54, %c0_55], %128 {strides = array<i32>} : memref<128x128xf32, #tpu.memory_space<vmem>>, vector<128x128xf32>,
    return
  }
}

</mosaic_0001>

<bundles_post_ra>
// kernel: generator_forward.1
= control target key start
LH: loop header
LB: loop body
LE: loop exit
PB: predicated region body
PF: predicated region fallthrough
CT: control target
= control target key end

     0   :  { %14 = vsyncpa [#allocation6], 0  ;;  %s14267_s0 = inlined_call_operand.vmem [shape: bf16[128,64], index: 0, kind: input, shape index: {}]   ;;  %s14268_s1 = inlined_call_operand.vmem [shape: bf16[64,128], index: 1, kind: input, shape index: {}]   ;;  %s14269_s2 = inlined_call_operand.vmem [shape: bf16[128,256], index: 2, kind: input, shape index: {}]   ;;  %s14270_s3 = inlined_call_operand.hbm [shape: bf16[256,512], index: 3, kind: input, shape index: {}]   ;;  %s14271_s4 = inlined_call_operand.hbm [shape: bf16[512,1024], index: 4, kind: input, shape index: {}]   ;;  %s14272_s5 = inlined_call_operand.hbm [shape: bf16[1024,128], index: 5, kind: input, shape index: {}]   ;;  %s14273_s6 = inlined_call_operand.vmem [shape: f32[1,5632], index: 6, kind: input, shape index: {}]   ;;  %s14274_s7 = inlined_call_operand.vmem [shape: f32[128,128], index: 7, kind: output, shape index: {0}]   ;;  %s14275_s8 = inlined_call_operand.hbm [shape: f32[128,128], index: 8, kind: output, shape index: {1}]  }
   0x1   :  { %15 = vsyncpa [#allocation7], 0  ;;  %s8266_s27 = smov [#allocation5]  }
   0x2   :  { %s27_s28 = sshll.u32 %s8266_s27, 4  ;;  %s28_s28 = int_to_ptr.vmem [resolvable:$true] %s27_s28 }
   0x3   :  { %s8186_s29 = scalar_lea.vmem %s28_s28, 8192  ;;  %p8191_p1 = scmp.lt.s32.totalorder %s28_s28, %s28_s28 }
   0x4   :  { %p8187_p0 = scmp.ne.s32.totalorder %s28_s28, %s8186_s29  ;;  %p8192_p2 = scmp.lt.s32.totalorder %s8186_s29, %s8186_s29 }
   0x6   :  { %p8193_p3 = por %p8192_p2, %p8191_p1 }
   0x8   :  { %p8194_p4 = pnand %p8193_p3, %p8187_p0 }
   0xa   :  { %8197 = shalt.err (!%p8194_p4)
}
   0xb   :  { %s8267_s30 = smov 256   ;;  %s8268_s9 = smov 16  }
   0xc   :  { %33 = dma.hbm_to_vmem [thread:$0]  %s14270_s3, 8192, %s28_s28, [#allocation6], %s8267_s30, %s8267_s30, %s8268_s9  }
   0xd   :  { %8258 = dma.done.wait [#allocation6], 8192  }
   0xe   :  { %8259 = vsyncadd [#allocation6], 4294959104  ;;  %v7921_v0 = vld [vmem:[%s14268_s1 + $0x18] sm:$0xff]   ;;  %v7922_v1 = vld [vmem:[%s14268_s1 + $0x10] sm:$0xff]   ;;  %vm158_vm0 = vcmask 523264   ;;  %v8269_v28 = vmov 0  }
   0xf   :  { %7871 = vmatprep.subr.bf16.mxu0 %v7921_v0  ;;  %v7923_v2 = vld [vmem:[%s14268_s1 + $0x8] sm:$0xff]   ;;  %v7925_v3 = vld [vmem:[%s14267_s0] sm:$0xff]   ;;  %v7933_v5 = vld [vmem:[%s14269_s2 + $0x74] ss:$8 sps:$4 sm:$0xff]   ;;  %492 = vmatprep.mubr.bf16.mxu1 %v8269_v28  ;;  %s8271_s27 = smov [#allocation2]  }
  0x10   :  { %7872 = vmatpush3.bf16.msra.mxu0 %v7921_v0  ;;  %7879 = vmatprep.mubr.msk.bf16.mxu0 %vm158_vm0, %v7925_v3  ;;  %v7924_v4 = vld [vmem:[%s14268_s1] sm:$0xff]   ;;  %v7935_v6 = vld [vmem:[%s14269_s2 + $0x70] ss:$8 sps:$4 sm:$0xff]   ;;  %v7926_v7 = vld [vmem:[%s14267_s0 + $0x8] sm:$0xff]   ;;  %s47_s28 = sshll.u32 %s8271_s27, 4  ;;  %s8272_s1 = smov [#allocation3]   ;;  %s48_s28 = int_to_ptr.vmem [resolvable:$true] %s47_s28 }
  0x11   :  { %7873 = vmatprep.subr.bf16.mxu0 %v7922_v1  ;;  %460 = vmatprep.subr.bf16.mxu1 %v7933_v5  ;;  %v7936_v8 = vld [vmem:[%s14269_s2 + $0x64] ss:$8 sps:$4 sm:$0xff]   ;;  %v7927_v9 = vld [vmem:[%s14267_s0 + $0x10] sm:$0xff]   ;;  %v7938_v10 = vld [vmem:[%s14269_s2 + $0x60] ss:$8 sps:$4 sm:$0xff]   ;;  %s59_s29 = sshll.u32 %s8272_s1, 4  ;;  %p8211_p6 = scmp.lt.s32.totalorder %s48_s28, %s48_s28  ;;  %s60_s29 = int_to_ptr.vmem [resolvable:$true] %s59_s29 }
  0x12   :  { %461 = vmatpush1.bf16.msra.mxu1 %v7935_v6  ;;  %v7939_v11 = vld [vmem:[%s14269_s2 + $0x54] ss:$8 sps:$4 sm:$0xff]   ;;  %v7941_v12 = vld [vmem:[%s14269_s2 + $0x50] ss:$8 sps:$4 sm:$0xff]   ;;  %v7942_v13 = vld [vmem:[%s14269_s2 + $0x44] ss:$8 sps:$4 sm:$0xff]  }
  0x13   :  { %462 = vmatprep.subr.bf16.mxu1 %v7936_v8  ;;  %v7928_v14 = vld [vmem:[%s14267_s0 + $0x18] sm:$0xff]   ;;  %v7929_v15 = vld [vmem:[%s14267_s0 + $0x20] sm:$0xff]   ;;  %v7930_v19 = vld [vmem:[%s14267_s0 + $0x28] sm:$0xff]   ;;  %s8206_s30 = scalar_lea.vmem %s48_s28, 32768 }
  0x14   :  { %7874 = vmatpush3.bf16.msra.mxu0 %v7922_v1  ;;  %v7944_v16 = vld [vmem:[%s14269_s2 + $0x40] ss:$8 sps:$4 sm:$0xff]   ;;  %v7945_v17 = vld [vmem:[%s14269_s2 + $0x34] ss:$8 sps:$4 sm:$0xff]   ;;  %v7947_v18 = vld [vmem:[%s14269_s2 + $0x30] ss:$8 sps:$4 sm:$0xff]   ;;  %p8207_p5 = scmp.ne.s32.totalorder %s48_s28, %s8206_s30  ;;  %p8212_p7 = scmp.lt.s32.totalorder %s8206_s30, %s8206_s30 }
  0x15   :  { %7875 = vmatprep.subr.bf16.mxu0 %v7923_v2  ;;  %v7931_v20 = vld [vmem:[%s14267_s0 + $0x30] sm:$0xff]   ;;  %v7932_v21 = vld [vmem:[%s14267_s0 + $0x38] sm:$0xff]   ;;  %v7948_v22 = vld [vmem:[%s14269_s2 + $0x24] ss:$8 sps:$4 sm:$0xff]  }
  0x16   :  { %463 = vmatpush1.bf16.msra.mxu1 %v7938_v10  ;;  %v7950_v23 = vld [vmem:[%s14269_s2 + $0x20] ss:$8 sps:$4 sm:$0xff]   ;;  %v7951_v24 = vld [vmem:[%s14269_s2 + $0x14] ss:$8 sps:$4 sm:$0xff]   ;;  %v7953_v25 = vld [vmem:[%s14269_s2 + $0x10] ss:$8 sps:$4 sm:$0xff]   ;;  %p8213_p8 = por %p8212_p7, %p8211_p6 }
  0x17   :  { %464 = vmatprep.subr.bf16.mxu1 %v7939_v11  ;;  %v7954_v26 = vld [vmem:[%s14269_s2 + $0x4] ss:$8 sps:$4 sm:$0xff]   ;;  %v7956_v27 = vld [vmem:[%s14269_s2] ss:$8 sps:$4 sm:$0xff]  }
  0x18   :  { %7876 = vmatpush3.bf16.msra.mxu0 %v7923_v2  ;;  %v8420_v29 = vld [vmem:[%s14273_s6] ss:$0 sm:$0xff]  ;;  %p8214_p9 = pnand %p8213_p8, %p8207_p5 }
  0x19   :  { %7877 = vmatprep.subr.bf16.mxu0 %v7924_v4 }
  0x1a   :  { %465 = vmatpush1.bf16.msra.mxu1 %v7941_v12 }
  0x1b   :  { %466 = vmatprep.subr.bf16.mxu1 %v7942_v13 }
  0x1c   :  { %7878 = vmatpush3.bf16.msra.mxu0 %v7924_v4 }
  0x1e   :  { %467 = vmatpush1.bf16.msra.mxu1 %v7944_v16 }
  0x1f   :  { %7880 = vmatmul.mubr.msk.bf16.vlgmr.msra.gmra.mxu0 %vm158_vm0, %v7926_v7  ;;  %468 = vmatprep.subr.bf16.mxu1 %v7945_v17 }
  0x20   :  { %7883 = vmatprep.mubr.msk.bf16.mxu0 %vm158_vm0, %v7927_v9 }
  0x22   :  { %469 = vmatpush1.bf16.msra.mxu1 %v7947_v18 }
  0x23   :  { %470 = vmatprep.subr.bf16.mxu1 %v7948_v22 }
  0x26   :  { %471 = vmatpush1.bf16.msra.mxu1 %v7950_v23 }
  0x27   :  { %7884 = vmatmul.mubr.msk.bf16.gmra.mxu0 %vm158_vm0, %v7928_v14  ;;  %472 = vmatprep.subr.bf16.mxu1 %v7951_v24 }
  0x28   :  { %7887 = vmatprep.mubr.msk.bf16.mxu0 %vm158_vm0, %v7929_v15 }
  0x2a   :  { %473 = vmatpush1.bf16.msra.mxu1 %v7953_v25 }
  0x2b   :  { %474 = vmatprep.subr.bf16.mxu1 %v7954_v26 }
  0x2e   :  { %475 = vmatpush1.bf16.msra.mxu1 %v7956_v27 }
  0x2f   :  { %7888 = vmatmul.mubr.msk.bf16.gmra.mxu0 %vm158_vm0, %v7930_v19 }
  0x30   :  { %7891 = vmatprep.mubr.msk.bf16.mxu0 %vm158_vm0, %v7931_v20 }
  0x37   :  { %7892 = vmatmul.mubr.msk.bf16.gmra.mxu0 %vm158_vm0, %v7932_v21 }
  0xdf   :  { %v7881_v30 = vpop.f32.mrf.mxu0 }
  0xe0   :  { %v226_v31 = vadd.f32 %v7881_v30, %v8420_v29 }
  0xe1   :  { %v217_v32 = vpop.f32.mrf.mxu0 }
  0xe2   :  { %vm282_vm1 = vcmp.gt.f32.partialorder %v226_v31, 0.0  ;;  %v298_v33 = vmul.f32 0.2, %v226_v31  ;;  %v218_v34 = vadd.f32 %v8420_v29, %v217_v32 }
  0xe3   :  { %v7882_v35 = vpop.f32.mrf.mxu0 }
  0xe4   :  { %vm280_vm2 = vcmp.gt.f32.partialorder %v218_v34, 0.0  ;;  %v296_v36 = vmul.f32 0.2, %v218_v34  ;;  %v229_v37 = vadd.f32 %v7882_v35, %v8420_v29  ;;  %v314_v38 = vsel %vm282_vm1, %v226_v31, %v298_v33 }
  0xe5   :  { %v220_v39 = vpop.f32.mrf.mxu0  ;;  %330 = vst [vmem:[#allocation8 + $0x10] sm:$0xff] %v314_v38 }
  0xe6   :  { %vm283_vm3 = vcmp.gt.f32.partialorder %v229_v37, 0.0  ;;  %v299_v40 = vmul.f32 0.2, %v229_v37  ;;  %v221_v41 = vadd.f32 %v8420_v29, %v220_v39  ;;  %v312_v42 = vsel %vm280_vm2, %v218_v34, %v296_v36  ;;  %v7959_v39 = vld [vmem:[#allocation5 + $0xec] ss:$16 sps:$4 sm:$0xff]  }
  0xe7   :  { %v7885_v43 = vpop.f32.mrf.mxu0  ;;  %328 = vst [vmem:[#allocation8] sm:$0xff] %v312_v42  ;;  %1461 = vmatprep.subr.bf16.mxu1 %v7959_v39 }
  0xe8   :  { %vm281_vm4 = vcmp.gt.f32.partialorder %v221_v41, 0.0  ;;  %v297_v44 = vmul.f32 0.2, %v221_v41  ;;  %v242_v45 = vadd.f32 %v7885_v43, %v8420_v29  ;;  %v315_v46 = vsel %vm283_vm3, %v229_v37, %v299_v40  ;;  %v7962_v40 = vld [vmem:[#allocation5 + $0xe4] ss:$16 sps:$4 sm:$0xff]  }
  0xe9   :  { %v233_v47 = vpop.f32.mrf.mxu0  ;;  %331 = vst [vmem:[#allocation8 + $0x18] sm:$0xff] %v315_v46  ;;  %v345_v4 = vpack.c.bf16 %v315_v46, %v314_v38  ;;  %1348 = vmatprep.subr.bf16.mxu0 %v7962_v40  ;;  %v7965_v43 = vld [vmem:[#allocation5 + $0xcc] ss:$16 sps:$4 sm:$0xff]   ;;  %v7966_v46 = vld [vmem:[#allocation5 + $0xc0] ss:$16 sps:$4 sm:$0xff]  }
  0xea   :  { %vm286_vm5 = vcmp.gt.f32.partialorder %v242_v45, 0.0  ;;  %v302_v48 = vmul.f32 0.2, %v242_v45  ;;  %v234_v49 = vadd.f32 %v8420_v29, %v233_v47  ;;  %v313_v50 = vsel %vm281_vm4, %v221_v41, %v297_v44  ;;  %v7957_v41 = vld [vmem:[#allocation5 + $0xe8] ss:$16 sps:$4 sm:$0xff]  }
  0xeb   :  { %v7886_v51 = vpop.f32.mrf.mxu0  ;;  %329 = vst [vmem:[#allocation8 + $0x8] sm:$0xff] %v313_v50  ;;  %v344_v52 = vpack.c.bf16 %v313_v50, %v312_v42  ;;  %v7960_v42 = vld [vmem:[#allocation5 + $0xe0] ss:$16 sps:$4 sm:$0xff]   ;;  %v7968_v44 = vld [vmem:[#allocation5 + $0xc4] ss:$16 sps:$4 sm:$0xff]  }
  0xec   :  { %vm284_vm6 = vcmp.gt.f32.partialorder %v234_v49, 0.0  ;;  %v300_v53 = vmul.f32 0.2, %v234_v49  ;;  %v245_v54 = vadd.f32 %v7886_v51, %v8420_v29  ;;  %v8429_v55 = vsel %vm286_vm5, %v242_v45, %v302_v48  ;;  %1349 = vmatpush1.bf16.msra.mxu0 %v7960_v42  ;;  %v7963_v45 = vld [vmem:[#allocation5 + $0xc8] ss:$16 sps:$4 sm:$0xff]  }
  0xed   :  { %v236_v56 = vpop.f32.mrf.mxu0  ;;  %493 = vmatmul.mubr.bf16.vlgmr.msra.gmra.mxu1 %v344_v52  ;;  %334 = vst [vmem:[#allocation8 + $0x30] sm:$0xff] %v8429_v55  ;;  %1350 = vmatprep.subr.bf16.mxu0 %v7968_v44  ;;  %v7971_v47 = vld [vmem:[#allocation5 + $0xac] ss:$16 sps:$4 sm:$0xff]   ;;  %v7969_v48 = vld [vmem:[#allocation5 + $0xa8] ss:$16 sps:$4 sm:$0xff]  }
  0xee   :  { %vm287_vm7 = vcmp.gt.f32.partialorder %v245_v54, 0.0  ;;  %v303_v57 = vmul.f32 0.2, %v245_v54  ;;  %v237_v58 = vadd.f32 %v8420_v29, %v236_v56  ;;  %502 = vmatprep.mubr.bf16.mxu1 %v8269_v28  ;;  %v316_v59 = vsel %vm284_vm6, %v234_v49, %v300_v53  ;;  %1462 = vmatpush1.bf16.msra.mxu1 %v7957_v41  ;;  %v7972_v49 = vld [vmem:[#allocation5 + $0xa0] ss:$16 sps:$4 sm:$0xff]  }
  0xef   :  { %v7889_v60 = vpop.f32.mrf.mxu0  ;;  %332 = vst [vmem:[#allocation8 + $0x20] sm:$0xff] %v316_v59  ;;  %1463 = vmatprep.subr.bf16.mxu1 %v7965_v43  ;;  %v7977_v50 = vld [vmem:[#allocation5 + $0x8c] ss:$16 sps:$4 sm:$0xff]   ;;  %v7980_v51 = vld [vmem:[#allocation5 + $0x84] ss:$16 sps:$4 sm:$0xff]  }
  0xf0   :  { %vm285_vm8 = vcmp.gt.f32.partialorder %v237_v58, 0.0  ;;  %v301_v61 = vmul.f32 0.2, %v237_v58  ;;  %v258_v62 = vadd.f32 %v7889_v60, %v8420_v29  ;;  %v319_v63 = vsel %vm287_vm7, %v245_v54, %v303_v57  ;;  %1351 = vmatpush1.bf16.msra.mxu0 %v7966_v46  ;;  %v7975_v52 = vld [vmem:[#allocation5 + $0x88] ss:$16 sps:$4 sm:$0xff]  }
  0xf1   :  { %v249_v0 = vpop.f32.mrf.mxu0  ;;  %335 = vst [vmem:[#allocation8 + $0x38] sm:$0xff] %v319_v63  ;;  %v347_v35 = vpack.c.bf16 %v319_v63, %v8429_v55  ;;  %v7978_v53 = vld [vmem:[#allocation5 + $0x80] ss:$16 sps:$4 sm:$0xff]   ;;  %v7983_v54 = vld [vmem:[#allocation5 + $0x6c] ss:$16 sps:$4 sm:$0xff]   ;;  %v370_v46 = vlaneseq }
  0xf2   :  { %vm290_vm9 = vcmp.gt.f32.partialorder %v258_v62, 0.0  ;;  %v306_v1 = vmul.f32 0.2, %v258_v62  ;;  %v250_v2 = vadd.f32 %v8420_v29, %v249_v0  ;;  %v317_v3 = vsel %vm285_vm8, %v237_v58, %v301_v61  ;;  %1464 = vmatpush1.bf16.msra.mxu1 %v7963_v45  ;;  %v7986_v55 = vld [vmem:[#allocation5 + $0x64] ss:$16 sps:$4 sm:$0xff]  }
  0xf3   :  { %v7890_v5 = vpop.f32.mrf.mxu0  ;;  %333 = vst [vmem:[#allocation8 + $0x28] sm:$0xff] %v317_v3  ;;  %v346_v21 = vpack.c.bf16 %v317_v3, %v316_v59  ;;  %1465 = vmatprep.subr.bf16.mxu1 %v7971_v47  ;;  %v7981_v56 = vld [vmem:[#allocation5 + $0x68] ss:$16 sps:$4 sm:$0xff]   ;;  %v7984_v57 = vld [vmem:[#allocation5 + $0x60] ss:$16 sps:$4 sm:$0xff]  }
  0xf4   :  { %vm288_vm10 = vcmp.gt.f32.partialorder %v250_v2, 0.0  ;;  %v304_v6 = vmul.f32 0.2, %v250_v2  ;;  %v261_v7 = vadd.f32 %v7890_v5, %v8420_v29  ;;  %v322_v8 = vsel %vm290_vm9, %v258_v62, %v306_v1  ;;  %v7989_v58 = vld [vmem:[#allocation5 + $0x4c] ss:$16 sps:$4 sm:$0xff]  }
  0xf5   :  { %503 = vmatmul.mubr.bf16.gmra.mxu1 %v345_v4  ;;  %v252_v9 = vpop.f32.mrf.mxu0  ;;  %338 = vst [vmem:[#allocation8 + $0x50] sm:$0xff] %v322_v8  ;;  %v7987_v59 = vld [vmem:[#allocation5 + $0x48] ss:$16 sps:$4 sm:$0xff]   ;;  %v7990_v60 = vld [vmem:[#allocation5 + $0x40] ss:$16 sps:$4 sm:$0xff]  }
  0xf6   :  { %vm291_vm11 = vcmp.gt.f32.partialorder %v261_v7, 0.0  ;;  %v307_v10 = vmul.f32 0.2, %v261_v7  ;;  %512 = vmatprep.mubr.bf16.mxu1 %v8269_v28  ;;  %v253_v11 = vadd.f32 %v8420_v29, %v252_v9  ;;  %v320_v12 = vsel %vm288_vm10, %v250_v2, %v304_v6  ;;  %1466 = vmatpush1.bf16.msra.mxu1 %v7969_v48  ;;  %v7992_v61 = vld [vmem:[#allocation5 + $0x44] ss:$16 sps:$4 sm:$0xff]  }
  0xf7   :  { %v7893_v13 = vpop.f32.mrf.mxu0  ;;  %336 = vst [vmem:[#allocation8 + $0x40] sm:$0xff] %v320_v12  ;;  %1467 = vmatprep.subr.bf16.mxu1 %v7977_v50  ;;  %v7995_v62 = vld [vmem:[#allocation5 + $0x2c] ss:$16 sps:$4 sm:$0xff]   ;;  %v7998_v63 = vld [vmem:[#allocation5 + $0x24] ss:$16 sps:$4 sm:$0xff]   ;;  %v8449_v48 = vshrl.u32 %v370_v46, 7 }
  0xf8   :  { %vm289_vm12 = vcmp.gt.f32.partialorder %v253_v11, 0.0  ;;  %v305_v14 = vmul.f32 0.2, %v253_v11  ;;  %v274_v15 = vadd.f32 %v7893_v13, %v8420_v29  ;;  %v323_v16 = vsel %vm291_vm11, %v261_v7, %v307_v10  ;;  %v7993_v0 = vld [vmem:[#allocation5 + $0x28] ss:$16 sps:$4 sm:$0xff]  }
  0xf9   :  { %v265_v17 = vpop.f32.mrf.mxu0  ;;  %339 = vst [vmem:[#allocation8 + $0x58] sm:$0xff] %v323_v16  ;;  %v349_v37 = vpack.c.bf16 %v323_v16, %v322_v8  ;;  %v7996_v1 = vld [vmem:[#allocation5 + $0x20] ss:$16 sps:$4 sm:$0xff]   ;;  %v8001_v2 = vld [vmem:[#allocation5 + $0xc] ss:$16 sps:$4 sm:$0xff]   ;;  %14577 = vst [vmem:[#allocation19_spill] sm:$0xff] %v8449_v48 }
  0xfa   :  { %vm294_vm13 = vcmp.gt.f32.partialorder %v274_v15, 0.0  ;;  %v310_v18 = vmul.f32 0.2, %v274_v15  ;;  %v266_v19 = vadd.f32 %v8420_v29, %v265_v17  ;;  %v321_v20 = vsel %vm289_vm12, %v253_v11, %v305_v14  ;;  %1468 = vmatpush1.bf16.msra.mxu1 %v7975_v52  ;;  %v8004_v3 = vld [vmem:[#allocation5 + $0x4] ss:$16 sps:$4 sm:$0xff]  }
  0xfb   :  { %v7894_v22 = vpop.f32.mrf.mxu0  ;;  %337 = vst [vmem:[#allocation8 + $0x48] sm:$0xff] %v321_v20  ;;  %v348_v36 = vpack.c.bf16 %v321_v20, %v320_v12  ;;  %1469 = vmatprep.subr.bf16.mxu1 %v7983_v54  ;;  %v7999_v4 = vld [vmem:[#allocation5 + $0x8] ss:$16 sps:$4 sm:$0xff]   ;;  %v8002_v5 = vld [vmem:[#allocation5] ss:$16 sps:$4 sm:$0xff]  }
  0xfc   :  { %vm292_vm14 = vcmp.gt.f32.partialorder %v266_v19, 0.0  ;;  %v308_v23 = vmul.f32 0.2, %v266_v19  ;;  %v277_v24 = vadd.f32 %v7894_v22, %v8420_v29  ;;  %v326_v25 = vsel %vm294_vm13, %v274_v15, %v310_v18  ;;  %v8007_v6 = vld [vmem:[#allocation5 + $0x1ec] ss:$16 sps:$4 sm:$0xff]  }
  0xfd   :  { %513 = vmatmul.mubr.bf16.gmra.mxu1 %v346_v21  ;;  %v268_v26 = vpop.f32.mrf.mxu0  ;;  %342 = vst [vmem:[#allocation8 + $0x70] sm:$0xff] %v326_v25  ;;  %v8010_v7 = vld [vmem:[#allocation5 + $0x1e4] ss:$16 sps:$4 sm:$0xff]   ;;  %v8005_v8 = vld [vmem:[#allocation5 + $0x1e8] ss:$16 sps:$4 sm:$0xff]  }
  0xfe   :  { %522 = vmatprep.mubr.bf16.mxu1 %v8269_v28  ;;  %vm295_vm15 = vcmp.gt.f32.partialorder %v277_v24, 0.0  ;;  %v311_v27 = vmul.f32 0.2, %v277_v24  ;;  %v269_v30 = vadd.f32 %v8420_v29, %v268_v26  ;;  %v324_v31 = vsel %vm292_vm14, %v266_v19, %v308_v23  ;;  %1470 = vmatpush1.bf16.msra.mxu1 %v7981_v56  ;;  %v8008_v9 = vld [vmem:[#allocation5 + $0x1e0] ss:$16 sps:$4 sm:$0xff]  }
  0xff   :  { %340 = vst [vmem:[#allocation8 + $0x60] sm:$0xff] %v324_v31  ;;  %1471 = vmatprep.subr.bf16.mxu1 %v7989_v58  ;;  %v8013_v10 = vld [vmem:[#allocation5 + $0x1cc] ss:$16 sps:$4 sm:$0xff]   ;;  %v8016_v11 = vld [vmem:[#allocation5 + $0x1c4] ss:$16 sps:$4 sm:$0xff]  }
 0x100   :  { %vm293_vm0 = vcmp.gt.f32.partialorder %v269_v30, 0.0  ;;  %v309_v32 = vmul.f32 0.2, %v269_v30  ;;  %v327_v33 = vsel %vm295_vm15, %v277_v24, %v311_v27  ;;  %v8011_v12 = vld [vmem:[#allocation5 + $0x1c8] ss:$16 sps:$4 sm:$0xff]  }
 0x101   :  { %343 = vst [vmem:[#allocation8 + $0x78] sm:$0xff] %v327_v33  ;;  %v351_v38 = vpack.c.bf16 %v327_v33, %v326_v25  ;;  %v8014_v13 = vld [vmem:[#allocation5 + $0x1c0] ss:$16 sps:$4 sm:$0xff]   ;;  %v8019_v14 = vld [vmem:[#allocation5 + $0x1ac] ss:$16 sps:$4 sm:$0xff]  }
 0x102   :  { %v325_v34 = vsel %vm293_vm0, %v269_v30, %v309_v32  ;;  %1472 = vmatpush1.bf16.msra.mxu1 %v7987_v59  ;;  %v8022_v15 = vld [vmem:[#allocation5 + $0x1a4] ss:$16 sps:$4 sm:$0xff]   ;;  %v8017_v16 = vld [vmem:[#allocation5 + $0x1a8] ss:$16 sps:$4 sm:$0xff]   ;;  %v8020_v17 = vld [vmem:[#allocation5 + $0x1a0] ss:$16 sps:$4 sm:$0xff]  }
 0x103   :  { %341 = vst [vmem:[#allocation8 + $0x68] sm:$0xff] %v325_v34  ;;  %v350_v29 = vpack.c.bf16 %v325_v34, %v324_v31  ;;  %1473 = vmatprep.subr.bf16.mxu1 %v7995_v62  ;;  %v8025_v18 = vld [vmem:[#allocation5 + $0x18c] ss:$16 sps:$4 sm:$0xff]   ;;  %v8028_v19 = vld [vmem:[#allocation5 + $0x184] ss:$16 sps:$4 sm:$0xff]  }
 0x104   :  { %v8023_v20 = vld [vmem:[#allocation5 + $0x188] ss:$16 sps:$4 sm:$0xff]   ;;  %v8026_v21 = vld [vmem:[#allocation5 + $0x180] ss:$16 sps:$4 sm:$0xff]   ;;  %v8031_v22 = vld [vmem:[#allocation5 + $0x16c] ss:$16 sps:$4 sm:$0xff]  }
 0x105   :  { %523 = vmatmul.mubr.bf16.gmra.mxu1 %v347_v35  ;;  %v8034_v23 = vld [vmem:[#allocation5 + $0x164] ss:$16 sps:$4 sm:$0xff]   ;;  %v8029_v24 = vld [vmem:[#allocation5 + $0x168] ss:$16 sps:$4 sm:$0xff]   ;;  %v8032_v25 = vld [vmem:[#allocation5 + $0x160] ss:$16 sps:$4 sm:$0xff]  }
 0x106   :  { %532 = vmatprep.mubr.bf16.mxu1 %v8269_v28  ;;  %1474 = vmatpush1.bf16.msra.mxu1 %v7993_v0  ;;  %v8037_v26 = vld [vmem:[#allocation5 + $0x14c] ss:$16 sps:$4 sm:$0xff]   ;;  %v8040_v27 = vld [vmem:[#allocation5 + $0x144] ss:$16 sps:$4 sm:$0xff]   ;;  %v8035_v30 = vld [vmem:[#allocation5 + $0x148] ss:$16 sps:$4 sm:$0xff]  }
 0x107   :  { %1475 = vmatprep.subr.bf16.mxu1 %v8001_v2  ;;  %v8038_v31 = vld [vmem:[#allocation5 + $0x140] ss:$16 sps:$4 sm:$0xff]   ;;  %v8043_v32 = vld [vmem:[#allocation5 + $0x12c] ss:$16 sps:$4 sm:$0xff]   ;;  %v8046_v33 = vld [vmem:[#allocation5 + $0x124] ss:$16 sps:$4 sm:$0xff]  }
 0x108   :  { %v8041_v34 = vld [vmem:[#allocation5 + $0x128] ss:$16 sps:$4 sm:$0xff]   ;;  %v8044_v35 = vld [vmem:[#allocation5 + $0x120] ss:$16 sps:$4 sm:$0xff]  }
 0x109   :  { %v368_v52 = vld [vmem:[%s14273_s6 + $0x2] sm:$0x3] }
 0x10a   :  { %1476 = vmatpush1.bf16.msra.mxu1 %v7999_v4 }
 0x10b   :  { %1477 = vmatprep.subr.bf16.mxu1 %v8007_v6 }
 0x10d   :  { %533 = vmatmul.mubr.bf16.gmra.mxu1 %v348_v36  ;;  %v8049_v36 = vld [vmem:[#allocation5 + $0x10c] ss:$16 sps:$4 sm:$0xff]  }
 0x10e   :  { %542 = vmatprep.mubr.bf16.mxu1 %v8269_v28  ;;  %1478 = vmatpush2.bf16.msra.mxu1 %v8005_v8 }
 0x10f   :  { %1479 = vmatprep.subr.bf16.mxu1 %v8013_v10 }
 0x112   :  { %1480 = vmatpush2.bf16.msra.mxu1 %v8011_v12 }
 0x113   :  { %1481 = vmatprep.subr.bf16.mxu1 %v8019_v14 }
 0x115   :  { %543 = vmatmul.mubr.bf16.gmra.mxu1 %v349_v37  ;;  %v8047_v37 = vld [vmem:[#allocation5 + $0x108] ss:$16 sps:$4 sm:$0xff]  }
 0x116   :  { %552 = vmatprep.mubr.bf16.mxu1 %v8269_v28  ;;  %1482 = vmatpush2.bf16.msra.mxu1 %v8017_v16 }
 0x117   :  { %1483 = vmatprep.subr.bf16.mxu1 %v8025_v18 }
 0x11a   :  { %1484 = vmatpush2.bf16.msra.mxu1 %v8023_v20 }
 0x11b   :  { %1485 = vmatprep.subr.bf16.mxu1 %v8031_v22 }
 0x11d   :  { %553 = vmatmul.mubr.bf16.gmra.mxu1 %v350_v29  ;;  %v8052_v29 = vld [vmem:[#allocation5 + $0x104] ss:$16 sps:$4 sm:$0xff]  }
 0x11e   :  { %562 = vmatprep.mubr.bf16.mxu1 %v8269_v28  ;;  %v7974_v28 = vld [vmem:[#allocation5 + $0xa4] ss:$16 sps:$4 sm:$0xff]   ;;  %1486 = vmatpush2.bf16.msra.mxu1 %v8029_v24 }
 0x11f   :  { %1352 = vmatprep.subr.bf16.mxu0 %v7974_v28  ;;  %1487 = vmatprep.subr.bf16.mxu1 %v8037_v26 }
 0x120   :  { %1353 = vmatpush1.bf16.msra.mxu0 %v7972_v49 }
 0x121   :  { %1354 = vmatprep.subr.bf16.mxu0 %v7980_v51  ;;  %v8452_v51 = vsub.s32 0, %v8449_v48 }
 0x122   :  { %1488 = vmatpush2.bf16.msra.mxu1 %v8035_v30 }
 0x123   :  { %1489 = vmatprep.subr.bf16.mxu1 %v8043_v32  ;;  %14578 = vst [vmem:[#allocation20_spill] sm:$0xff] %v8452_v51  ;;  %v8461_v56 = vrot.slane %v368_v52, %v8452_v51 }
 0x124   :  { %1355 = vmatpush1.bf16.msra.mxu0 %v7978_v53  ;;  %v8458_v53 = vsub.s32 1, %v8449_v48 }
 0x125   :  { %563 = vmatmul.mubr.bf16.gmra.mxu1 %v351_v38  ;;  %1356 = vmatprep.subr.bf16.mxu0 %v7986_v55  ;;  %v8050_v38 = vld [vmem:[#allocation5 + $0x100] ss:$16 sps:$4 sm:$0xff]  }
 0x126   :  { %1490 = vmatpush2.bf16.msra.mxu1 %v8041_v34  ;;  %14579 = vst [vmem:[#allocation21_spill] sm:$0xff] %v8458_v53 }
 0x127   :  { %1491 = vmatprep.subr.bf16.mxu1 %v8049_v36 }
 0x128   :  { %1357 = vmatpush1.bf16.msra.mxu0 %v7984_v57  ;;  %v8464_v57 = vrot.slane %v368_v52, %v8458_v53 }
 0x129   :  { %1358 = vmatprep.subr.bf16.mxu0 %v7992_v61 }
 0x12a   :  { %1492 = vmatpush2.bf16.msra.mxu1 %v8047_v37 }
 0x12c   :  { %1359 = vmatpush1.bf16.msra.mxu0 %v7990_v60 }
 0x12d   :  { %1360 = vmatprep.subr.bf16.mxu0 %v7998_v63 }
 0x130   :  { %1361 = vmatpush1.bf16.msra.mxu0 %v7996_v1 }
 0x131   :  { %1362 = vmatprep.subr.bf16.mxu0 %v8004_v3 }
 0x134   :  { %1363 = vmatpush1.bf16.msra.mxu0 %v8002_v5 }
 0x135   :  { %1364 = vmatprep.subr.bf16.mxu0 %v8010_v7 }
 0x138   :  { %1365 = vmatpush2.bf16.msra.mxu0 %v8008_v9 }
 0x139   :  { %1366 = vmatprep.subr.bf16.mxu0 %v8016_v11 }
 0x13c   :  { %1367 = vmatpush2.bf16.msra.mxu0 %v8014_v13 }
 0x13d   :  { %1368 = vmatprep.subr.bf16.mxu0 %v8022_v15 }
 0x140   :  { %1369 = vmatpush2.bf16.msra.mxu0 %v8020_v17 }
 0x141   :  { %1370 = vmatprep.subr.bf16.mxu0 %v8028_v19 }
 0x144   :  { %1371 = vmatpush2.bf16.msra.mxu0 %v8026_v21 }
 0x145   :  { %1372 = vmatprep.subr.bf16.mxu0 %v8034_v23 }
 0x148   :  { %1373 = vmatpush2.bf16.msra.mxu0 %v8032_v25 }
 0x149   :  { %1374 = vmatprep.subr.bf16.mxu0 %v8040_v27 }
 0x14c   :  { %1375 = vmatpush2.bf16.msra.mxu0 %v8038_v31 }
 0x14d   :  { %1376 = vmatprep.subr.bf16.mxu0 %v8046_v33 }
 0x150   :  { %1377 = vmatpush2.bf16.msra.mxu0 %v8044_v35 }
 0x151   :  { %1378 = vmatprep.subr.bf16.mxu0 %v8052_v29 }
 0x154   :  { %1379 = vmatpush2.bf16.msra.mxu0 %v8050_v38 }
 0x1ad   :  { %v494_v39 = vpop.f32.mrf.mxu1 }
 0x1ae   :  { %v8473_v62 = vadd.f32 %v494_v39, %v8461_v56 }
 0x1af   :  { %v496_v40 = vpop.f32.mrf.mxu1 }
 0x1b0   :  { %v8479_v0 = vadd.f32 %v496_v40, %v8464_v57  ;;  %v620_v8 = vmul.f32 %v8473_v62, %v8473_v62 }
 0x1b1   :  { %v498_v41 = vpop.f32.mrf.mxu1 }
 0x1b2   :  { %v8467_v59 = vadd.f32 %v498_v41, %v8461_v56  ;;  %v621_v11 = vmul.f32 %v8479_v0, %v8479_v0 }
 0x1b3   :  { %v500_v42 = vpop.f32.mrf.mxu1 }
 0x1b4   :  { %v8470_v60 = vadd.f32 %v500_v42, %v8464_v57  ;;  %v622_v3 = vmul.f32 %v8467_v59, %v8467_v59  ;;  %v575_v12 = vadd.f32 %v8467_v59, %v8473_v62 }
 0x1b5   :  { %v504_v43 = vpop.f32.mrf.mxu1 }
 0x1b6   :  { %v8476_v63 = vadd.f32 %v504_v43, %v8461_v56  ;;  %v623_v5 = vmul.f32 %v8470_v60, %v8470_v60  ;;  %v652_v16 = vadd.f32 %v622_v3, %v620_v8  ;;  %v596_v17 = vadd.f32 %v8470_v60, %v8479_v0 }
 0x1b7   :  { %v506_v44 = vpop.f32.mrf.mxu1 }
 0x1b8   :  { %v8482_v1 = vadd.f32 %v506_v44, %v8464_v57  ;;  %v624_v9 = vmul.f32 %v8476_v63, %v8476_v63  ;;  %v673_v20 = vadd.f32 %v623_v5, %v621_v11  ;;  %v576_v21 = vadd.f32 %v575_v12, %v8476_v63 }
 0x1b9   :  { %v508_v45 = vpop.f32.mrf.mxu1 }
 0x1ba   :  { %v8487_v4 = vadd.f32 %v508_v45, %v8461_v56  ;;  %v625_v13 = vmul.f32 %v8482_v1, %v8482_v1  ;;  %v653_v25 = vadd.f32 %v652_v16, %v624_v9  ;;  %v597_v30 = vadd.f32 %v596_v17, %v8482_v1 }
 0x1bb   :  { %v510_v47 = vpop.f32.mrf.mxu1 }
 0x1bc   :  { %v8492_v6 = vadd.f32 %v510_v47, %v8464_v57  ;;  %v626_v18 = vmul.f32 %v8487_v4, %v8487_v4  ;;  %v674_v31 = vadd.f32 %v673_v20, %v625_v13  ;;  %v577_v32 = vadd.f32 %v576_v21, %v8487_v4 }
 0x1bd   :  { %v514_v28 = vpop.f32.mrf.mxu1 }
 0x1be   :  { %v8499_v10 = vadd.f32 %v514_v28, %v8461_v56  ;;  %v627_v22 = vmul.f32 %v8492_v6, %v8492_v6  ;;  %v654_v35 = vadd.f32 %v653_v25, %v626_v18  ;;  %v598_v38 = vadd.f32 %v597_v30, %v8492_v6 }
 0x1bf   :  { %v516_v49 = vpop.f32.mrf.mxu1 }
 0x1c0   :  { %v8508_v14 = vadd.f32 %v516_v49, %v8464_v57  ;;  %v628_v26 = vmul.f32 %v8499_v10, %v8499_v10  ;;  %v675_v39 = vadd.f32 %v674_v31, %v627_v22  ;;  %v578_v40 = vadd.f32 %v577_v32, %v8499_v10 }
 0x1c1   :  { %v518_v50 = vpop.f32.mrf.mxu1 }
 0x1c2   :  { %v8515_v19 = vadd.f32 %v518_v50, %v8461_v56  ;;  %v629_v33 = vmul.f32 %v8508_v14, %v8508_v14  ;;  %v655_v43 = vadd.f32 %v654_v35, %v628_v26  ;;  %v599_v47 = vadd.f32 %v598_v38, %v8508_v14 }
 0x1c3   :  { %v520_v54 = vpop.f32.mrf.mxu1 }
 0x1c4   :  { %v8521_v23 = vadd.f32 %v520_v54, %v8464_v57  ;;  %v630_v36 = vmul.f32 %v8515_v19, %v8515_v19  ;;  %v676_v28 = vadd.f32 %v675_v39, %v629_v33  ;;  %v579_v49 = vadd.f32 %v578_v40, %v8515_v19 }
 0x1c5   :  { %v524_v55 = vpop.f32.mrf.mxu1 }
 0x1c6   :  { %v8526_v27 = vadd.f32 %v524_v55, %v8461_v56  ;;  %v631_v41 = vmul.f32 %v8521_v23, %v8521_v23  ;;  %v656_v52 = vadd.f32 %v655_v43, %v630_v36 }
 0x1c7   :  { %v526_v58 = vpop.f32.mrf.mxu1 }
 0x1c8   :  { %v8535_v37 = vadd.f32 %v526_v58, %v8464_v57  ;;  %v632_v44 = vmul.f32 %v8526_v27, %v8526_v27 }
 0x1c9   :  { %v528_v61 = vpop.f32.mrf.mxu1 }
 0x1ca   :  { %v8538_v29 = vadd.f32 %v528_v61, %v8461_v56  ;;  %v633_v54 = vmul.f32 %v8535_v37, %v8535_v37  ;;  %v600_v61 = vadd.f32 %v599_v47, %v8521_v23  ;;  %v657_v8 = vadd.f32 %v656_v52, %v632_v44 }
 0x1cb   :  { %v530_v2 = vpop.f32.mrf.mxu1 }
 0x1cc   :  { %v8547_v45 = vadd.f32 %v530_v2, %v8464_v57  ;;  %v634_v55 = vmul.f32 %v8538_v29, %v8538_v29  ;;  %v677_v2 = vadd.f32 %v676_v28, %v631_v41  ;;  %v601_v12 = vadd.f32 %v600_v61, %v8535_v37 }
 0x1cd   :  { %v534_v7 = vpop.f32.mrf.mxu1 }
 0x1ce   :  { %v8550_v46 = vadd.f32 %v534_v7, %v8461_v56  ;;  %v580_v7 = vadd.f32 %v579_v49, %v8526_v27  ;;  %v635_v9 = vmul.f32 %v8547_v45, %v8547_v45  ;;  %v678_v17 = vadd.f32 %v677_v2, %v633_v54 }
 0x1cf   :  { %v536_v15 = vpop.f32.mrf.mxu1  ;;  %v658_v20 = vadd.f32 %v657_v8, %v634_v55  ;;  %v602_v30 = vadd.f32 %v601_v12, %v8547_v45 }
 0x1d0   :  { %v8559_v58 = vadd.f32 %v536_v15, %v8464_v57  ;;  %v636_v11 = vmul.f32 %v8550_v46, %v8550_v46  ;;  %v581_v18 = vadd.f32 %v580_v7, %v8538_v29  ;;  %v679_v31 = vadd.f32 %v678_v17, %v635_v9 }
 0x1d1   :  { %v538_v24 = vpop.f32.mrf.mxu1 }
 0x1d2   :  { %v8563_v3 = vadd.f32 %v538_v24, %v8461_v56  ;;  %v637_v21 = vmul.f32 %v8559_v58, %v8559_v58  ;;  %v582_v32 = vadd.f32 %v581_v18, %v8550_v46  ;;  %v659_v33 = vadd.f32 %v658_v20, %v636_v11 }
 0x1d3   :  { %v540_v34 = vpop.f32.mrf.mxu1  ;;  %v603_v40 = vadd.f32 %v602_v30, %v8559_v58 }
 0x1d4   :  { %v8572_v13 = vadd.f32 %v540_v34, %v8464_v57  ;;  %v638_v22 = vmul.f32 %v8563_v3, %v8563_v3  ;;  %v680_v41 = vadd.f32 %v679_v31, %v637_v21 }
 0x1d5   :  { %v544_v42 = vpop.f32.mrf.mxu1 }
 0x1d6   :  { %v8575_v15 = vadd.f32 %v544_v42, %v8461_v56  ;;  %v639_v34 = vmul.f32 %v8572_v13, %v8572_v13  ;;  %v583_v42 = vadd.f32 %v582_v32, %v8563_v3  ;;  %v660_v43 = vadd.f32 %v659_v33, %v638_v22 }
 0x1d7   :  { %v546_v50 = vpop.f32.mrf.mxu1 }
 0x1d8   :  { %v8583_v24 = vadd.f32 %v546_v50, %v8464_v57  ;;  %v640_v35 = vmul.f32 %v8575_v15, %v8575_v15  ;;  %v604_v50 = vadd.f32 %v603_v40, %v8572_v13  ;;  %v584_v52 = vadd.f32 %v583_v42, %v8575_v15 }
 0x1d9   :  { %v548_v5 = vpop.f32.mrf.mxu1  ;;  %v681_v55 = vadd.f32 %v680_v41, %v639_v34 }
 0x1da   :  { %v8586_v25 = vadd.f32 %v548_v5, %v8461_v56  ;;  %v641_v44 = vmul.f32 %v8583_v24, %v8583_v24  ;;  %v661_v61 = vadd.f32 %v660_v43, %v640_v35  ;;  %v605_v8 = vadd.f32 %v604_v50, %v8583_v24 }
 0x1db   :  { %v550_v16 = vpop.f32.mrf.mxu1 }
 0x1dc   :  { %v8595_v36 = vadd.f32 %v550_v16, %v8464_v57  ;;  %v642_v47 = vmul.f32 %v8586_v25, %v8586_v25  ;;  %v585_v9 = vadd.f32 %v584_v52, %v8586_v25  ;;  %v682_v12 = vadd.f32 %v681_v55, %v641_v44 }
 0x1dd   :  { %v554_v26 = vpop.f32.mrf.mxu1 }
 0x1de   :  { %v8598_v38 = vadd.f32 %v554_v26, %v8461_v56  ;;  %v643_v2 = vmul.f32 %v8595_v36, %v8595_v36  ;;  %v662_v16 = vadd.f32 %v661_v61, %v642_v47  ;;  %v606_v21 = vadd.f32 %v605_v8, %v8595_v36 }
 0x1df   :  { %v556_v39 = vpop.f32.mrf.mxu1 }
 0x1e0   :  { %v8607_v28 = vadd.f32 %v556_v39, %v8464_v57  ;;  %v644_v5 = vmul.f32 %v8598_v38, %v8598_v38  ;;  %v586_v22 = vadd.f32 %v585_v9, %v8598_v38  ;;  %v683_v30 = vadd.f32 %v682_v12, %v643_v2 }
 0x1e1   :  { %v558_v49 = vpop.f32.mrf.mxu1 }
 0x1e2   :  { %v8612_v54 = vadd.f32 %v558_v49, %v8461_v56  ;;  %v645_v17 = vmul.f32 %v8607_v28, %v8607_v28  ;;  %v663_v31 = vadd.f32 %v662_v16, %v644_v5  ;;  %v607_v34 = vadd.f32 %v606_v21, %v8607_v28 }
 0x1e3   :  { %v560_v7 = vpop.f32.mrf.mxu1 }
 0x1e4   :  { %v8621_v11 = vadd.f32 %v560_v7, %v8464_v57  ;;  %v646_v18 = vmul.f32 %v8612_v54, %v8612_v54  ;;  %v587_v35 = vadd.f32 %v586_v22, %v8612_v54  ;;  %v684_v41 = vadd.f32 %v683_v30, %v645_v17 }
 0x1e5   :  { %v564_v20 = vpop.f32.mrf.mxu1 }
 0x1e6   :  { %v8630_v26 = vadd.f32 %v564_v20, %v8461_v56  ;;  %v647_v32 = vmul.f32 %v8621_v11, %v8621_v11  ;;  %v664_v42 = vadd.f32 %v663_v31, %v646_v18  ;;  %v608_v44 = vadd.f32 %v607_v34, %v8621_v11 }
 0x1e7   :  { %v566_v33 = vpop.f32.mrf.mxu1 }
 0x1e8   :  { %v648_v39 = vmul.f32 %v8630_v26, %v8630_v26  ;;  %v8639_v40 = vadd.f32 %v566_v33, %v8464_v57  ;;  %v588_v47 = vadd.f32 %v587_v35, %v8630_v26  ;;  %v685_v52 = vadd.f32 %v684_v41, %v647_v32 }
 0x1e9   :  { %v568_v43 = vpop.f32.mrf.mxu1 }
 0x1ea   :  { %v649_v49 = vmul.f32 %v8639_v40, %v8639_v40  ;;  %v8646_v50 = vadd.f32 %v568_v43, %v8461_v56  ;;  %v665_v55 = vadd.f32 %v664_v42, %v648_v39  ;;  %v609_v2 = vadd.f32 %v608_v44, %v8639_v40 }
 0x1eb   :  { %v570_v61 = vpop.f32.mrf.mxu1 }
 0x1ec   :  { %v589_v5 = vadd.f32 %v588_v47, %v8646_v50  ;;  %v650_v7 = vmul.f32 %v8646_v50, %v8646_v50  ;;  %v8653_v8 = vadd.f32 %v570_v61, %v8464_v57  ;;  %v686_v9 = vadd.f32 %v685_v52, %v649_v49 }
 0x1ee   :  { %v590_v12 = vrot.slane %v589_v5, 4  ;;  %v666_v16 = vadd.f32 %v665_v55, %v650_v7  ;;  %v610_v17 = vadd.f32 %v609_v2, %v8653_v8  ;;  %v651_v56 = vmul.f32 %v8653_v8, %v8653_v8 }
 0x1f0   :  { %v591_v18 = vadd.f32 %v590_v12, %v589_v5  ;;  %v667_v20 = vrot.slane %v666_v16, 4  ;;  %v611_v21 = vrot.slane %v610_v17, 4  ;;  %v687_v22 = vadd.f32 %v686_v9, %v651_v56 }
 0x1f2   :  { %v592_v30 = vrot.slane %v591_v18, 2  ;;  %v668_v31 = vadd.f32 %v667_v20, %v666_v16  ;;  %v612_v32 = vadd.f32 %v611_v21, %v610_v17  ;;  %v688_v33 = vrot.slane %v687_v22, 4 }
 0x1f4   :  { %v593_v34 = vadd.f32 %v592_v30, %v591_v18  ;;  %v669_v35 = vrot.slane %v668_v31, 2  ;;  %v613_v57 = vrot.slane %v612_v32, 2  ;;  %v689_v39 = vadd.f32 %v688_v33, %v687_v22 }
 0x1f6   :  { %v594_v41 = vrot.slane %v593_v34, 1  ;;  %v670_v42 = vadd.f32 %v669_v35, %v668_v31  ;;  %v614_v43 = vadd.f32 %v613_v57, %v612_v32  ;;  %v690_v44 = vrot.slane %v689_v39, 2 }
 0x1f7   :  { %v8270_v31 = vmov 1966171168  }
 0x1f8   :  { %v595_v47 = vadd.f32 %v594_v41, %v593_v34  ;;  %v671_v49 = vrot.slane %v670_v42, 1  ;;  %v615_v52 = vrot.slane %v614_v43, 1  ;;  %v691_v55 = vadd.f32 %v690_v44, %v689_v39 }
 0x1f9   :  { %v708_v32 = vunpack.c.l.s4 %v8270_v31 }
 0x1fa   :  { %v618_v61 = vmul.f32 0.0078125, %v595_v47  ;;  %v672_v2 = vadd.f32 %v671_v49, %v670_v42  ;;  %v616_v5 = vadd.f32 %v615_v52, %v614_v43  ;;  %v692_v7 = vrot.slane %v691_v55, 1  ;;  %v573_v42 = vld [vmem:[%s14273_s6 + $0x4] sm:$0x3] }
 0x1fb   :  { %v709_v33 = vunpack.c.0.s8 %v708_v32 }
 0x1fc   :  { %v694_v9 = vmul.f32 0.0078125, %v672_v2  ;;  %v696_v12 = vmul.f32 %v618_v61, %v618_v61  ;;  %v619_v16 = vmul.f32 0.0078125, %v616_v5  ;;  %v693_v17 = vadd.f32 %v692_v7, %v691_v55  ;;  %v574_v7 = vld [vmem:[%s14273_s6 + $0x6] sm:$0x3] }
 0x1fd   :  { %v8659_v35 = vsub.s32 %v709_v33, %v8449_v48 }
 0x1fe   :  { %v698_v56 = vsub.f32 %v694_v9, %v696_v12  ;;  %v695_v18 = vmul.f32 0.0078125, %v693_v17  ;;  %v697_v20 = vmul.f32 %v619_v16, %v619_v16 }
 0x1ff   :  { %14580 = vst [vmem:[#allocation22_spill] sm:$0xff] %v8659_v35 }
 0x200   :  { %v700_v21 = vadd.f32 0.8, %v698_v56  ;;  %v699_v22 = vsub.f32 %v695_v18, %v697_v20 }
 0x202   :  { %v701_v30 = vadd.f32 0.8, %v699_v22  ;;  %8053 = vrsqrt.f32 %v700_v21 }
 0x204   :  { %8055 = vrsqrt.f32 %v701_v30 }
 0x20f   :  { %v8054_v34 = vpop.eup %8053 }
 0x211   :  { %v8056_v57 = vpop.eup %8055 }
 0x212   :  { %v706_v39 = vcombine.low %v8054_v34, %v8056_v57 }
 0x214   :  { %v713_v41 = vrot.slane %v706_v39, %v8659_v35 }
 0x216   :  { %v720_v43 = vrot.slane %v713_v41, %v8659_v35 }
 0x218   :  { %v722_v44 = vmul.f32 %v720_v43, %v573_v42 }
 0x21a   :  { %v8667_v47 = vrot.slane %v722_v44, %v8452_v51  ;;  %v8670_v49 = vrot.slane %v722_v44, %v8458_v53 }
 0x21c   :  { %v734_v52 = vmul.f32 %v8667_v47, %v618_v61  ;;  %v735_v55 = vmul.f32 %v8670_v49, %v619_v16  ;;  %v756_v17 = vmul.f32 %v8670_v49, %v8479_v0  ;;  %v758_v56 = vmul.f32 %v8670_v49, %v8470_v60 }
 0x21d   :  { %v755_v61 = vmul.f32 %v8667_v47, %v8473_v62  ;;  %v757_v16 = vmul.f32 %v8667_v47, %v8467_v59  ;;  %v8689_v18 = vmul.f32 %v8667_v47, %v8630_v26  ;;  %v8693_v20 = vmul.f32 %v8667_v47, %v8646_v50 }
 0x21e   :  { %v738_v2 = vcombine.low %v734_v52, %v735_v55  ;;  %v760_v60 = vmul.f32 %v8670_v49, %v8482_v1  ;;  %v762_v59 = vmul.f32 %v8670_v49, %v8492_v6  ;;  %v759_v62 = vmul.f32 %v8667_v47, %v8476_v63 }
 0x21f   :  { %v761_v26 = vmul.f32 %v8667_v47, %v8487_v4  ;;  %v764_v50 = vmul.f32 %v8670_v49, %v8508_v14  ;;  %v766_v22 = vmul.f32 %v8670_v49, %v8521_v23  ;;  %v763_v6 = vmul.f32 %v8667_v47, %v8499_v10 }
 0x220   :  { %v745_v5 = vrot.slane %v738_v2, %v8659_v35 }
 0x222   :  { %v752_v9 = vrot.slane %v745_v5, %v8659_v35  ;;  %v765_v5 = vmul.f32 %v8667_v47, %v8515_v19  ;;  %v768_v19 = vmul.f32 %v8670_v49, %v8535_v37 }
 0x224   :  { %v754_v12 = vsub.f32 %v574_v7, %v752_v9 }
 0x226   :  { %v8696_v21 = vrot.slane %v754_v12, %v8452_v51  ;;  %v8699_v0 = vrot.slane %v754_v12, %v8458_v53 }
 0x228   :  { %v799_v30 = vadd.f32 %v8699_v0, %v756_v17  ;;  %v801_v31 = vadd.f32 %v8699_v0, %v758_v56  ;;  %v798_v1 = vadd.f32 %v8696_v21, %v755_v61  ;;  %v800_v63 = vadd.f32 %v8696_v21, %v757_v16 }
 0x229   :  { %v803_v32 = vadd.f32 %v8699_v0, %v760_v60  ;;  %v805_v4 = vadd.f32 %v8699_v0, %v762_v59  ;;  %v802_v14 = vadd.f32 %v8696_v21, %v759_v62  ;;  %v804_v2 = vadd.f32 %v8696_v21, %v761_v26 }
 0x22a   :  { %vm831_vm1 = vcmp.gt.f32.partialorder %v799_v30, 0.0  ;;  %vm833_vm2 = vcmp.gt.f32.partialorder %v801_v31, 0.0  ;;  %v863_v23 = vmul.f32 0.2, %v799_v30  ;;  %v865_v33 = vmul.f32 0.2, %v801_v31 }
 0x22b   :  { %vm830_vm3 = vcmp.gt.f32.partialorder %v798_v1, 0.0  ;;  %vm832_vm4 = vcmp.gt.f32.partialorder %v800_v63, 0.0  ;;  %v862_v34 = vmul.f32 0.2, %v798_v1  ;;  %v864_v57 = vmul.f32 0.2, %v800_v63 }
 0x22c   :  { %v895_v39 = vsel %vm831_vm1, %v799_v30, %v863_v23  ;;  %v897_v41 = vsel %vm833_vm2, %v801_v31, %v865_v33  ;;  %vm835_vm5 = vcmp.gt.f32.partialorder %v803_v32, 0.0  ;;  %vm837_vm6 = vcmp.gt.f32.partialorder %v805_v4, 0.0 }
 0x22d   :  { %v927_v10 = vpack.c.bf16 %v897_v41, %v895_v39  ;;  %v894_v42 = vsel %vm830_vm3, %v798_v1, %v862_v34  ;;  %v896_v43 = vsel %vm832_vm4, %v800_v63, %v864_v57  ;;  %v867_v44 = vmul.f32 0.2, %v803_v32 }
 0x22e   :  { %v926_v52 = vpack.c.bf16 %v896_v43, %v894_v42  ;;  %v869_v55 = vmul.f32 0.2, %v805_v4  ;;  %v866_v9 = vmul.f32 0.2, %v802_v14  ;;  %v807_v12 = vadd.f32 %v8699_v0, %v764_v50 }
 0x22f   :  { %1380 = vmatprep.mubr.bf16.mxu0 %v927_v10  ;;  %1493 = vmatprep.mubr.bf16.mxu1 %v927_v10  ;;  %v899_v7 = vsel %vm835_vm5, %v803_v32, %v867_v44  ;;  %v809_v17 = vadd.f32 %v8699_v0, %v766_v22  ;;  %vm834_vm7 = vcmp.gt.f32.partialorder %v802_v14, 0.0  ;;  %vm836_vm8 = vcmp.gt.f32.partialorder %v804_v2, 0.0 }
 0x230   :  { %1381 = vmatmul.mubr.bf16.vlgmr.msra.gmra.mxu0 %v926_v52  ;;  %1494 = vmatmul.mubr.bf16.vlgmr.msra.gmra.mxu1 %v926_v52  ;;  %v901_v56 = vsel %vm837_vm6, %v805_v4, %v869_v55  ;;  %v868_v61 = vmul.f32 0.2, %v804_v2  ;;  %vm839_vm9 = vcmp.gt.f32.partialorder %v807_v12, 0.0  ;;  %v871_v60 = vmul.f32 0.2, %v807_v12 }
 0x231   :  { %v929_v16 = vpack.c.bf16 %v901_v56, %v899_v7  ;;  %vm841_vm10 = vcmp.gt.f32.partialorder %v809_v17, 0.0  ;;  %v873_v59 = vmul.f32 0.2, %v809_v17  ;;  %v806_v62 = vadd.f32 %v8696_v21, %v763_v6 }
 0x232   :  { %v808_v26 = vadd.f32 %v8696_v21, %v765_v5  ;;  %v898_v50 = vsel %vm834_vm7, %v802_v14, %v866_v9  ;;  %v900_v22 = vsel %vm836_vm8, %v804_v2, %v868_v61  ;;  %v770_v30 = vmul.f32 %v8670_v49, %v8547_v45 }
 0x233   :  { %1390 = vmatprep.mubr.bf16.mxu0 %v929_v16  ;;  %1503 = vmatprep.mubr.bf16.mxu1 %v929_v16  ;;  %v903_v31 = vsel %vm839_vm9, %v807_v12, %v871_v60  ;;  %v905_v1 = vsel %vm841_vm10, %v809_v17, %v873_v59  ;;  %v811_v63 = vadd.f32 %v8699_v0, %v768_v19  ;;  %v870_v4 = vmul.f32 0.2, %v806_v62 }
 0x234   :  { %v813_v32 = vadd.f32 %v8699_v0, %v770_v30  ;;  %v928_v37 = vpack.c.bf16 %v900_v22, %v898_v50  ;;  %v872_v23 = vmul.f32 0.2, %v808_v26  ;;  %v931_v33 = vpack.c.bf16 %v905_v1, %v903_v31 }
 0x235   :  { %vm838_vm11 = vcmp.gt.f32.partialorder %v806_v62, 0.0  ;;  %vm840_vm12 = vcmp.gt.f32.partialorder %v808_v26, 0.0  ;;  %v875_v6 = vmul.f32 0.2, %v811_v63  ;;  %v767_v34 = vmul.f32 %v8667_v47, %v8526_v27 }
 0x236   :  { %v877_v14 = vmul.f32 0.2, %v813_v32  ;;  %v769_v45 = vmul.f32 %v8667_v47, %v8538_v29  ;;  %vm843_vm13 = vcmp.gt.f32.partialorder %v811_v63, 0.0  ;;  %vm845_vm14 = vcmp.gt.f32.partialorder %v813_v32, 0.0 }
 0x237   :  { %v772_v57 = vmul.f32 %v8670_v49, %v8559_v58  ;;  %v774_v39 = vmul.f32 %v8670_v49, %v8572_v13  ;;  %v902_v41 = vsel %vm838_vm11, %v806_v62, %v870_v4  ;;  %v904_v10 = vsel %vm840_vm12, %v808_v26, %v872_v23 }
 0x238   :  { %1391 = vmatmul.mubr.bf16.gmra.mxu0 %v928_v37  ;;  %1504 = vmatmul.mubr.bf16.gmra.mxu1 %v928_v37  ;;  %v810_v42 = vadd.f32 %v8696_v21, %v767_v34  ;;  %v812_v43 = vadd.f32 %v8696_v21, %v769_v45  ;;  %v907_v44 = vsel %vm843_vm13, %v811_v63, %v875_v6 }
 0x239   :  { %1400 = vmatprep.mubr.bf16.mxu0 %v931_v33  ;;  %1513 = vmatprep.mubr.bf16.mxu1 %v931_v33  ;;  %v815_v27 = vadd.f32 %v8699_v0, %v772_v57  ;;  %v817_v29 = vadd.f32 %v8699_v0, %v774_v39  ;;  %v909_v52 = vsel %vm845_vm14, %v813_v32, %v877_v14 }
 0x23a   :  { %v771_v55 = vmul.f32 %v8667_v47, %v8550_v46  ;;  %v930_v2 = vpack.c.bf16 %v904_v10, %v902_v41  ;;  %v773_v58 = vmul.f32 %v8667_v47, %v8563_v3  ;;  %vm842_vm15 = vcmp.gt.f32.partialorder %v810_v42, 0.0 }
 0x23b   :  { %v874_v13 = vmul.f32 0.2, %v810_v42  ;;  %v876_v5 = vmul.f32 0.2, %v812_v43  ;;  %v933_v9 = vpack.c.bf16 %v909_v52, %v907_v44  ;;  %vm844_vm0 = vcmp.gt.f32.partialorder %v812_v43, 0.0 }
 0x23c   :  { %v814_v7 = vadd.f32 %v8696_v21, %v771_v55  ;;  %v879_v12 = vmul.f32 0.2, %v815_v27  ;;  %v881_v17 = vmul.f32 0.2, %v817_v29  ;;  %v786_v56 = vmul.f32 %v8670_v49, %v8653_v8 }
 0x23d   :  { %vm847_vm1 = vcmp.gt.f32.partialorder %v815_v27, 0.0  ;;  %vm849_vm2 = vcmp.gt.f32.partialorder %v817_v29, 0.0  ;;  %v776_v46 = vmul.f32 %v8670_v49, %v8583_v24  ;;  %v816_v3 = vadd.f32 %v8696_v21, %v773_v58 }
 0x23e   :  { %v778_v61 = vmul.f32 %v8670_v49, %v8595_v36  ;;  %v775_v16 = vmul.f32 %v8667_v47, %v8575_v15  ;;  %v829_v19 = vadd.f32 %v8699_v0, %v786_v56  ;;  %v906_v8 = vsel %vm842_vm15, %v810_v42, %v874_v13 }
 0x23f   :  { %v908_v60 = vsel %vm844_vm0, %v812_v43, %v876_v5  ;;  %v878_v59 = vmul.f32 0.2, %v814_v7  ;;  %v911_v62 = vsel %vm847_vm1, %v815_v27, %v879_v12  ;;  %v913_v26 = vsel %vm849_vm2, %v817_v29, %v881_v17 }
 0x240   :  { %1401 = vmatmul.mubr.bf16.gmra.mxu0 %v930_v2  ;;  %1514 = vmatmul.mubr.bf16.gmra.mxu1 %v930_v2  ;;  %vm846_vm3 = vcmp.gt.f32.partialorder %v814_v7, 0.0  ;;  %v819_v24 = vadd.f32 %v8699_v0, %v776_v46  ;;  %v821_v50 = vadd.f32 %v8699_v0, %v778_v61  ;;  %v777_v36 = vmul.f32 %v8667_v47, %v8586_v25 }
 0x241   :  { %1410 = vmatprep.mubr.bf16.mxu0 %v933_v9  ;;  %1523 = vmatprep.mubr.bf16.mxu1 %v933_v9  ;;  %v780_v15 = vmul.f32 %v8670_v49, %v8607_v28  ;;  %v784_v22 = vmul.f32 %v8670_v49, %v8639_v40  ;;  %v932_v30 = vpack.c.bf16 %v908_v60, %v906_v8  ;;  %vm848_vm4 = vcmp.gt.f32.partialorder %v816_v3, 0.0 }
 0x242   :  { %v880_v31 = vmul.f32 0.2, %v816_v3  ;;  %v782_v1 = vmul.f32 %v8670_v49, %v8621_v11  ;;  %v935_v63 = vpack.c.bf16 %v913_v26, %v911_v62  ;;  %v910_v32 = vsel %vm846_vm3, %v814_v7, %v878_v59 }
 0x243   :  { %v827_v37 = vadd.f32 %v8699_v0, %v784_v22  ;;  %vm861_vm5 = vcmp.gt.f32.partialorder %v829_v19, 0.0  ;;  %v883_v4 = vmul.f32 0.2, %v819_v24  ;;  %v818_v25 = vadd.f32 %v8696_v21, %v775_v16 }
 0x244   :  { %v893_v23 = vmul.f32 0.2, %v829_v19  ;;  %v826_v28 = vadd.f32 %v8696_v21, %v8689_v18  ;;  %vm851_vm6 = vcmp.gt.f32.partialorder %v819_v24, 0.0  ;;  %v885_v40 = vmul.f32 0.2, %v821_v50 }
 0x245   :  { %vm859_vm7 = vcmp.gt.f32.partialorder %v827_v37, 0.0  ;;  %v891_v33 = vmul.f32 0.2, %v827_v37  ;;  %vm853_vm8 = vcmp.gt.f32.partialorder %v821_v50, 0.0  ;;  %v828_v49 = vadd.f32 %v8696_v21, %v8693_v20 }
 0x246   :  { %v925_v11 = vsel %vm861_vm5, %v829_v19, %v893_v23  ;;  %vm858_vm9 = vcmp.gt.f32.partialorder %v826_v28, 0.0  ;;  %v912_v6 = vsel %vm848_vm4, %v816_v3, %v880_v31  ;;  %v820_v14 = vadd.f32 %v8696_v21, %v777_v36  ;;  %v1006_v19 = vld [vmem:[%s14273_s6 + $0x8] sm:$0xf] }
 0x247   :  { %v923_v34 = vsel %vm859_vm7, %v827_v37, %v891_v33  ;;  %v890_v18 = vmul.f32 0.2, %v826_v28  ;;  %v915_v45 = vsel %vm851_vm6, %v819_v24, %v883_v4  ;;  %vm860_vm10 = vcmp.gt.f32.partialorder %v828_v49, 0.0 }
 0x248   :  { %1411 = vmatmul.mubr.bf16.gmra.mxu0 %v932_v30  ;;  %1524 = vmatmul.mubr.bf16.gmra.mxu1 %v932_v30  ;;  %v941_v57 = vpack.c.bf16 %v925_v11, %v923_v34  ;;  %v892_v39 = vmul.f32 0.2, %v828_v49  ;;  %v917_v41 = vsel %vm853_vm8, %v821_v50, %v885_v40  ;;  %v823_v10 = vadd.f32 %v8699_v0, %v780_v15 }
 0x249   :  { %1420 = vmatprep.mubr.bf16.mxu0 %v935_v63  ;;  %1533 = vmatprep.mubr.bf16.mxu1 %v935_v63  ;;  %v825_v42 = vadd.f32 %v8699_v0, %v782_v1  ;;  %v922_v43 = vsel %vm858_vm9, %v826_v28, %v890_v18  ;;  %v934_v29 = vpack.c.bf16 %v912_v6, %v910_v32  ;;  %v882_v52 = vmul.f32 0.2, %v818_v25 }
 0x24a   :  { %v924_v27 = vsel %vm860_vm10, %v828_v49, %v892_v39  ;;  %v937_v44 = vpack.c.bf16 %v917_v41, %v915_v45  ;;  %v884_v55 = vmul.f32 0.2, %v820_v14  ;;  %vm850_vm11 = vcmp.gt.f32.partialorder %v818_v25, 0.0 }
 0x24b   :  { %v940_v20 = vpack.c.bf16 %v924_v27, %v922_v43  ;;  %vm852_vm12 = vcmp.gt.f32.partialorder %v820_v14, 0.0  ;;  %v887_v2 = vmul.f32 0.2, %v823_v10  ;;  %v889_v58 = vmul.f32 0.2, %v825_v42 }
 0x24c   :  { %vm855_vm13 = vcmp.gt.f32.partialorder %v823_v10, 0.0  ;;  %vm857_vm14 = vcmp.gt.f32.partialorder %v825_v42, 0.0  ;;  %v779_v0 = vmul.f32 %v8667_v47, %v8598_v38  ;;  %v781_v13 = vmul.f32 %v8667_v47, %v8612_v54 }
 0x24d   :  { %v914_v5 = vsel %vm850_vm11, %v818_v25, %v882_v52  ;;  %v916_v7 = vsel %vm852_vm12, %v820_v14, %v884_v55  ;;  %v919_v17 = vsel %vm855_vm13, %v823_v10, %v887_v2  ;;  %v921_v56 = vsel %vm857_vm14, %v825_v42, %v889_v58 }
 0x24e   :  { %v822_v9 = vadd.f32 %v8696_v21, %v779_v0  ;;  %v824_v12 = vadd.f32 %v8696_v21, %v781_v13  ;;  %v936_v46 = vpack.c.bf16 %v916_v7, %v914_v5  ;;  %v939_v3 = vpack.c.bf16 %v921_v56, %v919_v17 }
 0x24f   :  { %v8792_v21 = vsub.s32 2, %v8449_v48  ;;  %v8798_v8 = vsub.s32 3, %v8449_v48  ;;  %v8801_v60 = vrot.slane %v1006_v19, %v8452_v51  ;;  %v8807_v62 = vrot.slane %v1006_v19, %v8458_v53 }
 0x250   :  { %1421 = vmatmul.mubr.bf16.gmra.mxu0 %v934_v29  ;;  %1534 = vmatmul.mubr.bf16.gmra.mxu1 %v934_v29  ;;  %v886_v61 = vmul.f32 0.2, %v822_v9  ;;  %v888_v16 = vmul.f32 0.2, %v824_v12  ;;  %vm854_vm15 = vcmp.gt.f32.partialorder %v822_v9, 0.0  ;;  %vm856_vm0 = vcmp.gt.f32.partialorder %v824_v12, 0.0 }
 0x251   :  { %1430 = vmatprep.mubr.bf16.mxu0 %v937_v44  ;;  %1543 = vmatprep.mubr.bf16.mxu1 %v937_v44  ;;  %14581 = vst [vmem:[#allocation23_spill] sm:$0xff] %v8792_v21  ;;  %14582 = vst [vmem:[#allocation24_spill] sm:$0xff] %v8798_v8  ;;  %v8804_v59 = vrot.slane %v1006_v19, %v8792_v21  ;;  %v8810_v26 = vrot.slane %v1006_v19, %v8798_v8 }
 0x252   :  { %v918_v38 = vsel %vm854_vm15, %v822_v9, %v886_v61  ;;  %v920_v54 = vsel %vm856_vm0, %v824_v12, %v888_v16 }
 0x253   :  { %v938_v47 = vpack.c.bf16 %v920_v54, %v918_v38 }
 0x258   :  { %1431 = vmatmul.mubr.bf16.gmra.mxu0 %v936_v46  ;;  %1544 = vmatmul.mubr.bf16.gmra.mxu1 %v936_v46 }
 0x259   :  { %1440 = vmatprep.mubr.bf16.mxu0 %v939_v3  ;;  %1553 = vmatprep.mubr.bf16.mxu1 %v939_v3 }
 0x260   :  { %1441 = vmatmul.mubr.bf16.gmra.mxu0 %v938_v47  ;;  %1554 = vmatmul.mubr.bf16.gmra.mxu1 %v938_v47 }
 0x261   :  { %1450 = vmatprep.mubr.bf16.mxu0 %v941_v57  ;;  %1563 = vmatprep.mubr.bf16.mxu1 %v941_v57 }
 0x268   :  { %1451 = vmatmul.mubr.bf16.gmra.mxu0 %v940_v20  ;;  %1564 = vmatmul.mubr.bf16.gmra.mxu1 %v940_v20 }
 0x2f0   :  { %v1382_v24 = vpop.f32.mrf.mxu0  ;;  %v1495_v50 = vpop.f32.mrf.mxu1 }
 0x2f1   :  { %v8813_v36 = vadd.f32 %v1382_v24, %v8801_v60  ;;  %v8816_v15 = vadd.f32 %v1495_v50, %v8804_v59 }
 0x2f2   :  { %v1384_v22 = vpop.f32.mrf.mxu0  ;;  %v1497_v30 = vpop.f32.mrf.mxu1 }
 0x2f3   :  { %v8819_v31 = vadd.f32 %v1384_v22, %v8807_v62  ;;  %v8822_v1 = vadd.f32 %v1497_v30, %v8810_v26  ;;  %v1664_v25 = vmul.f32 %v8813_v36, %v8813_v36  ;;  %v1666_v23 = vmul.f32 %v8816_v15, %v8816_v15 }
 0x2f4   :  { %v1386_v63 = vpop.f32.mrf.mxu0  ;;  %v1499_v32 = vpop.f32.mrf.mxu1 }
 0x2f5   :  { %v8825_v37 = vadd.f32 %v1386_v63, %v8801_v60  ;;  %v8828_v4 = vadd.f32 %v1499_v32, %v8804_v59  ;;  %v1665_v33 = vmul.f32 %v8819_v31, %v8819_v31  ;;  %v1667_v11 = vmul.f32 %v8822_v1, %v8822_v1 }
 0x2f6   :  { %v1388_v28 = vpop.f32.mrf.mxu0  ;;  %v1501_v40 = vpop.f32.mrf.mxu1 }
 0x2f7   :  { %v1668_v49 = vmul.f32 %v8825_v37, %v8825_v37  ;;  %v1670_v6 = vmul.f32 %v8828_v4, %v8828_v4  ;;  %v1576_v14 = vadd.f32 %v8825_v37, %v8813_v36  ;;  %v1618_v34 = vadd.f32 %v8828_v4, %v8816_v15 }
 0x2f8   :  { %v8847_v18 = vadd.f32 %v1388_v28, %v8807_v62  ;;  %v8850_v45 = vadd.f32 %v1501_v40, %v8810_v26  ;;  %v1392_v57 = vpop.f32.mrf.mxu0  ;;  %v1505_v39 = vpop.f32.mrf.mxu1 }
 0x2f9   :  { %v1728_v41 = vadd.f32 %v1668_v49, %v1664_v25  ;;  %v1770_v10 = vadd.f32 %v1670_v6, %v1666_v23  ;;  %v8853_v42 = vadd.f32 %v1392_v57, %v8801_v60  ;;  %v8856_v43 = vadd.f32 %v1505_v39, %v8804_v59 }
 0x2fa   :  { %v1597_v27 = vadd.f32 %v8847_v18, %v8819_v31  ;;  %v1669_v29 = vmul.f32 %v8847_v18, %v8847_v18  ;;  %v1639_v20 = vadd.f32 %v8850_v45, %v8822_v1  ;;  %v1671_v44 = vmul.f32 %v8850_v45, %v8850_v45  ;;  %v1394_v52 = vpop.f32.mrf.mxu0  ;;  %v1507_v55 = vpop.f32.mrf.mxu1 }
 0x2fb   :  { %v1577_v2 = vadd.f32 %v1576_v14, %v8853_v42  ;;  %v1672_v58 = vmul.f32 %v8853_v42, %v8853_v42  ;;  %v1619_v0 = vadd.f32 %v1618_v34, %v8856_v43  ;;  %v1674_v13 = vmul.f32 %v8856_v43, %v8856_v43 }
 0x2fc   :  { %v1749_v5 = vadd.f32 %v1669_v29, %v1665_v33  ;;  %v1791_v7 = vadd.f32 %v1671_v44, %v1667_v11  ;;  %v8873_v9 = vadd.f32 %v1394_v52, %v8807_v62  ;;  %v8876_v12 = vadd.f32 %v1507_v55, %v8810_v26  ;;  %v1396_v17 = vpop.f32.mrf.mxu0  ;;  %v1509_v56 = vpop.f32.mrf.mxu1 }
 0x2fd   :  { %v1729_v46 = vadd.f32 %v1728_v41, %v1672_v58  ;;  %v1771_v3 = vadd.f32 %v1770_v10, %v1674_v13  ;;  %v8879_v61 = vadd.f32 %v1396_v17, %v8801_v60  ;;  %v8882_v16 = vadd.f32 %v1509_v56, %v8804_v59 }
 0x2fe   :  { %v1598_v38 = vadd.f32 %v1597_v27, %v8873_v9  ;;  %v1673_v54 = vmul.f32 %v8873_v9, %v8873_v9  ;;  %v1640_v47 = vadd.f32 %v1639_v20, %v8876_v12  ;;  %v1675_v19 = vmul.f32 %v8876_v12, %v8876_v12  ;;  %v1398_v24 = vpop.f32.mrf.mxu0  ;;  %v1511_v50 = vpop.f32.mrf.mxu1 }
 0x2ff   :  { %v1578_v22 = vadd.f32 %v1577_v2, %v8879_v61  ;;  %v1676_v30 = vmul.f32 %v8879_v61, %v8879_v61  ;;  %v1620_v63 = vadd.f32 %v1619_v0, %v8882_v16  ;;  %v1678_v32 = vmul.f32 %v8882_v16, %v8882_v16 }
 0x300   :  { %v1750_v25 = vadd.f32 %v1749_v5, %v1673_v54  ;;  %v1792_v23 = vadd.f32 %v1791_v7, %v1675_v19  ;;  %v8897_v28 = vadd.f32 %v1398_v24, %v8807_v62  ;;  %v8900_v40 = vadd.f32 %v1511_v50, %v8810_v26  ;;  %v1402_v33 = vpop.f32.mrf.mxu0  ;;  %v1515_v11 = vpop.f32.mrf.mxu1 }
 0x301   :  { %v1730_v49 = vadd.f32 %v1729_v46, %v1676_v30  ;;  %v1772_v6 = vadd.f32 %v1771_v3, %v1678_v32  ;;  %v8903_v14 = vadd.f32 %v1402_v33, %v8801_v60  ;;  %v8906_v34 = vadd.f32 %v1515_v11, %v8804_v59 }
 0x302   :  { %v1599_v57 = vadd.f32 %v1598_v38, %v8897_v28  ;;  %v1677_v39 = vmul.f32 %v8897_v28, %v8897_v28  ;;  %v1641_v41 = vadd.f32 %v1640_v47, %v8900_v40  ;;  %v1679_v10 = vmul.f32 %v8900_v40, %v8900_v40  ;;  %v1404_v27 = vpop.f32.mrf.mxu0  ;;  %v1517_v29 = vpop.f32.mrf.mxu1 }
 0x303   :  { %v1579_v20 = vadd.f32 %v1578_v22, %v8903_v14  ;;  %v1680_v44 = vmul.f32 %v8903_v14, %v8903_v14  ;;  %v1621_v52 = vadd.f32 %v1620_v63, %v8906_v34  ;;  %v1682_v55 = vmul.f32 %v8906_v34, %v8906_v34 }
 0x304   :  { %v1751_v2 = vadd.f32 %v1750_v25, %v1677_v39  ;;  %v1793_v58 = vadd.f32 %v1792_v23, %v1679_v10  ;;  %v8921_v0 = vadd.f32 %v1404_v27, %v8807_v62  ;;  %v8924_v13 = vadd.f32 %v1517_v29, %v8810_v26  ;;  %v1406_v5 = vpop.f32.mrf.mxu0  ;;  %v1519_v7 = vpop.f32.mrf.mxu1 }
 0x305   :  { %v1731_v17 = vadd.f32 %v1730_v49, %v1680_v44  ;;  %v1773_v56 = vadd.f32 %v1772_v6, %v1682_v55  ;;  %v8927_v46 = vadd.f32 %v1406_v5, %v8801_v60  ;;  %v8930_v3 = vadd.f32 %v1519_v7, %v8804_v59 }
 0x306   :  { %v1600_v38 = vadd.f32 %v1599_v57, %v8921_v0  ;;  %v1681_v54 = vmul.f32 %v8921_v0, %v8921_v0  ;;  %v1642_v47 = vadd.f32 %v1641_v41, %v8924_v13  ;;  %v1683_v19 = vmul.f32 %v8924_v13, %v8924_v13  ;;  %v1408_v24 = vpop.f32.mrf.mxu0  ;;  %v1521_v50 = vpop.f32.mrf.mxu1 }
 0x307   :  { %v1580_v22 = vadd.f32 %v1579_v20, %v8927_v46  ;;  %v1684_v30 = vmul.f32 %v8927_v46, %v8927_v46  ;;  %v1622_v63 = vadd.f32 %v1621_v52, %v8930_v3  ;;  %v1686_v32 = vmul.f32 %v8930_v3, %v8930_v3 }
 0x308   :  { %v1752_v25 = vadd.f32 %v1751_v2, %v1681_v54  ;;  %v1794_v23 = vadd.f32 %v1793_v58, %v1683_v19  ;;  %v8945_v33 = vadd.f32 %v1408_v24, %v8807_v62  ;;  %v8948_v11 = vadd.f32 %v1521_v50, %v8810_v26  ;;  %v1412_v49 = vpop.f32.mrf.mxu0  ;;  %v1525_v6 = vpop.f32.mrf.mxu1 }
 0x309   :  { %v1732_v57 = vadd.f32 %v1731_v17, %v1684_v30  ;;  %v1774_v39 = vadd.f32 %v1773_v56, %v1686_v32  ;;  %v8951_v41 = vadd.f32 %v1412_v49, %v8801_v60  ;;  %v8954_v10 = vadd.f32 %v1525_v6, %v8804_v59 }
 0x30a   :  { %v1601_v27 = vadd.f32 %v1600_v38, %v8945_v33  ;;  %v1685_v29 = vmul.f32 %v8945_v33, %v8945_v33  ;;  %v1643_v20 = vadd.f32 %v1642_v47, %v8948_v11  ;;  %v1687_v44 = vmul.f32 %v8948_v11, %v8948_v11  ;;  %v1414_v52 = vpop.f32.mrf.mxu0  ;;  %v1527_v55 = vpop.f32.mrf.mxu1 }
 0x30b   :  { %14583 = vst [vmem:[#allocation25_spill] sm:$0xff] %v8954_v10  ;;  %v1581_v2 = vadd.f32 %v1580_v22, %v8951_v41  ;;  %v1688_v58 = vmul.f32 %v8951_v41, %v8951_v41  ;;  %v1623_v5 = vadd.f32 %v1622_v63, %v8954_v10  ;;  %v1690_v7 = vmul.f32 %v8954_v10, %v8954_v10 }
 0x30c   :  { %v1753_v17 = vadd.f32 %v1752_v25, %v1685_v29  ;;  %v1795_v56 = vadd.f32 %v1794_v23, %v1687_v44  ;;  %v8969_v38 = vadd.f32 %v1414_v52, %v8807_v62  ;;  %v8972_v54 = vadd.f32 %v1527_v55, %v8810_v26  ;;  %v1416_v47 = vpop.f32.mrf.mxu0  ;;  %v1529_v19 = vpop.f32.mrf.mxu1 }
 0x30d   :  { %v1733_v24 = vadd.f32 %v1732_v57, %v1688_v58  ;;  %v1775_v50 = vadd.f32 %v1774_v39, %v1690_v7  ;;  %v8975_v22 = vadd.f32 %v1416_v47, %v8801_v60  ;;  %v8978_v30 = vadd.f32 %v1529_v19, %v8804_v59 }
 0x30e   :  { %14584 = vst [vmem:[#allocation26_spill] sm:$0xff] %v8972_v54  ;;  %v1602_v63 = vadd.f32 %v1601_v27, %v8969_v38  ;;  %v1689_v32 = vmul.f32 %v8969_v38, %v8969_v38  ;;  %v1644_v25 = vadd.f32 %v1643_v20, %v8972_v54  ;;  %v1691_v23 = vmul.f32 %v8972_v54, %v8972_v54  ;;  %v1418_v49 = vpop.f32.mrf.mxu0  ;;  %v1531_v6 = vpop.f32.mrf.mxu1 }
 0x30f   :  { %14585 = vst [vmem:[#allocation27_spill] sm:$0xff] %v8975_v22  ;;  %14586 = vst [vmem:[#allocation28_spill] sm:$0xff] %v8978_v30  ;;  %v1582_v57 = vadd.f32 %v1581_v2, %v8975_v22  ;;  %v1692_v39 = vmul.f32 %v8975_v22, %v8975_v22  ;;  %v1624_v29 = vadd.f32 %v1623_v5, %v8978_v30 }
 0x310   :  { %v1694_v27 = vmul.f32 %v8978_v30, %v8978_v30  ;;  %v1754_v44 = vadd.f32 %v1753_v17, %v1689_v32  ;;  %v1796_v52 = vadd.f32 %v1795_v56, %v1691_v23  ;;  %v8993_v55 = vadd.f32 %v1418_v49, %v8807_v62  ;;  %v1422_v58 = vpop.f32.mrf.mxu0  ;;  %v1535_v7 = vpop.f32.mrf.mxu1 }
 0x311   :  { %v8996_v20 = vadd.f32 %v1531_v6, %v8810_v26  ;;  %v1734_v47 = vadd.f32 %v1733_v24, %v1692_v39  ;;  %v8999_v19 = vadd.f32 %v1422_v58, %v8801_v60  ;;  %v9002_v5 = vadd.f32 %v1535_v7, %v8804_v59 }
 0x312   :  { %14587 = vst [vmem:[#allocation29_spill] sm:$0xff] %v8993_v55  ;;  %v1776_v2 = vadd.f32 %v1775_v50, %v1694_v27  ;;  %v1603_v48 = vadd.f32 %v1602_v63, %v8993_v55  ;;  %v1693_v17 = vmul.f32 %v8993_v55, %v8993_v55  ;;  %v1424_v23 = vpop.f32.mrf.mxu0  ;;  %v1537_v49 = vpop.f32.mrf.mxu1 }
 0x313   :  { %14588 = vst [vmem:[#allocation30_spill] sm:$0xff] %v8996_v20  ;;  %14589 = vst [vmem:[#allocation31_spill] sm:$0xff] %v8999_v19  ;;  %v1645_v56 = vadd.f32 %v1644_v25, %v8996_v20  ;;  %v1695_v32 = vmul.f32 %v8996_v20, %v8996_v20  ;;  %v1583_v24 = vadd.f32 %v1582_v57, %v8999_v19 }
 0x314   :  { %14590 = vst [vmem:[#allocation32_spill] sm:$0xff] %v9002_v5  ;;  %v1696_v50 = vmul.f32 %v8999_v19, %v8999_v19  ;;  %v1625_v6 = vadd.f32 %v1624_v29, %v9002_v5  ;;  %v1698_v63 = vmul.f32 %v9002_v5, %v9002_v5  ;;  %v1755_v39 = vadd.f32 %v1754_v44, %v1693_v17  ;;  %v1426_v7 = vpop.f32.mrf.mxu0  ;;  %v1539_v20 = vpop.f32.mrf.mxu1 }
 0x315   :  { %v1797_v27 = vadd.f32 %v1796_v52, %v1695_v32  ;;  %v9017_v58 = vadd.f32 %v1424_v23, %v8807_v62  ;;  %v9020_v25 = vadd.f32 %v1537_v49, %v8810_v26  ;;  %v9023_v55 = vadd.f32 %v1426_v7, %v8801_v60 }
 0x316   :  { %v1735_v30 = vadd.f32 %v1734_v47, %v1696_v50  ;;  %v1777_v57 = vadd.f32 %v1776_v2, %v1698_v63  ;;  %v9026_v29 = vadd.f32 %v1539_v20, %v8804_v59  ;;  %v1428_v32 = vpop.f32.mrf.mxu0  ;;  %v1541_v23 = vpop.f32.mrf.mxu1 }
 0x317   :  { %14591 = vst [vmem:[#allocation33_spill] sm:$0xff] %v9017_v58  ;;  %14592 = vst [vmem:[#allocation34_spill] sm:$0xff] %v9020_v25  ;;  %v1604_v5 = vadd.f32 %v1603_v48, %v9017_v58  ;;  %v1697_v44 = vmul.f32 %v9017_v58, %v9017_v58  ;;  %v1646_v52 = vadd.f32 %v1645_v56, %v9020_v25 }
 0x318   :  { %14593 = vst [vmem:[#allocation35_spill] sm:$0xff] %v9023_v55  ;;  %14594 = vst [vmem:[#allocation36_spill] sm:$0xff] %v9026_v29  ;;  %v1699_v17 = vmul.f32 %v9020_v25, %v9020_v25  ;;  %v1584_v47 = vadd.f32 %v1583_v24, %v9023_v55  ;;  %v1700_v2 = vmul.f32 %v9023_v55, %v9023_v55  ;;  %v1432_v7 = vpop.f32.mrf.mxu0  ;;  %v1545_v25 = vpop.f32.mrf.mxu1 }
 0x319   :  { %v1626_v20 = vadd.f32 %v1625_v6, %v9026_v29  ;;  %v1702_v48 = vmul.f32 %v9026_v29, %v9026_v29  ;;  %v1756_v49 = vadd.f32 %v1755_v39, %v1697_v44  ;;  %v9041_v63 = vadd.f32 %v1428_v32, %v8807_v62 }
 0x31a   :  { %v1798_v50 = vadd.f32 %v1797_v27, %v1699_v17  ;;  %v9044_v56 = vadd.f32 %v1541_v23, %v8810_v26  ;;  %v1736_v58 = vadd.f32 %v1735_v30, %v1700_v2  ;;  %v9047_v19 = vadd.f32 %v1432_v7, %v8801_v60  ;;  %v1434_v17 = vpop.f32.mrf.mxu0  ;;  %v1547_v32 = vpop.f32.mrf.mxu1 }
 0x31b   :  { %14595 = vst [vmem:[#allocation37_spill] sm:$0xff] %v9041_v63  ;;  %v1778_v24 = vadd.f32 %v1777_v57, %v1702_v48  ;;  %v9050_v6 = vadd.f32 %v1545_v25, %v8804_v59  ;;  %v1605_v29 = vadd.f32 %v1604_v5, %v9041_v63  ;;  %v1701_v39 = vmul.f32 %v9041_v63, %v9041_v63 }
 0x31c   :  { %14596 = vst [vmem:[#allocation38_spill] sm:$0xff] %v9044_v56  ;;  %14597 = vst [vmem:[#allocation39_spill] sm:$0xff] %v9047_v19  ;;  %v1647_v27 = vadd.f32 %v1646_v52, %v9044_v56  ;;  %v1703_v44 = vmul.f32 %v9044_v56, %v9044_v56  ;;  %v1585_v30 = vadd.f32 %v1584_v47, %v9047_v19  ;;  %v1436_v7 = vpop.f32.mrf.mxu0  ;;  %v1549_v56 = vpop.f32.mrf.mxu1 }
 0x31d   :  { %14598 = vst [vmem:[#allocation40_spill] sm:$0xff] %v9050_v6  ;;  %v1704_v57 = vmul.f32 %v9047_v19, %v9047_v19  ;;  %v1627_v25 = vadd.f32 %v1626_v20, %v9050_v6  ;;  %v1706_v5 = vmul.f32 %v9050_v6, %v9050_v6  ;;  %v1757_v23 = vadd.f32 %v1756_v49, %v1701_v39 }
 0x31e   :  { %v1799_v2 = vadd.f32 %v1798_v50, %v1703_v44  ;;  %v9065_v48 = vadd.f32 %v1434_v17, %v8807_v62  ;;  %v9068_v52 = vadd.f32 %v1547_v32, %v8810_v26  ;;  %v9071_v55 = vadd.f32 %v1436_v7, %v8801_v60  ;;  %v1438_v44 = vpop.f32.mrf.mxu0  ;;  %v1551_v17 = vpop.f32.mrf.mxu1 }
 0x31f   :  { %v1737_v63 = vadd.f32 %v1736_v58, %v1704_v57  ;;  %v1779_v47 = vadd.f32 %v1778_v24, %v1706_v5  ;;  %v9074_v20 = vadd.f32 %v1549_v56, %v8804_v59  ;;  %v9089_v5 = vadd.f32 %v1438_v44, %v8807_v62 }
 0x320   :  { %14599 = vst [vmem:[#allocation41_spill] sm:$0xff] %v9065_v48  ;;  %14600 = vst [vmem:[#allocation42_spill] sm:$0xff] %v9068_v52  ;;  %v1606_v6 = vadd.f32 %v1605_v29, %v9065_v48  ;;  %v1705_v49 = vmul.f32 %v9065_v48, %v9065_v48  ;;  %v1648_v50 = vadd.f32 %v1647_v27, %v9068_v52  ;;  %v1442_v7 = vpop.f32.mrf.mxu0 }
 0x321   :  { %14601 = vst [vmem:[#allocation43_spill] sm:$0xff] %v9071_v55  ;;  %14602 = vst [vmem:[#allocation44_spill] sm:$0xff] %v9074_v20  ;;  %v1707_v39 = vmul.f32 %v9068_v52, %v9068_v52  ;;  %v1586_v58 = vadd.f32 %v1585_v30, %v9071_v55  ;;  %v1708_v24 = vmul.f32 %v9071_v55, %v9071_v55  ;;  %v1555_v52 = vpop.f32.mrf.mxu1 }
 0x322   :  { %v1628_v56 = vadd.f32 %v1627_v25, %v9074_v20  ;;  %v1710_v29 = vmul.f32 %v9074_v20, %v9074_v20  ;;  %v1758_v32 = vadd.f32 %v1757_v23, %v1705_v49  ;;  %14603 = vst [vmem:[#allocation45_spill] sm:$0xff] %v9089_v5  ;;  %v9092_v27 = vadd.f32 %v1551_v17, %v8810_v26 }
 0x323   :  { %v1800_v57 = vadd.f32 %v1799_v2, %v1707_v39  ;;  %v1738_v48 = vadd.f32 %v1737_v63, %v1708_v24  ;;  %v9095_v19 = vadd.f32 %v1442_v7, %v8801_v60  ;;  %v9098_v25 = vadd.f32 %v1555_v52, %v8804_v59  ;;  %v1444_v39 = vpop.f32.mrf.mxu0  ;;  %v1557_v44 = vpop.f32.mrf.mxu1 }
 0x324   :  { %14604 = vst [vmem:[#allocation46_spill] sm:$0xff] %v9092_v27  ;;  %v1780_v30 = vadd.f32 %v1779_v47, %v1710_v29  ;;  %v1607_v20 = vadd.f32 %v1606_v6, %v9089_v5  ;;  %v1709_v23 = vmul.f32 %v9089_v5, %v9089_v5  ;;  %v1649_v2 = vadd.f32 %v1648_v50, %v9092_v27 }
 0x325   :  { %14605 = vst [vmem:[#allocation47_spill] sm:$0xff] %v9095_v19  ;;  %14606 = vst [vmem:[#allocation48_spill] sm:$0xff] %v9098_v25  ;;  %v1711_v49 = vmul.f32 %v9092_v27, %v9092_v27  ;;  %v1587_v63 = vadd.f32 %v1586_v58, %v9095_v19  ;;  %v1712_v47 = vmul.f32 %v9095_v19, %v9095_v19  ;;  %v1446_v7 = vpop.f32.mrf.mxu0  ;;  %v1559_v27 = vpop.f32.mrf.mxu1 }
 0x326   :  { %v1629_v52 = vadd.f32 %v1628_v56, %v9098_v25  ;;  %v1714_v6 = vmul.f32 %v9098_v25, %v9098_v25  ;;  %v1759_v17 = vadd.f32 %v1758_v32, %v1709_v23  ;;  %v9113_v29 = vadd.f32 %v1444_v39, %v8807_v62 }
 0x327   :  { %v1801_v24 = vadd.f32 %v1800_v57, %v1711_v49  ;;  %v9116_v50 = vadd.f32 %v1557_v44, %v8810_v26  ;;  %v1739_v5 = vadd.f32 %v1738_v48, %v1712_v47  ;;  %v9119_v55 = vadd.f32 %v1446_v7, %v8801_v60  ;;  %v1448_v49 = vpop.f32.mrf.mxu0  ;;  %v1561_v39 = vpop.f32.mrf.mxu1 }
 0x328   :  { %14607 = vst [vmem:[#allocation49_spill] sm:$0xff] %v9113_v29  ;;  %v1781_v58 = vadd.f32 %v1780_v30, %v1714_v6  ;;  %v9122_v56 = vadd.f32 %v1559_v27, %v8804_v59  ;;  %v1608_v25 = vadd.f32 %v1607_v20, %v9113_v29  ;;  %v1713_v32 = vmul.f32 %v9113_v29, %v9113_v29 }
 0x329   :  { %14608 = vst [vmem:[#allocation50_spill] sm:$0xff] %v9116_v50  ;;  %14609 = vst [vmem:[#allocation51_spill] sm:$0xff] %v9119_v55  ;;  %v1650_v57 = vadd.f32 %v1649_v2, %v9116_v50  ;;  %v1715_v23 = vmul.f32 %v9116_v50, %v9116_v50  ;;  %v1588_v48 = vadd.f32 %v1587_v63, %v9119_v55  ;;  %v1452_v7 = vpop.f32.mrf.mxu0  ;;  %v1565_v50 = vpop.f32.mrf.mxu1 }
 0x32a   :  { %14610 = vst [vmem:[#allocation52_spill] sm:$0xff] %v9122_v56  ;;  %v1716_v30 = vmul.f32 %v9119_v55, %v9119_v55  ;;  %v1630_v27 = vadd.f32 %v1629_v52, %v9122_v56  ;;  %v1718_v20 = vmul.f32 %v9122_v56, %v9122_v56  ;;  %v1760_v44 = vadd.f32 %v1759_v17, %v1713_v32 }
 0x32b   :  { %v1802_v47 = vadd.f32 %v1801_v24, %v1715_v23  ;;  %v9137_v6 = vadd.f32 %v1448_v49, %v8807_v62  ;;  %v9140_v2 = vadd.f32 %v1561_v39, %v8810_v26  ;;  %v9143_v19 = vadd.f32 %v1452_v7, %v8801_v60  ;;  %v1454_v23 = vpop.f32.mrf.mxu0  ;;  %v1567_v49 = vpop.f32.mrf.mxu1 }
 0x32c   :  { %v1740_v29 = vadd.f32 %v1739_v5, %v1716_v30  ;;  %v1782_v63 = vadd.f32 %v1781_v58, %v1718_v20  ;;  %v9146_v52 = vadd.f32 %v1565_v50, %v8804_v59  ;;  %v9161_v20 = vadd.f32 %v1454_v23, %v8807_v62 }
 0x32d   :  { %14611 = vst [vmem:[#allocation53_spill] sm:$0xff] %v9137_v6  ;;  %14612 = vst [vmem:[#allocation54_spill] sm:$0xff] %v9140_v2  ;;  %v1609_v56 = vadd.f32 %v1608_v25, %v9137_v6  ;;  %v1717_v17 = vmul.f32 %v9137_v6, %v9137_v6  ;;  %v1651_v24 = vadd.f32 %v1650_v57, %v9140_v2  ;;  %v1456_v7 = vpop.f32.mrf.mxu0 }
 0x32e   :  { %14613 = vst [vmem:[#allocation55_spill] sm:$0xff] %v9143_v19  ;;  %14614 = vst [vmem:[#allocation56_spill] sm:$0xff] %v9146_v52  ;;  %v1719_v32 = vmul.f32 %v9140_v2, %v9140_v2  ;;  %v1589_v5 = vadd.f32 %v1588_v48, %v9143_v19  ;;  %v1720_v58 = vmul.f32 %v9143_v19, %v9143_v19  ;;  %v1569_v2 = vpop.f32.mrf.mxu1 }
 0x32f   :  { %v1631_v50 = vadd.f32 %v1630_v27, %v9146_v52  ;;  %v1722_v25 = vmul.f32 %v9146_v52, %v9146_v52  ;;  %v1761_v39 = vadd.f32 %v1760_v44, %v1717_v17  ;;  %14615 = vst [vmem:[#allocation57_spill] sm:$0xff] %v9161_v20  ;;  %v9164_v57 = vadd.f32 %v1567_v49, %v8810_v26 }
 0x330   :  { %v1803_v30 = vadd.f32 %v1802_v47, %v1719_v32  ;;  %v1741_v6 = vadd.f32 %v1740_v29, %v1720_v58  ;;  %v9167_v55 = vadd.f32 %v1456_v7, %v8801_v60  ;;  %v9170_v27 = vadd.f32 %v1569_v2, %v8804_v59  ;;  %v1458_v32 = vpop.f32.mrf.mxu0  ;;  %v1571_v23 = vpop.f32.mrf.mxu1 }
 0x331   :  { %14616 = vst [vmem:[#allocation58_spill] sm:$0xff] %v9164_v57  ;;  %v1783_v48 = vadd.f32 %v1782_v63, %v1722_v25  ;;  %v1610_v52 = vadd.f32 %v1609_v56, %v9161_v20  ;;  %v1721_v44 = vmul.f32 %v9161_v20, %v9161_v20  ;;  %v1652_v47 = vadd.f32 %v1651_v24, %v9164_v57 }
 0x332   :  { %14617 = vst [vmem:[#allocation59_spill] sm:$0xff] %v9167_v55  ;;  %14618 = vst [vmem:[#allocation60_spill] sm:$0xff] %v9170_v27  ;;  %v1723_v17 = vmul.f32 %v9164_v57, %v9164_v57  ;;  %v1590_v29 = vadd.f32 %v1589_v5, %v9167_v55  ;;  %v1724_v60 = vmul.f32 %v9167_v55, %v9167_v55 }
 0x333   :  { %v1632_v59 = vadd.f32 %v1631_v50, %v9170_v27  ;;  %v1726_v56 = vmul.f32 %v9170_v27, %v9170_v27  ;;  %v1762_v2 = vadd.f32 %v1761_v39, %v1721_v44  ;;  %v9185_v49 = vadd.f32 %v1458_v32, %v8807_v62 }
 0x334   :  { %v1804_v63 = vadd.f32 %v1803_v30, %v1723_v17  ;;  %v9188_v24 = vadd.f32 %v1571_v23, %v8810_v26  ;;  %v1591_v58 = vrot.slane %v1590_v29, 4  ;;  %v1742_v25 = vadd.f32 %v1741_v6, %v1724_v60 }
 0x335   :  { %14619 = vst [vmem:[#allocation61_spill] sm:$0xff] %v9185_v49  ;;  %v1633_v7 = vrot.slane %v1632_v59, 4  ;;  %v1784_v5 = vadd.f32 %v1783_v48, %v1726_v56  ;;  %v1611_v57 = vadd.f32 %v1610_v52, %v9185_v49  ;;  %v1725_v50 = vmul.f32 %v9185_v49, %v9185_v49 }
 0x336   :  { %14620 = vst [vmem:[#allocation62_spill] sm:$0xff] %v9188_v24  ;;  %v1653_v55 = vadd.f32 %v1652_v47, %v9188_v24  ;;  %v1727_v39 = vmul.f32 %v9188_v24, %v9188_v24  ;;  %v1592_v30 = vadd.f32 %v1591_v58, %v1590_v29  ;;  %v1743_v62 = vrot.slane %v1742_v25, 4 }
 0x337   :  { %v1634_v44 = vadd.f32 %v1633_v7, %v1632_v59  ;;  %v1785_v17 = vrot.slane %v1784_v5, 4  ;;  %v1612_v26 = vrot.slane %v1611_v57, 4  ;;  %v1763_v32 = vadd.f32 %v1762_v2, %v1725_v50 }
 0x338   :  { %v1654_v23 = vrot.slane %v1653_v55, 4  ;;  %v1805_v6 = vadd.f32 %v1804_v63, %v1727_v39  ;;  %v1593_v48 = vrot.slane %v1592_v30, 2  ;;  %v1744_v52 = vadd.f32 %v1743_v62, %v1742_v25 }
 0x339   :  { %v1635_v60 = vrot.slane %v1634_v44, 2  ;;  %v1786_v56 = vadd.f32 %v1785_v17, %v1784_v5  ;;  %v1613_v47 = vadd.f32 %v1612_v26, %v1611_v57  ;;  %v1764_v27 = vrot.slane %v1763_v32, 4 }
 0x33a   :  { %v1655_v24 = vadd.f32 %v1654_v23, %v1653_v55  ;;  %v1806_v29 = vrot.slane %v1805_v6, 4 }
 0x33b   :  { %8217 = shalt.err (!%p8214_p9)  }
 0x33c   :  { %50 = dma.hbm_to_vmem [thread:$0]  %s14271_s4, 32768, %s48_s28, [#allocation4]  ;;  %v1594_v59 = vadd.f32 %v1593_v48, %v1592_v30  ;;  %v1745_v2 = vrot.slane %v1744_v52, 2  ;;  %v1636_v63 = vadd.f32 %v1635_v60, %v1634_v44  ;;  %v1787_v58 = vrot.slane %v1786_v56, 2 }
 0x33d   :  { %v1614_v57 = vrot.slane %v1613_v47, 2  ;;  %v1765_v25 = vadd.f32 %v1764_v27, %v1763_v32  ;;  %v1656_v55 = vrot.slane %v1655_v24, 2  ;;  %v1807_v7 = vadd.f32 %v1806_v29, %v1805_v6  ;;  %s8226_s11 = scalar_lea.vmem %s60_s29, 8192  ;;  %p8231_p11 = scmp.lt.s32.totalorder %s60_s29, %s60_s29 }
 0x33e   :  { %p8227_p10 = scmp.ne.s32.totalorder %s60_s29, %s8226_s11  ;;  %p8232_p12 = scmp.lt.s32.totalorder %s8226_s11, %s8226_s11 }
 0x340   :  { %p8233_p13 = por %p8232_p12, %p8231_p11 }
 0x342   :  { %p8234_p0 = pnand %p8233_p13, %p8227_p10 }
 0x344   :  { %8237 = shalt.err (!%p8234_p0)  }
 0x345   :  { %62 = dma.hbm_to_vmem [thread:$0]  %s14272_s5, 8192, %s60_s29, [#allocation4 + $0x1]  ;;  %v1595_v5 = vrot.slane %v1594_v59, 1  ;;  %v1746_v50 = vadd.f32 %v1745_v2, %v1744_v52  ;;  %v1637_v39 = vrot.slane %v1636_v63, 1  ;;  %v1788_v30 = vadd.f32 %v1787_v58, %v1786_v56 }
 0x346   :  { %v1615_v62 = vadd.f32 %v1614_v57, %v1613_v47  ;;  %v1766_v44 = vrot.slane %v1765_v25, 2  ;;  %v1657_v27 = vadd.f32 %v1656_v55, %v1655_v24  ;;  %v1808_v17 = vrot.slane %v1807_v7, 2 }
 0x347   :  { %v1596_v26 = vadd.f32 %v1595_v5, %v1594_v59  ;;  %v1747_v32 = vrot.slane %v1746_v50, 1  ;;  %v1638_v23 = vadd.f32 %v1637_v39, %v1636_v63  ;;  %v1789_v6 = vrot.slane %v1788_v30, 1 }
 0x348   :  { %v1616_v48 = vrot.slane %v1615_v62, 1  ;;  %v1767_v60 = vadd.f32 %v1766_v44, %v1765_v25  ;;  %v1658_v29 = vrot.slane %v1657_v27, 1  ;;  %v1809_v49 = vadd.f32 %v1808_v17, %v1807_v7 }
 0x349   :  { %v1660_v20 = vmul.f32 0.0078125, %v1596_v26  ;;  %v1748_v19 = vadd.f32 %v1747_v32, %v1746_v50  ;;  %v1662_v22 = vmul.f32 0.0078125, %v1638_v23  ;;  %v1790_v54 = vadd.f32 %v1789_v6, %v1788_v30 }
 0x34a   :  { %v1617_v10 = vadd.f32 %v1616_v48, %v1615_v62  ;;  %v1768_v52 = vrot.slane %v1767_v60, 1  ;;  %v1659_v2 = vadd.f32 %v1658_v29, %v1657_v27  ;;  %v1810_v56 = vrot.slane %v1809_v49, 1 }
 0x34b   :  { %v1812_v47 = vmul.f32 0.0078125, %v1748_v19  ;;  %v1816_v58 = vmul.f32 %v1660_v20, %v1660_v20  ;;  %v1814_v24 = vmul.f32 0.0078125, %v1790_v54  ;;  %v1818_v57 = vmul.f32 %v1662_v22, %v1662_v22 }
 0x34c   :  { %v1661_v59 = vmul.f32 0.0078125, %v1617_v10  ;;  %v1769_v55 = vadd.f32 %v1768_v52, %v1767_v60  ;;  %v1663_v63 = vmul.f32 0.0078125, %v1659_v2  ;;  %v1811_v5 = vadd.f32 %v1810_v56, %v1809_v49  ;;  %v1574_v2 = vld [vmem:[%s14273_s6 + $0xc] sm:$0xf] }
 0x34d   :  { %v1820_v39 = vsub.f32 %v1812_v47, %v1816_v58  ;;  %v1822_v25 = vsub.f32 %v1814_v24, %v1818_v57 }
 0x34e   :  { %v1813_v44 = vmul.f32 0.0078125, %v1769_v55  ;;  %v1817_v7 = vmul.f32 %v1661_v59, %v1661_v59  ;;  %v1815_v17 = vmul.f32 0.0078125, %v1811_v5  ;;  %v1819_v50 = vmul.f32 %v1663_v63, %v1663_v63 }
 0x34f   :  { %v1824_v26 = vadd.f32 0.8, %v1820_v39  ;;  %v1826_v30 = vadd.f32 0.8, %v1822_v25 }
 0x350   :  { %v1821_v62 = vsub.f32 %v1813_v44, %v1817_v7  ;;  %v1823_v32 = vsub.f32 %v1815_v17, %v1819_v50 }
 0x351   :  { %8057 = vrsqrt.f32 %v1824_v26 }
 0x352   :  { %v1825_v27 = vadd.f32 0.8, %v1821_v62  ;;  %v1827_v19 = vadd.f32 0.8, %v1823_v32  ;;  %8059 = vrsqrt.f32 %v1826_v30 }
 0x354   :  { %8061 = vrsqrt.f32 %v1825_v27 }
 0x355   :  { %8063 = vrsqrt.f32 %v1827_v19  ;;  %v14621_v19 = vld [vmem:[#allocation25_spill] sm:$0xff] }
 0x35e   :  { %v8058_v10 = vpop.eup %8057 }
 0x35f   :  { %v8060_v54 = vpop.eup %8059 }
 0x361   :  { %v8062_v23 = vpop.eup %8061 }
 0x362   :  { %v8064_v49 = vpop.eup %8063  ;;  %v1836_v6 = vcombine.low %v8058_v10, %v8062_v23  ;;  %v14622_v10 = vld [vmem:[#allocation26_spill] sm:$0xff]  ;;  %v14623_v23 = vld [vmem:[#allocation27_spill] sm:$0xff] }
 0x363   :  { %v1837_v48 = vcombine.low %v8060_v54, %v8064_v49  ;;  %v14624_v49 = vld [vmem:[#allocation29_spill] sm:$0xff] }
 0x364   :  { %v1844_v60 = vrot.slane %v1836_v6, %v8659_v35  ;;  %v14625_v6 = vld [vmem:[#allocation28_spill] sm:$0xff] }
 0x365   :  { %v1851_v29 = vrot.slane %v1837_v48, %v8659_v35  ;;  %v14626_v48 = vld [vmem:[#allocation30_spill] sm:$0xff] }
 0x367   :  { %v1852_v52 = vcombine.low %v1844_v60, %v1851_v29  ;;  %v14627_v29 = vld [vmem:[#allocation31_spill] sm:$0xff] }
 0x369   :  { %v1859_v56 = vrot.slane %v1852_v52, %v8659_v35 }
 0x36b   :  { %v1861_v47 = vmul.f32 %v1859_v56, %v1574_v2  ;;  %v14628_v2 = vld [vmem:[#allocation33_spill] sm:$0xff] }
 0x36d   :  { %v9209_v58 = vrot.slane %v1861_v47, %v8452_v51  ;;  %v9212_v24 = vrot.slane %v1861_v47, %v8458_v53  ;;  %v9215_v57 = vrot.slane %v1861_v47, %v8792_v21  ;;  %v9218_v55 = vrot.slane %v1861_v47, %v8798_v8  ;;  %v14629_v47 = vld [vmem:[#allocation32_spill] sm:$0xff] }
 0x36f   :  { %v1883_v5 = vmul.f32 %v9209_v58, %v1660_v20  ;;  %v1884_v39 = vmul.f32 %v9212_v24, %v1661_v59  ;;  %v1885_v25 = vmul.f32 %v9215_v57, %v1662_v22  ;;  %v1886_v44 = vmul.f32 %v9218_v55, %v1663_v63 }
 0x370   :  { %v9228_v62 = vmul.f32 %v9209_v58, %v8813_v36  ;;  %v9232_v20 = vmul.f32 %v9212_v24, %v8819_v31  ;;  %v9236_v22 = vmul.f32 %v9215_v57, %v8816_v15  ;;  %v9240_v59 = vmul.f32 %v9218_v55, %v8822_v1 }
 0x371   :  { %v1891_v7 = vcombine.low %v1883_v5, %v1884_v39  ;;  %v1892_v17 = vcombine.low %v1885_v25, %v1886_v44  ;;  %v9244_v63 = vmul.f32 %v9209_v58, %v8825_v37  ;;  %v9248_v36 = vmul.f32 %v9212_v24, %v8847_v18  ;;  %v14630_v39 = vld [vmem:[#allocation34_spill] sm:$0xff]  ;;  %v14631_v44 = vld [vmem:[#allocation35_spill] sm:$0xff] }
 0x372   :  { %v9252_v31 = vmul.f32 %v9215_v57, %v8828_v4  ;;  %v9256_v15 = vmul.f32 %v9218_v55, %v8850_v45  ;;  %v9260_v1 = vmul.f32 %v9209_v58, %v8853_v42  ;;  %v9264_v37 = vmul.f32 %v9212_v24, %v8873_v9 }
 0x373   :  { %v1899_v50 = vrot.slane %v1891_v7, %v8659_v35  ;;  %v1906_v26 = vrot.slane %v1892_v17, %v8659_v35  ;;  %v9268_v18 = vmul.f32 %v9215_v57, %v8856_v43  ;;  %v9272_v4 = vmul.f32 %v9218_v55, %v8876_v12  ;;  %v1575_v12 = vld [vmem:[%s14273_s6 + $0x10] sm:$0xf] }
 0x374   :  { %v9276_v45 = vmul.f32 %v9209_v58, %v8879_v61  ;;  %v9281_v42 = vmul.f32 %v9212_v24, %v8897_v28  ;;  %v9285_v9 = vmul.f32 %v9215_v57, %v8882_v16  ;;  %v9289_v43 = vmul.f32 %v9218_v55, %v8900_v40  ;;  %v14632_v17 = vld [vmem:[#allocation37_spill] sm:$0xff] }
 0x375   :  { %v1907_v30 = vcombine.low %v1899_v50, %v1906_v26  ;;  %v9296_v61 = vmul.f32 %v9209_v58, %v8903_v14  ;;  %v9300_v28 = vmul.f32 %v9212_v24, %v8921_v0  ;;  %v9304_v16 = vmul.f32 %v9215_v57, %v8906_v34  ;;  %v14633_v26 = vld [vmem:[#allocation36_spill] sm:$0xff] }
 0x376   :  { %v9308_v40 = vmul.f32 %v9218_v55, %v8924_v13  ;;  %v9312_v27 = vmul.f32 %v9209_v58, %v8927_v46  ;;  %v9316_v14 = vmul.f32 %v9212_v24, %v8945_v33  ;;  %v9320_v0 = vmul.f32 %v9215_v57, %v8930_v3 }
 0x377   :  { %v1914_v32 = vrot.slane %v1907_v30, %v8659_v35  ;;  %v9324_v34 = vmul.f32 %v9218_v55, %v8948_v11  ;;  %v9328_v13 = vmul.f32 %v9209_v58, %v8951_v41  ;;  %v9332_v46 = vmul.f32 %v9212_v24, %v8969_v38  ;;  %v14649_v35 = vld [vmem:[#allocation49_spill] sm:$0xff] }
 0x378   :  { %v9336_v33 = vmul.f32 %v9215_v57, %v14621_v19  ;;  %v9340_v3 = vmul.f32 %v9218_v55, %v14622_v10  ;;  %v9344_v11 = vmul.f32 %v9209_v58, %v14623_v23  ;;  %v9348_v41 = vmul.f32 %v9212_v24, %v14624_v49  ;;  %v14635_v19 = vld [vmem:[#allocation39_spill] sm:$0xff]  ;;  %v14636_v23 = vld [vmem:[#allocation41_spill] sm:$0xff] }
 0x379   :  { %v1916_v54 = vsub.f32 %v1575_v12, %v1914_v32  ;;  %v9352_v38 = vmul.f32 %v9215_v57, %v14625_v6  ;;  %v9356_v60 = vmul.f32 %v9218_v55, %v14626_v48  ;;  %v9360_v52 = vmul.f32 %v9209_v58, %v14627_v29  ;;  %v14634_v32 = vld [vmem:[#allocation38_spill] sm:$0xff]  ;;  %v14637_v6 = vld [vmem:[#allocation40_spill] sm:$0xff] }
 0x37a   :  { %v9364_v56 = vmul.f32 %v9212_v24, %v14628_v2  ;;  %v9368_v5 = vmul.f32 %v9215_v57, %v14629_v47  ;;  %v9372_v25 = vmul.f32 %v9218_v55, %v14630_v39  ;;  %v9376_v7 = vmul.f32 %v9209_v58, %v14631_v44  ;;  %v14638_v29 = vld [vmem:[#allocation42_spill] sm:$0xff]  ;;  %v14639_v47 = vld [vmem:[#allocation43_spill] sm:$0xff]  ;;  %v14641_v44 = vld [vmem:[#allocation45_spill] sm:$0xff] }
 0x37b   :  { %v9380_v50 = vmul.f32 %v9212_v24, %v14632_v17  ;;  %v9384_v30 = vmul.f32 %v9215_v57, %v14633_v26  ;;  %v9388_v12 = vmul.f32 %v9218_v55, %v14634_v32  ;;  %v9392_v10 = vmul.f32 %v9209_v58, %v14635_v19  ;;  %v14643_v26 = vld [vmem:[#allocation44_spill] sm:$0xff]  ;;  %v14645_v19 = vld [vmem:[#allocation46_spill] sm:$0xff] }
 0x37c   :  { %v9396_v49 = vmul.f32 %v9212_v24, %v14636_v23  ;;  %v9400_v48 = vmul.f32 %v9215_v57, %v14637_v6  ;;  %v9404_v2 = vmul.f32 %v9218_v55, %v14638_v29  ;;  %v9408_v39 = vmul.f32 %v9209_v58, %v14639_v47  ;;  %v14647_v6 = vld [vmem:[#allocation47_spill] sm:$0xff] }
 0x37d   :  { %v9412_v17 = vmul.f32 %v9212_v24, %v14641_v44  ;;  %v9416_v32 = vmul.f32 %v9215_v57, %v14643_v26  ;;  %v9420_v23 = vmul.f32 %v9218_v55, %v14645_v19  ;;  %v9424_v29 = vmul.f32 %v9209_v58, %v14647_v6 }
 0x37e   :  { %14640 = vst [vmem:[#allocation25_spill] sm:$0xff] %v9408_v39  ;;  %v9428_v47 = vmul.f32 %v9212_v24, %v14649_v35  ;;  %v14651_v39 = vld [vmem:[#allocation48_spill] sm:$0xff] }
 0x37f   :  { %14642 = vst [vmem:[#allocation26_spill] sm:$0xff] %v9412_v17  ;;  %14644 = vst [vmem:[#allocation27_spill] sm:$0xff] %v9416_v32  ;;  %v9432_v44 = vmul.f32 %v9215_v57, %v14651_v39  ;;  %v14652_v17 = vld [vmem:[#allocation50_spill] sm:$0xff]  ;;  %v14654_v32 = vld [vmem:[#allocation51_spill] sm:$0xff]  ;;  %v9454_v39 = vrot.slane %v1916_v54, %v8458_v53 }
 0x380   :  { %14646 = vst [vmem:[#allocation29_spill] sm:$0xff] %v9420_v23  ;;  %14648 = vst [vmem:[#allocation28_spill] sm:$0xff] %v9424_v29  ;;  %v9436_v26 = vmul.f32 %v9218_v55, %v14652_v17  ;;  %v9440_v19 = vmul.f32 %v9209_v58, %v14654_v32  ;;  %v14656_v23 = vld [vmem:[#allocation53_spill] sm:$0xff]  ;;  %v9447_v29 = vrot.slane %v1916_v54, %v8452_v51  ;;  %v14658_v35 = vld [vmem:[#allocation52_spill] sm:$0xff] }
 0x381   :  { %14650 = vst [vmem:[#allocation30_spill] sm:$0xff] %v9428_v47  ;;  %v9444_v6 = vmul.f32 %v9212_v24, %v14656_v23  ;;  %v9451_v47 = vmul.f32 %v9215_v57, %v14658_v35  ;;  %v9457_v17 = vrot.slane %v1916_v54, %v8792_v21  ;;  %v9460_v32 = vrot.slane %v1916_v54, %v8798_v8  ;;  %v14666_v53 = vld [vmem:[#allocation56_spill] sm:$0xff]  ;;  %v14667_v21 = vld [vmem:[#allocation58_spill] sm:$0xff]  ;;  %v14668_v8 = vld [vmem:[#allocation59_spill] sm:$0xff] }
 0x382   :  { %14653 = vst [vmem:[#allocation31_spill] sm:$0xff] %v9436_v26  ;;  %14655 = vst [vmem:[#allocation33_spill] sm:$0xff] %v9440_v19  ;;  %v14660_v19 = vld [vmem:[#allocation54_spill] sm:$0xff]  ;;  %v14664_v26 = vld [vmem:[#allocation57_spill] sm:$0xff]  ;;  %v9480_v54 = vmul.f32 %v9218_v55, %v14667_v21  ;;  %v9500_v21 = vadd.f32 %v9447_v29, %v9228_v62  ;;  %v9528_v62 = vadd.f32 %v9454_v39, %v9248_v36 }
 0x383   :  { %14657 = vst [vmem:[#allocation32_spill] sm:$0xff] %v9444_v6  ;;  %14659 = vst [vmem:[#allocation34_spill] sm:$0xff] %v9451_v47  ;;  %v9464_v23 = vmul.f32 %v9218_v55, %v14660_v19  ;;  %v14662_v6 = vld [vmem:[#allocation55_spill] sm:$0xff]  ;;  %v9472_v35 = vmul.f32 %v9212_v24, %v14664_v26  ;;  %v9476_v47 = vmul.f32 %v9215_v57, %v14666_v53 }
 0x384   :  { %v9468_v51 = vmul.f32 %v9209_v58, %v14662_v6  ;;  %v9484_v19 = vmul.f32 %v9209_v58, %v14668_v8  ;;  %v9504_v8 = vadd.f32 %v9447_v29, %v9244_v63  ;;  %v9508_v58 = vadd.f32 %v9447_v29, %v9260_v1 }
 0x385   :  { %14661 = vst [vmem:[#allocation35_spill] sm:$0xff] %v9464_v23  ;;  %14665 = vst [vmem:[#allocation36_spill] sm:$0xff] %v9472_v35  ;;  %v14669_v23 = vld [vmem:[#allocation61_spill] sm:$0xff]  ;;  %v14671_v35 = vld [vmem:[#allocation62_spill] sm:$0xff]  ;;  %v9544_v63 = vadd.f32 %v9457_v17, %v9268_v18  ;;  %v9548_v36 = vadd.f32 %v9460_v32, %v9272_v4  ;;  %v9560_v1 = vadd.f32 %v9460_v32, %v9289_v43  ;;  %vm2066_vm1 = vcmp.gt.f32.partialorder %v9500_v21, 0.0 }
 0x386   :  { %14663 = vst [vmem:[#allocation37_spill] sm:$0xff] %v9468_v51  ;;  %v9488_v6 = vmul.f32 %v9212_v24, %v14669_v23  ;;  %v14670_v51 = vld [vmem:[#allocation60_spill] sm:$0xff]  ;;  %v9496_v53 = vmul.f32 %v9218_v55, %v14671_v35  ;;  %v9516_v24 = vadd.f32 %v9457_v17, %v9236_v22  ;;  %v9524_v55 = vadd.f32 %v9447_v29, %v9276_v45  ;;  %v14679_v23 = vld [vmem:[#allocation27_spill] sm:$0xff] }
 0x387   :  { %v9492_v26 = vmul.f32 %v9215_v57, %v14670_v51  ;;  %v9512_v51 = vadd.f32 %v9454_v39, %v9232_v20  ;;  %v9520_v57 = vadd.f32 %v9460_v32, %v9240_v59  ;;  %v9532_v20 = vadd.f32 %v9457_v17, %v9252_v31  ;;  %v14681_v35 = vld [vmem:[#allocation29_spill] sm:$0xff] }
 0x388   :  { %v9536_v22 = vadd.f32 %v9460_v32, %v9256_v15  ;;  %v9540_v59 = vadd.f32 %v9454_v39, %v9264_v37  ;;  %v9552_v31 = vadd.f32 %v9454_v39, %v9281_v42  ;;  %v9556_v15 = vadd.f32 %v9457_v17, %v9285_v9 }
 0x389   :  { %v9564_v37 = vadd.f32 %v9447_v29, %v9296_v61  ;;  %v9568_v18 = vadd.f32 %v9454_v39, %v9300_v28  ;;  %v9572_v4 = vadd.f32 %v9457_v17, %v9304_v16  ;;  %v9576_v45 = vadd.f32 %v9460_v32, %v9308_v40 }
 0x38a   :  { %v9580_v42 = vadd.f32 %v9447_v29, %v9312_v27  ;;  %v9584_v9 = vadd.f32 %v9454_v39, %v9316_v14  ;;  %v9588_v43 = vadd.f32 %v9457_v17, %v9320_v0  ;;  %v9592_v61 = vadd.f32 %v9460_v32, %v9324_v34 }
 0x38b   :  { %v9596_v28 = vadd.f32 %v9447_v29, %v9328_v13  ;;  %v9600_v16 = vadd.f32 %v9454_v39, %v9332_v46  ;;  %v9604_v40 = vadd.f32 %v9457_v17, %v9336_v33  ;;  %v9608_v27 = vadd.f32 %v9460_v32, %v9340_v3 }
 0x38c   :  { %v9612_v14 = vadd.f32 %v9447_v29, %v9344_v11  ;;  %v9616_v0 = vadd.f32 %v9454_v39, %v9348_v41  ;;  %v9620_v34 = vadd.f32 %v9457_v17, %v9352_v38  ;;  %v9624_v13 = vadd.f32 %v9460_v32, %v9356_v60 }
 0x38d   :  { %v9628_v46 = vadd.f32 %v9447_v29, %v9360_v52  ;;  %v9632_v33 = vadd.f32 %v9454_v39, %v9364_v56  ;;  %v9636_v3 = vadd.f32 %v9457_v17, %v9368_v5  ;;  %v9640_v11 = vadd.f32 %v9460_v32, %v9372_v25 }
 0x38e   :  { %v9644_v41 = vadd.f32 %v9447_v29, %v9376_v7  ;;  %v9648_v38 = vadd.f32 %v9454_v39, %v9380_v50  ;;  %v9652_v60 = vadd.f32 %v9457_v17, %v9384_v30  ;;  %v9656_v52 = vadd.f32 %v9460_v32, %v9388_v12  ;;  %v14676_v50 = vld [vmem:[#allocation25_spill] sm:$0xff]  ;;  %v14677_v12 = vld [vmem:[#allocation26_spill] sm:$0xff] }
 0x38f   :  { %v9660_v56 = vadd.f32 %v9447_v29, %v9392_v10  ;;  %v9664_v5 = vadd.f32 %v9454_v39, %v9396_v49  ;;  %v9668_v25 = vadd.f32 %v9457_v17, %v9400_v48  ;;  %v9672_v7 = vadd.f32 %v9460_v32, %v9404_v2 }
 0x390   :  { %14672 = vst [vmem:[#allocation38_spill] sm:$0xff] %v9648_v38  ;;  %v9676_v30 = vadd.f32 %v9447_v29, %v14676_v50  ;;  %v9680_v10 = vadd.f32 %v9454_v39, %v14677_v12  ;;  %v9684_v49 = vadd.f32 %v9457_v17, %v14679_v23  ;;  %v9688_v48 = vadd.f32 %v9460_v32, %v14681_v35 }
 0x391   :  { %14673 = vst [vmem:[#allocation39_spill] sm:$0xff] %v9664_v5  ;;  %14674 = vst [vmem:[#allocation41_spill] sm:$0xff] %v9668_v25  ;;  %v14683_v25 = vld [vmem:[#allocation28_spill] sm:$0xff]  ;;  %v9700_v12 = vadd.f32 %v9457_v17, %v9432_v44  ;;  %vm2067_vm2 = vcmp.gt.f32.partialorder %v9512_v51, 0.0  ;;  %vm2068_vm3 = vcmp.gt.f32.partialorder %v9516_v24, 0.0  ;;  %vm2069_vm4 = vcmp.gt.f32.partialorder %v9520_v57, 0.0 }
 0x392   :  { %14675 = vst [vmem:[#allocation40_spill] sm:$0xff] %v9672_v7  ;;  %14678 = vst [vmem:[#allocation42_spill] sm:$0xff] %v9680_v10  ;;  %v9692_v2 = vadd.f32 %v9447_v29, %v14683_v25  ;;  %v14685_v7 = vld [vmem:[#allocation30_spill] sm:$0xff]  ;;  %v14688_v10 = vld [vmem:[#allocation31_spill] sm:$0xff]  ;;  %vm2070_vm5 = vcmp.gt.f32.partialorder %v9504_v8, 0.0  ;;  %vm2071_vm6 = vcmp.gt.f32.partialorder %v9528_v62, 0.0 }
 0x393   :  { %14680 = vst [vmem:[#allocation43_spill] sm:$0xff] %v9684_v49  ;;  %14682 = vst [vmem:[#allocation45_spill] sm:$0xff] %v9688_v48  ;;  %v9696_v50 = vadd.f32 %v9454_v39, %v14685_v7  ;;  %v9704_v23 = vadd.f32 %v9460_v32, %v14688_v10  ;;  %v14690_v49 = vld [vmem:[#allocation33_spill] sm:$0xff]  ;;  %v14692_v48 = vld [vmem:[#allocation32_spill] sm:$0xff]  ;;  %vm2072_vm7 = vcmp.gt.f32.partialorder %v9532_v20, 0.0  ;;  %vm2073_vm8 = vcmp.gt.f32.partialorder %v9536_v22, 0.0 }
 0x394   :  { %14684 = vst [vmem:[#allocation44_spill] sm:$0xff] %v9692_v2  ;;  %14687 = vst [vmem:[#allocation47_spill] sm:$0xff] %v9700_v12  ;;  %v9708_v35 = vadd.f32 %v9447_v29, %v14690_v49  ;;  %v9712_v25 = vadd.f32 %v9454_v39, %v14692_v48  ;;  %v14694_v2 = vld [vmem:[#allocation34_spill] sm:$0xff]  ;;  %v14698_v12 = vld [vmem:[#allocation37_spill] sm:$0xff]  ;;  %v9732_v48 = vadd.f32 %v9457_v17, %v9476_v47  ;;  %vm2074_vm9 = vcmp.gt.f32.partialorder %v9508_v58, 0.0 }
 0x395   :  { %14686 = vst [vmem:[#allocation46_spill] sm:$0xff] %v9696_v50  ;;  %14689 = vst [vmem:[#allocation49_spill] sm:$0xff] %v9704_v23  ;;  %v9716_v7 = vadd.f32 %v9457_v17, %v14694_v2  ;;  %v14696_v50 = vld [vmem:[#allocation35_spill] sm:$0xff]  ;;  %v9724_v10 = vadd.f32 %v9447_v29, %v14698_v12  ;;  %v14700_v23 = vld [vmem:[#allocation36_spill] sm:$0xff]  ;;  %v9736_v2 = vadd.f32 %v9460_v32, %v9480_v54  ;;  %vm2075_vm10 = vcmp.gt.f32.partialorder %v9540_v59, 0.0 }
 0x396   :  { %14691 = vst [vmem:[#allocation48_spill] sm:$0xff] %v9708_v35  ;;  %14693 = vst [vmem:[#allocation50_spill] sm:$0xff] %v9712_v25  ;;  %v9720_v44 = vadd.f32 %v9460_v32, %v14696_v50  ;;  %v9728_v49 = vadd.f32 %v9454_v39, %v14700_v23  ;;  %v9740_v50 = vadd.f32 %v9447_v29, %v9484_v19  ;;  %v2130_v47 = vmul.f32 0.2, %v9500_v21 }
 0x397   :  { %14695 = vst [vmem:[#allocation51_spill] sm:$0xff] %v9716_v7  ;;  %14699 = vst [vmem:[#allocation52_spill] sm:$0xff] %v9724_v10  ;;  %v9744_v12 = vadd.f32 %v9454_v39, %v9488_v6  ;;  %v9757_v29 = vadd.f32 %v9457_v17, %v9492_v26  ;;  %v2131_v39 = vmul.f32 0.2, %v9512_v51  ;;  %v2132_v54 = vmul.f32 0.2, %v9516_v24 }
 0x398   :  { %14697 = vst [vmem:[#allocation53_spill] sm:$0xff] %v9720_v44  ;;  %14701 = vst [vmem:[#allocation54_spill] sm:$0xff] %v9728_v49  ;;  %v9765_v19 = vadd.f32 %v9460_v32, %v9496_v53  ;;  %vm2076_vm11 = vcmp.gt.f32.partialorder %v9544_v63, 0.0  ;;  %v2133_v6 = vmul.f32 0.2, %v9520_v57  ;;  %vm2077_vm12 = vcmp.gt.f32.partialorder %v9548_v36, 0.0 }
 0x399   :  { %14702 = vst [vmem:[#allocation55_spill] sm:$0xff] %v9732_v48  ;;  %14703 = vst [vmem:[#allocation57_spill] sm:$0xff] %v9736_v2  ;;  %v2134_v23 = vmul.f32 0.2, %v9504_v8  ;;  %v2135_v17 = vmul.f32 0.2, %v9528_v62  ;;  %v9778_v32 = vsel %vm2066_vm1, %v9500_v21, %v2130_v47  ;;  %v9789_v2 = vsel %vm2067_vm2, %v9512_v51, %v2131_v39 }
 0x39a   :  { %14704 = vst [vmem:[#allocation56_spill] sm:$0xff] %v9740_v50  ;;  %14705 = vst [vmem:[#allocation58_spill] sm:$0xff] %v9744_v12  ;;  %v2136_v26 = vmul.f32 0.2, %v9532_v20  ;;  %v2138_v12 = vmul.f32 0.2, %v9508_v58  ;;  %v9819_v49 = vsel %vm2069_vm4, %v9520_v57, %v2133_v6 }
 0x39b   :  { %14706 = vst [vmem:[#allocation59_spill] sm:$0xff] %v9757_v29  ;;  %14707 = vst [vmem:[#allocation61_spill] sm:$0xff] %v9765_v19  ;;  %v2137_v29 = vmul.f32 0.2, %v9536_v22  ;;  %vm2078_vm13 = vcmp.gt.f32.partialorder %v9524_v55, 0.0  ;;  %vm2079_vm14 = vcmp.gt.f32.partialorder %v9552_v31, 0.0 }
 0x39c   :  { %14708 = vst [vmem:[#allocation60_spill] sm:$0xff] %v9778_v32  ;;  %v2139_v53 = vmul.f32 0.2, %v9540_v59  ;;  %v2140_v19 = vmul.f32 0.2, %v9544_v63  ;;  %14709 = vst [vmem:[#allocation62_spill] sm:$0xff] %v9789_v2  ;;  %v9804_v32 = vsel %vm2068_vm3, %v9516_v24, %v2132_v54 }
 0x39d   :  { %v9784_v50 = vmul.f32 0.2, %v9548_v36  ;;  %v9793_v48 = vmul.f32 0.2, %v9524_v55  ;;  %v9796_v21 = vmul.f32 0.2, %v9552_v31 }
 0x39e   :  { %v9799_v47 = vmul.f32 0.2, %v9556_v15  ;;  %14710 = vst [vmem:[#allocation25_spill] sm:$0xff] %v9804_v32  ;;  %vm2080_vm15 = vcmp.gt.f32.partialorder %v9556_v15, 0.0  ;;  %v9808_v51 = vmul.f32 0.2, %v9560_v1 }
 0x39f   :  { %v9811_v39 = vmul.f32 0.2, %v9564_v37  ;;  %v9814_v2 = vmul.f32 0.2, %v9568_v18  ;;  %14712 = vst [vmem:[#allocation27_spill] sm:$0xff] %v9819_v49  ;;  %vm2081_vm0 = vcmp.gt.f32.partialorder %v9560_v1, 0.0 }
 0x3a0   :  { %v9823_v24 = vmul.f32 0.2, %v9572_v4  ;;  %v9826_v54 = vmul.f32 0.2, %v9576_v45  ;;  %v9829_v32 = vmul.f32 0.2, %v9580_v42 }
 0x3a1   :  { %14711 = vst [vmem:[#allocation26_spill] sm:$0xff] %v9814_v2  ;;  %v9834_v2 = vsel %vm2070_vm5, %v9504_v8, %v2134_v23  ;;  %vm2082_vm1 = vcmp.gt.f32.partialorder %v9564_v37, 0.0  ;;  %v9838_v57 = vmul.f32 0.2, %v9584_v9  ;;  %v9841_v6 = vmul.f32 0.2, %v9588_v43 }
 0x3a2   :  { %14713 = vst [vmem:[#allocation29_spill] sm:$0xff] %v9829_v32  ;;  %14714 = vst [vmem:[#allocation28_spill] sm:$0xff] %v9834_v2  ;;  %v9844_v49 = vmul.f32 0.2, %v9592_v61  ;;  %v9849_v32 = vsel %vm2071_vm6, %v9528_v62, %v2135_v17  ;;  %vm2083_vm2 = vcmp.gt.f32.partialorder %v9568_v18, 0.0  ;;  %vm2084_vm3 = vcmp.gt.f32.partialorder %v9572_v4, 0.0 }
 0x3a3   :  { %14716 = vst [vmem:[#allocation31_spill] sm:$0xff] %v9849_v32  ;;  %v9853_v8 = vmul.f32 0.2, %v9596_v28  ;;  %v9856_v23 = vmul.f32 0.2, %v9600_v16  ;;  %vm2085_vm4 = vcmp.gt.f32.partialorder %v9576_v45, 0.0 }
 0x3a4   :  { %14715 = vst [vmem:[#allocation30_spill] sm:$0xff] %v9844_v49  ;;  %v9859_v2 = vmul.f32 0.2, %v9604_v40  ;;  %v9864_v49 = vsel %vm2072_vm7, %v9532_v20, %v2136_v26  ;;  %v9868_v62 = vmul.f32 0.2, %v9608_v27  ;;  %vm2088_vm7 = vcmp.gt.f32.partialorder %v9588_v43, 0.0 }
 0x3a5   :  { %14718 = vst [vmem:[#allocation32_spill] sm:$0xff] %v9864_v49  ;;  %v9871_v17 = vmul.f32 0.2, %v9612_v14  ;;  %v9874_v32 = vmul.f32 0.2, %v9616_v0 }
 0x3a6   :  { %14717 = vst [vmem:[#allocation33_spill] sm:$0xff] %v9859_v2  ;;  %v9879_v2 = vsel %vm2073_vm8, %v9536_v22, %v2137_v29  ;;  %v9885_v20 = vmul.f32 0.2, %v9620_v34  ;;  %v9888_v26 = vmul.f32 0.2, %v9624_v13  ;;  %v9896_v22 = vsel %vm2074_vm9, %v9508_v58, %v2138_v12 }
 0x3a7   :  { %14719 = vst [vmem:[#allocation34_spill] sm:$0xff] %v9879_v2  ;;  %v9891_v49 = vmul.f32 0.2, %v9628_v46  ;;  %14721 = vst [vmem:[#allocation37_spill] sm:$0xff] %v9896_v22  ;;  %v9903_v29 = vmul.f32 0.2, %v9632_v33  ;;  %v9914_v58 = vsel %vm2075_vm10, %v9540_v59, %v2139_v53  ;;  %v9932_v59 = vsel %vm2076_vm11, %v9544_v63, %v2140_v19 }
 0x3a8   :  { %v9906_v2 = vmul.f32 0.2, %v9636_v3  ;;  %14723 = vst [vmem:[#allocation63_spill] sm:$0xff] %v9914_v58  ;;  %vm2092_vm9 = vcmp.gt.f32.partialorder %v9604_v40, 0.0  ;;  %v9921_v12 = vmul.f32 0.2, %v9644_v41  ;;  %v9951_v63 = vsel %vm2077_vm12, %v9548_v36, %v9784_v50 }
 0x3a9   :  { %14720 = vst [vmem:[#allocation35_spill] sm:$0xff] %v9891_v49  ;;  %v9909_v49 = vmul.f32 0.2, %v9640_v11  ;;  %v9924_v22 = vmul.f32 0.2, %v9648_v38  ;;  %14725 = vst [vmem:[#allocation65_spill] sm:$0xff] %v9932_v59  ;;  %v9970_v36 = vsel %vm2078_vm13, %v9524_v55, %v9793_v48  ;;  %v9989_v55 = vsel %vm2079_vm14, %v9552_v31, %v9796_v21 }
 0x3aa   :  { %vm2096_vm10 = vcmp.gt.f32.partialorder %v9620_v34, 0.0  ;;  %v9939_v53 = vmul.f32 0.2, %v9656_v52  ;;  %v9942_v58 = vmul.f32 0.2, %v9660_v56  ;;  %14729 = vst [vmem:[#allocation69_spill] sm:$0xff] %v9951_v63  ;;  %v10008_v31 = vsel %vm2080_vm15, %v9556_v15, %v9799_v47 }
 0x3ab   :  { %14722 = vst [vmem:[#allocation36_spill] sm:$0xff] %v9909_v49  ;;  %v9927_v49 = vmul.f32 0.2, %v9652_v60  ;;  %vm2100_vm11 = vcmp.gt.f32.partialorder %v9636_v3, 0.0  ;;  %v14730_v19 = vld [vmem:[#allocation41_spill] sm:$0xff]  ;;  %14735 = vst [vmem:[#allocation71_spill] sm:$0xff] %v9970_v36  ;;  %v10027_v15 = vsel %vm2081_vm0, %v9560_v1, %v9808_v51  ;;  %v10040_v1 = vsel %vm2082_vm1, %v9564_v37, %v9811_v39 }
 0x3ac   :  { %14726 = vst [vmem:[#allocation66_spill] sm:$0xff] %v9939_v53  ;;  %14727 = vst [vmem:[#allocation67_spill] sm:$0xff] %v9942_v58  ;;  %v9958_v59 = vmul.f32 0.2, %v14730_v19  ;;  %v14732_v58 = vld [vmem:[#allocation40_spill] sm:$0xff]  ;;  %vm2104_vm12 = vcmp.gt.f32.partialorder %v9652_v60, 0.0 }
 0x3ad   :  { %14724 = vst [vmem:[#allocation64_spill] sm:$0xff] %v9927_v49  ;;  %v9945_v49 = vmul.f32 0.2, %v9664_v5  ;;  %v9961_v53 = vmul.f32 0.2, %v14732_v58  ;;  %v14736_v50 = vld [vmem:[#allocation42_spill] sm:$0xff] }
 0x3ae   :  { %14731 = vst [vmem:[#allocation41_spill] sm:$0xff] %v9958_v59  ;;  %v9977_v63 = vmul.f32 0.2, %v14736_v50  ;;  %14742 = vst [vmem:[#allocation72_spill] sm:$0xff] %v9989_v55  ;;  %vm2108_vm13 = vcmp.gt.f32.partialorder %v14730_v19, 0.0  ;;  %v14743_v48 = vld [vmem:[#allocation44_spill] sm:$0xff] }
 0x3af   :  { %14728 = vst [vmem:[#allocation68_spill] sm:$0xff] %v9945_v49  ;;  %14733 = vst [vmem:[#allocation40_spill] sm:$0xff] %v9961_v53  ;;  %v9964_v49 = vmul.f32 0.2, %v9676_v30  ;;  %v14738_v53 = vld [vmem:[#allocation43_spill] sm:$0xff]  ;;  %v14749_v21 = vld [vmem:[#allocation49_spill] sm:$0xff] }
 0x3b0   :  { %14737 = vst [vmem:[#allocation42_spill] sm:$0xff] %v9977_v63  ;;  %v9980_v59 = vmul.f32 0.2, %v14738_v53  ;;  %v9996_v36 = vmul.f32 0.2, %v14743_v48  ;;  %vm2112_vm14 = vcmp.gt.f32.partialorder %v14738_v53, 0.0 }
 0x3b1   :  { %14734 = vst [vmem:[#allocation70_spill] sm:$0xff] %v9964_v49  ;;  %v14740_v49 = vld [vmem:[#allocation45_spill] sm:$0xff]  ;;  %v10015_v55 = vmul.f32 0.2, %v14749_v21  ;;  %14753 = vst [vmem:[#allocation76_spill] sm:$0xff] %v10027_v15  ;;  %vm2120_vm0 = vcmp.gt.f32.partialorder %v9716_v7, 0.0 }
 0x3b2   :  { %14739 = vst [vmem:[#allocation43_spill] sm:$0xff] %v9980_v59  ;;  %v9983_v38 = vmul.f32 0.2, %v14740_v49  ;;  %v14744_v59 = vld [vmem:[#allocation46_spill] sm:$0xff]  ;;  %v2184_v47 = vmul.f32 0.2, %v9716_v7 }
 0x3b3   :  { %v9999_v63 = vmul.f32 0.2, %v14744_v59  ;;  %14750 = vst [vmem:[#allocation73_spill] sm:$0xff] %v10015_v55  ;;  %14754 = vst [vmem:[#allocation77_spill] sm:$0xff] %v10040_v1  ;;  %v14755_v51 = vld [vmem:[#allocation54_spill] sm:$0xff]  ;;  %v14760_v39 = vld [vmem:[#allocation56_spill] sm:$0xff] }
 0x3b4   :  { %14741 = vst [vmem:[#allocation45_spill] sm:$0xff] %v9983_v38  ;;  %v14746_v38 = vld [vmem:[#allocation47_spill] sm:$0xff]  ;;  %v2187_v15 = vmul.f32 0.2, %v14755_v51  ;;  %v14758_v55 = vld [vmem:[#allocation26_spill] sm:$0xff]  ;;  %vm2126_vm5 = vcmp.gt.f32.partialorder %v14760_v39, 0.0 }
 0x3b5   :  { %14745 = vst [vmem:[#allocation44_spill] sm:$0xff] %v9999_v63  ;;  %v10002_v5 = vmul.f32 0.2, %v14746_v38  ;;  %14748 = vst [vmem:[#allocation47_spill] sm:$0xff] %v10008_v31  ;;  %v10018_v63 = vmul.f32 0.2, %v9708_v35  ;;  %v10053_v37 = vsel %vm2083_vm2, %v9568_v18, %v14758_v55  ;;  %v10066_v18 = vsel %vm2084_vm3, %v9572_v4, %v9823_v24 }
 0x3b6   :  { %vm2116_vm15 = vcmp.gt.f32.partialorder %v14746_v38, 0.0  ;;  %v2185_v31 = vmul.f32 0.2, %v9720_v44  ;;  %v14761_v1 = vld [vmem:[#allocation58_spill] sm:$0xff]  ;;  %v2190_v51 = vmul.f32 0.2, %v14760_v39  ;;  %v10075_v39 = vsel %vm2085_vm4, %v9576_v45, %v9826_v54 }
 0x3b7   :  { %14747 = vst [vmem:[#allocation46_spill] sm:$0xff] %v10002_v5  ;;  %14751 = vst [vmem:[#allocation74_spill] sm:$0xff] %v10018_v63  ;;  %v10021_v5 = vmul.f32 0.2, %v9712_v25  ;;  %v14756_v25 = vld [vmem:[#allocation55_spill] sm:$0xff]  ;;  %v14757_v63 = vld [vmem:[#allocation57_spill] sm:$0xff]  ;;  %v10093_v24 = vsel %vm2088_vm7, %v9588_v43, %v9841_v6 }
 0x3b8   :  { %v2188_v35 = vmul.f32 0.2, %v14756_v25  ;;  %v2189_v21 = vmul.f32 0.2, %v14757_v63  ;;  %14759 = vst [vmem:[#allocation55_spill] sm:$0xff] %v10053_v37  ;;  %vm2124_vm1 = vcmp.gt.f32.partialorder %v14756_v25, 0.0 }
 0x3b9   :  { %14752 = vst [vmem:[#allocation75_spill] sm:$0xff] %v10021_v5  ;;  %v2186_v5 = vmul.f32 0.2, %v9724_v10  ;;  %v2191_v10 = vmul.f32 0.2, %v14761_v1  ;;  %v14762_v44 = vld [vmem:[#allocation59_spill] sm:$0xff] }
 0x3ba   :  { %v2192_v7 = vmul.f32 0.2, %v14762_v44  ;;  %vm2128_vm2 = vcmp.gt.f32.partialorder %v14762_v44, 0.0  ;;  %v14763_v55 = vld [vmem:[#allocation61_spill] sm:$0xff]  ;;  %vm14765_vm8 = vcmp.gt.f32.partialorder %v9580_v42, 0.0  ;;  %vm14766_vm3 = vcmp.gt.f32.partialorder %v9584_v9, 0.0 }
 0x3bb   :  { %vm2129_vm6 = vcmp.gt.f32.partialorder %v14763_v55, 0.0  ;;  %v2193_v37 = vmul.f32 0.2, %v14763_v55  ;;  %v14764_v1 = vld [vmem:[#allocation29_spill] sm:$0xff]  ;;  %v10087_v4 = vsel %vm14766_vm3, %v9584_v9, %v9838_v57  ;;  %v14767_v45 = vld [vmem:[#allocation30_spill] sm:$0xff]  ;;  %vm14768_vm4 = vcmp.gt.f32.partialorder %v9592_v61, 0.0 }
 0x3bc   :  { %v10081_v63 = vsel %vm14765_vm8, %v9580_v42, %v14764_v1  ;;  %v10099_v54 = vsel %vm14768_vm4, %v9592_v61, %v14767_v45  ;;  %vm14769_vm8 = vcmp.gt.f32.partialorder %v9596_v28, 0.0  ;;  %vm14770_vm3 = vcmp.gt.f32.partialorder %v9600_v16, 0.0  ;;  %v14771_v43 = vld [vmem:[#allocation33_spill] sm:$0xff]  ;;  %v14797_v1 = vld [vmem:[#allocation42_spill] sm:$0xff] }
 0x3bd   :  { %v10105_v42 = vsel %vm14769_vm8, %v9596_v28, %v9853_v8  ;;  %v10111_v9 = vsel %vm14770_vm3, %v9600_v16, %v9856_v23  ;;  %v10117_v57 = vsel %vm2092_vm9, %v9604_v40, %v14771_v43  ;;  %vm14772_vm7 = vcmp.gt.f32.partialorder %v9608_v27, 0.0 }
 0x3be   :  { %v10123_v61 = vsel %vm14772_vm7, %v9608_v27, %v9868_v62  ;;  %vm14773_vm4 = vcmp.gt.f32.partialorder %v9612_v14, 0.0  ;;  %vm14774_vm8 = vcmp.gt.f32.partialorder %v9616_v0, 0.0  ;;  %v10141_v40 = vsel %vm2096_vm10, %v9620_v34, %v9885_v20  ;;  %v14790_v20 = vld [vmem:[#allocation39_spill] sm:$0xff] }
 0x3bf   :  { %v10129_v28 = vsel %vm14773_vm4, %v9612_v14, %v9871_v17  ;;  %v10135_v16 = vsel %vm14774_vm8, %v9616_v0, %v9874_v32  ;;  %vm14775_vm9 = vcmp.gt.f32.partialorder %v9624_v13, 0.0  ;;  %v14776_v14 = vld [vmem:[#allocation35_spill] sm:$0xff]  ;;  %vm14777_vm3 = vcmp.gt.f32.partialorder %v9628_v46, 0.0  ;;  %v14789_v17 = vld [vmem:[#allocation68_spill] sm:$0xff] }
 0x3c0   :  { %v10147_v27 = vsel %vm14775_vm9, %v9624_v13, %v9888_v26  ;;  %v10153_v6 = vsel %vm14777_vm3, %v9628_v46, %v14776_v14  ;;  %vm14778_vm7 = vcmp.gt.f32.partialorder %v9632_v33, 0.0  ;;  %v10165_v34 = vsel %vm2100_vm11, %v9636_v3, %v9906_v2  ;;  %v14779_v13 = vld [vmem:[#allocation36_spill] sm:$0xff] }
 0x3c1   :  { %v10159_v0 = vsel %vm14778_vm7, %v9632_v33, %v9903_v29  ;;  %vm14780_vm10 = vcmp.gt.f32.partialorder %v9640_v11, 0.0  ;;  %vm14781_vm4 = vcmp.gt.f32.partialorder %v9644_v41, 0.0  ;;  %v14782_v33 = vld [vmem:[#allocation38_spill] sm:$0xff]  ;;  %v14784_v3 = vld [vmem:[#allocation64_spill] sm:$0xff]  ;;  %vm14786_vm11 = vcmp.gt.f32.partialorder %v9656_v52, 0.0 }
 0x3c2   :  { %v10171_v32 = vsel %vm14780_vm10, %v9640_v11, %v14779_v13  ;;  %v10177_v46 = vsel %vm14781_vm4, %v9644_v41, %v9921_v12  ;;  %vm14783_vm8 = vcmp.gt.f32.partialorder %v14782_v33, 0.0  ;;  %v10189_v2 = vsel %vm2104_vm12, %v9652_v60, %v14784_v3  ;;  %v14785_v11 = vld [vmem:[#allocation66_spill] sm:$0xff]  ;;  %v14787_v41 = vld [vmem:[#allocation67_spill] sm:$0xff]  ;;  %v14792_v60 = vld [vmem:[#allocation41_spill] sm:$0xff] }
 0x3c3   :  { %v10183_v8 = vsel %vm14783_vm8, %v14782_v33, %v9924_v22  ;;  %v10195_v23 = vsel %vm14786_vm11, %v9656_v52, %v14785_v11  ;;  %vm14788_vm9 = vcmp.gt.f32.partialorder %v9660_v56, 0.0  ;;  %vm14791_vm3 = vcmp.gt.f32.partialorder %v14790_v20, 0.0  ;;  %v14793_v52 = vld [vmem:[#allocation40_spill] sm:$0xff]  ;;  %v14807_v3 = vld [vmem:[#allocation49_spill] sm:$0xff] }
 0x3c4   :  { %v10201_v62 = vsel %vm14788_vm9, %v9660_v56, %v14787_v41  ;;  %v10207_v26 = vsel %vm14791_vm3, %v14790_v20, %v14789_v17  ;;  %v10213_v22 = vsel %vm2108_vm13, %v14730_v19, %v14792_v60  ;;  %vm14794_vm12 = vcmp.gt.f32.partialorder %v14732_v58, 0.0  ;;  %v14795_v56 = vld [vmem:[#allocation70_spill] sm:$0xff]  ;;  %v14799_v19 = vld [vmem:[#allocation43_spill] sm:$0xff] }
 0x3c5   :  { %v10219_v29 = vsel %vm14794_vm12, %v14732_v58, %v14793_v52  ;;  %vm14796_vm7 = vcmp.gt.f32.partialorder %v9676_v30, 0.0  ;;  %vm14798_vm10 = vcmp.gt.f32.partialorder %v14736_v50, 0.0  ;;  %v10237_v43 = vsel %vm2112_vm14, %v14738_v53, %v14799_v19  ;;  %v14800_v58 = vld [vmem:[#allocation45_spill] sm:$0xff]  ;;  %v14805_v53 = vld [vmem:[#allocation46_spill] sm:$0xff] }
 0x3c6   :  { %v10225_v12 = vsel %vm14796_vm7, %v9676_v30, %v14795_v56  ;;  %v10231_v45 = vsel %vm14798_vm10, %v14736_v50, %v14797_v1  ;;  %vm14801_vm13 = vcmp.gt.f32.partialorder %v14740_v49, 0.0  ;;  %vm14802_vm4 = vcmp.gt.f32.partialorder %v14743_v48, 0.0  ;;  %v14803_v50 = vld [vmem:[#allocation44_spill] sm:$0xff]  ;;  %v14813_v17 = vld [vmem:[#allocation50_spill] sm:$0xff]  ;;  %v14817_v52 = vld [vmem:[#allocation53_spill] sm:$0xff] }
 0x3c7   :  { %v10243_v14 = vsel %vm14801_vm13, %v14740_v49, %v14800_v58  ;;  %v10249_v30 = vsel %vm14802_vm4, %v14743_v48, %v9996_v36  ;;  %vm14804_vm8 = vcmp.gt.f32.partialorder %v14744_v59, 0.0  ;;  %v10261_v33 = vsel %vm2116_vm15, %v14746_v38, %v14805_v53  ;;  %v14806_v49 = vld [vmem:[#allocation73_spill] sm:$0xff]  ;;  %v14809_v36 = vld [vmem:[#allocation74_spill] sm:$0xff]  ;;  %v14810_v48 = vld [vmem:[#allocation48_spill] sm:$0xff] }
 0x3c8   :  { %v10255_v13 = vsel %vm14804_vm8, %v14744_v59, %v14803_v50  ;;  %vm14808_vm14 = vcmp.gt.f32.partialorder %v14807_v3, 0.0  ;;  %vm14811_vm11 = vcmp.gt.f32.partialorder %v14810_v48, 0.0  ;;  %v14812_v59 = vld [vmem:[#allocation75_spill] sm:$0xff]  ;;  %vm14814_vm9 = vcmp.gt.f32.partialorder %v14813_v17, 0.0  ;;  %v14819_v1 = vld [vmem:[#allocation52_spill] sm:$0xff]  ;;  %v14822_v58 = vld [vmem:[#allocation54_spill] sm:$0xff] }
 0x3c9   :  { %v10267_v11 = vsel %vm14808_vm14, %v14807_v3, %v14806_v49  ;;  %v10273_v41 = vsel %vm14811_vm11, %v14810_v48, %v14809_v36  ;;  %v10279_v20 = vsel %vm14814_vm9, %v14813_v17, %v14812_v59  ;;  %v14815_v38 = vld [vmem:[#allocation51_spill] sm:$0xff]  ;;  %vm14818_vm15 = vcmp.gt.f32.partialorder %v14817_v52, 0.0  ;;  %v14826_v53 = vld [vmem:[#allocation57_spill] sm:$0xff]  ;;  %v14829_v49 = vld [vmem:[#allocation56_spill] sm:$0xff] }
 0x3ca   :  { %v10284_v60 = vsel %vm2120_vm0, %v14815_v38, %v2184_v47  ;;  %v10289_v56 = vsel %vm14818_vm15, %v14817_v52, %v2185_v31  ;;  %vm14820_vm3 = vcmp.gt.f32.partialorder %v14819_v1, 0.0  ;;  %vm14823_vm12 = vcmp.gt.f32.partialorder %v14822_v58, 0.0  ;;  %v14831_v3 = vld [vmem:[#allocation58_spill] sm:$0xff] }
 0x3cb   :  { %14816 = vst [vmem:[#allocation26_spill] sm:$0xff] %v10284_v60  ;;  %v10294_v19 = vsel %vm14820_vm3, %v14819_v1, %v2186_v5  ;;  %v10299_v50 = vsel %vm14823_vm12, %v14822_v58, %v2187_v15  ;;  %v10304_v47 = vsel %vm2124_vm1, %v14756_v25, %v2188_v35  ;;  %vm14827_vm0 = vcmp.gt.f32.partialorder %v14826_v53, 0.0 }
 0x3cc   :  { %14821 = vst [vmem:[#allocation59_spill] sm:$0xff] %v10294_v19  ;;  %14824 = vst [vmem:[#allocation61_spill] sm:$0xff] %v10299_v50  ;;  %v10309_v31 = vsel %vm14827_vm0, %v14826_v53, %v2189_v21  ;;  %v10314_v5 = vsel %vm2126_vm5, %v14829_v49, %v2190_v51  ;;  %vm14832_vm7 = vcmp.gt.f32.partialorder %v14831_v3, 0.0  ;;  %v10324_v35 = vsel %vm2128_vm2, %v14762_v44, %v2192_v7 }
 0x3cd   :  { %14825 = vst [vmem:[#allocation29_spill] sm:$0xff] %v10304_v47  ;;  %14828 = vst [vmem:[#allocation30_spill] sm:$0xff] %v10309_v31  ;;  %v10319_v15 = vsel %vm14832_vm7, %v14831_v3, %v2191_v10  ;;  %v10329_v25 = vsel %vm2129_vm6, %v14763_v55, %v2193_v37 }
 0x3ce   :  { %14830 = vst [vmem:[#allocation33_spill] sm:$0xff] %v10314_v5  ;;  %14833 = vst [vmem:[#allocation35_spill] sm:$0xff] %v10319_v15 }
 0x3cf   :  { %14834 = vst [vmem:[#allocation36_spill] sm:$0xff] %v10324_v35  ;;  %14835 = vst [vmem:[#allocation38_spill] sm:$0xff] %v10329_v25 }
 0x3d0   :  { %8260 = dma.done.wait [#allocation4], 32768 }
 0x3d1   :  { %8261 = vsyncadd [#allocation4], 4294934528  ;;  %v14836_v21 = vld [vmem:[#allocation62_spill] sm:$0xff]  ;;  %v14837_v51 = vld [vmem:[#allocation31_spill] sm:$0xff] }
 0x3d2   :  { %v10333_v36 = vpack.c.bf16 %v14837_v51, %v14836_v21  ;;  %v14839_v48 = vld [vmem:[#allocation27_spill] sm:$0xff]  ;;  %v14840_v59 = vld [vmem:[#allocation34_spill] sm:$0xff]  ;;  %v14845_v15 = vld [vmem:[#allocation32_spill] sm:$0xff] }
 0x3d3   :  { %v10337_v10 = vpack.c.bf16 %v14840_v59, %v14839_v48  ;;  %v2350_v7 = vld [vmem:[#allocation2 + $0x1c0] sm:$0xff] }
 0x3d4   :  { %14838 = vst [vmem:[#allocation64_spill] sm:$0xff] %v10333_v36  ;;  %3904 = vmatprep.mubr.bf16.mxu0 %v10333_v36  ;;  %v2354_v44 = vld [vmem:[#allocation2 + $0x1e0] sm:$0xff] }
 0x3d5   :  { %14841 = vst [vmem:[#allocation66_spill] sm:$0xff] %v10337_v10  ;;  %4017 = vmatprep.mubr.bf16.mxu1 %v10337_v10  ;;  %v2478_v17 = vld [vmem:[#allocation2 + $0x5c0] sm:$0xff]  ;;  %v7337_v38 = vcombine.high %v2350_v7, %v2354_v44  ;;  %v7336_v55 = vcombine.low %v2350_v7, %v2354_v44 }
 0x3d6   :  { %v2482_v37 = vld [vmem:[#allocation2 + $0x5e0] sm:$0xff] }
 0x3d7   :  { %v2342_v52 = vld [vmem:[#allocation2 + $0x180] sm:$0xff]  ;;  %v7465_v58 = vcombine.high %v2478_v17, %v2482_v37  ;;  %v7464_v53 = vcombine.low %v2478_v17, %v2482_v37  ;;  %3872 = vmatprep.subr.bf16.mxu0 %v7337_v38 }
 0x3d8   :  { %v2346_v1 = vld [vmem:[#allocation2 + $0x1a0] sm:$0xff]  ;;  %3873 = vmatpush1.bf16.msra.mxu0 %v7336_v55 }
 0x3d9   :  { %v7329_v49 = vcombine.high %v2342_v52, %v2346_v1  ;;  %v2470_v3 = vld [vmem:[#allocation2 + $0x580] sm:$0xff]  ;;  %3985 = vmatprep.subr.bf16.mxu1 %v7465_v58  ;;  %v7328_v10 = vcombine.low %v2342_v52, %v2346_v1 }
 0x3da   :  { %v2474_v21 = vld [vmem:[#allocation2 + $0x5a0] sm:$0xff]  ;;  %3986 = vmatpush1.bf16.msra.mxu1 %v7464_v53 }
 0x3db   :  { %v2334_v51 = vld [vmem:[#allocation2 + $0x140] sm:$0xff]  ;;  %v7457_v48 = vcombine.high %v2470_v3, %v2474_v21  ;;  %3874 = vmatprep.subr.bf16.mxu0 %v7329_v49  ;;  %v7456_v47 = vcombine.low %v2470_v3, %v2474_v21 }
 0x3dc   :  { %v2338_v59 = vld [vmem:[#allocation2 + $0x160] sm:$0xff]  ;;  %3875 = vmatpush1.bf16.msra.mxu0 %v7328_v10 }
 0x3dd   :  { %v2462_v36 = vld [vmem:[#allocation2 + $0x540] sm:$0xff]  ;;  %v7321_v7 = vcombine.high %v2334_v51, %v2338_v59  ;;  %3987 = vmatprep.subr.bf16.mxu1 %v7457_v48  ;;  %v7320_v25 = vcombine.low %v2334_v51, %v2338_v59 }
 0x3de   :  { %v2466_v35 = vld [vmem:[#allocation2 + $0x560] sm:$0xff]  ;;  %3988 = vmatpush1.bf16.msra.mxu1 %v7456_v47 }
 0x3df   :  { %v7449_v44 = vcombine.high %v2462_v36, %v2466_v35  ;;  %v2326_v5 = vld [vmem:[#allocation2 + $0x100] sm:$0xff]  ;;  %3876 = vmatprep.subr.bf16.mxu0 %v7321_v7  ;;  %v7448_v38 = vcombine.low %v2462_v36, %v2466_v35 }
 0x3e0   :  { %v2330_v17 = vld [vmem:[#allocation2 + $0x120] sm:$0xff]  ;;  %3877 = vmatpush1.bf16.msra.mxu0 %v7320_v25 }
 0x3e1   :  { %v2454_v37 = vld [vmem:[#allocation2 + $0x500] sm:$0xff]  ;;  %v7313_v31 = vcombine.high %v2326_v5, %v2330_v17  ;;  %3989 = vmatprep.subr.bf16.mxu1 %v7449_v44  ;;  %v7312_v49 = vcombine.low %v2326_v5, %v2330_v17 }
 0x3e2   :  { %v2458_v19 = vld [vmem:[#allocation2 + $0x520] sm:$0xff]  ;;  %3990 = vmatpush1.bf16.msra.mxu1 %v7448_v38 }
 0x3e3   :  { %v7441_v58 = vcombine.high %v2454_v37, %v2458_v19  ;;  %v2318_v55 = vld [vmem:[#allocation2 + $0xc0] sm:$0xff]  ;;  %3878 = vmatprep.subr.bf16.mxu0 %v7313_v31  ;;  %v7440_v3 = vcombine.low %v2454_v37, %v2458_v19 }
 0x3e4   :  { %v2322_v52 = vld [vmem:[#allocation2 + $0xe0] sm:$0xff]  ;;  %3879 = vmatpush1.bf16.msra.mxu0 %v7312_v49 }
 0x3e5   :  { %v2446_v1 = vld [vmem:[#allocation2 + $0x4c0] sm:$0xff]  ;;  %v7305_v21 = vcombine.high %v2318_v55, %v2322_v52  ;;  %3991 = vmatprep.subr.bf16.mxu1 %v7441_v58  ;;  %v7304_v35 = vcombine.low %v2318_v55, %v2322_v52 }
 0x3e6   :  { %v2450_v53 = vld [vmem:[#allocation2 + $0x4e0] sm:$0xff]  ;;  %3992 = vmatpush1.bf16.msra.mxu1 %v7440_v3 }
 0x3e7   :  { %v7433_v48 = vcombine.high %v2446_v1, %v2450_v53  ;;  %v2310_v10 = vld [vmem:[#allocation2 + $0x80] sm:$0xff]  ;;  %3880 = vmatprep.subr.bf16.mxu0 %v7305_v21  ;;  %v7432_v36 = vcombine.low %v2446_v1, %v2450_v53 }
 0x3e8   :  { %v2314_v51 = vld [vmem:[#allocation2 + $0xa0] sm:$0xff]  ;;  %3881 = vmatpush1.bf16.msra.mxu0 %v7304_v35 }
 0x3e9   :  { %v2438_v47 = vld [vmem:[#allocation2 + $0x480] sm:$0xff]  ;;  %v7297_v7 = vcombine.high %v2310_v10, %v2314_v51  ;;  %3993 = vmatprep.subr.bf16.mxu1 %v7433_v48  ;;  %v7296_v19 = vcombine.low %v2310_v10, %v2314_v51 }
 0x3ea   :  { %v2442_v59 = vld [vmem:[#allocation2 + $0x4a0] sm:$0xff]  ;;  %3994 = vmatpush1.bf16.msra.mxu1 %v7432_v36 }
 0x3eb   :  { %v7425_v44 = vcombine.high %v2438_v47, %v2442_v59  ;;  %v2302_v25 = vld [vmem:[#allocation2 + $0x40] sm:$0xff]  ;;  %3882 = vmatprep.subr.bf16.mxu0 %v7297_v7  ;;  %v7424_v37 = vcombine.low %v2438_v47, %v2442_v59 }
 0x3ec   :  { %v2306_v5 = vld [vmem:[#allocation2 + $0x60] sm:$0xff]  ;;  %3883 = vmatpush1.bf16.msra.mxu0 %v7296_v19 }
 0x3ed   :  { %v2430_v17 = vld [vmem:[#allocation2 + $0x440] sm:$0xff]  ;;  %v7289_v38 = vcombine.high %v2302_v25, %v2306_v5  ;;  %3995 = vmatprep.subr.bf16.mxu1 %v7425_v44  ;;  %v7288_v1 = vcombine.low %v2302_v25, %v2306_v5 }
 0x3ee   :  { %v2434_v31 = vld [vmem:[#allocation2 + $0x460] sm:$0xff]  ;;  %3996 = vmatpush1.bf16.msra.mxu1 %v7424_v37 }
 0x3ef   :  { %v7417_v58 = vcombine.high %v2430_v17, %v2434_v31  ;;  %v2294_v49 = vld [vmem:[#allocation2] sm:$0xff]  ;;  %3884 = vmatprep.subr.bf16.mxu0 %v7289_v38  ;;  %v7416_v53 = vcombine.low %v2430_v17, %v2434_v31 }
 0x3f0   :  { %v2298_v55 = vld [vmem:[#allocation2 + $0x20] sm:$0xff]  ;;  %3885 = vmatpush1.bf16.msra.mxu0 %v7288_v1 }
 0x3f1   :  { %v2422_v52 = vld [vmem:[#allocation2 + $0x400] sm:$0xff]  ;;  %v7281_v21 = vcombine.high %v2294_v49, %v2298_v55  ;;  %3997 = vmatprep.subr.bf16.mxu1 %v7417_v58  ;;  %v7280_v47 = vcombine.low %v2294_v49, %v2298_v55 }
 0x3f2   :  { %v2426_v3 = vld [vmem:[#allocation2 + $0x420] sm:$0xff]  ;;  %3998 = vmatpush1.bf16.msra.mxu1 %v7416_v53 }
 0x3f3   :  { %v7409_v48 = vcombine.high %v2422_v52, %v2426_v3  ;;  %v2414_v35 = vld [vmem:[#allocation2 + $0x3c0] sm:$0xff]  ;;  %3886 = vmatprep.subr.bf16.mxu0 %v7281_v21  ;;  %v7408_v59 = vcombine.low %v2422_v52, %v2426_v3 }
 0x3f4   :  { %v2418_v10 = vld [vmem:[#allocation2 + $0x3e0] sm:$0xff]  ;;  %3887 = vmatpush1.bf16.msra.mxu0 %v7280_v47 }
 0x3f5   :  { %v2542_v51 = vld [vmem:[#allocation2 + $0x7c0] sm:$0xff]  ;;  %v7401_v7 = vcombine.high %v2414_v35, %v2418_v10  ;;  %3999 = vmatprep.subr.bf16.mxu1 %v7409_v48  ;;  %v7400_v17 = vcombine.low %v2414_v35, %v2418_v10 }
 0x3f6   :  { %v2546_v36 = vld [vmem:[#allocation2 + $0x7e0] sm:$0xff]  ;;  %4000 = vmatpush1.bf16.msra.mxu1 %v7408_v59 }
 0x3f7   :  { %v7529_v44 = vcombine.high %v2542_v51, %v2546_v36  ;;  %v2406_v19 = vld [vmem:[#allocation2 + $0x380] sm:$0xff]  ;;  %3888 = vmatprep.subr.bf16.mxu0 %v7401_v7  ;;  %v7528_v31 = vcombine.low %v2542_v51, %v2546_v36 }
 0x3f8   :  { %v2410_v25 = vld [vmem:[#allocation2 + $0x3a0] sm:$0xff]  ;;  %3889 = vmatpush2.bf16.msra.mxu0 %v7400_v17 }
 0x3f9   :  { %v2534_v5 = vld [vmem:[#allocation2 + $0x780] sm:$0xff]  ;;  %v7393_v38 = vcombine.high %v2406_v19, %v2410_v25  ;;  %4001 = vmatprep.subr.bf16.mxu1 %v7529_v44  ;;  %v7392_v52 = vcombine.low %v2406_v19, %v2410_v25 }
 0x3fa   :  { %v2538_v37 = vld [vmem:[#allocation2 + $0x7a0] sm:$0xff]  ;;  %4002 = vmatpush2.bf16.msra.mxu1 %v7528_v31 }
 0x3fb   :  { %v7521_v58 = vcombine.high %v2534_v5, %v2538_v37  ;;  %v2398_v1 = vld [vmem:[#allocation2 + $0x340] sm:$0xff]  ;;  %3890 = vmatprep.subr.bf16.mxu0 %v7393_v38  ;;  %v7520_v3 = vcombine.low %v2534_v5, %v2538_v37 }
 0x3fc   :  { %v2402_v49 = vld [vmem:[#allocation2 + $0x360] sm:$0xff]  ;;  %3891 = vmatpush2.bf16.msra.mxu0 %v7392_v52 }
 0x3fd   :  { %v2526_v55 = vld [vmem:[#allocation2 + $0x740] sm:$0xff]  ;;  %v7385_v21 = vcombine.high %v2398_v1, %v2402_v49  ;;  %4003 = vmatprep.subr.bf16.mxu1 %v7521_v58  ;;  %v7384_v51 = vcombine.low %v2398_v1, %v2402_v49 }
 0x3fe   :  { %v2530_v53 = vld [vmem:[#allocation2 + $0x760] sm:$0xff]  ;;  %4004 = vmatpush2.bf16.msra.mxu1 %v7520_v3 }
 0x3ff   :  { %v7513_v48 = vcombine.high %v2526_v55, %v2530_v53  ;;  %v2390_v47 = vld [vmem:[#allocation2 + $0x300] sm:$0xff]  ;;  %3892 = vmatprep.subr.bf16.mxu0 %v7385_v21  ;;  %v7512_v36 = vcombine.low %v2526_v55, %v2530_v53 }
 0x400   :  { %v2394_v35 = vld [vmem:[#allocation2 + $0x320] sm:$0xff]  ;;  %3893 = vmatpush2.bf16.msra.mxu0 %v7384_v51 }
 0x401   :  { %v2518_v10 = vld [vmem:[#allocation2 + $0x700] sm:$0xff]  ;;  %v7377_v7 = vcombine.high %v2390_v47, %v2394_v35  ;;  %4005 = vmatprep.subr.bf16.mxu1 %v7513_v48  ;;  %v7376_v5 = vcombine.low %v2390_v47, %v2394_v35 }
 0x402   :  { %v2522_v59 = vld [vmem:[#allocation2 + $0x720] sm:$0xff]  ;;  %4006 = vmatpush2.bf16.msra.mxu1 %v7512_v36 }
 0x403   :  { %v7505_v44 = vcombine.high %v2518_v10, %v2522_v59  ;;  %v2382_v17 = vld [vmem:[#allocation2 + $0x2c0] sm:$0xff]  ;;  %3894 = vmatprep.subr.bf16.mxu0 %v7377_v7  ;;  %v7504_v37 = vcombine.low %v2518_v10, %v2522_v59 }
 0x404   :  { %v2386_v19 = vld [vmem:[#allocation2 + $0x2e0] sm:$0xff]  ;;  %3895 = vmatpush2.bf16.msra.mxu0 %v7376_v5 }
 0x405   :  { %v2510_v25 = vld [vmem:[#allocation2 + $0x6c0] sm:$0xff]  ;;  %v7369_v38 = vcombine.high %v2382_v17, %v2386_v19  ;;  %4007 = vmatprep.subr.bf16.mxu1 %v7505_v44  ;;  %v7368_v55 = vcombine.low %v2382_v17, %v2386_v19 }
 0x406   :  { %v2514_v31 = vld [vmem:[#allocation2 + $0x6e0] sm:$0xff]  ;;  %4008 = vmatpush2.bf16.msra.mxu1 %v7504_v37 }
 0x407   :  { %v7497_v58 = vcombine.high %v2510_v25, %v2514_v31  ;;  %v2374_v52 = vld [vmem:[#allocation2 + $0x280] sm:$0xff]  ;;  %3896 = vmatprep.subr.bf16.mxu0 %v7369_v38  ;;  %v7496_v53 = vcombine.low %v2510_v25, %v2514_v31 }
 0x408   :  { %v2378_v1 = vld [vmem:[#allocation2 + $0x2a0] sm:$0xff]  ;;  %3897 = vmatpush2.bf16.msra.mxu0 %v7368_v55  ;;  %v2351_v55 = vld [vmem:[#allocation2 + $0x1c8] sm:$0xff] }
 0x409   :  { %v2502_v49 = vld [vmem:[#allocation2 + $0x680] sm:$0xff]  ;;  %v7361_v21 = vcombine.high %v2374_v52, %v2378_v1  ;;  %4009 = vmatprep.subr.bf16.mxu1 %v7497_v58  ;;  %v7360_v10 = vcombine.low %v2374_v52, %v2378_v1  ;;  %v2355_v52 = vld [vmem:[#allocation2 + $0x1e8] sm:$0xff] }
 0x40a   :  { %v2506_v3 = vld [vmem:[#allocation2 + $0x6a0] sm:$0xff]  ;;  %4010 = vmatpush2.bf16.msra.mxu1 %v7496_v53  ;;  %v2479_v1 = vld [vmem:[#allocation2 + $0x5c8] sm:$0xff] }
 0x40b   :  { %v7489_v48 = vcombine.high %v2502_v49, %v2506_v3  ;;  %v2366_v51 = vld [vmem:[#allocation2 + $0x240] sm:$0xff]  ;;  %3898 = vmatprep.subr.bf16.mxu0 %v7361_v21  ;;  %v7488_v59 = vcombine.low %v2502_v49, %v2506_v3  ;;  %v2483_v53 = vld [vmem:[#allocation2 + $0x5e8] sm:$0xff]  ;;  %v7339_v21 = vcombine.high %v2351_v55, %v2355_v52 }
 0x40c   :  { %v2370_v47 = vld [vmem:[#allocation2 + $0x260] sm:$0xff]  ;;  %3899 = vmatpush2.bf16.msra.mxu0 %v7360_v10  ;;  %v2343_v10 = vld [vmem:[#allocation2 + $0x188] sm:$0xff] }
 0x40d   :  { %v2494_v35 = vld [vmem:[#allocation2 + $0x640] sm:$0xff]  ;;  %v7353_v7 = vcombine.high %v2366_v51, %v2370_v47  ;;  %4011 = vmatprep.subr.bf16.mxu1 %v7489_v48  ;;  %v7352_v25 = vcombine.low %v2366_v51, %v2370_v47  ;;  %v7467_v48 = vcombine.high %v2479_v1, %v2483_v53  ;;  %v2347_v51 = vld [vmem:[#allocation2 + $0x1a8] sm:$0xff] }
 0x40e   :  { %v2498_v36 = vld [vmem:[#allocation2 + $0x660] sm:$0xff]  ;;  %4012 = vmatpush2.bf16.msra.mxu1 %v7488_v59  ;;  %v14842_v47 = vld [vmem:[#allocation60_spill] sm:$0xff] }
 0x40f   :  { %v7481_v44 = vcombine.high %v2494_v35, %v2498_v36  ;;  %v2358_v5 = vld [vmem:[#allocation2 + $0x200] sm:$0xff]  ;;  %3900 = vmatprep.subr.bf16.mxu0 %v7353_v7  ;;  %v7480_v31 = vcombine.low %v2494_v35, %v2498_v36  ;;  %v14843_v59 = vld [vmem:[#allocation28_spill] sm:$0xff] }
 0x410   :  { %v2362_v17 = vld [vmem:[#allocation2 + $0x220] sm:$0xff]  ;;  %3901 = vmatpush2.bf16.msra.mxu0 %v7352_v25  ;;  %v10343_v35 = vpack.c.bf16 %v14843_v59, %v14842_v47  ;;  %v2471_v36 = vld [vmem:[#allocation2 + $0x588] sm:$0xff] }
 0x411   :  { %v2486_v19 = vld [vmem:[#allocation2 + $0x600] sm:$0xff]  ;;  %v7345_v38 = vcombine.high %v2358_v5, %v2362_v17  ;;  %4013 = vmatprep.subr.bf16.mxu1 %v7481_v44  ;;  %v7344_v49 = vcombine.low %v2358_v5, %v2362_v17  ;;  %v2475_v7 = vld [vmem:[#allocation2 + $0x5a8] sm:$0xff]  ;;  %v14844_v44 = vld [vmem:[#allocation25_spill] sm:$0xff]  ;;  %v7338_v5 = vcombine.low %v2351_v55, %v2355_v52  ;;  %v7466_v17 = vcombine.low %v2479_v1, %v2483_v53 }
 0x412   :  { %v2490_v37 = vld [vmem:[#allocation2 + $0x620] sm:$0xff]  ;;  %4014 = vmatpush2.bf16.msra.mxu1 %v7480_v31  ;;  %v10347_v50 = vpack.c.bf16 %v14845_v15, %v14844_v44  ;;  %v14847_v31 = vld [vmem:[#allocation72_spill] sm:$0xff]  ;;  %v7330_v52 = vcombine.low %v2343_v10, %v2347_v51  ;;  %v7458_v1 = vcombine.low %v2471_v36, %v2475_v7  ;;  %v14851_v44 = vld [vmem:[#allocation37_spill] sm:$0xff] }
 0x413   :  { %v7473_v58 = vcombine.high %v2486_v19, %v2490_v37  ;;  %3902 = vmatprep.subr.bf16.mxu0 %v7345_v38  ;;  %v7472_v3 = vcombine.low %v2486_v19, %v2490_v37  ;;  %v7331_v19 = vcombine.high %v2343_v10, %v2347_v51  ;;  %v7459_v37 = vcombine.high %v2471_v36, %v2475_v7  ;;  %v14846_v25 = vld [vmem:[#allocation63_spill] sm:$0xff]  ;;  %v2339_v47 = vld [vmem:[#allocation2 + $0x168] sm:$0xff]  ;;  %v14853_v10 = vld [vmem:[#allocation65_spill] sm:$0xff] }
 0x414   :  { %3903 = vmatpush2.bf16.msra.mxu0 %v7344_v49  ;;  %v10351_v38 = vpack.c.bf16 %v14847_v31, %v14846_v25  ;;  %v14848_v49 = vld [vmem:[#allocation69_spill] sm:$0xff]  ;;  %v14849_v59 = vld [vmem:[#allocation76_spill] sm:$0xff]  ;;  %v14852_v25 = vld [vmem:[#allocation71_spill] sm:$0xff] }
 0x415   :  { %4015 = vmatprep.subr.bf16.mxu1 %v7473_v58  ;;  %4098 = vmatprep.subr.bf16.mxu0 %v7339_v21  ;;  %v2335_v58 = vld [vmem:[#allocation2 + $0x148] sm:$0xff]  ;;  %v10356_v60 = vpack.c.bf16 %v14849_v59, %v14848_v49  ;;  %v10363_v31 = vpack.c.bf16 %v14852_v25, %v14851_v44  ;;  %v14854_v51 = vld [vmem:[#allocation47_spill] sm:$0xff] }
 0x416   :  { %4016 = vmatpush2.bf16.msra.mxu1 %v7472_v3  ;;  %v2463_v15 = vld [vmem:[#allocation2 + $0x548] sm:$0xff]  ;;  %v7323_v53 = vcombine.high %v2335_v58, %v2339_v47  ;;  %v7322_v36 = vcombine.low %v2335_v58, %v2339_v47 }
 0x417   :  { %4211 = vmatprep.subr.bf16.mxu1 %v7467_v48  ;;  %3905 = vmatmul.mubr.bf16.vlgmr.msra.gmra.mxu0 %v10343_v35  ;;  %14850 = vst [vmem:[#allocation67_spill] sm:$0xff] %v10356_v60  ;;  %v2467_v55 = vld [vmem:[#allocation2 + $0x568] sm:$0xff] }
 0x418   :  { %4099 = vmatpush1.bf16.msra.mxu0 %v7338_v5  ;;  %3914 = vmatprep.mubr.bf16.mxu0 %v10351_v38  ;;  %v7451_v3 = vcombine.high %v2463_v15, %v2467_v55  ;;  %v2327_v21 = vld [vmem:[#allocation2 + $0x108] sm:$0xff]  ;;  %v10367_v5 = vpack.c.bf16 %v14854_v51, %v14853_v10  ;;  %v7450_v7 = vcombine.low %v2463_v15, %v2467_v55 }
 0x419   :  { %4018 = vmatmul.mubr.bf16.vlgmr.msra.gmra.mxu1 %v10347_v50  ;;  %4100 = vmatprep.subr.bf16.mxu0 %v7331_v19  ;;  %v2331_v48 = vld [vmem:[#allocation2 + $0x128] sm:$0xff] }
 0x41a   :  { %4212 = vmatpush1.bf16.msra.mxu1 %v7466_v17  ;;  %4027 = vmatprep.mubr.bf16.mxu1 %v10356_v60  ;;  %v2455_v49 = vld [vmem:[#allocation2 + $0x508] sm:$0xff]  ;;  %v7315_v17 = vcombine.high %v2327_v21, %v2331_v48  ;;  %v7314_v47 = vcombine.low %v2327_v21, %v2331_v48  ;;  %v10387_v21 = vpack.c.bf16 %v10093_v24, %v10066_v18 }
 0x41b   :  { %4213 = vmatprep.subr.bf16.mxu1 %v7459_v37  ;;  %v2459_v59 = vld [vmem:[#allocation2 + $0x528] sm:$0xff]  ;;  %v14855_v37 = vld [vmem:[#allocation55_spill] sm:$0xff] }
 0x41c   :  { %4101 = vmatpush1.bf16.msra.mxu0 %v7330_v52  ;;  %v7443_v19 = vcombine.high %v2455_v49, %v2459_v59  ;;  %v10371_v60 = vpack.c.bf16 %v10087_v4, %v14855_v37  ;;  %v2319_v44 = vld [vmem:[#allocation2 + $0xc8] sm:$0xff]  ;;  %v10376_v52 = vpack.c.bf16 %v10099_v54, %v10075_v39  ;;  %v7442_v15 = vcombine.low %v2455_v49, %v2459_v59  ;;  %v14856_v39 = vld [vmem:[#allocation77_spill] sm:$0xff] }
 0x41d   :  { %4102 = vmatprep.subr.bf16.mxu0 %v7323_v53  ;;  %v2323_v25 = vld [vmem:[#allocation2 + $0xe8] sm:$0xff]  ;;  %v10383_v54 = vpack.c.bf16 %v10081_v63, %v14856_v39  ;;  %v10416_v39 = vpack.c.bf16 %v10195_v23, %v10171_v32  ;;  %v10423_v32 = vpack.c.bf16 %v10177_v46, %v10153_v6 }
 0x41e   :  { %4214 = vmatpush1.bf16.msra.mxu1 %v7458_v1  ;;  %v2447_v10 = vld [vmem:[#allocation2 + $0x4c8] sm:$0xff]  ;;  %v7307_v55 = vcombine.high %v2319_v44, %v2323_v25  ;;  %v7306_v48 = vcombine.low %v2319_v44, %v2323_v25 }
 0x41f   :  { %4215 = vmatprep.subr.bf16.mxu1 %v7451_v3  ;;  %3915 = vmatmul.mubr.bf16.gmra.mxu0 %v10363_v31  ;;  %v2451_v58 = vld [vmem:[#allocation2 + $0x4e8] sm:$0xff] }
 0x420   :  { %4103 = vmatpush1.bf16.msra.mxu0 %v7322_v36  ;;  %3924 = vmatprep.mubr.bf16.mxu0 %v10371_v60  ;;  %v7435_v4 = vcombine.high %v2447_v10, %v2451_v58  ;;  %v2311_v1 = vld [vmem:[#allocation2 + $0x88] sm:$0xff]  ;;  %v7434_v49 = vcombine.low %v2447_v10, %v2451_v58 }
 0x421   :  { %4028 = vmatmul.mubr.bf16.gmra.mxu1 %v10367_v5  ;;  %4104 = vmatprep.subr.bf16.mxu0 %v7315_v17  ;;  %v2315_v53 = vld [vmem:[#allocation2 + $0xa8] sm:$0xff] }
 0x422   :  { %4216 = vmatpush1.bf16.msra.mxu1 %v7450_v7  ;;  %4037 = vmatprep.mubr.bf16.mxu1 %v10376_v52  ;;  %v2439_v3 = vld [vmem:[#allocation2 + $0x488] sm:$0xff]  ;;  %v7299_v59 = vcombine.high %v2311_v1, %v2315_v53  ;;  %v10391_v7 = vpack.c.bf16 %v10135_v16, %v10111_v9  ;;  %v7298_v37 = vcombine.low %v2311_v1, %v2315_v53 }
 0x423   :  { %4217 = vmatprep.subr.bf16.mxu1 %v7443_v19  ;;  %v2443_v51 = vld [vmem:[#allocation2 + $0x4a8] sm:$0xff]  ;;  %v10396_v19 = vpack.c.bf16 %v10147_v27, %v10123_v61  ;;  %v10403_v61 = vpack.c.bf16 %v10129_v28, %v10105_v42  ;;  %v10411_v53 = vpack.c.bf16 %v10183_v8, %v10159_v0 }
 0x424   :  { %4105 = vmatpush1.bf16.msra.mxu0 %v7314_v47  ;;  %v7427_v36 = vcombine.high %v2439_v3, %v2443_v51  ;;  %v2303_v63 = vld [vmem:[#allocation2 + $0x48] sm:$0xff]  ;;  %v7426_v44 = vcombine.low %v2439_v3, %v2443_v51  ;;  %v10407_v47 = vpack.c.bf16 %v10141_v40, %v10117_v57 }
 0x425   :  { %4106 = vmatprep.subr.bf16.mxu0 %v7307_v55  ;;  %v2307_v17 = vld [vmem:[#allocation2 + $0x68] sm:$0xff] }
 0x426   :  { %4218 = vmatpush1.bf16.msra.mxu1 %v7442_v15  ;;  %v2431_v18 = vld [vmem:[#allocation2 + $0x448] sm:$0xff]  ;;  %v7291_v25 = vcombine.high %v2303_v63, %v2307_v17  ;;  %v7290_v15 = vcombine.low %v2303_v63, %v2307_v17 }
 0x427   :  { %4219 = vmatprep.subr.bf16.mxu1 %v7435_v4  ;;  %3925 = vmatmul.mubr.bf16.gmra.mxu0 %v10383_v54  ;;  %v2435_v24 = vld [vmem:[#allocation2 + $0x468] sm:$0xff] }
 0x428   :  { %4107 = vmatpush1.bf16.msra.mxu0 %v7306_v48  ;;  %3934 = vmatprep.mubr.bf16.mxu0 %v10391_v7  ;;  %v7419_v9 = vcombine.high %v2431_v18, %v2435_v24  ;;  %v2295_v16 = vld [vmem:[#allocation2 + $0x8] sm:$0xff]  ;;  %v7418_v55 = vcombine.low %v2431_v18, %v2435_v24 }
 0x429   :  { %4038 = vmatmul.mubr.bf16.gmra.mxu1 %v10387_v21  ;;  %4108 = vmatprep.subr.bf16.mxu0 %v7299_v59  ;;  %v2299_v10 = vld [vmem:[#allocation2 + $0x28] sm:$0xff] }
 0x42a   :  { %4220 = vmatpush1.bf16.msra.mxu1 %v7434_v49  ;;  %4047 = vmatprep.mubr.bf16.mxu1 %v10396_v19  ;;  %v2423_v27 = vld [vmem:[#allocation2 + $0x408] sm:$0xff]  ;;  %v7283_v4 = vcombine.high %v2295_v16, %v2299_v10  ;;  %v7282_v3 = vcombine.low %v2295_v16, %v2299_v10 }
 0x42b   :  { %4221 = vmatprep.subr.bf16.mxu1 %v7427_v36  ;;  %v2427_v58 = vld [vmem:[#allocation2 + $0x428] sm:$0xff]  ;;  %v10427_v36 = vpack.c.bf16 %v10189_v2, %v10165_v34 }
 0x42c   :  { %4109 = vmatpush1.bf16.msra.mxu0 %v7298_v37  ;;  %v7411_v1 = vcombine.high %v2423_v27, %v2427_v58  ;;  %v2415_v42 = vld [vmem:[#allocation2 + $0x3c8] sm:$0xff]  ;;  %v7410_v51 = vcombine.low %v2423_v27, %v2427_v58  ;;  %v10431_v37 = vpack.c.bf16 %v10231_v45, %v10207_v26  ;;  %v10447_v58 = vpack.c.bf16 %v10237_v43, %v10213_v22 }
 0x42d   :  { %4110 = vmatprep.subr.bf16.mxu0 %v7291_v25  ;;  %v2419_v28 = vld [vmem:[#allocation2 + $0x3e8] sm:$0xff] }
 0x42e   :  { %4222 = vmatpush1.bf16.msra.mxu1 %v7426_v44  ;;  %v2543_v57 = vld [vmem:[#allocation2 + $0x7c8] sm:$0xff]  ;;  %v7403_v48 = vcombine.high %v2415_v42, %v2419_v28  ;;  %v7402_v63 = vcombine.low %v2415_v42, %v2419_v28  ;;  %v10436_v44 = vpack.c.bf16 %v10243_v14, %v10219_v29  ;;  %v10443_v29 = vpack.c.bf16 %v10225_v12, %v10201_v62 }
 0x42f   :  { %4223 = vmatprep.subr.bf16.mxu1 %v7419_v9  ;;  %3935 = vmatmul.mubr.bf16.gmra.mxu0 %v10403_v61  ;;  %v2547_v40 = vld [vmem:[#allocation2 + $0x7e8] sm:$0xff]  ;;  %v10451_v42 = vpack.c.bf16 %v10279_v20, %v10255_v13  ;;  %v10456_v28 = vpack.c.bf16 %v10289_v56, %v10267_v11  ;;  %v10463_v11 = vpack.c.bf16 %v10273_v41, %v10249_v30 }
 0x430   :  { %4111 = vmatpush1.bf16.msra.mxu0 %v7290_v15  ;;  %3944 = vmatprep.mubr.bf16.mxu0 %v10411_v53  ;;  %v7531_v0 = vcombine.high %v2543_v57, %v2547_v40  ;;  %v2407_v8 = vld [vmem:[#allocation2 + $0x388] sm:$0xff]  ;;  %v7530_v17 = vcombine.low %v2543_v57, %v2547_v40 }
 0x431   :  { %4048 = vmatmul.mubr.bf16.gmra.mxu1 %v10407_v47  ;;  %4112 = vmatprep.subr.bf16.mxu0 %v7283_v4  ;;  %v2411_v49 = vld [vmem:[#allocation2 + $0x3a8] sm:$0xff] }
 0x432   :  { %4224 = vmatpush1.bf16.msra.mxu1 %v7418_v55  ;;  %4057 = vmatprep.mubr.bf16.mxu1 %v10416_v39  ;;  %v2535_v23 = vld [vmem:[#allocation2 + $0x788] sm:$0xff]  ;;  %v7395_v18 = vcombine.high %v2407_v8, %v2411_v49  ;;  %v7394_v25 = vcombine.low %v2407_v8, %v2411_v49 }
 0x433   :  { %4225 = vmatprep.subr.bf16.mxu1 %v7411_v1  ;;  %v2539_v59 = vld [vmem:[#allocation2 + $0x7a8] sm:$0xff] }
 0x434   :  { %4113 = vmatpush1.bf16.msra.mxu0 %v7282_v3  ;;  %v7523_v24 = vcombine.high %v2535_v23, %v2539_v59  ;;  %v2399_v6 = vld [vmem:[#allocation2 + $0x348] sm:$0xff]  ;;  %v7522_v9 = vcombine.low %v2535_v23, %v2539_v59 }
 0x435   :  { %4114 = vmatprep.subr.bf16.mxu0 %v7403_v48  ;;  %v2403_v46 = vld [vmem:[#allocation2 + $0x368] sm:$0xff] }
 0x436   :  { %4226 = vmatpush1.bf16.msra.mxu1 %v7410_v51  ;;  %v2527_v34 = vld [vmem:[#allocation2 + $0x748] sm:$0xff]  ;;  %v7387_v16 = vcombine.high %v2399_v6, %v2403_v46  ;;  %v7386_v15 = vcombine.low %v2399_v6, %v2403_v46  ;;  %v14860_v6 = vld [vmem:[#allocation30_spill] sm:$0xff] }
 0x437   :  { %4227 = vmatprep.subr.bf16.mxu1 %v7531_v0  ;;  %3945 = vmatmul.mubr.bf16.gmra.mxu0 %v10423_v32  ;;  %v2531_v2 = vld [vmem:[#allocation2 + $0x768] sm:$0xff]  ;;  %v14857_v0 = vld [vmem:[#allocation26_spill] sm:$0xff] }
 0x438   :  { %4115 = vmatpush2.bf16.msra.mxu0 %v7402_v63  ;;  %3954 = vmatprep.mubr.bf16.mxu0 %v10431_v37  ;;  %v7515_v26 = vcombine.high %v2527_v34, %v2531_v2  ;;  %v2391_v45 = vld [vmem:[#allocation2 + $0x308] sm:$0xff]  ;;  %v7514_v55 = vcombine.low %v2527_v34, %v2531_v2  ;;  %v10467_v8 = vpack.c.bf16 %v14857_v0, %v10261_v33  ;;  %v14861_v46 = vld [vmem:[#allocation38_spill] sm:$0xff] }
 0x439   :  { %4058 = vmatmul.mubr.bf16.gmra.mxu1 %v10427_v36  ;;  %4116 = vmatprep.subr.bf16.mxu0 %v7395_v18  ;;  %v2395_v10 = vld [vmem:[#allocation2 + $0x328] sm:$0xff]  ;;  %v14859_v18 = vld [vmem:[#allocation35_spill] sm:$0xff]  ;;  %v10476_v34 = vpack.c.bf16 %v14861_v46, %v14860_v6 }
 0x43a   :  { %4228 = vmatpush2.bf16.msra.mxu1 %v7530_v17  ;;  %4067 = vmatprep.mubr.bf16.mxu1 %v10436_v44  ;;  %v2519_v14 = vld [vmem:[#allocation2 + $0x708] sm:$0xff]  ;;  %v7379_v4 = vcombine.high %v2391_v45, %v2395_v10  ;;  %v7378_v57 = vcombine.low %v2391_v45, %v2395_v10  ;;  %v14858_v17 = vld [vmem:[#allocation61_spill] sm:$0xff] }
 0x43b   :  { %4229 = vmatprep.subr.bf16.mxu1 %v7523_v24  ;;  %v2523_v27 = vld [vmem:[#allocation2 + $0x728] sm:$0xff]  ;;  %v10471_v24 = vpack.c.bf16 %v14859_v18, %v14858_v17  ;;  %v14867_v17 = vld [vmem:[#allocation66_spill] sm:$0xff]  ;;  %v2472_v18 = vld [vmem:[#allocation2 + $0x590] sm:$0xff] }
 0x43c   :  { %4117 = vmatpush2.bf16.msra.mxu0 %v7394_v25  ;;  %v7507_v1 = vcombine.high %v2519_v14, %v2523_v27  ;;  %v2383_v62 = vld [vmem:[#allocation2 + $0x2c8] sm:$0xff]  ;;  %v7506_v40 = vcombine.low %v2519_v14, %v2523_v27  ;;  %v14862_v14 = vld [vmem:[#allocation59_spill] sm:$0xff]  ;;  %v14863_v27 = vld [vmem:[#allocation33_spill] sm:$0xff] }
 0x43d   :  { %4118 = vmatprep.subr.bf16.mxu0 %v7387_v16  ;;  %v2387_v12 = vld [vmem:[#allocation2 + $0x2e8] sm:$0xff] }
 0x43e   :  { %4230 = vmatpush2.bf16.msra.mxu1 %v7522_v9  ;;  %v2511_v22 = vld [vmem:[#allocation2 + $0x6c8] sm:$0xff]  ;;  %v7371_v3 = vcombine.high %v2383_v62, %v2387_v12  ;;  %v7370_v49 = vcombine.low %v2383_v62, %v2387_v12 }
 0x43f   :  { %4231 = vmatprep.subr.bf16.mxu1 %v7515_v26  ;;  %3955 = vmatmul.mubr.bf16.gmra.mxu0 %v10443_v29  ;;  %v2515_v43 = vld [vmem:[#allocation2 + $0x6e8] sm:$0xff] }
 0x440   :  { %4119 = vmatpush2.bf16.msra.mxu0 %v7386_v15  ;;  %3964 = vmatprep.mubr.bf16.mxu0 %v10451_v42  ;;  %v7499_v13 = vcombine.high %v2511_v22, %v2515_v43  ;;  %v2375_v20 = vld [vmem:[#allocation2 + $0x288] sm:$0xff]  ;;  %v7498_v23 = vcombine.low %v2511_v22, %v2515_v43  ;;  %v10483_v15 = vpack.c.bf16 %v14863_v27, %v14862_v14  ;;  %v2328_v27 = vld [vmem:[#allocation2 + $0x110] sm:$0xff] }
 0x441   :  { %4068 = vmatmul.mubr.bf16.gmra.mxu1 %v10447_v58  ;;  %4120 = vmatprep.subr.bf16.mxu0 %v7379_v4  ;;  %v2379_v51 = vld [vmem:[#allocation2 + $0x2a8] sm:$0xff] }
 0x442   :  { %4232 = vmatpush2.bf16.msra.mxu1 %v7514_v55  ;;  %4077 = vmatprep.mubr.bf16.mxu1 %v10456_v28  ;;  %v2503_v56 = vld [vmem:[#allocation2 + $0x688] sm:$0xff]  ;;  %v7363_v59 = vcombine.high %v2375_v20, %v2379_v51  ;;  %v7362_v25 = vcombine.low %v2375_v20, %v2379_v51  ;;  %v2480_v20 = vld [vmem:[#allocation2 + $0x5d0] sm:$0xff] }
 0x443   :  { %4233 = vmatprep.subr.bf16.mxu1 %v7507_v1  ;;  %v2507_v48 = vld [vmem:[#allocation2 + $0x6a8] sm:$0xff]  ;;  %v14864_v1 = vld [vmem:[#allocation29_spill] sm:$0xff] }
 0x444   :  { %4121 = vmatpush2.bf16.msra.mxu0 %v7378_v57  ;;  %v7491_v63 = vcombine.high %v2503_v56, %v2507_v48  ;;  %v2367_v30 = vld [vmem:[#allocation2 + $0x248] sm:$0xff]  ;;  %v7490_v9 = vcombine.low %v2503_v56, %v2507_v48  ;;  %v2484_v51 = vld [vmem:[#allocation2 + $0x5f0] sm:$0xff] }
 0x445   :  { %4122 = vmatprep.subr.bf16.mxu0 %v7371_v3  ;;  %v2371_v41 = vld [vmem:[#allocation2 + $0x268] sm:$0xff]  ;;  %v2352_v3 = vld [vmem:[#allocation2 + $0x1d0] sm:$0xff]  ;;  %v7468_v6 = vcombine.low %v2480_v20, %v2484_v51 }
 0x446   :  { %4234 = vmatpush2.bf16.msra.mxu1 %v7506_v40  ;;  %v2495_v33 = vld [vmem:[#allocation2 + $0x648] sm:$0xff]  ;;  %v7355_v16 = vcombine.high %v2367_v30, %v2371_v41  ;;  %v7354_v22 = vcombine.low %v2367_v30, %v2371_v41  ;;  %v2476_v30 = vld [vmem:[#allocation2 + $0x5b0] sm:$0xff] }
 0x447   :  { %4235 = vmatprep.subr.bf16.mxu1 %v7499_v13  ;;  %3965 = vmatmul.mubr.bf16.gmra.mxu0 %v10463_v11  ;;  %v2499_v2 = vld [vmem:[#allocation2 + $0x668] sm:$0xff]  ;;  %v2356_v13 = vld [vmem:[#allocation2 + $0x1f0] sm:$0xff] }
 0x448   :  { %4123 = vmatpush2.bf16.msra.mxu0 %v7370_v49  ;;  %3974 = vmatprep.mubr.bf16.mxu0 %v10471_v24  ;;  %v7483_v26 = vcombine.high %v2495_v33, %v2499_v2  ;;  %v2359_v45 = vld [vmem:[#allocation2 + $0x208] sm:$0xff]  ;;  %v7482_v43 = vcombine.low %v2495_v33, %v2499_v2  ;;  %v7341_v0 = vcombine.high %v2352_v3, %v2356_v13  ;;  %v2336_v2 = vld [vmem:[#allocation2 + $0x150] sm:$0xff] }
 0x449   :  { %4078 = vmatmul.mubr.bf16.gmra.mxu1 %v10467_v8  ;;  %4124 = vmatprep.subr.bf16.mxu0 %v7363_v59  ;;  %v2363_v10 = vld [vmem:[#allocation2 + $0x228] sm:$0xff]  ;;  %v2344_v59 = vld [vmem:[#allocation2 + $0x190] sm:$0xff]  ;;  %v7340_v41 = vcombine.low %v2352_v3, %v2356_v13  ;;  %v7461_v33 = vcombine.high %v2472_v18, %v2476_v30 }
 0x44a   :  { %4236 = vmatpush2.bf16.msra.mxu1 %v7498_v23  ;;  %4087 = vmatprep.mubr.bf16.mxu1 %v10476_v34  ;;  %v2487_v55 = vld [vmem:[#allocation2 + $0x608] sm:$0xff]  ;;  %v7347_v57 = vcombine.high %v2359_v45, %v2363_v10  ;;  %v7346_v56 = vcombine.low %v2359_v45, %v2363_v10  ;;  %v7469_v23 = vcombine.high %v2480_v20, %v2484_v51  ;;  %v2320_v3 = vld [vmem:[#allocation2 + $0xd0] sm:$0xff] }
 0x44b   :  { %4237 = vmatprep.subr.bf16.mxu1 %v7491_v63  ;;  %v2491_v4 = vld [vmem:[#allocation2 + $0x628] sm:$0xff]  ;;  %v2348_v63 = vld [vmem:[#allocation2 + $0x1b0] sm:$0xff]  ;;  %v7460_v45 = vcombine.low %v2472_v18, %v2476_v30 }
 0x44c   :  { %4125 = vmatpush2.bf16.msra.mxu0 %v7362_v25  ;;  %v14865_v62 = vld [vmem:[#allocation36_spill] sm:$0xff]  ;;  %v7475_v40 = vcombine.high %v2487_v55, %v2491_v4  ;;  %v7474_v48 = vcombine.low %v2487_v55, %v2491_v4  ;;  %v7333_v46 = vcombine.high %v2344_v59, %v2348_v63  ;;  %v2340_v25 = vld [vmem:[#allocation2 + $0x170] sm:$0xff]  ;;  %v14868_v4 = vld [vmem:[#allocation67_spill] sm:$0xff] }
 0x44d   :  { %v10487_v12 = vpack.c.bf16 %v14865_v62, %v14864_v1  ;;  %4126 = vmatprep.subr.bf16.mxu0 %v7355_v16  ;;  %v14866_v49 = vld [vmem:[#allocation64_spill] sm:$0xff]  ;;  %v2468_v16 = vld [vmem:[#allocation2 + $0x570] sm:$0xff]  ;;  %v7325_v10 = vcombine.high %v2336_v2, %v2340_v25 }
 0x44e   :  { %4238 = vmatpush2.bf16.msra.mxu1 %v7490_v9  ;;  %v2464_v9 = vld [vmem:[#allocation2 + $0x550] sm:$0xff] }
 0x44f   :  { %4239 = vmatprep.subr.bf16.mxu1 %v7483_v26  ;;  %3975 = vmatmul.mubr.bf16.gmra.mxu0 %v10483_v15  ;;  %v7332_v26 = vcombine.low %v2344_v59, %v2348_v63  ;;  %v7453_v14 = vcombine.high %v2464_v9, %v2468_v16  ;;  %v2332_v55 = vld [vmem:[#allocation2 + $0x130] sm:$0xff] }
 0x450   :  { %4127 = vmatpush2.bf16.msra.mxu0 %v7354_v22  ;;  %4130 = vmatprep.mubr.bf16.mxu0 %v14866_v49  ;;  %v2456_v1 = vld [vmem:[#allocation2 + $0x510] sm:$0xff]  ;;  %v7324_v22 = vcombine.low %v2336_v2, %v2340_v25 }
 0x451   :  { %4088 = vmatmul.mubr.bf16.gmra.mxu1 %v10487_v12  ;;  %4128 = vmatprep.subr.bf16.mxu0 %v7347_v57  ;;  %v2460_v62 = vld [vmem:[#allocation2 + $0x530] sm:$0xff]  ;;  %v7317_v57 = vcombine.high %v2328_v27, %v2332_v55 }
 0x452   :  { %4240 = vmatpush2.bf16.msra.mxu1 %v7482_v43  ;;  %4243 = vmatprep.mubr.bf16.mxu1 %v14867_v17  ;;  %v7452_v43 = vcombine.low %v2464_v9, %v2468_v16  ;;  %v2324_v13 = vld [vmem:[#allocation2 + $0xf0] sm:$0xff] }
 0x453   :  { %4241 = vmatprep.subr.bf16.mxu1 %v7475_v40  ;;  %v7445_v40 = vcombine.high %v2456_v1, %v2460_v62  ;;  %v2448_v20 = vld [vmem:[#allocation2 + $0x4d0] sm:$0xff] }
 0x454   :  { %4129 = vmatpush2.bf16.msra.mxu0 %v7346_v56  ;;  %v2452_v51 = vld [vmem:[#allocation2 + $0x4f0] sm:$0xff]  ;;  %v7316_v56 = vcombine.low %v2328_v27, %v2332_v55 }
 0x455   :  { %4324 = vmatprep.subr.bf16.mxu0 %v7341_v0  ;;  %v7309_v0 = vcombine.high %v2320_v3, %v2324_v13  ;;  %v2312_v59 = vld [vmem:[#allocation2 + $0x90] sm:$0xff] }
 0x456   :  { %4242 = vmatpush2.bf16.msra.mxu1 %v7474_v48  ;;  %v7444_v48 = vcombine.low %v2456_v1, %v2460_v62  ;;  %v2316_v63 = vld [vmem:[#allocation2 + $0xb0] sm:$0xff] }
 0x457   :  { %4437 = vmatprep.subr.bf16.mxu1 %v7469_v23  ;;  %4131 = vmatmul.mubr.bf16.vlgmr.msra.gmra.mxu0 %v10343_v35  ;;  %v7437_v23 = vcombine.high %v2448_v20, %v2452_v51  ;;  %v2440_v18 = vld [vmem:[#allocation2 + $0x490] sm:$0xff] }
 0x458   :  { %4325 = vmatpush1.bf16.msra.mxu0 %v7340_v41  ;;  %4140 = vmatprep.mubr.bf16.mxu0 %v10351_v38  ;;  %v2444_v30 = vld [vmem:[#allocation2 + $0x4b0] sm:$0xff]  ;;  %v7308_v41 = vcombine.low %v2320_v3, %v2324_v13 }
 0x459   :  { %4244 = vmatmul.mubr.bf16.vlgmr.msra.gmra.mxu1 %v10347_v50  ;;  %4326 = vmatprep.subr.bf16.mxu0 %v7333_v46  ;;  %v7301_v46 = vcombine.high %v2312_v59, %v2316_v63  ;;  %v2304_v2 = vld [vmem:[#allocation2 + $0x50] sm:$0xff] }
 0x45a   :  { %4438 = vmatpush1.bf16.msra.mxu1 %v7468_v6  ;;  %4253 = vmatprep.mubr.bf16.mxu1 %v14868_v4  ;;  %v7436_v6 = vcombine.low %v2448_v20, %v2452_v51  ;;  %v2308_v25 = vld [vmem:[#allocation2 + $0x70] sm:$0xff] }
 0x45b   :  { %4439 = vmatprep.subr.bf16.mxu1 %v7461_v33  ;;  %v7429_v33 = vcombine.high %v2440_v18, %v2444_v30  ;;  %v2432_v9 = vld [vmem:[#allocation2 + $0x450] sm:$0xff] }
 0x45c   :  { %4327 = vmatpush1.bf16.msra.mxu0 %v7332_v26  ;;  %v2436_v16 = vld [vmem:[#allocation2 + $0x470] sm:$0xff]  ;;  %v7300_v26 = vcombine.low %v2312_v59, %v2316_v63 }
 0x45d   :  { %4328 = vmatprep.subr.bf16.mxu0 %v7325_v10  ;;  %v7293_v10 = vcombine.high %v2304_v2, %v2308_v25  ;;  %v2296_v27 = vld [vmem:[#allocation2 + $0x10] sm:$0xff] }
 0x45e   :  { %4440 = vmatpush1.bf16.msra.mxu1 %v7460_v45  ;;  %v7428_v45 = vcombine.low %v2440_v18, %v2444_v30  ;;  %v2300_v55 = vld [vmem:[#allocation2 + $0x30] sm:$0xff] }
 0x45f   :  { %4441 = vmatprep.subr.bf16.mxu1 %v7453_v14  ;;  %4141 = vmatmul.mubr.bf16.gmra.mxu0 %v10363_v31  ;;  %v7421_v14 = vcombine.high %v2432_v9, %v2436_v16  ;;  %v2424_v1 = vld [vmem:[#allocation2 + $0x410] sm:$0xff] }
 0x460   :  { %4329 = vmatpush1.bf16.msra.mxu0 %v7324_v22  ;;  %4150 = vmatprep.mubr.bf16.mxu0 %v10371_v60  ;;  %v2428_v62 = vld [vmem:[#allocation2 + $0x430] sm:$0xff]  ;;  %v7292_v22 = vcombine.low %v2304_v2, %v2308_v25 }
 0x461   :  { %4254 = vmatmul.mubr.bf16.gmra.mxu1 %v10367_v5  ;;  %4330 = vmatprep.subr.bf16.mxu0 %v7317_v57  ;;  %v7285_v57 = vcombine.high %v2296_v27, %v2300_v55  ;;  %v2416_v3 = vld [vmem:[#allocation2 + $0x3d0] sm:$0xff] }
 0x462   :  { %4442 = vmatpush1.bf16.msra.mxu1 %v7452_v43  ;;  %4263 = vmatprep.mubr.bf16.mxu1 %v10376_v52  ;;  %v7420_v43 = vcombine.low %v2432_v9, %v2436_v16  ;;  %v2420_v13 = vld [vmem:[#allocation2 + $0x3f0] sm:$0xff] }
 0x463   :  { %4443 = vmatprep.subr.bf16.mxu1 %v7445_v40  ;;  %v7413_v40 = vcombine.high %v2424_v1, %v2428_v62  ;;  %v2544_v20 = vld [vmem:[#allocation2 + $0x7d0] sm:$0xff] }
 0x464   :  { %4331 = vmatpush1.bf16.msra.mxu0 %v7316_v56  ;;  %v2548_v51 = vld [vmem:[#allocation2 + $0x7f0] sm:$0xff]  ;;  %v7284_v56 = vcombine.low %v2296_v27, %v2300_v55 }
 0x465   :  { %4332 = vmatprep.subr.bf16.mxu0 %v7309_v0  ;;  %v7405_v0 = vcombine.high %v2416_v3, %v2420_v13  ;;  %v2408_v59 = vld [vmem:[#allocation2 + $0x390] sm:$0xff] }
 0x466   :  { %4444 = vmatpush1.bf16.msra.mxu1 %v7444_v48  ;;  %v7412_v48 = vcombine.low %v2424_v1, %v2428_v62  ;;  %v2412_v63 = vld [vmem:[#allocation2 + $0x3b0] sm:$0xff] }
 0x467   :  { %4445 = vmatprep.subr.bf16.mxu1 %v7437_v23  ;;  %4151 = vmatmul.mubr.bf16.gmra.mxu0 %v10383_v54  ;;  %v7533_v23 = vcombine.high %v2544_v20, %v2548_v51  ;;  %v2536_v18 = vld [vmem:[#allocation2 + $0x790] sm:$0xff] }
 0x468   :  { %4333 = vmatpush1.bf16.msra.mxu0 %v7308_v41  ;;  %4160 = vmatprep.mubr.bf16.mxu0 %v10391_v7  ;;  %v2540_v30 = vld [vmem:[#allocation2 + $0x7b0] sm:$0xff]  ;;  %v7404_v41 = vcombine.low %v2416_v3, %v2420_v13 }
 0x469   :  { %4264 = vmatmul.mubr.bf16.gmra.mxu1 %v10387_v21  ;;  %4334 = vmatprep.subr.bf16.mxu0 %v7301_v46  ;;  %v7397_v46 = vcombine.high %v2408_v59, %v2412_v63  ;;  %v2400_v2 = vld [vmem:[#allocation2 + $0x350] sm:$0xff] }
 0x46a   :  { %4446 = vmatpush1.bf16.msra.mxu1 %v7436_v6  ;;  %4273 = vmatprep.mubr.bf16.mxu1 %v10396_v19  ;;  %v7532_v6 = vcombine.low %v2544_v20, %v2548_v51  ;;  %v2404_v25 = vld [vmem:[#allocation2 + $0x370] sm:$0xff] }
 0x46b   :  { %4447 = vmatprep.subr.bf16.mxu1 %v7429_v33  ;;  %v7525_v33 = vcombine.high %v2536_v18, %v2540_v30  ;;  %v2528_v9 = vld [vmem:[#allocation2 + $0x750] sm:$0xff] }
 0x46c   :  { %4335 = vmatpush1.bf16.msra.mxu0 %v7300_v26  ;;  %v2532_v16 = vld [vmem:[#allocation2 + $0x770] sm:$0xff]  ;;  %v7396_v26 = vcombine.low %v2408_v59, %v2412_v63 }
 0x46d   :  { %4336 = vmatprep.subr.bf16.mxu0 %v7293_v10  ;;  %v7389_v10 = vcombine.high %v2400_v2, %v2404_v25  ;;  %v2392_v27 = vld [vmem:[#allocation2 + $0x310] sm:$0xff] }
 0x46e   :  { %4448 = vmatpush1.bf16.msra.mxu1 %v7428_v45  ;;  %v7524_v45 = vcombine.low %v2536_v18, %v2540_v30  ;;  %v2396_v55 = vld [vmem:[#allocation2 + $0x330] sm:$0xff] }
 0x46f   :  { %4449 = vmatprep.subr.bf16.mxu1 %v7421_v14  ;;  %4161 = vmatmul.mubr.bf16.gmra.mxu0 %v10403_v61  ;;  %v7517_v14 = vcombine.high %v2528_v9, %v2532_v16  ;;  %v2520_v1 = vld [vmem:[#allocation2 + $0x710] sm:$0xff] }
 0x470   :  { %4337 = vmatpush1.bf16.msra.mxu0 %v7292_v22  ;;  %4170 = vmatprep.mubr.bf16.mxu0 %v10411_v53  ;;  %v2524_v62 = vld [vmem:[#allocation2 + $0x730] sm:$0xff]  ;;  %v7388_v22 = vcombine.low %v2400_v2, %v2404_v25 }
 0x471   :  { %4274 = vmatmul.mubr.bf16.gmra.mxu1 %v10407_v47  ;;  %4338 = vmatprep.subr.bf16.mxu0 %v7285_v57  ;;  %v7381_v57 = vcombine.high %v2392_v27, %v2396_v55  ;;  %v2384_v3 = vld [vmem:[#allocation2 + $0x2d0] sm:$0xff] }
 0x472   :  { %4450 = vmatpush1.bf16.msra.mxu1 %v7420_v43  ;;  %4283 = vmatprep.mubr.bf16.mxu1 %v10416_v39  ;;  %v7516_v43 = vcombine.low %v2528_v9, %v2532_v16  ;;  %v2388_v13 = vld [vmem:[#allocation2 + $0x2f0] sm:$0xff] }
 0x473   :  { %4451 = vmatprep.subr.bf16.mxu1 %v7413_v40  ;;  %v7509_v40 = vcombine.high %v2520_v1, %v2524_v62  ;;  %v2512_v20 = vld [vmem:[#allocation2 + $0x6d0] sm:$0xff] }
 0x474   :  { %4339 = vmatpush1.bf16.msra.mxu0 %v7284_v56  ;;  %v2516_v51 = vld [vmem:[#allocation2 + $0x6f0] sm:$0xff]  ;;  %v7380_v56 = vcombine.low %v2392_v27, %v2396_v55 }
 0x475   :  { %4340 = vmatprep.subr.bf16.mxu0 %v7405_v0  ;;  %v7373_v0 = vcombine.high %v2384_v3, %v2388_v13  ;;  %v2376_v59 = vld [vmem:[#allocation2 + $0x290] sm:$0xff] }
 0x476   :  { %4452 = vmatpush1.bf16.msra.mxu1 %v7412_v48  ;;  %v7508_v48 = vcombine.low %v2520_v1, %v2524_v62  ;;  %v2380_v63 = vld [vmem:[#allocation2 + $0x2b0] sm:$0xff] }
 0x477   :  { %4453 = vmatprep.subr.bf16.mxu1 %v7533_v23  ;;  %4171 = vmatmul.mubr.bf16.gmra.mxu0 %v10423_v32  ;;  %v7501_v23 = vcombine.high %v2512_v20, %v2516_v51  ;;  %v2504_v18 = vld [vmem:[#allocation2 + $0x690] sm:$0xff] }
 0x478   :  { %4341 = vmatpush2.bf16.msra.mxu0 %v7404_v41  ;;  %4180 = vmatprep.mubr.bf16.mxu0 %v10431_v37  ;;  %v2508_v30 = vld [vmem:[#allocation2 + $0x6b0] sm:$0xff]  ;;  %v7372_v41 = vcombine.low %v2384_v3, %v2388_v13  ;;  %v2353_v3 = vld [vmem:[#allocation2 + $0x1d8] sm:$0xff] }
 0x479   :  { %4284 = vmatmul.mubr.bf16.gmra.mxu1 %v10427_v36  ;;  %4342 = vmatprep.subr.bf16.mxu0 %v7397_v46  ;;  %v7365_v46 = vcombine.high %v2376_v59, %v2380_v63  ;;  %v2368_v2 = vld [vmem:[#allocation2 + $0x250] sm:$0xff]  ;;  %v2357_v13 = vld [vmem:[#allocation2 + $0x1f8] sm:$0xff] }
 0x47a   :  { %4454 = vmatpush2.bf16.msra.mxu1 %v7532_v6  ;;  %4293 = vmatprep.mubr.bf16.mxu1 %v10436_v44  ;;  %v7500_v6 = vcombine.low %v2512_v20, %v2516_v51  ;;  %v2372_v25 = vld [vmem:[#allocation2 + $0x270] sm:$0xff]  ;;  %v2481_v20 = vld [vmem:[#allocation2 + $0x5d8] sm:$0xff] }
 0x47b   :  { %4455 = vmatprep.subr.bf16.mxu1 %v7525_v33  ;;  %v7493_v33 = vcombine.high %v2504_v18, %v2508_v30  ;;  %v2496_v9 = vld [vmem:[#allocation2 + $0x650] sm:$0xff]  ;;  %v2485_v51 = vld [vmem:[#allocation2 + $0x5f8] sm:$0xff] }
 0x47c   :  { %4343 = vmatpush2.bf16.msra.mxu0 %v7396_v26  ;;  %v2500_v16 = vld [vmem:[#allocation2 + $0x670] sm:$0xff]  ;;  %v7364_v26 = vcombine.low %v2376_v59, %v2380_v63  ;;  %v2345_v59 = vld [vmem:[#allocation2 + $0x198] sm:$0xff] }
 0x47d   :  { %4344 = vmatprep.subr.bf16.mxu0 %v7389_v10  ;;  %v7357_v10 = vcombine.high %v2368_v2, %v2372_v25  ;;  %v2360_v27 = vld [vmem:[#allocation2 + $0x210] sm:$0xff]  ;;  %v2349_v63 = vld [vmem:[#allocation2 + $0x1b8] sm:$0xff] }
 0x47e   :  { %4456 = vmatpush2.bf16.msra.mxu1 %v7524_v45  ;;  %v7492_v45 = vcombine.low %v2504_v18, %v2508_v30  ;;  %v2364_v55 = vld [vmem:[#allocation2 + $0x230] sm:$0xff]  ;;  %v2473_v18 = vld [vmem:[#allocation2 + $0x598] sm:$0xff] }
 0x47f   :  { %4457 = vmatprep.subr.bf16.mxu1 %v7517_v14  ;;  %4181 = vmatmul.mubr.bf16.gmra.mxu0 %v10443_v29  ;;  %v7485_v14 = vcombine.high %v2496_v9, %v2500_v16  ;;  %v2488_v1 = vld [vmem:[#allocation2 + $0x610] sm:$0xff]  ;;  %v2477_v30 = vld [vmem:[#allocation2 + $0x5b8] sm:$0xff] }
 0x480   :  { %4345 = vmatpush2.bf16.msra.mxu0 %v7388_v22  ;;  %4190 = vmatprep.mubr.bf16.mxu0 %v10451_v42  ;;  %v2492_v62 = vld [vmem:[#allocation2 + $0x630] sm:$0xff]  ;;  %v7356_v22 = vcombine.low %v2368_v2, %v2372_v25  ;;  %v2337_v2 = vld [vmem:[#allocation2 + $0x158] sm:$0xff] }
 0x481   :  { %4294 = vmatmul.mubr.bf16.gmra.mxu1 %v10447_v58  ;;  %4346 = vmatprep.subr.bf16.mxu0 %v7381_v57  ;;  %v7349_v57 = vcombine.high %v2360_v27, %v2364_v55  ;;  %v2341_v25 = vld [vmem:[#allocation2 + $0x178] sm:$0xff] }
 0x482   :  { %4458 = vmatpush2.bf16.msra.mxu1 %v7516_v43  ;;  %4303 = vmatprep.mubr.bf16.mxu1 %v10456_v28  ;;  %v7484_v43 = vcombine.low %v2496_v9, %v2500_v16  ;;  %v2465_v9 = vld [vmem:[#allocation2 + $0x558] sm:$0xff] }
 0x483   :  { %4459 = vmatprep.subr.bf16.mxu1 %v7509_v40  ;;  %v7477_v40 = vcombine.high %v2488_v1, %v2492_v62  ;;  %v2469_v16 = vld [vmem:[#allocation2 + $0x578] sm:$0xff] }
 0x484   :  { %4347 = vmatpush2.bf16.msra.mxu0 %v7380_v56  ;;  %v7348_v56 = vcombine.low %v2360_v27, %v2364_v55  ;;  %v2329_v27 = vld [vmem:[#allocation2 + $0x118] sm:$0xff] }
 0x485   :  { %4348 = vmatprep.subr.bf16.mxu0 %v7373_v0  ;;  %v7343_v0 = vcombine.high %v2353_v3, %v2357_v13  ;;  %v2333_v55 = vld [vmem:[#allocation2 + $0x138] sm:$0xff] }
 0x486   :  { %4460 = vmatpush2.bf16.msra.mxu1 %v7508_v48  ;;  %v7476_v48 = vcombine.low %v2488_v1, %v2492_v62  ;;  %v2457_v1 = vld [vmem:[#allocation2 + $0x518] sm:$0xff] }
 0x487   :  { %4461 = vmatprep.subr.bf16.mxu1 %v7501_v23  ;;  %4191 = vmatmul.mubr.bf16.gmra.mxu0 %v10463_v11  ;;  %v7471_v23 = vcombine.high %v2481_v20, %v2485_v51  ;;  %v2461_v62 = vld [vmem:[#allocation2 + $0x538] sm:$0xff] }
 0x488   :  { %4349 = vmatpush2.bf16.msra.mxu0 %v7372_v41  ;;  %4200 = vmatprep.mubr.bf16.mxu0 %v10471_v24  ;;  %v7342_v41 = vcombine.low %v2353_v3, %v2357_v13  ;;  %v2321_v3 = vld [vmem:[#allocation2 + $0xd8] sm:$0xff] }
 0x489   :  { %4304 = vmatmul.mubr.bf16.gmra.mxu1 %v10467_v8  ;;  %4350 = vmatprep.subr.bf16.mxu0 %v7365_v46  ;;  %v7335_v46 = vcombine.high %v2345_v59, %v2349_v63  ;;  %v2325_v13 = vld [vmem:[#allocation2 + $0xf8] sm:$0xff] }
 0x48a   :  { %4462 = vmatpush2.bf16.msra.mxu1 %v7500_v6  ;;  %4313 = vmatprep.mubr.bf16.mxu1 %v10476_v34  ;;  %v7470_v6 = vcombine.low %v2481_v20, %v2485_v51  ;;  %v2449_v20 = vld [vmem:[#allocation2 + $0x4d8] sm:$0xff] }
 0x48b   :  { %4463 = vmatprep.subr.bf16.mxu1 %v7493_v33  ;;  %v7463_v33 = vcombine.high %v2473_v18, %v2477_v30  ;;  %v2453_v51 = vld [vmem:[#allocation2 + $0x4f8] sm:$0xff] }
 0x48c   :  { %4351 = vmatpush2.bf16.msra.mxu0 %v7364_v26  ;;  %v7334_v26 = vcombine.low %v2345_v59, %v2349_v63  ;;  %v2313_v59 = vld [vmem:[#allocation2 + $0x98] sm:$0xff] }
 0x48d   :  { %4352 = vmatprep.subr.bf16.mxu0 %v7357_v10  ;;  %v7327_v10 = vcombine.high %v2337_v2, %v2341_v25  ;;  %v2317_v63 = vld [vmem:[#allocation2 + $0xb8] sm:$0xff] }
 0x48e   :  { %4464 = vmatpush2.bf16.msra.mxu1 %v7492_v45  ;;  %v7462_v45 = vcombine.low %v2473_v18, %v2477_v30  ;;  %v2441_v18 = vld [vmem:[#allocation2 + $0x498] sm:$0xff] }
 0x48f   :  { %4465 = vmatprep.subr.bf16.mxu1 %v7485_v14  ;;  %4201 = vmatmul.mubr.bf16.gmra.mxu0 %v10483_v15  ;;  %v7455_v14 = vcombine.high %v2465_v9, %v2469_v16  ;;  %v2445_v30 = vld [vmem:[#allocation2 + $0x4b8] sm:$0xff] }
 0x490   :  { %4353 = vmatpush2.bf16.msra.mxu0 %v7356_v22  ;;  %4356 = vmatprep.mubr.bf16.mxu0 %v14866_v49  ;;  %v7326_v22 = vcombine.low %v2337_v2, %v2341_v25  ;;  %v2305_v2 = vld [vmem:[#allocation2 + $0x58] sm:$0xff] }
 0x491   :  { %4314 = vmatmul.mubr.bf16.gmra.mxu1 %v10487_v12  ;;  %4354 = vmatprep.subr.bf16.mxu0 %v7349_v57  ;;  %v7319_v57 = vcombine.high %v2329_v27, %v2333_v55  ;;  %v2309_v25 = vld [vmem:[#allocation2 + $0x78] sm:$0xff] }
 0x492   :  { %4466 = vmatpush2.bf16.msra.mxu1 %v7484_v43  ;;  %4469 = vmatprep.mubr.bf16.mxu1 %v14867_v17  ;;  %v7454_v43 = vcombine.low %v2465_v9, %v2469_v16  ;;  %v2433_v9 = vld [vmem:[#allocation2 + $0x458] sm:$0xff] }
 0x493   :  { %4467 = vmatprep.subr.bf16.mxu1 %v7477_v40  ;;  %v7447_v40 = vcombine.high %v2457_v1, %v2461_v62  ;;  %v2437_v16 = vld [vmem:[#allocation2 + $0x478] sm:$0xff] }
 0x494   :  { %4355 = vmatpush2.bf16.msra.mxu0 %v7348_v56  ;;  %v7318_v56 = vcombine.low %v2329_v27, %v2333_v55  ;;  %v2297_v27 = vld [vmem:[#allocation2 + $0x18] sm:$0xff] }
 0x495   :  { %4550 = vmatprep.subr.bf16.mxu0 %v7343_v0  ;;  %v7311_v0 = vcombine.high %v2321_v3, %v2325_v13  ;;  %v2301_v55 = vld [vmem:[#allocation2 + $0x38] sm:$0xff] }
 0x496   :  { %4468 = vmatpush2.bf16.msra.mxu1 %v7476_v48  ;;  %v7446_v48 = vcombine.low %v2457_v1, %v2461_v62  ;;  %v2425_v1 = vld [vmem:[#allocation2 + $0x418] sm:$0xff] }
 0x497   :  { %4663 = vmatprep.subr.bf16.mxu1 %v7471_v23  ;;  %4357 = vmatmul.mubr.bf16.vlgmr.msra.gmra.mxu0 %v10343_v35  ;;  %v7439_v23 = vcombine.high %v2449_v20, %v2453_v51  ;;  %v2429_v62 = vld [vmem:[#allocation2 + $0x438] sm:$0xff] }
 0x498   :  { %4551 = vmatpush1.bf16.msra.mxu0 %v7342_v41  ;;  %4366 = vmatprep.mubr.bf16.mxu0 %v10351_v38  ;;  %v7310_v41 = vcombine.low %v2321_v3, %v2325_v13  ;;  %v2417_v3 = vld [vmem:[#allocation2 + $0x3d8] sm:$0xff] }
 0x499   :  { %4470 = vmatmul.mubr.bf16.vlgmr.msra.gmra.mxu1 %v10347_v50  ;;  %4552 = vmatprep.subr.bf16.mxu0 %v7335_v46  ;;  %v7303_v46 = vcombine.high %v2313_v59, %v2317_v63  ;;  %v2421_v13 = vld [vmem:[#allocation2 + $0x3f8] sm:$0xff] }
 0x49a   :  { %4664 = vmatpush1.bf16.msra.mxu1 %v7470_v6  ;;  %4479 = vmatprep.mubr.bf16.mxu1 %v14868_v4  ;;  %v7438_v6 = vcombine.low %v2449_v20, %v2453_v51  ;;  %v2545_v20 = vld [vmem:[#allocation2 + $0x7d8] sm:$0xff] }
 0x49b   :  { %4665 = vmatprep.subr.bf16.mxu1 %v7463_v33  ;;  %v7431_v33 = vcombine.high %v2441_v18, %v2445_v30  ;;  %v2549_v51 = vld [vmem:[#allocation2 + $0x7f8] sm:$0xff] }
 0x49c   :  { %4553 = vmatpush1.bf16.msra.mxu0 %v7334_v26  ;;  %v7302_v26 = vcombine.low %v2313_v59, %v2317_v63  ;;  %v2409_v59 = vld [vmem:[#allocation2 + $0x398] sm:$0xff] }
 0x49d   :  { %4554 = vmatprep.subr.bf16.mxu0 %v7327_v10  ;;  %v7295_v10 = vcombine.high %v2305_v2, %v2309_v25  ;;  %v2413_v63 = vld [vmem:[#allocation2 + $0x3b8] sm:$0xff] }
 0x49e   :  { %4666 = vmatpush1.bf16.msra.mxu1 %v7462_v45  ;;  %v7430_v45 = vcombine.low %v2441_v18, %v2445_v30  ;;  %v2537_v18 = vld [vmem:[#allocation2 + $0x798] sm:$0xff] }
 0x49f   :  { %4667 = vmatprep.subr.bf16.mxu1 %v7455_v14  ;;  %4367 = vmatmul.mubr.bf16.gmra.mxu0 %v10363_v31  ;;  %v7423_v14 = vcombine.high %v2433_v9, %v2437_v16  ;;  %v2541_v30 = vld [vmem:[#allocation2 + $0x7b8] sm:$0xff] }
 0x4a0   :  { %4555 = vmatpush1.bf16.msra.mxu0 %v7326_v22  ;;  %4376 = vmatprep.mubr.bf16.mxu0 %v10371_v60  ;;  %v7294_v22 = vcombine.low %v2305_v2, %v2309_v25  ;;  %v2401_v2 = vld [vmem:[#allocation2 + $0x358] sm:$0xff] }
 0x4a1   :  { %4480 = vmatmul.mubr.bf16.gmra.mxu1 %v10367_v5  ;;  %4556 = vmatprep.subr.bf16.mxu0 %v7319_v57  ;;  %v7287_v57 = vcombine.high %v2297_v27, %v2301_v55  ;;  %v2405_v25 = vld [vmem:[#allocation2 + $0x378] sm:$0xff] }
 0x4a2   :  { %4668 = vmatpush1.bf16.msra.mxu1 %v7454_v43  ;;  %4489 = vmatprep.mubr.bf16.mxu1 %v10376_v52  ;;  %v7422_v43 = vcombine.low %v2433_v9, %v2437_v16  ;;  %v2529_v9 = vld [vmem:[#allocation2 + $0x758] sm:$0xff] }
 0x4a3   :  { %4669 = vmatprep.subr.bf16.mxu1 %v7447_v40  ;;  %v7415_v40 = vcombine.high %v2425_v1, %v2429_v62  ;;  %v2533_v16 = vld [vmem:[#allocation2 + $0x778] sm:$0xff] }
 0x4a4   :  { %4557 = vmatpush1.bf16.msra.mxu0 %v7318_v56  ;;  %v7286_v56 = vcombine.low %v2297_v27, %v2301_v55  ;;  %v2393_v27 = vld [vmem:[#allocation2 + $0x318] sm:$0xff] }
 0x4a5   :  { %4558 = vmatprep.subr.bf16.mxu0 %v7311_v0  ;;  %v7407_v0 = vcombine.high %v2417_v3, %v2421_v13  ;;  %v2397_v55 = vld [vmem:[#allocation2 + $0x338] sm:$0xff] }
 0x4a6   :  { %4670 = vmatpush1.bf16.msra.mxu1 %v7446_v48  ;;  %v7414_v48 = vcombine.low %v2425_v1, %v2429_v62  ;;  %v2521_v1 = vld [vmem:[#allocation2 + $0x718] sm:$0xff] }
 0x4a7   :  { %4671 = vmatprep.subr.bf16.mxu1 %v7439_v23  ;;  %4377 = vmatmul.mubr.bf16.gmra.mxu0 %v10383_v54  ;;  %v7535_v23 = vcombine.high %v2545_v20, %v2549_v51  ;;  %v2525_v62 = vld [vmem:[#allocation2 + $0x738] sm:$0xff] }
 0x4a8   :  { %4559 = vmatpush1.bf16.msra.mxu0 %v7310_v41  ;;  %4386 = vmatprep.mubr.bf16.mxu0 %v10391_v7  ;;  %v7406_v41 = vcombine.low %v2417_v3, %v2421_v13  ;;  %v2385_v3 = vld [vmem:[#allocation2 + $0x2d8] sm:$0xff] }
 0x4a9   :  { %4490 = vmatmul.mubr.bf16.gmra.mxu1 %v10387_v21  ;;  %4560 = vmatprep.subr.bf16.mxu0 %v7303_v46  ;;  %v7399_v46 = vcombine.high %v2409_v59, %v2413_v63  ;;  %v2389_v13 = vld [vmem:[#allocation2 + $0x2f8] sm:$0xff] }
 0x4aa   :  { %4672 = vmatpush1.bf16.msra.mxu1 %v7438_v6  ;;  %4499 = vmatprep.mubr.bf16.mxu1 %v10396_v19  ;;  %v7534_v6 = vcombine.low %v2545_v20, %v2549_v51  ;;  %v2513_v20 = vld [vmem:[#allocation2 + $0x6d8] sm:$0xff] }
 0x4ab   :  { %4673 = vmatprep.subr.bf16.mxu1 %v7431_v33  ;;  %v7527_v33 = vcombine.high %v2537_v18, %v2541_v30  ;;  %v2517_v51 = vld [vmem:[#allocation2 + $0x6f8] sm:$0xff] }
 0x4ac   :  { %4561 = vmatpush1.bf16.msra.mxu0 %v7302_v26  ;;  %v7398_v26 = vcombine.low %v2409_v59, %v2413_v63  ;;  %v2377_v59 = vld [vmem:[#allocation2 + $0x298] sm:$0xff] }
 0x4ad   :  { %4562 = vmatprep.subr.bf16.mxu0 %v7295_v10  ;;  %v7391_v10 = vcombine.high %v2401_v2, %v2405_v25  ;;  %v2381_v63 = vld [vmem:[#allocation2 + $0x2b8] sm:$0xff] }
 0x4ae   :  { %4674 = vmatpush1.bf16.msra.mxu1 %v7430_v45  ;;  %v7526_v45 = vcombine.low %v2537_v18, %v2541_v30  ;;  %v2505_v18 = vld [vmem:[#allocation2 + $0x698] sm:$0xff] }
 0x4af   :  { %4675 = vmatprep.subr.bf16.mxu1 %v7423_v14  ;;  %4387 = vmatmul.mubr.bf16.gmra.mxu0 %v10403_v61  ;;  %v7519_v14 = vcombine.high %v2529_v9, %v2533_v16  ;;  %v2509_v30 = vld [vmem:[#allocation2 + $0x6b8] sm:$0xff] }
 0x4b0   :  { %4563 = vmatpush1.bf16.msra.mxu0 %v7294_v22  ;;  %4396 = vmatprep.mubr.bf16.mxu0 %v10411_v53  ;;  %v7390_v22 = vcombine.low %v2401_v2, %v2405_v25  ;;  %v2369_v2 = vld [vmem:[#allocation2 + $0x258] sm:$0xff] }
 0x4b1   :  { %4500 = vmatmul.mubr.bf16.gmra.mxu1 %v10407_v47  ;;  %4564 = vmatprep.subr.bf16.mxu0 %v7287_v57  ;;  %v7383_v57 = vcombine.high %v2393_v27, %v2397_v55  ;;  %v2373_v25 = vld [vmem:[#allocation2 + $0x278] sm:$0xff] }
 0x4b2   :  { %4676 = vmatpush1.bf16.msra.mxu1 %v7422_v43  ;;  %4509 = vmatprep.mubr.bf16.mxu1 %v10416_v39  ;;  %v7518_v43 = vcombine.low %v2529_v9, %v2533_v16  ;;  %v2497_v9 = vld [vmem:[#allocation2 + $0x658] sm:$0xff] }
 0x4b3   :  { %4677 = vmatprep.subr.bf16.mxu1 %v7415_v40  ;;  %v7511_v40 = vcombine.high %v2521_v1, %v2525_v62  ;;  %v2501_v16 = vld [vmem:[#allocation2 + $0x678] sm:$0xff] }
 0x4b4   :  { %4565 = vmatpush1.bf16.msra.mxu0 %v7286_v56  ;;  %v7382_v56 = vcombine.low %v2393_v27, %v2397_v55  ;;  %v2361_v27 = vld [vmem:[#allocation2 + $0x218] sm:$0xff] }
 0x4b5   :  { %4566 = vmatprep.subr.bf16.mxu0 %v7407_v0  ;;  %v7375_v0 = vcombine.high %v2385_v3, %v2389_v13  ;;  %v2365_v55 = vld [vmem:[#allocation2 + $0x238] sm:$0xff] }
 0x4b6   :  { %4678 = vmatpush1.bf16.msra.mxu1 %v7414_v48  ;;  %v7510_v48 = vcombine.low %v2521_v1, %v2525_v62  ;;  %v2489_v1 = vld [vmem:[#allocation2 + $0x618] sm:$0xff] }
 0x4b7   :  { %4679 = vmatprep.subr.bf16.mxu1 %v7535_v23  ;;  %4397 = vmatmul.mubr.bf16.gmra.mxu0 %v10423_v32  ;;  %v7503_v23 = vcombine.high %v2513_v20, %v2517_v51  ;;  %v2493_v62 = vld [vmem:[#allocation2 + $0x638] sm:$0xff] }
 0x4b8   :  { %4567 = vmatpush2.bf16.msra.mxu0 %v7406_v41  ;;  %4406 = vmatprep.mubr.bf16.mxu0 %v10431_v37  ;;  %v7374_v41 = vcombine.low %v2385_v3, %v2389_v13  ;;  %v7350_v3 = vcombine.low %v2361_v27, %v2365_v55  ;;  %v7478_v13 = vcombine.low %v2489_v1, %v2493_v62 }
 0x4b9   :  { %4510 = vmatmul.mubr.bf16.gmra.mxu1 %v10427_v36  ;;  %4568 = vmatprep.subr.bf16.mxu0 %v7399_v46  ;;  %v7367_v46 = vcombine.high %v2377_v59, %v2381_v63 }
 0x4ba   :  { %4680 = vmatpush2.bf16.msra.mxu1 %v7534_v6  ;;  %4519 = vmatprep.mubr.bf16.mxu1 %v10436_v44  ;;  %v7502_v6 = vcombine.low %v2513_v20, %v2517_v51  ;;  %v10558_v20 = vld [vmem:[%s14273_s6 + $0x14] sm:$0xff]  ;;  %v14869_v51 = vld [vmem:[#allocation20_spill] sm:$0xff] }
 0x4bb   :  { %4681 = vmatprep.subr.bf16.mxu1 %v7527_v33  ;;  %v7495_v33 = vcombine.high %v2505_v18, %v2509_v30 }
 0x4bc   :  { %4569 = vmatpush2.bf16.msra.mxu0 %v7398_v26  ;;  %v7366_v26 = vcombine.low %v2377_v59, %v2381_v63 }
 0x4bd   :  { %4570 = vmatprep.subr.bf16.mxu0 %v7391_v10  ;;  %v7359_v10 = vcombine.high %v2369_v2, %v2373_v25 }
 0x4be   :  { %4682 = vmatpush2.bf16.msra.mxu1 %v7526_v45  ;;  %v7494_v45 = vcombine.low %v2505_v18, %v2509_v30 }
 0x4bf   :  { %4683 = vmatprep.subr.bf16.mxu1 %v7519_v14  ;;  %4407 = vmatmul.mubr.bf16.gmra.mxu0 %v10443_v29  ;;  %v7487_v14 = vcombine.high %v2497_v9, %v2501_v16 }
 0x4c0   :  { %4571 = vmatpush2.bf16.msra.mxu0 %v7390_v22  ;;  %4416 = vmatprep.mubr.bf16.mxu0 %v10451_v42  ;;  %v7358_v22 = vcombine.low %v2369_v2, %v2373_v25 }
 0x4c1   :  { %4520 = vmatmul.mubr.bf16.gmra.mxu1 %v10447_v58  ;;  %4572 = vmatprep.subr.bf16.mxu0 %v7383_v57  ;;  %v7351_v57 = vcombine.high %v2361_v27, %v2365_v55 }
 0x4c2   :  { %4684 = vmatpush2.bf16.msra.mxu1 %v7518_v43  ;;  %4529 = vmatprep.mubr.bf16.mxu1 %v10456_v28  ;;  %v7486_v43 = vcombine.low %v2497_v9, %v2501_v16 }
 0x4c3   :  { %4685 = vmatprep.subr.bf16.mxu1 %v7511_v40  ;;  %v7479_v40 = vcombine.high %v2489_v1, %v2493_v62 }
 0x4c4   :  { %4573 = vmatpush2.bf16.msra.mxu0 %v7382_v56  ;;  %v10564_v56 = vrot.slane %v10558_v20, %v14869_v51 }
 0x4c5   :  { %4574 = vmatprep.subr.bf16.mxu0 %v7375_v0 }
 0x4c6   :  { %4686 = vmatpush2.bf16.msra.mxu1 %v7510_v48  ;;  %v14870_v48 = vld [vmem:[#allocation21_spill] sm:$0xff] }
 0x4c7   :  { %4687 = vmatprep.subr.bf16.mxu1 %v7503_v23  ;;  %4417 = vmatmul.mubr.bf16.gmra.mxu0 %v10463_v11  ;;  %v10568_v0 = vrot.slane %v10558_v20, %v14870_v48 }
 0x4c8   :  { %4575 = vmatpush2.bf16.msra.mxu0 %v7374_v41  ;;  %4426 = vmatprep.mubr.bf16.mxu0 %v10471_v24 }
 0x4c9   :  { %4530 = vmatmul.mubr.bf16.gmra.mxu1 %v10467_v8  ;;  %4576 = vmatprep.subr.bf16.mxu0 %v7367_v46 }
 0x4ca   :  { %4688 = vmatpush2.bf16.msra.mxu1 %v7502_v6  ;;  %4539 = vmatprep.mubr.bf16.mxu1 %v10476_v34 }
 0x4cb   :  { %4689 = vmatprep.subr.bf16.mxu1 %v7495_v33 }
 0x4cc   :  { %4577 = vmatpush2.bf16.msra.mxu0 %v7366_v26 }
 0x4cd   :  { %4578 = vmatprep.subr.bf16.mxu0 %v7359_v10 }
 0x4ce   :  { %4690 = vmatpush2.bf16.msra.mxu1 %v7494_v45 }
 0x4cf   :  { %4691 = vmatprep.subr.bf16.mxu1 %v7487_v14  ;;  %4427 = vmatmul.mubr.bf16.gmra.mxu0 %v10483_v15 }
 0x4d0   :  { %4579 = vmatpush2.bf16.msra.mxu0 %v7358_v22  ;;  %4582 = vmatprep.mubr.bf16.mxu0 %v14866_v49 }
 0x4d1   :  { %4540 = vmatmul.mubr.bf16.gmra.mxu1 %v10487_v12  ;;  %4580 = vmatprep.subr.bf16.mxu0 %v7351_v57 }
 0x4d2   :  { %4692 = vmatpush2.bf16.msra.mxu1 %v7486_v43  ;;  %4695 = vmatprep.mubr.bf16.mxu1 %v14867_v17 }
 0x4d3   :  { %4693 = vmatprep.subr.bf16.mxu1 %v7479_v40 }
 0x4d4   :  { %4581 = vmatpush2.bf16.msra.mxu0 %v7350_v3 }
 0x4d6   :  { %4694 = vmatpush2.bf16.msra.mxu1 %v7478_v13 }
 0x4d7   :  { %v3906_v23 = vpop.f32.mrf.mxu0  ;;  %4583 = vmatmul.mubr.bf16.vlgmr.msra.gmra.mxu0 %v10343_v35 }
 0x4d8   :  { %v3907_v59 = vadd.f32 %v3906_v23, %v10564_v56  ;;  %4592 = vmatprep.mubr.bf16.mxu0 %v10351_v38 }
 0x4d9   :  { %v4019_v63 = vpop.f32.mrf.mxu1  ;;  %4696 = vmatmul.mubr.bf16.vlgmr.msra.gmra.mxu1 %v10347_v50  ;;  %v3908_v49 = vpop.f32.mrf.mxu0 }
 0x4da   :  { %4705 = vmatprep.mubr.bf16.mxu1 %v14868_v4  ;;  %v10575_v17 = vadd.f32 %v4019_v63, %v3907_v59  ;;  %v3909_v18 = vadd.f32 %v3908_v49, %v10568_v0 }
 0x4db   :  { %v4021_v30 = vpop.f32.mrf.mxu1  ;;  %v3910_v41 = vpop.f32.mrf.mxu0 }
 0x4dc   :  { %v10578_v6 = vadd.f32 %v4021_v30, %v3909_v18  ;;  %v3911_v35 = vadd.f32 %v3910_v41, %v10564_v56 }
 0x4dd   :  { %v4023_v46 = vpop.f32.mrf.mxu1  ;;  %v3912_v33 = vpop.f32.mrf.mxu0 }
 0x4de   :  { %v10581_v2 = vadd.f32 %v4023_v46, %v3911_v35  ;;  %v3913_v50 = vadd.f32 %v3912_v33, %v10568_v0 }
 0x4df   :  { %v4025_v38 = vpop.f32.mrf.mxu1  ;;  %v3916_v25 = vpop.f32.mrf.mxu0  ;;  %4593 = vmatmul.mubr.bf16.gmra.mxu0 %v10363_v31 }
 0x4e0   :  { %14871 = vst [vmem:[#allocation68_spill] sm:$0xff] %v10581_v2  ;;  %v10585_v4 = vadd.f32 %v4025_v38, %v3913_v50  ;;  %v3917_v9 = vadd.f32 %v3916_v25, %v10564_v56  ;;  %4602 = vmatprep.mubr.bf16.mxu0 %v10371_v60 }
 0x4e1   :  { %v4029_v16 = vpop.f32.mrf.mxu1  ;;  %4706 = vmatmul.mubr.bf16.gmra.mxu1 %v10367_v5  ;;  %v3918_v26 = vpop.f32.mrf.mxu0 }
 0x4e2   :  { %14872 = vst [vmem:[#allocation39_spill] sm:$0xff] %v10585_v4  ;;  %4715 = vmatprep.mubr.bf16.mxu1 %v10376_v52  ;;  %v10591_v45 = vadd.f32 %v4029_v16, %v3917_v9  ;;  %v3919_v14 = vadd.f32 %v3918_v26, %v10568_v0 }
 0x4e3   :  { %v4031_v10 = vpop.f32.mrf.mxu1  ;;  %v3920_v27 = vpop.f32.mrf.mxu0 }
 0x4e4   :  { %14873 = vst [vmem:[#allocation41_spill] sm:$0xff] %v10591_v45  ;;  %v3921_v31 = vadd.f32 %v3920_v27, %v10564_v56  ;;  %v10595_v1 = vadd.f32 %v4031_v10, %v3919_v14 }
 0x4e5   :  { %v4033_v55 = vpop.f32.mrf.mxu1  ;;  %v3922_v62 = vpop.f32.mrf.mxu0 }
 0x4e6   :  { %14874 = vst [vmem:[#allocation40_spill] sm:$0xff] %v10595_v1  ;;  %v10597_v22 = vadd.f32 %v4033_v55, %v3921_v31  ;;  %v3923_v5 = vadd.f32 %v3922_v62, %v10568_v0  ;;  %v4963_v55 = vmul.f32 %v10585_v4, %v10585_v4 }
 0x4e7   :  { %v4035_v43 = vpop.f32.mrf.mxu1  ;;  %v3926_v60 = vpop.f32.mrf.mxu0  ;;  %4603 = vmatmul.mubr.bf16.gmra.mxu0 %v10383_v54 }
 0x4e8   :  { %14875 = vst [vmem:[#allocation70_spill] sm:$0xff] %v10597_v22  ;;  %v10601_v52 = vadd.f32 %v4035_v43, %v3923_v5  ;;  %v3927_v57 = vadd.f32 %v3926_v60, %v10564_v56  ;;  %4612 = vmatprep.mubr.bf16.mxu0 %v10391_v7  ;;  %v4954_v60 = vmul.f32 %v10575_v17, %v10575_v17 }
 0x4e9   :  { %v4039_v40 = vpop.f32.mrf.mxu1  ;;  %4716 = vmatmul.mubr.bf16.gmra.mxu1 %v10387_v21  ;;  %v3928_v3 = vpop.f32.mrf.mxu0 }
 0x4ea   :  { %14876 = vst [vmem:[#allocation42_spill] sm:$0xff] %v10601_v52  ;;  %4725 = vmatprep.mubr.bf16.mxu1 %v10396_v19  ;;  %v10607_v13 = vadd.f32 %v4039_v40, %v3927_v57  ;;  %v3929_v59 = vadd.f32 %v3928_v3, %v10568_v0  ;;  %v4970_v57 = vmul.f32 %v10591_v45, %v10591_v45 }
 0x4eb   :  { %v4041_v23 = vpop.f32.mrf.mxu1  ;;  %v3930_v63 = vpop.f32.mrf.mxu0  ;;  %v4778_v3 = vadd.f32 %v10581_v2, %v10575_v17 }
 0x4ec   :  { %14877 = vst [vmem:[#allocation43_spill] sm:$0xff] %v10607_v13  ;;  %v3931_v54 = vadd.f32 %v3930_v63, %v10564_v56  ;;  %v10611_v18 = vadd.f32 %v4041_v23, %v3929_v59  ;;  %v4971_v63 = vmul.f32 %v10595_v1, %v10595_v1 }
 0x4ed   :  { %v4043_v49 = vpop.f32.mrf.mxu1  ;;  %v3932_v30 = vpop.f32.mrf.mxu0 }
 0x4ee   :  { %14878 = vst [vmem:[#allocation45_spill] sm:$0xff] %v10611_v18  ;;  %v10613_v41 = vadd.f32 %v4043_v49, %v3931_v54  ;;  %v3933_v21 = vadd.f32 %v3932_v30, %v10568_v0  ;;  %v4978_v54 = vmul.f32 %v10597_v22, %v10597_v22 }
 0x4ef   :  { %v4045_v35 = vpop.f32.mrf.mxu1  ;;  %v3936_v7 = vpop.f32.mrf.mxu0  ;;  %4613 = vmatmul.mubr.bf16.gmra.mxu0 %v10403_v61 }
 0x4f0   :  { %14879 = vst [vmem:[#allocation44_spill] sm:$0xff] %v10613_v41  ;;  %v10617_v19 = vadd.f32 %v4045_v35, %v3933_v21  ;;  %v3937_v46 = vadd.f32 %v3936_v7, %v10564_v56  ;;  %4622 = vmatprep.mubr.bf16.mxu0 %v10411_v53  ;;  %v4962_v53 = vmul.f32 %v10581_v2, %v10581_v2 }
 0x4f1   :  { %v4049_v33 = vpop.f32.mrf.mxu1  ;;  %4726 = vmatmul.mubr.bf16.gmra.mxu1 %v10407_v47  ;;  %v3938_v50 = vpop.f32.mrf.mxu0  ;;  %v4779_v7 = vadd.f32 %v4778_v3, %v10591_v45 }
 0x4f2   :  { %14880 = vst [vmem:[#allocation46_spill] sm:$0xff] %v10617_v19  ;;  %4735 = vmatprep.mubr.bf16.mxu1 %v10416_v39  ;;  %v10623_v38 = vadd.f32 %v4049_v33, %v3937_v46  ;;  %v3939_v9 = vadd.f32 %v3938_v50, %v10568_v0  ;;  %v5082_v59 = vadd.f32 %v4962_v53, %v4954_v60 }
 0x4f3   :  { %v4051_v25 = vpop.f32.mrf.mxu1  ;;  %v3940_v16 = vpop.f32.mrf.mxu0  ;;  %v4979_v33 = vmul.f32 %v10601_v52, %v10601_v52 }
 0x4f4   :  { %14881 = vst [vmem:[#allocation73_spill] sm:$0xff] %v10623_v38  ;;  %v3941_v61 = vadd.f32 %v3940_v16, %v10564_v56  ;;  %v10627_v10 = vadd.f32 %v4051_v25, %v3939_v9  ;;  %v5083_v46 = vadd.f32 %v5082_v59, %v4970_v57  ;;  %v4986_v16 = vmul.f32 %v10607_v13, %v10607_v13 }
 0x4f5   :  { %v4053_v26 = vpop.f32.mrf.mxu1  ;;  %v3942_v14 = vpop.f32.mrf.mxu0 }
 0x4f6   :  { %14882 = vst [vmem:[#allocation49_spill] sm:$0xff] %v10627_v10  ;;  %v10629_v27 = vadd.f32 %v4053_v26, %v3941_v61  ;;  %v3943_v47 = vadd.f32 %v3942_v14, %v10568_v0  ;;  %v5084_v53 = vadd.f32 %v5083_v46, %v4978_v54  ;;  %v5002_v54 = vmul.f32 %v10623_v38, %v10623_v38 }
 0x4f7   :  { %v4055_v31 = vpop.f32.mrf.mxu1  ;;  %v3946_v39 = vpop.f32.mrf.mxu0  ;;  %4623 = vmatmul.mubr.bf16.gmra.mxu0 %v10423_v32  ;;  %v4955_v32 = vmul.f32 %v10578_v6, %v10578_v6 }
 0x4f8   :  { %14883 = vst [vmem:[#allocation74_spill] sm:$0xff] %v10629_v27  ;;  %v10637_v62 = vadd.f32 %v4055_v31, %v3943_v47  ;;  %v3947_v5 = vadd.f32 %v3946_v39, %v10564_v56  ;;  %4632 = vmatprep.mubr.bf16.mxu0 %v10431_v37  ;;  %v4780_v31 = vadd.f32 %v4779_v7, %v10597_v22 }
 0x4f9   :  { %v4059_v43 = vpop.f32.mrf.mxu1  ;;  %4736 = vmatmul.mubr.bf16.gmra.mxu1 %v10427_v36  ;;  %v3948_v40 = vpop.f32.mrf.mxu0  ;;  %v5103_v30 = vadd.f32 %v4963_v55, %v4955_v32  ;;  %v4987_v39 = vmul.f32 %v10611_v18, %v10611_v18  ;;  %v5010_v7 = vmul.f32 %v10629_v27, %v10629_v27 }
 0x4fa   :  { %14884 = vst [vmem:[#allocation48_spill] sm:$0xff] %v10637_v62  ;;  %4745 = vmatprep.mubr.bf16.mxu1 %v10436_v44  ;;  %v10651_v23 = vadd.f32 %v4059_v43, %v3947_v5  ;;  %v3949_v37 = vadd.f32 %v3948_v40, %v10568_v0  ;;  %v4799_v44 = vadd.f32 %v10585_v4, %v10578_v6 }
 0x4fb   :  { %v4061_v36 = vpop.f32.mrf.mxu1  ;;  %v3950_v49 = vpop.f32.mrf.mxu0  ;;  %v5104_v47 = vadd.f32 %v5103_v30, %v4971_v63  ;;  %v4994_v43 = vmul.f32 %v10613_v41, %v10613_v41  ;;  %v4781_v3 = vadd.f32 %v4780_v31, %v10607_v13  ;;  %v5003_v30 = vmul.f32 %v10627_v10, %v10627_v10 }
 0x4fc   :  { %14885 = vst [vmem:[#allocation75_spill] sm:$0xff] %v10651_v23  ;;  %v3951_v21 = vadd.f32 %v3950_v49, %v10564_v56  ;;  %v10664_v50 = vadd.f32 %v4061_v36, %v3949_v37  ;;  %v4800_v9 = vadd.f32 %v4799_v44, %v10595_v1  ;;  %v4995_v36 = vmul.f32 %v10617_v19, %v10617_v19 }
 0x4fd   :  { %v4063_v35 = vpop.f32.mrf.mxu1  ;;  %v3952_v25 = vpop.f32.mrf.mxu0  ;;  %v5105_v32 = vadd.f32 %v5104_v47, %v4979_v33  ;;  %v4782_v44 = vadd.f32 %v4781_v3, %v10613_v41  ;;  %v5018_v31 = vmul.f32 %v10651_v23, %v10651_v23 }
 0x4fe   :  { %14886 = vst [vmem:[#allocation50_spill] sm:$0xff] %v10664_v50  ;;  %v10669_v61 = vadd.f32 %v4063_v35, %v3951_v21  ;;  %v3953_v26 = vadd.f32 %v3952_v25, %v10568_v0  ;;  %v4801_v5 = vadd.f32 %v4800_v9, %v10601_v52 }
 0x4ff   :  { %v4065_v14 = vpop.f32.mrf.mxu1  ;;  %v3956_v55 = vpop.f32.mrf.mxu0  ;;  %4633 = vmatmul.mubr.bf16.gmra.mxu0 %v10443_v29  ;;  %v5085_v29 = vadd.f32 %v5084_v53, %v4986_v16  ;;  %v5106_v49 = vadd.f32 %v5105_v32, %v4987_v39  ;;  %v4783_v9 = vadd.f32 %v4782_v44, %v10623_v38  ;;  %v5011_v16 = vmul.f32 %v10637_v62, %v10637_v62 }
 0x500   :  { %14887 = vst [vmem:[#allocation51_spill] sm:$0xff] %v10669_v61  ;;  %v10679_v60 = vadd.f32 %v4065_v14, %v3953_v26  ;;  %v3957_v57 = vadd.f32 %v3956_v55, %v10564_v56  ;;  %4642 = vmatprep.mubr.bf16.mxu0 %v10451_v42  ;;  %v4802_v63 = vadd.f32 %v4801_v5, %v10611_v18 }
 0x501   :  { %v4069_v40 = vpop.f32.mrf.mxu1  ;;  %4746 = vmatmul.mubr.bf16.gmra.mxu1 %v10447_v58  ;;  %v3958_v59 = vpop.f32.mrf.mxu0  ;;  %v5086_v35 = vadd.f32 %v5085_v29, %v4994_v43  ;;  %v5107_v25 = vadd.f32 %v5106_v49, %v4995_v36  ;;  %v5026_v36 = vmul.f32 %v10669_v61, %v10669_v61 }
 0x502   :  { %14888 = vst [vmem:[#allocation53_spill] sm:$0xff] %v10679_v60  ;;  %4755 = vmatprep.mubr.bf16.mxu1 %v10456_v28  ;;  %v10691_v37 = vadd.f32 %v4069_v40, %v3957_v57  ;;  %v3959_v21 = vadd.f32 %v3958_v59, %v10568_v0  ;;  %v4803_v28 = vadd.f32 %v4802_v63, %v10617_v19 }
 0x503   :  { %v4071_v58 = vpop.f32.mrf.mxu1  ;;  %v3960_v42 = vpop.f32.mrf.mxu0  ;;  %v5087_v47 = vadd.f32 %v5086_v35, %v5002_v54  ;;  %v5108_v43 = vadd.f32 %v5107_v25, %v5003_v30  ;;  %v4784_v57 = vadd.f32 %v4783_v9, %v10629_v27  ;;  %v5019_v40 = vmul.f32 %v10664_v50, %v10664_v50 }
 0x504   :  { %14889 = vst [vmem:[#allocation52_spill] sm:$0xff] %v10691_v37  ;;  %v3961_v46 = vadd.f32 %v3960_v42, %v10564_v56  ;;  %v10704_v26 = vadd.f32 %v4071_v58, %v3959_v21  ;;  %v4804_v5 = vadd.f32 %v4803_v28, %v10627_v10  ;;  %v5027_v49 = vmul.f32 %v10679_v60, %v10679_v60 }
 0x505   :  { %v4073_v33 = vpop.f32.mrf.mxu1  ;;  %v3962_v14 = vpop.f32.mrf.mxu0  ;;  %v5088_v3 = vadd.f32 %v5087_v47, %v5010_v7  ;;  %v5109_v58 = vadd.f32 %v5108_v43, %v5011_v16  ;;  %v5034_v28 = vmul.f32 %v10691_v37, %v10691_v37 }
 0x506   :  { %14890 = vst [vmem:[#allocation54_spill] sm:$0xff] %v10704_v26  ;;  %v10708_v53 = vadd.f32 %v4073_v33, %v3961_v46  ;;  %v3963_v39 = vadd.f32 %v3962_v14, %v10568_v0  ;;  %v4805_v54 = vadd.f32 %v4804_v5, %v10637_v62 }
 0x507   :  { %v4075_v55 = vpop.f32.mrf.mxu1  ;;  %v3966_v32 = vpop.f32.mrf.mxu0  ;;  %4643 = vmatmul.mubr.bf16.gmra.mxu0 %v10463_v11  ;;  %v4785_v11 = vadd.f32 %v4784_v57, %v10651_v23  ;;  %v5089_v30 = vadd.f32 %v5088_v3, %v5018_v31 }
 0x508   :  { %14891 = vst [vmem:[#allocation57_spill] sm:$0xff] %v10708_v53  ;;  %v10718_v59 = vadd.f32 %v4075_v55, %v3963_v39  ;;  %v3967_v29 = vadd.f32 %v3966_v32, %v10564_v56  ;;  %4652 = vmatprep.mubr.bf16.mxu0 %v10471_v24  ;;  %v4806_v35 = vadd.f32 %v4805_v54, %v10664_v50 }
 0x509   :  { %v4079_v63 = vpop.f32.mrf.mxu1  ;;  %4756 = vmatmul.mubr.bf16.gmra.mxu1 %v10467_v8  ;;  %v3968_v44 = vpop.f32.mrf.mxu0  ;;  %v5110_v8 = vadd.f32 %v5109_v58, %v5019_v40  ;;  %v4786_v33 = vadd.f32 %v4785_v11, %v10669_v61  ;;  %v5090_v24 = vadd.f32 %v5089_v30, %v5026_v36  ;;  %v5042_v47 = vmul.f32 %v10708_v53, %v10708_v53 }
 0x50a   :  { %14892 = vst [vmem:[#allocation56_spill] sm:$0xff] %v10718_v59  ;;  %4765 = vmatprep.mubr.bf16.mxu1 %v10476_v34  ;;  %v10728_v21 = vadd.f32 %v4079_v63, %v3967_v29  ;;  %v3969_v7 = vadd.f32 %v3968_v44, %v10568_v0  ;;  %v5035_v34 = vmul.f32 %v10704_v26, %v10704_v26 }
 0x50b   :  { %v4081_v42 = vpop.f32.mrf.mxu1  ;;  %v3970_v46 = vpop.f32.mrf.mxu0  ;;  %v4807_v16 = vadd.f32 %v4806_v35, %v10679_v60  ;;  %v5111_v14 = vadd.f32 %v5110_v8, %v5027_v49  ;;  %v4787_v55 = vadd.f32 %v4786_v33, %v10691_v37  ;;  %v5043_v5 = vmul.f32 %v10718_v59, %v10718_v59 }
 0x50c   :  { %14893 = vst [vmem:[#allocation58_spill] sm:$0xff] %v10728_v21  ;;  %v3971_v25 = vadd.f32 %v3970_v46, %v10564_v56  ;;  %v10741_v31 = vadd.f32 %v4081_v42, %v3969_v7  ;;  %v5091_v32 = vadd.f32 %v5090_v24, %v5034_v28  ;;  %v5050_v36 = vmul.f32 %v10728_v21, %v10728_v21 }
 0x50d   :  { %v4083_v9 = vpop.f32.mrf.mxu1  ;;  %v3972_v39 = vpop.f32.mrf.mxu0  ;;  %v4808_v3 = vadd.f32 %v4807_v16, %v10704_v26  ;;  %v5112_v63 = vadd.f32 %v5111_v14, %v5035_v34  ;;  %v4788_v54 = vadd.f32 %v4787_v55, %v10708_v53 }
 0x50e   :  { %14894 = vst [vmem:[#allocation62_spill] sm:$0xff] %v10741_v31  ;;  %v10746_v43 = vadd.f32 %v4083_v9, %v3971_v25  ;;  %v3973_v57 = vadd.f32 %v3972_v39, %v10568_v0  ;;  %v5092_v11 = vadd.f32 %v5091_v32, %v5042_v47  ;;  %v5051_v42 = vmul.f32 %v10741_v31, %v10741_v31  ;;  %v14898_v39 = vld [vmem:[#allocation23_spill] sm:$0xff] }
 0x50f   :  { %v4085_v40 = vpop.f32.mrf.mxu1  ;;  %v3976_v29 = vpop.f32.mrf.mxu0  ;;  %4653 = vmatmul.mubr.bf16.gmra.mxu0 %v10483_v15  ;;  %v4809_v30 = vadd.f32 %v4808_v3, %v10718_v59  ;;  %v5113_v8 = vadd.f32 %v5112_v63, %v5043_v5  ;;  %v4789_v28 = vadd.f32 %v4788_v54, %v10728_v21  ;;  %v10776_v55 = vrot.slane %v10558_v20, %v14898_v39 }
 0x510   :  { %14895 = vst [vmem:[#allocation31_spill] sm:$0xff] %v10746_v43  ;;  %v10754_v58 = vadd.f32 %v4085_v40, %v3973_v57  ;;  %v3977_v49 = vadd.f32 %v3976_v29, %v10564_v56  ;;  %v5058_v35 = vmul.f32 %v10746_v43, %v10746_v43  ;;  %v5093_v33 = vadd.f32 %v5092_v11, %v5050_v36 }
 0x511   :  { %v4089_v44 = vpop.f32.mrf.mxu1  ;;  %4766 = vmatmul.mubr.bf16.gmra.mxu1 %v10487_v12  ;;  %v3978_v15 = vpop.f32.mrf.mxu0  ;;  %v4810_v24 = vadd.f32 %v4809_v30, %v10741_v31  ;;  %v4790_v9 = vadd.f32 %v4789_v28, %v10746_v43  ;;  %v5114_v5 = vadd.f32 %v5113_v8, %v5051_v42 }
 0x512   :  { %14896 = vst [vmem:[#allocation27_spill] sm:$0xff] %v10754_v58  ;;  %v10764_v7 = vadd.f32 %v4089_v44, %v3977_v49  ;;  %v5059_v12 = vmul.f32 %v10754_v58, %v10754_v58  ;;  %v3979_v34 = vadd.f32 %v3978_v15, %v10568_v0  ;;  %v5094_v57 = vadd.f32 %v5093_v33, %v5058_v35 }
 0x513   :  { %v4091_v46 = vpop.f32.mrf.mxu1  ;;  %v3980_v25 = vpop.f32.mrf.mxu0  ;;  %v4811_v40 = vadd.f32 %v4810_v24, %v10754_v58 }
 0x514   :  { %14897 = vst [vmem:[#allocation34_spill] sm:$0xff] %v10764_v7  ;;  %v5066_v16 = vmul.f32 %v10764_v7, %v10764_v7  ;;  %v3981_v14 = vadd.f32 %v3980_v25, %v10564_v56  ;;  %v10779_v32 = vadd.f32 %v4091_v46, %v3979_v34  ;;  %v4791_v36 = vadd.f32 %v4790_v9, %v10764_v7  ;;  %v14901_v56 = vld [vmem:[#allocation24_spill] sm:$0xff] }
 0x515   :  { %v4093_v47 = vpop.f32.mrf.mxu1  ;;  %v3982_v3 = vpop.f32.mrf.mxu0  ;;  %v10787_v49 = vrot.slane %v10558_v20, %v14901_v56  ;;  %v5115_v44 = vadd.f32 %v5114_v5, %v5059_v12 }
 0x516   :  { %14899 = vst [vmem:[#allocation60_spill] sm:$0xff] %v10779_v32  ;;  %v10782_v29 = vadd.f32 %v4093_v47, %v3981_v14  ;;  %v3983_v63 = vadd.f32 %v3982_v3, %v10568_v0  ;;  %v5095_v11 = vadd.f32 %v5094_v57, %v5066_v16  ;;  %v4812_v30 = vadd.f32 %v4811_v40, %v10779_v32 }
 0x517   :  { %v4095_v54 = vpop.f32.mrf.mxu1  ;;  %v5067_v42 = vmul.f32 %v10779_v32, %v10779_v32  ;;  %v4132_v35 = vpop.f32.mrf.mxu0 }
 0x518   :  { %14900 = vst [vmem:[#allocation28_spill] sm:$0xff] %v10782_v29  ;;  %v4792_v15 = vadd.f32 %v4791_v36, %v10782_v29  ;;  %v5074_v8 = vmul.f32 %v10782_v29, %v10782_v29  ;;  %v10795_v28 = vadd.f32 %v4095_v54, %v3983_v63  ;;  %v4133_v0 = vadd.f32 %v4132_v35, %v10776_v55 }
 0x519   :  { %v4245_v46 = vpop.f32.mrf.mxu1  ;;  %v5116_v33 = vadd.f32 %v5115_v44, %v5067_v42  ;;  %v4134_v24 = vpop.f32.mrf.mxu0 }
 0x51a   :  { %14902 = vst [vmem:[#allocation25_spill] sm:$0xff] %v10795_v28  ;;  %v4793_v12 = vrot.slane %v4792_v15, 4  ;;  %v5096_v34 = vadd.f32 %v5095_v11, %v5074_v8  ;;  %v4813_v25 = vadd.f32 %v4812_v30, %v10795_v28  ;;  %v5075_v9 = vmul.f32 %v10795_v28, %v10795_v28 }
 0x51b   :  { %v4247_v16 = vpop.f32.mrf.mxu1  ;;  %v10801_v14 = vadd.f32 %v4245_v46, %v4133_v0  ;;  %v4135_v47 = vadd.f32 %v4134_v24, %v10787_v49  ;;  %v4136_v5 = vpop.f32.mrf.mxu0 }
 0x51c   :  { %v4794_v57 = vadd.f32 %v4793_v12, %v4792_v15  ;;  %v5097_v40 = vrot.slane %v5096_v34, 4  ;;  %v4814_v3 = vrot.slane %v4813_v25, 4  ;;  %v5117_v36 = vadd.f32 %v5116_v33, %v5075_v9 }
 0x51d   :  { %v4249_v63 = vpop.f32.mrf.mxu1  ;;  %v10804_v54 = vadd.f32 %v4247_v16, %v4135_v47  ;;  %v4137_v44 = vadd.f32 %v4136_v5, %v10776_v55  ;;  %v4138_v11 = vpop.f32.mrf.mxu0 }
 0x51e   :  { %v4795_v30 = vrot.slane %v4794_v57, 2  ;;  %v5098_v42 = vadd.f32 %v5097_v40, %v5096_v34  ;;  %v4815_v35 = vadd.f32 %v4814_v3, %v4813_v25  ;;  %v5118_v8 = vrot.slane %v5117_v36, 4 }
 0x51f   :  { %14903 = vst [vmem:[#allocation32_spill] sm:$0xff] %v10804_v54  ;;  %v4251_v28 = vpop.f32.mrf.mxu1  ;;  %v10807_v0 = vadd.f32 %v4249_v63, %v4137_v44  ;;  %v4139_v46 = vadd.f32 %v4138_v11, %v10787_v49  ;;  %v4142_v24 = vpop.f32.mrf.mxu0 }
 0x520   :  { %v4796_v15 = vadd.f32 %v4795_v30, %v4794_v57  ;;  %v5099_v12 = vrot.slane %v5098_v42, 2  ;;  %v4816_v29 = vrot.slane %v4815_v35, 2  ;;  %v5119_v33 = vadd.f32 %v5118_v8, %v5117_v36 }
 0x521   :  { %14904 = vst [vmem:[#allocation63_spill] sm:$0xff] %v10807_v0  ;;  %v4255_v9 = vpop.f32.mrf.mxu1  ;;  %v10810_v16 = vadd.f32 %v4251_v28, %v4139_v46  ;;  %v4143_v47 = vadd.f32 %v4142_v24, %v10776_v55  ;;  %v4144_v5 = vpop.f32.mrf.mxu0 }
 0x522   :  { %v4797_v32 = vrot.slane %v4796_v15, 1  ;;  %v5100_v34 = vadd.f32 %v5099_v12, %v5098_v42  ;;  %v4817_v25 = vadd.f32 %v4816_v29, %v4815_v35  ;;  %v5120_v40 = vrot.slane %v5119_v33, 2 }
 0x523   :  { %14905 = vst [vmem:[#allocation72_spill] sm:$0xff] %v10810_v16  ;;  %v4257_v3 = vpop.f32.mrf.mxu1  ;;  %v10813_v63 = vadd.f32 %v4255_v9, %v4143_v47  ;;  %v4146_v44 = vpop.f32.mrf.mxu0  ;;  %v4145_v36 = vadd.f32 %v4144_v5, %v10787_v49  ;;  %v4841_v26 = vadd.f32 %v10810_v16, %v10804_v54 }
 0x524   :  { %v4798_v11 = vadd.f32 %v4797_v32, %v4796_v15  ;;  %v5101_v7 = vrot.slane %v5100_v34, 1  ;;  %v4818_v57 = vrot.slane %v4817_v25, 1  ;;  %v5121_v30 = vadd.f32 %v5120_v40, %v5119_v33 }
 0x525   :  { %14906 = vst [vmem:[#allocation69_spill] sm:$0xff] %v10813_v63  ;;  %v4259_v58 = vpop.f32.mrf.mxu1  ;;  %v4148_v28 = vpop.f32.mrf.mxu0  ;;  %v10818_v29 = vadd.f32 %v4257_v3, %v4145_v36  ;;  %v4147_v35 = vadd.f32 %v4146_v44, %v10776_v55 }
 0x526   :  { %v10816_v8 = vmul.f32 0.0078125, %v4798_v11  ;;  %v5102_v46 = vadd.f32 %v5101_v7, %v5100_v34  ;;  %v4819_v24 = vadd.f32 %v4818_v57, %v4817_v25  ;;  %v5122_v43 = vrot.slane %v5121_v30, 1 }
 0x527   :  { %v4261_v42 = vpop.f32.mrf.mxu1  ;;  %14907 = vst [vmem:[#allocation76_spill] sm:$0xff] %v10818_v29  ;;  %v4149_v12 = vadd.f32 %v4148_v28, %v10787_v49  ;;  %v4152_v32 = vpop.f32.mrf.mxu0  ;;  %v10826_v40 = vadd.f32 %v4259_v58, %v4147_v35 }
 0x528   :  { %v5250_v15 = vmul.f32 0.0078125, %v5102_v46  ;;  %v5258_v33 = vmul.f32 %v10816_v8, %v10816_v8  ;;  %v10824_v9 = vmul.f32 0.0078125, %v4819_v24  ;;  %v5123_v47 = vadd.f32 %v5122_v43, %v5121_v30 }
 0x529   :  { %v4265_v5 = vpop.f32.mrf.mxu1  ;;  %14908 = vst [vmem:[#allocation37_spill] sm:$0xff] %v10826_v40  ;;  %v10828_v7 = vadd.f32 %v4261_v42, %v4149_v12  ;;  %v4154_v34 = vpop.f32.mrf.mxu0  ;;  %v4153_v11 = vadd.f32 %v4152_v32, %v10776_v55  ;;  %v4980_v21 = vmul.f32 %v10826_v40, %v10826_v40 }
 0x52a   :  { %v5266_v25 = vsub.f32 %v5250_v15, %v5258_v33  ;;  %v5251_v3 = vmul.f32 0.0078125, %v5123_v47  ;;  %v5259_v44 = vmul.f32 %v10824_v9, %v10824_v9  ;;  %v4155_v58 = vadd.f32 %v4154_v34, %v10787_v49 }
 0x52b   :  { %14909 = vst [vmem:[#allocation71_spill] sm:$0xff] %v10828_v7  ;;  %v4267_v57 = vpop.f32.mrf.mxu1  ;;  %v4156_v36 = vpop.f32.mrf.mxu0  ;;  %v10833_v24 = vadd.f32 %v4265_v5, %v4153_v11 }
 0x52c   :  { %v5274_v28 = vadd.f32 0.8, %v5266_v25  ;;  %v5267_v46 = vsub.f32 %v5251_v3, %v5259_v44  ;;  %v4157_v30 = vadd.f32 %v4156_v36, %v10776_v55  ;;  %v10837_v15 = vadd.f32 %v4267_v57, %v4155_v58 }
 0x52d   :  { %14910 = vst [vmem:[#allocation65_spill] sm:$0xff] %v10833_v24  ;;  %v4269_v43 = vpop.f32.mrf.mxu1  ;;  %v4158_v42 = vpop.f32.mrf.mxu0 }
 0x52e   :  { %v5275_v35 = vadd.f32 0.8, %v5267_v46  ;;  %8065 = vrsqrt.f32 %v5274_v28  ;;  %14911 = vst [vmem:[#allocation47_spill] sm:$0xff] %v10837_v15  ;;  %v10839_v33 = vadd.f32 %v4269_v43, %v4157_v30  ;;  %v4159_v32 = vadd.f32 %v4158_v42, %v10787_v49 }
 0x52f   :  { %v4271_v12 = vpop.f32.mrf.mxu1  ;;  %v4162_v47 = vpop.f32.mrf.mxu0 }
 0x530   :  { %14912 = vst [vmem:[#allocation55_spill] sm:$0xff] %v10839_v33  ;;  %8067 = vrsqrt.f32 %v5275_v35  ;;  %v4163_v5 = vadd.f32 %v4162_v47, %v10776_v55  ;;  %v10843_v44 = vadd.f32 %v4271_v12, %v4159_v32  ;;  %v4964_v35 = vmul.f32 %v10807_v0, %v10807_v0 }
 0x531   :  { %v4275_v25 = vpop.f32.mrf.mxu1  ;;  %v4164_v3 = vpop.f32.mrf.mxu0  ;;  %v4965_v47 = vmul.f32 %v10810_v16, %v10810_v16 }
 0x532   :  { %14913 = vst [vmem:[#allocation77_spill] sm:$0xff] %v10843_v44  ;;  %v10845_v34 = vadd.f32 %v4275_v25, %v4163_v5  ;;  %v4165_v11 = vadd.f32 %v4164_v3, %v10787_v49 }
 0x533   :  { %v4277_v36 = vpop.f32.mrf.mxu1  ;;  %v4166_v28 = vpop.f32.mrf.mxu0 }
 0x534   :  { %14914 = vst [vmem:[#allocation26_spill] sm:$0xff] %v10845_v34  ;;  %v10848_v46 = vadd.f32 %v4277_v36, %v4165_v11  ;;  %v4167_v43 = vadd.f32 %v4166_v28, %v10776_v55  ;;  %v4956_v11 = vmul.f32 %v10801_v14, %v10801_v14  ;;  %v4957_v36 = vmul.f32 %v10804_v54, %v10804_v54 }
 0x535   :  { %v4279_v57 = vpop.f32.mrf.mxu1  ;;  %v4168_v58 = vpop.f32.mrf.mxu0  ;;  %v4972_v28 = vmul.f32 %v10813_v63, %v10813_v63 }
 0x536   :  { %14915 = vst [vmem:[#allocation61_spill] sm:$0xff] %v10848_v46  ;;  %v4169_v30 = vadd.f32 %v4168_v58, %v10787_v49  ;;  %v10854_v12 = vadd.f32 %v4279_v57, %v4167_v43  ;;  %v4820_v43 = vadd.f32 %v10807_v0, %v10801_v14  ;;  %v4973_v58 = vmul.f32 %v10818_v29, %v10818_v29 }
 0x537   :  { %v4281_v42 = vpop.f32.mrf.mxu1  ;;  %v4172_v32 = vpop.f32.mrf.mxu0  ;;  %v5124_v31 = vadd.f32 %v4964_v35, %v4956_v11  ;;  %v5145_v37 = vadd.f32 %v4965_v47, %v4957_v36  ;;  %v4981_v35 = vmul.f32 %v10828_v7, %v10828_v7  ;;  %v4988_v11 = vmul.f32 %v10833_v24, %v10833_v24 }
 0x538   :  { %14916 = vst [vmem:[#allocation35_spill] sm:$0xff] %v10854_v12  ;;  %v10858_v5 = vadd.f32 %v4281_v42, %v4169_v30  ;;  %v4173_v25 = vadd.f32 %v4172_v32, %v10776_v55  ;;  %v4821_v60 = vadd.f32 %v4820_v43, %v10813_v63  ;;  %v4842_v36 = vadd.f32 %v4841_v26, %v10818_v29 }
 0x539   :  { %v4285_v3 = vpop.f32.mrf.mxu1  ;;  %v4174_v57 = vpop.f32.mrf.mxu0  ;;  %v5146_v43 = vadd.f32 %v5145_v37, %v4973_v58  ;;  %v4996_v47 = vmul.f32 %v10839_v33, %v10839_v33 }
 0x53a   :  { %14917 = vst [vmem:[#allocation30_spill] sm:$0xff] %v10858_v5  ;;  %v10871_v30 = vadd.f32 %v4285_v3, %v4173_v25  ;;  %v4175_v42 = vadd.f32 %v4174_v57, %v10787_v49  ;;  %v5125_v57 = vadd.f32 %v5124_v31, %v4972_v28  ;;  %v4989_v31 = vmul.f32 %v10837_v15, %v10837_v15 }
 0x53b   :  { %v4287_v32 = vpop.f32.mrf.mxu1  ;;  %v4176_v59 = vpop.f32.mrf.mxu0  ;;  %v5147_v58 = vadd.f32 %v5146_v43, %v4981_v35 }
 0x53c   :  { %14918 = vst [vmem:[#allocation38_spill] sm:$0xff] %v10871_v30  ;;  %v10876_v53 = vpop.eup %8065  ;;  %v10881_v61 = vadd.f32 %v4287_v32, %v4175_v42  ;;  %v4177_v50 = vadd.f32 %v4176_v59, %v10776_v55  ;;  %v4822_v42 = vadd.f32 %v4821_v60, %v10826_v40  ;;  %v5126_v62 = vadd.f32 %v5125_v57, %v4980_v21 }
 0x53d   :  { %v4289_v25 = vpop.f32.mrf.mxu1  ;;  %v10883_v3 = vpop.eup %8067  ;;  %v4843_v59 = vadd.f32 %v4842_v36, %v10828_v7  ;;  %v5148_v35 = vadd.f32 %v5147_v58, %v4989_v31 }
 0x53e   :  { %14919 = vst [vmem:[#allocation59_spill] sm:$0xff] %v10881_v61  ;;  %v4178_v23 = vpop.f32.mrf.mxu0  ;;  %v10896_v28 = vadd.f32 %v4289_v25, %v4177_v50  ;;  %v4823_v60 = vadd.f32 %v4822_v42, %v10833_v24  ;;  %v5127_v21 = vadd.f32 %v5126_v62, %v4988_v11  ;;  %v4997_v50 = vmul.f32 %v10843_v44, %v10843_v44 }
 0x53f   :  { %v4291_v32 = vpop.f32.mrf.mxu1  ;;  %v4179_v27 = vadd.f32 %v4178_v23, %v10787_v49  ;;  %v5004_v23 = vmul.f32 %v10845_v34, %v10845_v34  ;;  %v5005_v11 = vmul.f32 %v10848_v46, %v10848_v46  ;;  %v14953_v24 = vcombine.low %v10876_v53, %v10883_v3 }
 0x540   :  { %14920 = vst [vmem:[#allocation33_spill] sm:$0xff] %v10896_v28  ;;  %v4182_v10 = vpop.f32.mrf.mxu0  ;;  %v4824_v43 = vadd.f32 %v4823_v60, %v10839_v33 }
 0x541   :  { %v4183_v26 = vadd.f32 %v4182_v10, %v10776_v55  ;;  %v4295_v37 = vpop.f32.mrf.mxu1  ;;  %v10904_v57 = vadd.f32 %v4291_v32, %v4179_v27  ;;  %v4844_v10 = vadd.f32 %v4843_v59, %v10837_v15  ;;  %v5128_v27 = vadd.f32 %v5127_v21, %v4996_v47  ;;  %v14952_v15 = vld [vmem:[#allocation22_spill] sm:$0xff] }
 0x542   :  { %v4184_v38 = vpop.f32.mrf.mxu0  ;;  %v5149_v59 = vadd.f32 %v5148_v35, %v4997_v50  ;;  %v4825_v31 = vadd.f32 %v4824_v43, %v10845_v34  ;;  %v11098_v18 = vrot.slane %v14953_v24, %v14952_v15 }
 0x543   :  { %14921 = vst [vmem:[#allocation29_spill] sm:$0xff] %v10904_v57  ;;  %v10910_v25 = vadd.f32 %v4295_v37, %v4183_v26  ;;  %v4185_v36 = vadd.f32 %v4184_v38, %v10787_v49  ;;  %v4297_v19 = vpop.f32.mrf.mxu1  ;;  %v4845_v26 = vadd.f32 %v4844_v10, %v10843_v44  ;;  %v5012_v38 = vmul.f32 %v10854_v12, %v10854_v12 }
 0x544   :  { %v4186_v62 = vpop.f32.mrf.mxu0  ;;  %v5129_v58 = vadd.f32 %v5128_v27, %v5004_v23  ;;  %v5150_v44 = vadd.f32 %v5149_v59, %v5005_v11  ;;  %v4826_v50 = vadd.f32 %v4825_v31, %v10854_v12  ;;  %v5021_v11 = vmul.f32 %v10881_v61, %v10881_v61 }
 0x545   :  { %14922 = vst [vmem:[#allocation36_spill] sm:$0xff] %v10910_v25  ;;  %v10917_v42 = vadd.f32 %v4297_v19, %v4185_v36  ;;  %v4187_v32 = vadd.f32 %v4186_v62, %v10776_v55  ;;  %v4299_v41 = vpop.f32.mrf.mxu1  ;;  %v4846_v21 = vadd.f32 %v4845_v26, %v10848_v46  ;;  %v5013_v19 = vmul.f32 %v10858_v5, %v10858_v5 }
 0x546   :  { %v4188_v37 = vpop.f32.mrf.mxu0  ;;  %v5020_v36 = vmul.f32 %v10871_v30, %v10871_v30  ;;  %v5130_v27 = vadd.f32 %v5129_v58, %v5012_v38  ;;  %v5028_v26 = vmul.f32 %v10896_v28, %v10896_v28 }
 0x547   :  { %14923 = vst [vmem:[#allocation64_spill] sm:$0xff] %v10917_v42  ;;  %v10924_v60 = vadd.f32 %v4299_v41, %v4187_v32  ;;  %v4301_v47 = vpop.f32.mrf.mxu1  ;;  %v4189_v10 = vadd.f32 %v4188_v37, %v10787_v49  ;;  %v14925_v41 = vld [vmem:[#allocation19_spill] sm:$0xff]  ;;  %v4847_v32 = vadd.f32 %v4846_v21, %v10858_v5  ;;  %v4827_v37 = vadd.f32 %v4826_v50, %v10871_v30 }
 0x548   :  { %v4192_v62 = vpop.f32.mrf.mxu0  ;;  %v10935_v43 = vsub.s32 4, %v14925_v41  ;;  %v5151_v12 = vadd.f32 %v5150_v44, %v5013_v19  ;;  %v5131_v38 = vadd.f32 %v5130_v27, %v5020_v36  ;;  %v5036_v21 = vmul.f32 %v10910_v25, %v10910_v25 }
 0x549   :  { %14924 = vst [vmem:[#allocation66_spill] sm:$0xff] %v10924_v60  ;;  %v4193_v35 = vadd.f32 %v4192_v62, %v10776_v55  ;;  %v4305_v23 = vpop.f32.mrf.mxu1  ;;  %v10940_v46 = vadd.f32 %v4301_v47, %v4189_v10  ;;  %v4848_v58 = vadd.f32 %v4847_v32, %v10881_v61  ;;  %v4828_v10 = vadd.f32 %v4827_v37, %v10896_v28 }
 0x54a   :  { %v4194_v34 = vpop.f32.mrf.mxu0  ;;  %v5029_v50 = vmul.f32 %v10904_v57, %v10904_v57  ;;  %v5044_v44 = vmul.f32 %v10924_v60, %v10924_v60  ;;  %v10961_v36 = vrot.slane %v10558_v20, %v10935_v43  ;;  %v5152_v27 = vadd.f32 %v5151_v12, %v5021_v11 }
 0x54b   :  { %14926 = vst [vmem:[#allocation67_spill] sm:$0xff] %v10940_v46  ;;  %v10945_v59 = vadd.f32 %v4305_v23, %v4193_v35  ;;  %v4195_v31 = vadd.f32 %v4194_v34, %v10787_v49  ;;  %v4307_v62 = vpop.f32.mrf.mxu1  ;;  %v5132_v34 = vadd.f32 %v5131_v38, %v5028_v26  ;;  %v4849_v32 = vadd.f32 %v4848_v58, %v10904_v57 }
 0x54c   :  { %v4196_v47 = vpop.f32.mrf.mxu0  ;;  %v4829_v37 = vadd.f32 %v4828_v10, %v10910_v25  ;;  %v5037_v26 = vmul.f32 %v10917_v42, %v10917_v42  ;;  %v5153_v5 = vadd.f32 %v5152_v27, %v5029_v50  ;;  %v10975_v10 = vsub.s32 5, %v14925_v41 }
 0x54d   :  { %14927 = vst [vmem:[#allocation20_spill] sm:$0xff] %v10945_v59  ;;  %v10954_v30 = vadd.f32 %v4307_v62, %v4195_v31  ;;  %v4197_v35 = vadd.f32 %v4196_v47, %v10776_v55  ;;  %v4309_v23 = vpop.f32.mrf.mxu1  ;;  %v5133_v62 = vadd.f32 %v5132_v34, %v5036_v21  ;;  %v5052_v38 = vmul.f32 %v10945_v59, %v10945_v59 }
 0x54e   :  { %v4198_v19 = vpop.f32.mrf.mxu0  ;;  %v4830_v12 = vadd.f32 %v4829_v37, %v10924_v60  ;;  %v4850_v21 = vadd.f32 %v4849_v32, %v10917_v42  ;;  %v5154_v60 = vadd.f32 %v5153_v5, %v5037_v26 }
 0x54f   :  { %14928 = vst [vmem:[#allocation21_spill] sm:$0xff] %v10954_v30  ;;  %v10965_v28 = vadd.f32 %v4309_v23, %v4197_v35  ;;  %v4311_v31 = vpop.f32.mrf.mxu1  ;;  %v4199_v47 = vadd.f32 %v4198_v19, %v10787_v49  ;;  %v5134_v35 = vadd.f32 %v5133_v62, %v5044_v44  ;;  %v5045_v23 = vmul.f32 %v10940_v46, %v10940_v46 }
 0x550   :  { %v4202_v61 = vpop.f32.mrf.mxu0  ;;  %v4831_v19 = vadd.f32 %v4830_v12, %v10945_v59  ;;  %v4851_v32 = vadd.f32 %v4850_v21, %v10940_v46  ;;  %v5053_v62 = vmul.f32 %v10954_v30, %v10954_v30 }
 0x551   :  { %14929 = vst [vmem:[#allocation23_spill] sm:$0xff] %v10965_v28  ;;  %v4203_v11 = vadd.f32 %v4202_v61, %v10776_v55  ;;  %v4315_v58 = vpop.f32.mrf.mxu1  ;;  %v10980_v34 = vadd.f32 %v4311_v31, %v4199_v47  ;;  %v5060_v50 = vmul.f32 %v10965_v28, %v10965_v28  ;;  %v5135_v44 = vadd.f32 %v5134_v35, %v5052_v38 }
 0x552   :  { %v4204_v25 = vpop.f32.mrf.mxu0  ;;  %v4832_v47 = vadd.f32 %v4831_v19, %v10965_v28  ;;  %v4852_v5 = vadd.f32 %v4851_v32, %v10954_v30 }
 0x553   :  { %14930 = vst [vmem:[#allocation24_spill] sm:$0xff] %v10980_v34  ;;  %v10985_v27 = vadd.f32 %v4315_v58, %v4203_v11  ;;  %v4205_v61 = vadd.f32 %v4204_v25, %v10787_v49  ;;  %v4317_v37 = vpop.f32.mrf.mxu1  ;;  %v5155_v25 = vadd.f32 %v5154_v60, %v5045_v23  ;;  %v5061_v26 = vmul.f32 %v10980_v34, %v10980_v34 }
 0x554   :  { %v4206_v31 = vpop.f32.mrf.mxu0  ;;  %v5136_v21 = vadd.f32 %v5135_v44, %v5060_v50 }
 0x555   :  { %14931 = vst [vmem:[#allocation19_spill] sm:$0xff] %v10985_v27  ;;  %v5068_v12 = vmul.f32 %v10985_v27, %v10985_v27  ;;  %v10994_v59 = vadd.f32 %v4317_v37, %v4205_v61  ;;  %v4207_v11 = vadd.f32 %v4206_v31, %v10776_v55  ;;  %v4319_v58 = vpop.f32.mrf.mxu1  ;;  %v4833_v35 = vadd.f32 %v4832_v47, %v10985_v27 }
 0x556   :  { %v4208_v38 = vpop.f32.mrf.mxu0  ;;  %v11005_v61 = vrot.slane %v10558_v20, %v10975_v10  ;;  %v5156_v37 = vadd.f32 %v5155_v25, %v5053_v62  ;;  %v4853_v55 = vadd.f32 %v4852_v5, %v10980_v34 }
 0x557   :  { %14932 = vst [vmem:[#allocation78_spill] sm:$0xff] %v10994_v59  ;;  %v11001_v46 = vadd.f32 %v4319_v58, %v4207_v11  ;;  %v4321_v19 = vpop.f32.mrf.mxu1  ;;  %v5069_v60 = vmul.f32 %v10994_v59, %v10994_v59  ;;  %v4209_v23 = vadd.f32 %v4208_v38, %v10787_v49  ;;  %v5137_v31 = vadd.f32 %v5136_v21, %v5068_v12 }
 0x558   :  { %v4358_v32 = vpop.f32.mrf.mxu0  ;;  %v5157_v20 = vadd.f32 %v5156_v37, %v5061_v26  ;;  %v4854_v62 = vadd.f32 %v4853_v55, %v10994_v59 }
 0x559   :  { %14933 = vst [vmem:[#allocation79_spill] sm:$0xff] %v11001_v46  ;;  %v4834_v50 = vadd.f32 %v4833_v35, %v11001_v46  ;;  %v5076_v44 = vmul.f32 %v11001_v46, %v11001_v46  ;;  %v4359_v47 = vadd.f32 %v4358_v32, %v10961_v36  ;;  %v4471_v11 = vpop.f32.mrf.mxu1  ;;  %v11016_v58 = vadd.f32 %v4321_v19, %v4209_v23 }
 0x55a   :  { %v4360_v25 = vpop.f32.mrf.mxu0  ;;  %v5158_v38 = vadd.f32 %v5157_v20, %v5069_v60 }
 0x55b   :  { %14934 = vst [vmem:[#allocation80_spill] sm:$0xff] %v11016_v58  ;;  %v4835_v5 = vrot.slane %v4834_v50, 4  ;;  %v5138_v27 = vadd.f32 %v5137_v31, %v5076_v44  ;;  %v11018_v34 = vadd.f32 %v4471_v11, %v4359_v47  ;;  %v4361_v49 = vadd.f32 %v4360_v25, %v11005_v61  ;;  %v4473_v12 = vpop.f32.mrf.mxu1 }
 0x55c   :  { %v4855_v21 = vadd.f32 %v4854_v62, %v11016_v58  ;;  %v5077_v35 = vmul.f32 %v11016_v58, %v11016_v58  ;;  %v4362_v32 = vpop.f32.mrf.mxu0 }
 0x55d   :  { %14935 = vst [vmem:[#allocation81_spill] sm:$0xff] %v11018_v34  ;;  %v4836_v26 = vadd.f32 %v4835_v5, %v4834_v50  ;;  %v5139_v37 = vrot.slane %v5138_v27, 4  ;;  %v11024_v55 = vadd.f32 %v4473_v12, %v4361_v49  ;;  %v4475_v19 = vpop.f32.mrf.mxu1  ;;  %v4363_v31 = vadd.f32 %v4362_v32, %v10961_v36 }
 0x55e   :  { %v4856_v23 = vrot.slane %v4855_v21, 4  ;;  %v5159_v46 = vadd.f32 %v5158_v38, %v5077_v35  ;;  %v4364_v44 = vpop.f32.mrf.mxu0 }
 0x55f   :  { %14936 = vst [vmem:[#allocation82_spill] sm:$0xff] %v11024_v55  ;;  %v4837_v47 = vrot.slane %v4836_v26, 2  ;;  %v5140_v11 = vadd.f32 %v5139_v37, %v5138_v27  ;;  %v4365_v60 = vadd.f32 %v4364_v44, %v11005_v61  ;;  %v4477_v20 = vpop.f32.mrf.mxu1  ;;  %v11028_v59 = vadd.f32 %v4475_v19, %v4363_v31 }
 0x560   :  { %v4857_v62 = vadd.f32 %v4856_v23, %v4855_v21  ;;  %v5160_v25 = vrot.slane %v5159_v46, 4  ;;  %v4368_v58 = vpop.f32.mrf.mxu0 }
 0x561   :  { %14937 = vst [vmem:[#allocation83_spill] sm:$0xff] %v11028_v59  ;;  %v4838_v50 = vadd.f32 %v4837_v47, %v4836_v26  ;;  %v5141_v5 = vrot.slane %v5140_v11, 2  ;;  %v11030_v49 = vadd.f32 %v4477_v20, %v4365_v60  ;;  %v4369_v12 = vadd.f32 %v4368_v58, %v10961_v36  ;;  %v4481_v38 = vpop.f32.mrf.mxu1 }
 0x562   :  { %v4858_v35 = vrot.slane %v4857_v62, 2  ;;  %v5161_v32 = vadd.f32 %v5160_v25, %v5159_v46  ;;  %v4370_v28 = vpop.f32.mrf.mxu0 }
 0x563   :  { %14938 = vst [vmem:[#allocation84_spill] sm:$0xff] %v11030_v49  ;;  %v4839_v30 = vrot.slane %v4838_v50, 1  ;;  %v5142_v27 = vadd.f32 %v5141_v5, %v5140_v11  ;;  %v4483_v37 = vpop.f32.mrf.mxu1  ;;  %v11033_v21 = vadd.f32 %v4481_v38, %v4369_v12  ;;  %v4371_v26 = vadd.f32 %v4370_v28, %v11005_v61 }
 0x564   :  { %v4859_v44 = vadd.f32 %v4858_v35, %v4857_v62  ;;  %v5162_v42 = vrot.slane %v5161_v32, 2  ;;  %v4372_v19 = vpop.f32.mrf.mxu0  ;;  %v4883_v7 = vadd.f32 %v11030_v49, %v11024_v55 }
 0x565   :  { %14939 = vst [vmem:[#allocation85_spill] sm:$0xff] %v11033_v21  ;;  %v4840_v23 = vadd.f32 %v4839_v30, %v4838_v50  ;;  %v5143_v31 = vrot.slane %v5142_v27, 1  ;;  %v4485_v47 = vpop.f32.mrf.mxu1  ;;  %v11038_v25 = vadd.f32 %v4483_v37, %v4371_v26  ;;  %v4373_v11 = vadd.f32 %v4372_v19, %v10961_v36 }
 0x566   :  { %v4860_v60 = vrot.slane %v4859_v44, 1  ;;  %v5163_v20 = vadd.f32 %v5162_v42, %v5161_v32  ;;  %v4374_v58 = vpop.f32.mrf.mxu0 }
 0x567   :  { %v11036_v57 = vmul.f32 0.0078125, %v4840_v23  ;;  %v5144_v46 = vadd.f32 %v5143_v31, %v5142_v27  ;;  %14940 = vst [vmem:[#allocation86_spill] sm:$0xff] %v11038_v25  ;;  %v4487_v62 = vpop.f32.mrf.mxu1  ;;  %v4375_v38 = vadd.f32 %v4374_v58, %v11005_v61  ;;  %v11046_v23 = vadd.f32 %v4485_v47, %v4373_v11 }
 0x568   :  { %v4861_v5 = vadd.f32 %v4860_v60, %v4859_v44  ;;  %v5164_v12 = vrot.slane %v5163_v20, 1  ;;  %v4378_v30 = vpop.f32.mrf.mxu0  ;;  %v4884_v53 = vadd.f32 %v4883_v7, %v11038_v25 }
 0x569   :  { %v5252_v50 = vmul.f32 0.0078125, %v5144_v46  ;;  %v5260_v28 = vmul.f32 %v11036_v57, %v11036_v57  ;;  %v4491_v35 = vpop.f32.mrf.mxu1  ;;  %14941 = vst [vmem:[#allocation87_spill] sm:$0xff] %v11046_v23  ;;  %v11048_v27 = vadd.f32 %v4487_v62, %v4375_v38  ;;  %v4379_v44 = vadd.f32 %v4378_v30, %v10961_v36 }
 0x56a   :  { %v11044_v42 = vmul.f32 0.0078125, %v4861_v5  ;;  %v5165_v32 = vadd.f32 %v5164_v12, %v5163_v20  ;;  %v4380_v37 = vpop.f32.mrf.mxu0 }
 0x56b   :  { %14942 = vst [vmem:[#allocation88_spill] sm:$0xff] %v11048_v27  ;;  %v5268_v19 = vsub.f32 %v5252_v50, %v5260_v28  ;;  %v4381_v31 = vadd.f32 %v4380_v37, %v11005_v61  ;;  %v4493_v26 = vpop.f32.mrf.mxu1  ;;  %v11054_v5 = vadd.f32 %v4491_v35, %v4379_v44  ;;  %v4983_v24 = vmul.f32 %v11048_v27, %v11048_v27 }
 0x56c   :  { %v5253_v60 = vmul.f32 0.0078125, %v5165_v32  ;;  %v5261_v58 = vmul.f32 %v11044_v42, %v11044_v42  ;;  %v4382_v46 = vpop.f32.mrf.mxu0 }
 0x56d   :  { %v5276_v33 = vadd.f32 0.8, %v5268_v19  ;;  %14943 = vst [vmem:[#allocation89_spill] sm:$0xff] %v11054_v5  ;;  %v4495_v20 = vpop.f32.mrf.mxu1  ;;  %v11056_v11 = vadd.f32 %v4493_v26, %v4381_v31  ;;  %v4383_v62 = vadd.f32 %v4382_v46, %v10961_v36 }
 0x56e   :  { %v5269_v47 = vsub.f32 %v5253_v60, %v5261_v58  ;;  %v4384_v12 = vpop.f32.mrf.mxu0 }
 0x56f   :  { %14944 = vst [vmem:[#allocation90_spill] sm:$0xff] %v11056_v11  ;;  %v4497_v38 = vpop.f32.mrf.mxu1  ;;  %v11059_v50 = vadd.f32 %v4495_v20, %v4383_v62  ;;  %8069 = vrsqrt.f32 %v5276_v33  ;;  %v4385_v32 = vadd.f32 %v4384_v12, %v11005_v61  ;;  %v4991_v7 = vmul.f32 %v11056_v11, %v11056_v11 }
 0x570   :  { %v5277_v30 = vadd.f32 0.8, %v5269_v47  ;;  %v4388_v28 = vpop.f32.mrf.mxu0 }
 0x571   :  { %14945 = vst [vmem:[#allocation91_spill] sm:$0xff] %v11059_v50  ;;  %v4389_v37 = vadd.f32 %v4388_v28, %v10961_v36  ;;  %v4501_v19 = vpop.f32.mrf.mxu1  ;;  %v11063_v44 = vadd.f32 %v4497_v38, %v4385_v32  ;;  %v4967_v32 = vmul.f32 %v11030_v49, %v11030_v49 }
 0x572   :  { %8071 = vrsqrt.f32 %v5277_v30  ;;  %v4390_v35 = vpop.f32.mrf.mxu0  ;;  %v4966_v30 = vmul.f32 %v11028_v59, %v11028_v59 }
 0x573   :  { %14946 = vst [vmem:[#allocation92_spill] sm:$0xff] %v11063_v44  ;;  %v11065_v31 = vadd.f32 %v4501_v19, %v4389_v37  ;;  %v4391_v26 = vadd.f32 %v4390_v35, %v11005_v61  ;;  %v4503_v60 = vpop.f32.mrf.mxu1 }
 0x574   :  { %v4392_v58 = vpop.f32.mrf.mxu0 }
 0x575   :  { %14947 = vst [vmem:[#allocation93_spill] sm:$0xff] %v11065_v31  ;;  %v4505_v46 = vpop.f32.mrf.mxu1  ;;  %v11068_v20 = vadd.f32 %v4503_v60, %v4391_v26  ;;  %v4393_v33 = vadd.f32 %v4392_v58, %v10961_v36  ;;  %v4958_v26 = vmul.f32 %v11018_v34, %v11018_v34  ;;  %v4959_v60 = vmul.f32 %v11024_v55, %v11024_v55 }
 0x576   :  { %v4394_v47 = vpop.f32.mrf.mxu0  ;;  %v4974_v58 = vmul.f32 %v11033_v21, %v11033_v21 }
 0x577   :  { %14948 = vst [vmem:[#allocation94_spill] sm:$0xff] %v11068_v20  ;;  %v4395_v62 = vadd.f32 %v4394_v47, %v11005_v61  ;;  %v4507_v12 = vpop.f32.mrf.mxu1  ;;  %v11074_v38 = vadd.f32 %v4505_v46, %v4393_v33  ;;  %v4862_v33 = vadd.f32 %v11028_v59, %v11018_v34  ;;  %v4975_v47 = vmul.f32 %v11038_v25, %v11038_v25 }
 0x578   :  { %v4398_v28 = vpop.f32.mrf.mxu0  ;;  %v5166_v13 = vadd.f32 %v4966_v30, %v4958_v26  ;;  %v5187_v52 = vadd.f32 %v4967_v32, %v4959_v60 }
 0x579   :  { %14949 = vst [vmem:[#allocation95_spill] sm:$0xff] %v11074_v38  ;;  %v11078_v37 = vadd.f32 %v4507_v12, %v4395_v62  ;;  %v4399_v19 = vadd.f32 %v4398_v28, %v10961_v36  ;;  %v4511_v35 = vpop.f32.mrf.mxu1  ;;  %v4863_v22 = vadd.f32 %v4862_v33, %v11033_v21  ;;  %v4990_v33 = vmul.f32 %v11054_v5, %v11054_v5 }
 0x57a   :  { %v4400_v46 = vpop.f32.mrf.mxu0  ;;  %v5167_v63 = vadd.f32 %v5166_v13, %v4974_v58  ;;  %v5188_v32 = vadd.f32 %v5187_v52, %v4975_v47  ;;  %v4885_v13 = vadd.f32 %v4884_v53, %v11048_v27  ;;  %v4998_v52 = vmul.f32 %v11059_v50, %v11059_v50 }
 0x57b   :  { %14950 = vst [vmem:[#allocation96_spill] sm:$0xff] %v11078_v37  ;;  %v11091_v62 = vadd.f32 %v4511_v35, %v4399_v19  ;;  %v4401_v12 = vadd.f32 %v4400_v46, %v11005_v61  ;;  %v4513_v28 = vpop.f32.mrf.mxu1  ;;  %v4982_v19 = vmul.f32 %v11046_v23, %v11046_v23  ;;  %v4864_v60 = vadd.f32 %v4863_v22, %v11046_v23 }
 0x57c   :  { %v4402_v40 = vpop.f32.mrf.mxu0  ;;  %v8070_v29 = vpop.eup %8069 }
 0x57d   :  { %14951 = vst [vmem:[#allocation97_spill] sm:$0xff] %v11091_v62  ;;  %v11105_v35 = vadd.f32 %v4513_v28, %v4401_v12  ;;  %v4515_v46 = vpop.f32.mrf.mxu1  ;;  %v4403_v3 = vadd.f32 %v4402_v40, %v10961_v36  ;;  %v5168_v25 = vadd.f32 %v5167_v63, %v4982_v19  ;;  %v4865_v53 = vadd.f32 %v4864_v60, %v11054_v5 }
 0x57e   :  { %v4404_v30 = vpop.f32.mrf.mxu0  ;;  %v4886_v63 = vadd.f32 %v4885_v13, %v11056_v11  ;;  %v5015_v5 = vmul.f32 %v11078_v37, %v11078_v37 }
 0x57f   :  { %14954 = vst [vmem:[#allocation22_spill] sm:$0xff] %v11105_v35  ;;  %v8072_v26 = vpop.eup %8071  ;;  %v4405_v12 = vadd.f32 %v4404_v30, %v11005_v61  ;;  %v4517_v28 = vpop.f32.mrf.mxu1  ;;  %v11118_v58 = vadd.f32 %v4515_v46, %v4403_v3  ;;  %v4999_v46 = vmul.f32 %v11063_v44, %v11063_v44 }
 0x580   :  { %v5299_v21 = vcombine.low %v8070_v29, %v8072_v26  ;;  %v4408_v40 = vpop.f32.mrf.mxu0  ;;  %v5189_v29 = vadd.f32 %v5188_v32, %v4983_v24  ;;  %v5169_v26 = vadd.f32 %v5168_v25, %v4990_v33  ;;  %v5006_v24 = vmul.f32 %v11065_v31, %v11065_v31 }
 0x581   :  { %14955 = vst [vmem:[#allocation98_spill] sm:$0xff] %v11118_v58  ;;  %v11122_v22 = vadd.f32 %v4517_v28, %v4405_v12  ;;  %v4409_v47 = vadd.f32 %v4408_v40, %v10961_v36  ;;  %v4521_v23 = vpop.f32.mrf.mxu1  ;;  %v5007_v32 = vmul.f32 %v11068_v20, %v11068_v20  ;;  %v4866_v25 = vadd.f32 %v4865_v53, %v11059_v50 }
 0x582   :  { %v11126_v30 = vrot.slane %v5299_v21, %v14952_v15  ;;  %v4410_v3 = vpop.f32.mrf.mxu0  ;;  %v5190_v21 = vadd.f32 %v5189_v29, %v4991_v7  ;;  %v5170_v33 = vadd.f32 %v5169_v26, %v4998_v52  ;;  %v5014_v40 = vmul.f32 %v11074_v38, %v11074_v38 }
 0x583   :  { %14956 = vst [vmem:[#allocation99_spill] sm:$0xff] %v11122_v22  ;;  %v11132_v19 = vadd.f32 %v4521_v23, %v4409_v47  ;;  %v4411_v12 = vadd.f32 %v4410_v3, %v11005_v61  ;;  %v4523_v28 = vpop.f32.mrf.mxu1  ;;  %v4887_v47 = vadd.f32 %v4886_v63, %v11063_v44  ;;  %v4867_v11 = vadd.f32 %v4866_v25, %v11065_v31 }
 0x584   :  { %v4412_v60 = vpop.f32.mrf.mxu0  ;;  %v5191_v3 = vadd.f32 %v5190_v21, %v4999_v46  ;;  %v5171_v26 = vadd.f32 %v5170_v33, %v5006_v24  ;;  %v5022_v21 = vmul.f32 %v11091_v62, %v11091_v62 }
 0x585   :  { %14957 = vst [vmem:[#allocation100_spill] sm:$0xff] %v11132_v19  ;;  %v11142_v13 = vadd.f32 %v4523_v28, %v4411_v12  ;;  %v4525_v23 = vpop.f32.mrf.mxu1  ;;  %v4413_v7 = vadd.f32 %v4412_v60, %v10961_v36  ;;  %v4888_v12 = vadd.f32 %v4887_v47, %v11068_v20  ;;  %v5023_v60 = vmul.f32 %v11105_v35, %v11105_v35 }
 0x586   :  { %v4414_v29 = vpop.f32.mrf.mxu0  ;;  %v5192_v28 = vadd.f32 %v5191_v3, %v5007_v32  ;;  %v5172_v24 = vadd.f32 %v5171_v26, %v5014_v40  ;;  %v5030_v47 = vmul.f32 %v11118_v58, %v11118_v58 }
 0x587   :  { %14958 = vst [vmem:[#allocation101_spill] sm:$0xff] %v11142_v13  ;;  %v4415_v53 = vadd.f32 %v4414_v29, %v11005_v61  ;;  %v4527_v52 = vpop.f32.mrf.mxu1  ;;  %v11153_v63 = vadd.f32 %v4525_v23, %v4413_v7  ;;  %v4868_v29 = vadd.f32 %v4867_v11, %v11074_v38  ;;  %v4889_v33 = vadd.f32 %v4888_v12, %v11078_v37 }
 0x588   :  { %v4418_v46 = vpop.f32.mrf.mxu0  ;;  %v5193_v23 = vadd.f32 %v5192_v28, %v5015_v5  ;;  %v5173_v11 = vadd.f32 %v5172_v24, %v5022_v21 }
 0x589   :  { %14959 = vst [vmem:[#allocation102_spill] sm:$0xff] %v11153_v63  ;;  %v11159_v25 = vadd.f32 %v4527_v52, %v4415_v53  ;;  %v4419_v31 = vadd.f32 %v4418_v46, %v10961_v36  ;;  %v4531_v44 = vpop.f32.mrf.mxu1  ;;  %v4869_v53 = vadd.f32 %v4868_v29, %v11091_v62  ;;  %v5031_v52 = vmul.f32 %v11122_v22, %v11122_v22 }
 0x58a   :  { %v4420_v32 = vpop.f32.mrf.mxu0  ;;  %v4890_v40 = vadd.f32 %v4889_v33, %v11105_v35  ;;  %v5194_v26 = vadd.f32 %v5193_v23, %v5023_v60  ;;  %v5174_v62 = vadd.f32 %v5173_v11, %v5030_v47  ;;  %v5046_v23 = vmul.f32 %v11153_v63, %v11153_v63 }
 0x58b   :  { %14960 = vst [vmem:[#allocation103_spill] sm:$0xff] %v11159_v25  ;;  %v11166_v3 = vadd.f32 %v4531_v44, %v4419_v31  ;;  %v4421_v7 = vadd.f32 %v4420_v32, %v11005_v61  ;;  %v4533_v20 = vpop.f32.mrf.mxu1  ;;  %v4870_v28 = vadd.f32 %v4869_v53, %v11118_v58  ;;  %v5038_v44 = vmul.f32 %v11132_v19, %v11132_v19 }
 0x58c   :  { %v4422_v46 = vpop.f32.mrf.mxu0  ;;  %v5039_v31 = vmul.f32 %v11142_v13, %v11142_v13  ;;  %v4891_v21 = vadd.f32 %v4890_v40, %v11122_v22 }
 0x58d   :  { %14961 = vst [vmem:[#allocation104_spill] sm:$0xff] %v11166_v3  ;;  %v11173_v12 = vadd.f32 %v4533_v20, %v4421_v7  ;;  %v4535_v5 = vpop.f32.mrf.mxu1  ;;  %v4423_v29 = vadd.f32 %v4422_v46, %v10961_v36  ;;  %v5195_v20 = vadd.f32 %v5194_v26, %v5031_v52  ;;  %v4871_v33 = vadd.f32 %v4870_v28, %v11132_v19 }
 0x58e   :  { %v4424_v32 = vpop.f32.mrf.mxu0  ;;  %v4892_v58 = vadd.f32 %v4891_v21, %v11142_v13  ;;  %v5047_v46 = vmul.f32 %v11159_v25, %v11159_v25  ;;  %v5054_v28 = vmul.f32 %v11166_v3, %v11166_v3 }
 0x58f   :  { %14962 = vst [vmem:[#allocation105_spill] sm:$0xff] %v11173_v12  ;;  %v4425_v24 = vadd.f32 %v4424_v32, %v11005_v61  ;;  %v4537_v60 = vpop.f32.mrf.mxu1  ;;  %v11186_v7 = vadd.f32 %v4535_v5, %v4423_v29  ;;  %v5175_v32 = vadd.f32 %v5174_v62, %v5038_v44  ;;  %v5196_v52 = vadd.f32 %v5195_v20, %v5039_v31 }
 0x590   :  { %v4428_v53 = vpop.f32.mrf.mxu0  ;;  %v4872_v26 = vadd.f32 %v4871_v33, %v11153_v63  ;;  %v4893_v29 = vadd.f32 %v4892_v58, %v11159_v25  ;;  %v5055_v21 = vmul.f32 %v11173_v12, %v11173_v12 }
 0x591   :  { %14963 = vst [vmem:[#allocation106_spill] sm:$0xff] %v11186_v7  ;;  %v11191_v47 = vadd.f32 %v4537_v60, %v4425_v24  ;;  %v4429_v11 = vadd.f32 %v4428_v53, %v10961_v36  ;;  %v4541_v40 = vpop.f32.mrf.mxu1  ;;  %v5176_v53 = vadd.f32 %v5175_v32, %v5046_v23  ;;  %v5062_v44 = vmul.f32 %v11186_v7, %v11186_v7 }
 0x592   :  { %v4430_v5 = vpop.f32.mrf.mxu0  ;;  %v4873_v62 = vadd.f32 %v4872_v26, %v11166_v3  ;;  %v5197_v20 = vadd.f32 %v5196_v52, %v5047_v46  ;;  %v4894_v33 = vadd.f32 %v4893_v29, %v11173_v12 }
 0x593   :  { %14964 = vst [vmem:[#allocation107_spill] sm:$0xff] %v11191_v47  ;;  %v11200_v13 = vadd.f32 %v4541_v40, %v4429_v11  ;;  %v4431_v24 = vadd.f32 %v4430_v5, %v11005_v61  ;;  %v4543_v60 = vpop.f32.mrf.mxu1  ;;  %v5063_v58 = vmul.f32 %v11191_v47, %v11191_v47  ;;  %v5177_v40 = vadd.f32 %v5176_v53, %v5054_v28 }
 0x594   :  { %v4432_v31 = vpop.f32.mrf.mxu0  ;;  %v4874_v5 = vadd.f32 %v4873_v62, %v11186_v7  ;;  %v5198_v3 = vadd.f32 %v5197_v20, %v5055_v21  ;;  %v4895_v46 = vadd.f32 %v4894_v33, %v11191_v47 }
 0x595   :  { %14965 = vst [vmem:[#allocation108_spill] sm:$0xff] %v11200_v13  ;;  %v11209_v25 = vadd.f32 %v4543_v60, %v4431_v24  ;;  %v4545_v11 = vpop.f32.mrf.mxu1  ;;  %v5070_v23 = vmul.f32 %v11200_v13, %v11200_v13  ;;  %v4433_v32 = vadd.f32 %v4432_v31, %v10961_v36  ;;  %v5178_v60 = vadd.f32 %v5177_v40, %v5062_v44 }
 0x596   :  { %v4434_v26 = vpop.f32.mrf.mxu0  ;;  %v4875_v28 = vadd.f32 %v4874_v5, %v11200_v13  ;;  %v5199_v7 = vadd.f32 %v5198_v3, %v5063_v58 }
 0x597   :  { %14966 = vst [vmem:[#allocation109_spill] sm:$0xff] %v11209_v25  ;;  %v5071_v52 = vmul.f32 %v11209_v25, %v11209_v25  ;;  %v4435_v29 = vadd.f32 %v4434_v26, %v11005_v61  ;;  %v4547_v24 = vpop.f32.mrf.mxu1  ;;  %v11220_v53 = vadd.f32 %v4545_v11, %v4433_v32  ;;  %v4896_v36 = vadd.f32 %v4895_v46, %v11209_v25 }
 0x598   :  { %v11222_v62 = vpop.f32.mrf.mxu0  ;;  %v5179_v20 = vadd.f32 %v5178_v60, %v5070_v23 }
 0x599   :  { %14967 = vst [vmem:[#allocation110_spill] sm:$0xff] %v11220_v53  ;;  %v11225_v31 = vadd.f32 %v4547_v24, %v4435_v29  ;;  %v11227_v21 = vpop.f32.mrf.mxu1  ;;  %v4876_v33 = vadd.f32 %v4875_v28, %v11220_v53  ;;  %v5078_v61 = vmul.f32 %v11220_v53, %v11220_v53  ;;  %v5200_v40 = vadd.f32 %v5199_v7, %v5071_v52 }
 0x59a   :  { %v11232_v44 = vpop.f32.mrf.mxu0 }
 0x59b   :  { %14968 = vst [vmem:[#allocation111_spill] sm:$0xff] %v11225_v31  ;;  %v4897_v11 = vadd.f32 %v4896_v36, %v11225_v31  ;;  %v5079_v3 = vmul.f32 %v11225_v31, %v11225_v31  ;;  %v11237_v58 = vpop.f32.mrf.mxu1  ;;  %v4877_v5 = vrot.slane %v4876_v33, 4  ;;  %v5180_v32 = vadd.f32 %v5179_v20, %v5078_v61 }
 0x59c   :  { %v4588_v26 = vpop.f32.mrf.mxu0 }
 0x59d   :  { %v4898_v46 = vrot.slane %v4897_v11, 4  ;;  %v5201_v23 = vadd.f32 %v5200_v40, %v5079_v3  ;;  %v11239_v29 = vpop.f32.mrf.mxu1  ;;  %v4878_v24 = vadd.f32 %v4877_v5, %v4876_v33  ;;  %v5181_v60 = vrot.slane %v5180_v32, 4 }
 0x59e   :  { %v4590_v28 = vpop.f32.mrf.mxu0 }
 0x59f   :  { %v4899_v53 = vadd.f32 %v4898_v46, %v4897_v11  ;;  %v5202_v25 = vrot.slane %v5201_v23, 4  ;;  %v11241_v7 = vpop.f32.mrf.mxu1  ;;  %v4879_v52 = vrot.slane %v4878_v24, 2  ;;  %v5182_v36 = vadd.f32 %v5181_v60, %v5180_v32 }
 0x5a0   :  { %v4594_v13 = vpop.f32.mrf.mxu0 }
 0x5a1   :  { %v4900_v31 = vrot.slane %v4899_v53, 2  ;;  %v5203_v47 = vadd.f32 %v5202_v25, %v5201_v23  ;;  %v4707_v12 = vpop.f32.mrf.mxu1  ;;  %v4880_v63 = vadd.f32 %v4879_v52, %v4878_v24  ;;  %v5183_v20 = vrot.slane %v5182_v36, 2 }
 0x5a2   :  { %v4596_v61 = vpop.f32.mrf.mxu0  ;;  %v11244_v25 = vsub.s32 6, %v14925_v41  ;;  %v11247_v23 = vsub.s32 7, %v14925_v41  ;;  %v8081_v41 = vld [vmem:[%s14273_s6 + $0x14] sm:$0xff] }
 0x5a3   :  { %v4901_v19 = vadd.f32 %v4900_v31, %v4899_v53  ;;  %v5204_v40 = vrot.slane %v5203_v47, 2  ;;  %v4709_v3 = vpop.f32.mrf.mxu1  ;;  %v4881_v22 = vrot.slane %v4880_v63, 1  ;;  %v5184_v33 = vadd.f32 %v5183_v20, %v5182_v36 }
 0x5a4   :  { %v4598_v5 = vpop.f32.mrf.mxu0 }
 0x5a5   :  { %v4902_v35 = vrot.slane %v4901_v19, 1  ;;  %v5205_v11 = vadd.f32 %v5204_v40, %v5203_v47  ;;  %v4711_v46 = vpop.f32.mrf.mxu1  ;;  %v4882_v37 = vadd.f32 %v4881_v22, %v4880_v63  ;;  %v5185_v38 = vrot.slane %v5184_v33, 1 }
 0x5a6   :  { %v4600_v50 = vpop.f32.mrf.mxu0 }
 0x5a7   :  { %v4903_v32 = vadd.f32 %v4902_v35, %v4901_v19  ;;  %v5206_v60 = vrot.slane %v5205_v11, 1  ;;  %v4713_v53 = vpop.f32.mrf.mxu1  ;;  %v11249_v31 = vmul.f32 0.0078125, %v4882_v37  ;;  %v5186_v24 = vadd.f32 %v5185_v38, %v5184_v33 }
 0x5a8   :  { %v4604_v52 = vpop.f32.mrf.mxu0  ;;  %v11261_v38 = vrot.slane %v8081_v41, %v11244_v25  ;;  %v11264_v37 = vrot.slane %v8081_v41, %v11247_v23 }
 0x5a9   :  { %v11251_v36 = vmul.f32 0.0078125, %v4903_v32  ;;  %v5207_v47 = vadd.f32 %v5206_v60, %v5205_v11  ;;  %v4717_v20 = vpop.f32.mrf.mxu1  ;;  %v5254_v22 = vmul.f32 0.0078125, %v5186_v24  ;;  %v5262_v35 = vmul.f32 %v11249_v31, %v11249_v31 }
 0x5aa   :  { %v4606_v19 = vpop.f32.mrf.mxu0  ;;  %v4585_v49 = vadd.f32 %v11222_v62, %v11261_v38  ;;  %v4587_v59 = vadd.f32 %v11232_v44, %v11264_v37  ;;  %v4591_v16 = vadd.f32 %v4590_v28, %v11264_v37 }
 0x5ab   :  { %v5255_v63 = vmul.f32 0.0078125, %v5207_v47  ;;  %v5263_v40 = vmul.f32 %v11251_v36, %v11251_v36  ;;  %v4719_v33 = vpop.f32.mrf.mxu1  ;;  %v5270_v11 = vsub.f32 %v5254_v22, %v5262_v35  ;;  %v4589_v47 = vadd.f32 %v4588_v26, %v11261_v38 }
 0x5ac   :  { %v4608_v32 = vpop.f32.mrf.mxu0  ;;  %v4595_v22 = vadd.f32 %v4594_v13, %v11261_v38  ;;  %v4597_v35 = vadd.f32 %v4596_v61, %v11264_v37  ;;  %v11278_v62 = vadd.f32 %v11227_v21, %v4585_v49  ;;  %v11281_v44 = vadd.f32 %v11237_v58, %v4587_v59 }
 0x5ad   :  { %v5271_v60 = vsub.f32 %v5255_v63, %v5263_v40  ;;  %v4721_v24 = vpop.f32.mrf.mxu1  ;;  %v5278_v27 = vadd.f32 0.8, %v5270_v11  ;;  %v11275_v26 = vadd.f32 %v11239_v29, %v4589_v47  ;;  %v11284_v28 = vadd.f32 %v11241_v7, %v4591_v16 }
 0x5ae   :  { %v4610_v1 = vpop.f32.mrf.mxu0  ;;  %14970 = vst [vmem:[#allocation113_spill] sm:$0xff] %v11278_v62  ;;  %14971 = vst [vmem:[#allocation114_spill] sm:$0xff] %v11281_v44  ;;  %v11287_v11 = vadd.f32 %v4707_v12, %v4595_v22  ;;  %v11289_v61 = vadd.f32 %v4709_v3, %v4597_v35  ;;  %v4601_v29 = vadd.f32 %v4600_v50, %v11264_v37 }
 0x5af   :  { %v5279_v45 = vadd.f32 0.8, %v5271_v60  ;;  %v4723_v41 = vpop.f32.mrf.mxu1  ;;  %8073 = vrsqrt.f32 %v5278_v27  ;;  %14969 = vst [vmem:[#allocation112_spill] sm:$0xff] %v11275_v26  ;;  %14972 = vst [vmem:[#allocation115_spill] sm:$0xff] %v11284_v28  ;;  %v4968_v49 = vmul.f32 %v11275_v26, %v11275_v26  ;;  %v4605_v59 = vadd.f32 %v4604_v52, %v11261_v38 }
 0x5b0   :  { %v4614_v0 = vpop.f32.mrf.mxu0  ;;  %14973 = vst [vmem:[#allocation116_spill] sm:$0xff] %v11289_v61  ;;  %v4960_v16 = vmul.f32 %v11278_v62, %v11278_v62  ;;  %v4961_v58 = vmul.f32 %v11281_v44, %v11281_v44  ;;  %v4969_v12 = vmul.f32 %v11284_v28, %v11284_v28  ;;  %v4904_v50 = vadd.f32 %v11275_v26, %v11278_v62 }
 0x5b1   :  { %8075 = vrsqrt.f32 %v5279_v45  ;;  %v4727_v63 = vpop.f32.mrf.mxu1  ;;  %v4599_v45 = vadd.f32 %v4598_v5, %v11261_v38  ;;  %v4607_v5 = vadd.f32 %v4606_v19, %v11264_v37  ;;  %v4609_v52 = vadd.f32 %v4608_v32, %v11261_v38 }
 0x5b2   :  { %v4616_v40 = vpop.f32.mrf.mxu0  ;;  %v4925_v22 = vadd.f32 %v11284_v28, %v11281_v44  ;;  %v4976_v35 = vmul.f32 %v11287_v11, %v11287_v11  ;;  %v4977_v4 = vmul.f32 %v11289_v61, %v11289_v61  ;;  %v11313_v2 = vadd.f32 %v4713_v53, %v4601_v29 }
 0x5b3   :  { %v4729_v27 = vpop.f32.mrf.mxu1  ;;  %v11303_v3 = vadd.f32 %v4711_v46, %v4599_v45  ;;  %v5208_v26 = vadd.f32 %v4968_v49, %v4960_v16  ;;  %v11315_v46 = vadd.f32 %v4717_v20, %v4605_v59  ;;  %v4611_v19 = vadd.f32 %v4610_v1, %v11264_v37 }
 0x5b4   :  { %v4618_v13 = vpop.f32.mrf.mxu0  ;;  %14975 = vst [vmem:[#allocation118_spill] sm:$0xff] %v11313_v2  ;;  %v5229_v32 = vadd.f32 %v4969_v12, %v4961_v58  ;;  %v4905_v62 = vadd.f32 %v4904_v50, %v11287_v11  ;;  %v4926_v28 = vadd.f32 %v4925_v22, %v11289_v61  ;;  %v4615_v44 = vadd.f32 %v4614_v0, %v11261_v38 }
 0x5b5   :  { %v4731_v60 = vpop.f32.mrf.mxu1  ;;  %14974 = vst [vmem:[#allocation117_spill] sm:$0xff] %v11303_v3  ;;  %v4984_v54 = vmul.f32 %v11303_v3, %v11303_v3  ;;  %v11323_v53 = vadd.f32 %v4719_v33, %v4607_v5  ;;  %v11325_v29 = vadd.f32 %v4721_v24, %v4609_v52  ;;  %v4617_v20 = vadd.f32 %v4616_v40, %v11264_v37 }
 0x5b6   :  { %v4620_v21 = vpop.f32.mrf.mxu0  ;;  %v5209_v59 = vadd.f32 %v5208_v26, %v4976_v35  ;;  %v5230_v16 = vadd.f32 %v5229_v32, %v4977_v4  ;;  %v4985_v58 = vmul.f32 %v11313_v2, %v11313_v2  ;;  %v4619_v0 = vadd.f32 %v4618_v13, %v11261_v38 }
 0x5b7   :  { %v4733_v7 = vpop.f32.mrf.mxu1  ;;  %v4906_v33 = vadd.f32 %v4905_v62, %v11303_v3  ;;  %v4927_v24 = vadd.f32 %v4926_v28, %v11313_v2  ;;  %v4992_v40 = vmul.f32 %v11315_v46, %v11315_v46  ;;  %v11339_v5 = vadd.f32 %v4723_v41, %v4611_v19 }
 0x5b8   :  { %v4624_v47 = vpop.f32.mrf.mxu0  ;;  %v11343_v26 = vadd.f32 %v4727_v63, %v4615_v44  ;;  %v4621_v13 = vadd.f32 %v4620_v21, %v11264_v37  ;;  %v5210_v32 = vadd.f32 %v5209_v59, %v4984_v54  ;;  %v4993_v62 = vmul.f32 %v11323_v53, %v11323_v53 }
 0x5b9   :  { %v4737_v55 = vpop.f32.mrf.mxu1  ;;  %v4625_v22 = vadd.f32 %v4624_v47, %v11261_v38  ;;  %v5000_v28 = vmul.f32 %v11325_v29, %v11325_v29  ;;  %v11351_v41 = vadd.f32 %v4729_v27, %v4617_v20  ;;  %v5231_v2 = vadd.f32 %v5230_v16, %v4985_v58 }
 0x5ba   :  { %v4626_v45 = vpop.f32.mrf.mxu0  ;;  %14976 = vst [vmem:[#allocation119_spill] sm:$0xff] %v11343_v26  ;;  %v4907_v4 = vadd.f32 %v4906_v33, %v11315_v46  ;;  %v11354_v63 = vadd.f32 %v4731_v60, %v4619_v0  ;;  %v5211_v47 = vadd.f32 %v5210_v32, %v4992_v40  ;;  %v4928_v54 = vadd.f32 %v4927_v24, %v11323_v53 }
 0x5bb   :  { %v4739_v34 = vpop.f32.mrf.mxu1  ;;  %v5001_v59 = vmul.f32 %v11339_v5, %v11339_v5  ;;  %v4627_v3 = vadd.f32 %v4626_v45, %v11264_v37  ;;  %v5008_v27 = vmul.f32 %v11343_v26, %v11343_v26  ;;  %v11363_v20 = vadd.f32 %v4733_v7, %v4621_v13 }
 0x5bc   :  { %v4628_v49 = vpop.f32.mrf.mxu0  ;;  %v11328_v1 = vpop.eup %8073  ;;  %v11365_v16 = vadd.f32 %v4737_v55, %v4625_v22  ;;  %v5232_v58 = vadd.f32 %v5231_v2, %v4993_v62  ;;  %v4908_v0 = vadd.f32 %v4907_v4, %v11325_v29  ;;  %v5212_v33 = vadd.f32 %v5211_v47, %v5000_v28 }
 0x5bd   :  { %v4741_v12 = vpop.f32.mrf.mxu1  ;;  %v4629_v44 = vadd.f32 %v4628_v49, %v11261_v38  ;;  %14977 = vst [vmem:[#allocation120_spill] sm:$0xff] %v11363_v20  ;;  %v5009_v24 = vmul.f32 %v11351_v41, %v11351_v41  ;;  %v4929_v45 = vadd.f32 %v4928_v54, %v11339_v5  ;;  %v5016_v32 = vmul.f32 %v11354_v63, %v11354_v63 }
 0x5be   :  { %v11333_v50 = vpop.eup %8075  ;;  %v4630_v52 = vpop.f32.mrf.mxu0  ;;  %v5233_v22 = vadd.f32 %v5232_v58, %v5001_v59  ;;  %v4909_v2 = vadd.f32 %v4908_v0, %v11343_v26  ;;  %v11378_v62 = vadd.f32 %v4739_v34, %v4627_v3  ;;  %v5017_v47 = vmul.f32 %v11363_v20, %v11363_v20 }
 0x5bf   :  { %v4743_v35 = vpop.f32.mrf.mxu1  ;;  %v11374_v7 = vadd.f32 %v4741_v12, %v4629_v44  ;;  %v4631_v55 = vadd.f32 %v4630_v52, %v11264_v37  ;;  %v5024_v54 = vmul.f32 %v11365_v16, %v11365_v16  ;;  %v4930_v52 = vadd.f32 %v4929_v45, %v11351_v41 }
 0x5c0   :  { %v4634_v19 = vpop.f32.mrf.mxu0  ;;  %v5234_v59 = vadd.f32 %v5233_v22, %v5009_v24  ;;  %v4910_v58 = vadd.f32 %v4909_v2, %v11354_v63 }
 0x5c1   :  { %v4747_v21 = vpop.f32.mrf.mxu1  ;;  %v4635_v60 = vadd.f32 %v4634_v19, %v11261_v38  ;;  %v5213_v19 = vadd.f32 %v5212_v33, %v5008_v27  ;;  %v5032_v27 = vmul.f32 %v11374_v7, %v11374_v7  ;;  %v11392_v33 = vadd.f32 %v4743_v35, %v4631_v55 }
 0x5c2   :  { %v4636_v61 = vpop.f32.mrf.mxu0  ;;  %v5235_v22 = vadd.f32 %v5234_v59, %v5017_v47 }
 0x5c3   :  { %v4749_v49 = vpop.f32.mrf.mxu1  ;;  %v11385_v12 = vadd.f32 %v4747_v21, %v4635_v60  ;;  %v4637_v34 = vadd.f32 %v4636_v61, %v11264_v37  ;;  %v5214_v0 = vadd.f32 %v5213_v19, %v5016_v32  ;;  %v4931_v21 = vadd.f32 %v4930_v52, %v11363_v20 }
 0x5c4   :  { %v4638_v40 = vpop.f32.mrf.mxu0  ;;  %v5025_v60 = vmul.f32 %v11378_v62, %v11378_v62  ;;  %v4911_v32 = vadd.f32 %v4910_v58, %v11365_v16  ;;  %v5033_v47 = vmul.f32 %v11392_v33, %v11392_v33 }
 0x5c5   :  { %v4751_v13 = vpop.f32.mrf.mxu1  ;;  %v4639_v4 = vadd.f32 %v4638_v40, %v11261_v38  ;;  %14978 = vst [vmem:[#allocation121_spill] sm:$0xff] %v11385_v12  ;;  %v5215_v2 = vadd.f32 %v5214_v0, %v5024_v54  ;;  %v5040_v35 = vmul.f32 %v11385_v12, %v11385_v12  ;;  %v4932_v19 = vadd.f32 %v4931_v21, %v11378_v62 }
 0x5c6   :  { %v4640_v28 = vpop.f32.mrf.mxu0  ;;  %v5236_v58 = vadd.f32 %v5235_v22, %v5025_v60 }
 0x5c7   :  { %v4753_v44 = vpop.f32.mrf.mxu1  ;;  %v11398_v24 = vadd.f32 %v4751_v13, %v4639_v4  ;;  %v4641_v45 = vadd.f32 %v4640_v28, %v11264_v37  ;;  %v4912_v28 = vadd.f32 %v4911_v32, %v11374_v7  ;;  %v5216_v20 = vadd.f32 %v5215_v2, %v5032_v27 }
 0x5c8   :  { %v4644_v3 = vpop.f32.mrf.mxu0  ;;  %v5237_v2 = vadd.f32 %v5236_v58, %v5033_v47 }
 0x5c9   :  { %v4645_v40 = vadd.f32 %v4644_v3, %v11261_v38  ;;  %v4757_v26 = vpop.f32.mrf.mxu1  ;;  %v11405_v3 = vadd.f32 %v4749_v49, %v4637_v34  ;;  %v5048_v0 = vmul.f32 %v11398_v24, %v11398_v24  ;;  %v11416_v49 = vadd.f32 %v4753_v44, %v4641_v45 }
 0x5ca   :  { %v4646_v61 = vpop.f32.mrf.mxu0  ;;  %v4933_v34 = vadd.f32 %v4932_v19, %v11392_v33  ;;  %v5217_v21 = vadd.f32 %v5216_v20, %v5040_v35 }
 0x5cb   :  { %v4759_v55 = vpop.f32.mrf.mxu1  ;;  %v11407_v52 = vadd.f32 %v4757_v26, %v4645_v40  ;;  %v4647_v13 = vadd.f32 %v4646_v61, %v11264_v37  ;;  %v4913_v40 = vadd.f32 %v4912_v28, %v11385_v12  ;;  %v5041_v32 = vmul.f32 %v11405_v3, %v11405_v3 }
 0x5cc   :  { %v4648_v4 = vpop.f32.mrf.mxu0  ;;  %v4934_v35 = vadd.f32 %v4933_v34, %v11405_v3  ;;  %v5218_v28 = vadd.f32 %v5217_v21, %v5048_v0 }
 0x5cd   :  { %14979 = vst [vmem:[#allocation122_spill] sm:$0xff] %v11407_v52  ;;  %v4649_v54 = vadd.f32 %v4648_v4, %v11261_v38  ;;  %v4761_v59 = vpop.f32.mrf.mxu1  ;;  %v5056_v60 = vmul.f32 %v11407_v52, %v11407_v52  ;;  %v11426_v22 = vadd.f32 %v4759_v55, %v4647_v13  ;;  %v4914_v19 = vadd.f32 %v4913_v40, %v11398_v24 }
 0x5ce   :  { %v4650_v26 = vpop.f32.mrf.mxu0  ;;  %v5238_v40 = vadd.f32 %v5237_v2, %v5041_v32  ;;  %v4935_v34 = vadd.f32 %v4934_v35, %v11416_v49 }
 0x5cf   :  { %v11420_v61 = vadd.f32 %v4761_v59, %v4649_v54  ;;  %v4763_v27 = vpop.f32.mrf.mxu1  ;;  %v4651_v44 = vadd.f32 %v4650_v26, %v11264_v37  ;;  %v5049_v54 = vmul.f32 %v11416_v49, %v11416_v49  ;;  %v4915_v55 = vadd.f32 %v4914_v19, %v11407_v52 }
 0x5d0   :  { %v4654_v45 = vpop.f32.mrf.mxu0  ;;  %v5219_v0 = vadd.f32 %v5218_v28, %v5056_v60  ;;  %v5057_v21 = vmul.f32 %v11426_v22, %v11426_v22  ;;  %v4936_v32 = vadd.f32 %v4935_v34, %v11426_v22 }
 0x5d1   :  { %14980 = vst [vmem:[#allocation123_spill] sm:$0xff] %v11420_v61  ;;  %v4655_v4 = vadd.f32 %v4654_v45, %v11261_v38  ;;  %v4767_v20 = vpop.f32.mrf.mxu1  ;;  %v11434_v59 = vadd.f32 %v4763_v27, %v4651_v44  ;;  %v5064_v13 = vmul.f32 %v11420_v61, %v11420_v61  ;;  %v4916_v44 = vadd.f32 %v4915_v55, %v11420_v61 }
 0x5d2   :  { %v4656_v12 = vpop.f32.mrf.mxu0 }
 0x5d3   :  { %14981 = vst [vmem:[#allocation124_spill] sm:$0xff] %v11434_v59  ;;  %v11439_v47 = vadd.f32 %v4767_v20, %v4655_v4  ;;  %v4657_v58 = vadd.f32 %v4656_v12, %v11264_v37  ;;  %v4769_v26 = vpop.f32.mrf.mxu1  ;;  %v5239_v12 = vadd.f32 %v5238_v40, %v5049_v54  ;;  %v5065_v60 = vmul.f32 %v11434_v59, %v11434_v59 }
 0x5d4   :  { %v4658_v27 = vpop.f32.mrf.mxu0  ;;  %v5220_v35 = vadd.f32 %v5219_v0, %v5064_v13  ;;  %v4937_v61 = vadd.f32 %v4936_v32, %v11434_v59 }
 0x5d5   :  { %14982 = vst [vmem:[#allocation125_spill] sm:$0xff] %v11439_v47  ;;  %v5072_v45 = vmul.f32 %v11439_v47, %v11439_v47  ;;  %v11448_v19 = vadd.f32 %v4769_v26, %v4657_v58  ;;  %v4659_v4 = vadd.f32 %v4658_v27, %v11261_v38  ;;  %v4771_v20 = vpop.f32.mrf.mxu1  ;;  %v4917_v28 = vadd.f32 %v4916_v44, %v11439_v47 }
 0x5d6   :  { %v4660_v2 = vpop.f32.mrf.mxu0  ;;  %v5240_v55 = vadd.f32 %v5239_v12, %v5057_v21 }
 0x5d7   :  { %14983 = vst [vmem:[#allocation126_spill] sm:$0xff] %v11448_v19  ;;  %v11455_v52 = vadd.f32 %v4771_v20, %v4659_v4  ;;  %v5073_v58 = vmul.f32 %v11448_v19, %v11448_v19  ;;  %v4661_v38 = vadd.f32 %v4660_v2, %v11264_v37  ;;  %v5221_v54 = vadd.f32 %v5220_v35, %v5072_v45  ;;  %v4773_v34 = vpop.f32.mrf.mxu1 }
 0x5d8   :  { %v5241_v13 = vadd.f32 %v5240_v55, %v5065_v60  ;;  %v4938_v0 = vadd.f32 %v4937_v61, %v11448_v19 }
 0x5d9   :  { %14984 = vst [vmem:[#allocation127_spill] sm:$0xff] %v11455_v52  ;;  %v4918_v26 = vadd.f32 %v4917_v28, %v11455_v52  ;;  %v5080_v40 = vmul.f32 %v11455_v52, %v11455_v52  ;;  %v11465_v27 = vadd.f32 %v4773_v34, %v4661_v38 }
 0x5da   :  { %v5242_v4 = vadd.f32 %v5241_v13, %v5073_v58 }
 0x5db   :  { %14985 = vst [vmem:[#allocation128_spill] sm:$0xff] %v11465_v27  ;;  %v4919_v21 = vrot.slane %v4918_v26, 4  ;;  %v5222_v44 = vadd.f32 %v5221_v54, %v5080_v40  ;;  %v4939_v20 = vadd.f32 %v4938_v0, %v11465_v27  ;;  %v5081_v37 = vmul.f32 %v11465_v27, %v11465_v27 }
 0x5dd   :  { %v4920_v45 = vadd.f32 %v4919_v21, %v4918_v26  ;;  %v5223_v12 = vrot.slane %v5222_v44, 4  ;;  %v4940_v32 = vrot.slane %v4939_v20, 4  ;;  %v5243_v2 = vadd.f32 %v5242_v4, %v5081_v37 }
 0x5df   :  { %v4921_v35 = vrot.slane %v4920_v45, 2  ;;  %v5224_v28 = vadd.f32 %v5223_v12, %v5222_v44  ;;  %v4941_v52 = vadd.f32 %v4940_v32, %v4939_v20  ;;  %v5244_v60 = vrot.slane %v5243_v2, 4 }
 0x5e1   :  { %v4922_v55 = vadd.f32 %v4921_v35, %v4920_v45  ;;  %v5225_v61 = vrot.slane %v5224_v28, 2  ;;  %v4942_v38 = vrot.slane %v4941_v52, 2  ;;  %v5245_v34 = vadd.f32 %v5244_v60, %v5243_v2 }
 0x5e3   :  { %v4923_v19 = vrot.slane %v4922_v55, 1  ;;  %v5226_v54 = vadd.f32 %v5225_v61, %v5224_v28  ;;  %v4943_v58 = vadd.f32 %v4942_v38, %v4941_v52  ;;  %v5246_v40 = vrot.slane %v5245_v34, 2 }
 0x5e5   :  { %v4924_v13 = vadd.f32 %v4923_v19, %v4922_v55  ;;  %v5227_v0 = vrot.slane %v5226_v54, 1  ;;  %v4944_v47 = vrot.slane %v4943_v58, 1  ;;  %v5247_v27 = vadd.f32 %v5246_v40, %v5245_v34 }
 0x5e7   :  { %v4952_v26 = vmul.f32 0.0078125, %v4924_v13  ;;  %v5228_v21 = vadd.f32 %v5227_v0, %v5226_v54  ;;  %v4945_v59 = vadd.f32 %v4944_v47, %v4943_v58  ;;  %v5248_v4 = vrot.slane %v5247_v27, 1  ;;  %v4776_v58 = vld [vmem:[%s14273_s6 + $0x1c] sm:$0xff] }
 0x5e8   :  { %v14986_v47 = vcombine.low %v11328_v1, %v11333_v50 }
 0x5e9   :  { %v5256_v37 = vmul.f32 0.0078125, %v5228_v21  ;;  %v5264_v44 = vmul.f32 %v4952_v26, %v4952_v26  ;;  %v4953_v20 = vmul.f32 0.0078125, %v4945_v59  ;;  %v5249_v12 = vadd.f32 %v5248_v4, %v5247_v27 }
 0x5ea   :  { %v5322_v61 = vrot.slane %v14986_v47, %v14952_v15  ;;  %v14987_v27 = vcombine.low %v11098_v18, %v11126_v30 }
 0x5eb   :  { %v5272_v45 = vsub.f32 %v5256_v37, %v5264_v44  ;;  %v5257_v32 = vmul.f32 0.0078125, %v5249_v12  ;;  %v5265_v35 = vmul.f32 %v4953_v20, %v4953_v20 }
 0x5ec   :  { %v5338_v34 = vrot.slane %v14987_v27, %v14952_v15 }
 0x5ed   :  { %v5280_v2 = vadd.f32 0.8, %v5272_v45  ;;  %v5273_v60 = vsub.f32 %v5257_v32, %v5265_v35 }
 0x5ef   :  { %v5281_v28 = vadd.f32 0.8, %v5273_v60  ;;  %8077 = vrsqrt.f32 %v5280_v2 }
 0x5f1   :  { %8079 = vrsqrt.f32 %v5281_v28 }
 0x5fc   :  { %v8078_v52 = vpop.eup %8077 }
 0x5fe   :  { %v8080_v19 = vpop.eup %8079 }
 0x5ff   :  { %v5301_v55 = vcombine.low %v8078_v52, %v8080_v19 }
 0x601   :  { %v5329_v38 = vrot.slane %v5301_v55, %v14952_v15 }
 0x603   :  { %v5331_v59 = vcombine.low %v5322_v61, %v5329_v38 }
 0x605   :  { %v5345_v54 = vrot.slane %v5331_v59, %v14952_v15  ;;  %v14991_v59 = vld [vmem:[#allocation113_spill] sm:$0xff] }
 0x607   :  { %v5346_v40 = vcombine.low %v5338_v34, %v5345_v54  ;;  %v14992_v34 = vld [vmem:[#allocation114_spill] sm:$0xff] }
 0x609   :  { %v5348_v13 = vmul.f32 %v5346_v40, %v4776_v58  ;;  %v14993_v40 = vld [vmem:[#allocation68_spill] sm:$0xff] }
 0x60b   :  { %v11484_v0 = vrot.slane %v5348_v13, %v14869_v51  ;;  %v11487_v1 = vrot.slane %v5348_v13, %v14870_v48  ;;  %v11490_v50 = vrot.slane %v5348_v13, %v14898_v39  ;;  %v11493_v18 = vrot.slane %v5348_v13, %v14901_v56 }
 0x60c   :  { %v11496_v30 = vrot.slane %v5348_v13, %v10935_v43  ;;  %v11499_v21 = vrot.slane %v5348_v13, %v10975_v10  ;;  %v11502_v4 = vrot.slane %v5348_v13, %v11244_v25  ;;  %v11505_v37 = vrot.slane %v5348_v13, %v11247_v23 }
 0x60d   :  { %v5390_v44 = vmul.f32 %v11484_v0, %v10816_v8  ;;  %v5391_v12 = vmul.f32 %v11487_v1, %v10824_v9  ;;  %v5392_v45 = vmul.f32 %v11490_v50, %v11036_v57  ;;  %v5393_v32 = vmul.f32 %v11493_v18, %v11044_v42 }
 0x60e   :  { %v5394_v35 = vmul.f32 %v11496_v30, %v11249_v31  ;;  %v5395_v2 = vmul.f32 %v11499_v21, %v11251_v36  ;;  %v5396_v60 = vmul.f32 %v11502_v4, %v4952_v26  ;;  %v5397_v28 = vmul.f32 %v11505_v37, %v4953_v20  ;;  %v14988_v36 = vld [vmem:[#allocation32_spill] sm:$0xff] }
 0x60f   :  { %v5406_v8 = vcombine.low %v5390_v44, %v5391_v12  ;;  %v5407_v52 = vcombine.low %v5392_v45, %v5393_v32  ;;  %v11523_v9 = vmul.f32 %v11484_v0, %v10575_v17  ;;  %v11527_v57 = vmul.f32 %v11487_v1, %v10578_v6  ;;  %v14989_v17 = vld [vmem:[#allocation81_spill] sm:$0xff]  ;;  %v14990_v6 = vld [vmem:[#allocation82_spill] sm:$0xff]  ;;  %v14994_v44 = vld [vmem:[#allocation39_spill] sm:$0xff] }
 0x610   :  { %v5408_v42 = vcombine.low %v5394_v35, %v5395_v2  ;;  %v5409_v19 = vcombine.low %v5396_v60, %v5397_v28  ;;  %v11531_v31 = vmul.f32 %v11490_v50, %v10801_v14  ;;  %v11535_v26 = vmul.f32 %v11493_v18, %v14988_v36  ;;  %v14995_v45 = vld [vmem:[#allocation63_spill] sm:$0xff]  ;;  %v14996_v2 = vld [vmem:[#allocation72_spill] sm:$0xff] }
 0x611   :  { %v5416_v20 = vrot.slane %v5406_v8, %v14952_v15  ;;  %v5423_v55 = vrot.slane %v5407_v52, %v14952_v15  ;;  %v11541_v47 = vmul.f32 %v11496_v30, %v14989_v17  ;;  %v11545_v61 = vmul.f32 %v11499_v21, %v14990_v6  ;;  %v14997_v28 = vld [vmem:[#allocation83_spill] sm:$0xff]  ;;  %v14998_v52 = vld [vmem:[#allocation84_spill] sm:$0xff]  ;;  %v15001_v6 = vld [vmem:[#allocation41_spill] sm:$0xff] }
 0x612   :  { %v5430_v38 = vrot.slane %v5408_v42, %v14952_v15  ;;  %v5437_v14 = vrot.slane %v5409_v19, %v14952_v15  ;;  %v11551_v27 = vmul.f32 %v11502_v4, %v14991_v59  ;;  %v11555_v54 = vmul.f32 %v11505_v37, %v14992_v34  ;;  %v14999_v36 = vld [vmem:[#allocation112_spill] sm:$0xff] }
 0x613   :  { %v5438_v58 = vcombine.low %v5416_v20, %v5423_v55  ;;  %v11559_v13 = vmul.f32 %v11484_v0, %v14993_v40  ;;  %v11563_v12 = vmul.f32 %v11487_v1, %v14994_v44  ;;  %v11567_v32 = vmul.f32 %v11490_v50, %v14995_v45  ;;  %v15000_v55 = vld [vmem:[#allocation115_spill] sm:$0xff]  ;;  %v15002_v59 = vld [vmem:[#allocation40_spill] sm:$0xff]  ;;  %v15003_v40 = vld [vmem:[#allocation69_spill] sm:$0xff] }
 0x614   :  { %v5439_v35 = vcombine.low %v5430_v38, %v5437_v14  ;;  %v11571_v60 = vmul.f32 %v11493_v18, %v14996_v2  ;;  %v11575_v8 = vmul.f32 %v11496_v30, %v14997_v28  ;;  %v11579_v42 = vmul.f32 %v11499_v21, %v14998_v52  ;;  %v15004_v44 = vld [vmem:[#allocation76_spill] sm:$0xff]  ;;  %v15006_v28 = vld [vmem:[#allocation85_spill] sm:$0xff] }
 0x615   :  { %v5446_v19 = vrot.slane %v5438_v58, %v14952_v15  ;;  %v11584_v20 = vmul.f32 %v11502_v4, %v14999_v36  ;;  %v11588_v17 = vmul.f32 %v11505_v37, %v15000_v55  ;;  %v11592_v38 = vmul.f32 %v11484_v0, %v15001_v6  ;;  %v4777_v2 = vld [vmem:[%s14273_s6 + $0x24] sm:$0xff] }
 0x616   :  { %v5453_v14 = vrot.slane %v5439_v35, %v14952_v15  ;;  %v11597_v34 = vmul.f32 %v11487_v1, %v15002_v59  ;;  %v11601_v58 = vmul.f32 %v11490_v50, %v15003_v40  ;;  %v11605_v45 = vmul.f32 %v11493_v18, %v15004_v44  ;;  %v15008_v15 = vld [vmem:[#allocation86_spill] sm:$0xff]  ;;  %v15011_v55 = vld [vmem:[#allocation116_spill] sm:$0xff] }
 0x617   :  { %v11612_v52 = vmul.f32 %v11496_v30, %v15006_v28  ;;  %v11616_v35 = vmul.f32 %v11499_v21, %v15008_v15  ;;  %v11620_v36 = vmul.f32 %v11502_v4, %v11287_v11  ;;  %v11624_v6 = vmul.f32 %v11505_v37, %v15011_v55  ;;  %v15012_v40 = vld [vmem:[#allocation70_spill] sm:$0xff] }
 0x618   :  { %15005 = vst [vmem:[#allocation32_spill] sm:$0xff] %v11605_v45  ;;  %v5454_v59 = vcombine.low %v5446_v19, %v5453_v14  ;;  %v11628_v44 = vmul.f32 %v11484_v0, %v15012_v40  ;;  %v15013_v45 = vld [vmem:[#allocation42_spill] sm:$0xff]  ;;  %v15021_v19 = vld [vmem:[#allocation88_spill] sm:$0xff]  ;;  %v15023_v40 = vld [vmem:[#allocation117_spill] sm:$0xff] }
 0x619   :  { %15007 = vst [vmem:[#allocation81_spill] sm:$0xff] %v11612_v52  ;;  %15009 = vst [vmem:[#allocation82_spill] sm:$0xff] %v11616_v35  ;;  %v11632_v28 = vmul.f32 %v11487_v1, %v15013_v45  ;;  %v15015_v52 = vld [vmem:[#allocation37_spill] sm:$0xff]  ;;  %v15017_v35 = vld [vmem:[#allocation71_spill] sm:$0xff]  ;;  %v11648_v14 = vmul.f32 %v11499_v21, %v15021_v19  ;;  %v11652_v45 = vmul.f32 %v11502_v4, %v15023_v40 }
 0x61a   :  { %15010 = vst [vmem:[#allocation113_spill] sm:$0xff] %v11620_v36  ;;  %v11636_v15 = vmul.f32 %v11490_v50, %v15015_v52  ;;  %v11640_v11 = vmul.f32 %v11493_v18, %v15017_v35  ;;  %v15019_v36 = vld [vmem:[#allocation87_spill] sm:$0xff]  ;;  %v15024_v52 = vld [vmem:[#allocation118_spill] sm:$0xff]  ;;  %v15028_v19 = vld [vmem:[#allocation65_spill] sm:$0xff] }
 0x61b   :  { %15014 = vst [vmem:[#allocation114_spill] sm:$0xff] %v11632_v28  ;;  %v11644_v55 = vmul.f32 %v11496_v30, %v15019_v36  ;;  %15022 = vst [vmem:[#allocation72_spill] sm:$0xff] %v11648_v14  ;;  %v11654_v28 = vsub.f32 %v4777_v2, %v5454_v59  ;;  %v15026_v35 = vld [vmem:[#allocation43_spill] sm:$0xff]  ;;  %v15027_v36 = vld [vmem:[#allocation45_spill] sm:$0xff]  ;;  %v11670_v14 = vmul.f32 %v11490_v50, %v15028_v19 }
 0x61c   :  { %15016 = vst [vmem:[#allocation68_spill] sm:$0xff] %v11636_v15  ;;  %15018 = vst [vmem:[#allocation39_spill] sm:$0xff] %v11640_v11  ;;  %v11658_v15 = vmul.f32 %v11505_v37, %v15024_v52  ;;  %v11662_v11 = vmul.f32 %v11484_v0, %v15026_v35  ;;  %v15030_v40 = vld [vmem:[#allocation47_spill] sm:$0xff]  ;;  %v15032_v59 = vld [vmem:[#allocation89_spill] sm:$0xff]  ;;  %v11690_v19 = vmul.f32 %v11505_v37, %v11323_v53 }
 0x61d   :  { %15020 = vst [vmem:[#allocation63_spill] sm:$0xff] %v11644_v55  ;;  %v11666_v55 = vmul.f32 %v11487_v1, %v15027_v36  ;;  %15029 = vst [vmem:[#allocation84_spill] sm:$0xff] %v11670_v14  ;;  %v11674_v2 = vmul.f32 %v11493_v18, %v15030_v40  ;;  %v11678_v52 = vmul.f32 %v11496_v30, %v15032_v59  ;;  %v15038_v14 = vld [vmem:[#allocation44_spill] sm:$0xff] }
 0x61e   :  { %15025 = vst [vmem:[#allocation83_spill] sm:$0xff] %v11658_v15  ;;  %v15034_v15 = vld [vmem:[#allocation90_spill] sm:$0xff]  ;;  %v11686_v36 = vmul.f32 %v11502_v4, %v11315_v46  ;;  %15037 = vst [vmem:[#allocation69_spill] sm:$0xff] %v11690_v19  ;;  %v11694_v40 = vmul.f32 %v11484_v0, %v15038_v14  ;;  %v15046_v19 = vld [vmem:[#allocation92_spill] sm:$0xff] }
 0x61f   :  { %15031 = vst [vmem:[#allocation112_spill] sm:$0xff] %v11674_v2  ;;  %15033 = vst [vmem:[#allocation115_spill] sm:$0xff] %v11678_v52  ;;  %v11682_v35 = vmul.f32 %v11499_v21, %v15034_v15  ;;  %v15039_v2 = vld [vmem:[#allocation46_spill] sm:$0xff]  ;;  %v15040_v52 = vld [vmem:[#allocation55_spill] sm:$0xff]  ;;  %v11714_v14 = vmul.f32 %v11499_v21, %v15046_v19 }
 0x620   :  { %15036 = vst [vmem:[#allocation40_spill] sm:$0xff] %v11686_v36  ;;  %v11698_v59 = vmul.f32 %v11487_v1, %v15039_v2  ;;  %v11702_v15 = vmul.f32 %v11490_v50, %v15040_v52  ;;  %v15044_v36 = vld [vmem:[#allocation91_spill] sm:$0xff]  ;;  %v11718_v2 = vmul.f32 %v11502_v4, %v11325_v29  ;;  %v11722_v52 = vmul.f32 %v11505_v37, %v11339_v5 }
 0x621   :  { %15035 = vst [vmem:[#allocation41_spill] sm:$0xff] %v11682_v35  ;;  %v15042_v35 = vld [vmem:[#allocation77_spill] sm:$0xff]  ;;  %v11710_v53 = vmul.f32 %v11496_v30, %v15044_v36  ;;  %15047 = vst [vmem:[#allocation116_spill] sm:$0xff] %v11714_v14 }
 0x622   :  { %15041 = vst [vmem:[#allocation76_spill] sm:$0xff] %v11702_v15  ;;  %v11706_v46 = vmul.f32 %v11493_v18, %v15042_v35  ;;  %15048 = vst [vmem:[#allocation70_spill] sm:$0xff] %v11718_v2  ;;  %v15050_v15 = vld [vmem:[#allocation73_spill] sm:$0xff] }
 0x623   :  { %15045 = vst [vmem:[#allocation86_spill] sm:$0xff] %v11710_v53  ;;  %15049 = vst [vmem:[#allocation42_spill] sm:$0xff] %v11722_v52  ;;  %v11726_v35 = vmul.f32 %v11484_v0, %v15050_v15  ;;  %v15053_v53 = vld [vmem:[#allocation26_spill] sm:$0xff]  ;;  %v15055_v14 = vld [vmem:[#allocation61_spill] sm:$0xff] }
 0x624   :  { %15043 = vst [vmem:[#allocation85_spill] sm:$0xff] %v11706_v46  ;;  %v15052_v46 = vld [vmem:[#allocation49_spill] sm:$0xff]  ;;  %v11734_v19 = vmul.f32 %v11490_v50, %v15053_v53  ;;  %v11738_v29 = vmul.f32 %v11493_v18, %v15055_v14  ;;  %v15059_v52 = vld [vmem:[#allocation94_spill] sm:$0xff]  ;;  %v11754_v53 = vmul.f32 %v11505_v37, %v11351_v41 }
 0x625   :  { %15051 = vst [vmem:[#allocation37_spill] sm:$0xff] %v11726_v35  ;;  %v11730_v36 = vmul.f32 %v11487_v1, %v15052_v46  ;;  %v15057_v2 = vld [vmem:[#allocation93_spill] sm:$0xff]  ;;  %v11746_v15 = vmul.f32 %v11499_v21, %v15059_v52  ;;  %v15061_v35 = vld [vmem:[#allocation119_spill] sm:$0xff] }
 0x626   :  { %15054 = vst [vmem:[#allocation71_spill] sm:$0xff] %v11734_v19  ;;  %15056 = vst [vmem:[#allocation87_spill] sm:$0xff] %v11738_v29  ;;  %v11742_v5 = vmul.f32 %v11496_v30, %v15057_v2  ;;  %v11750_v46 = vmul.f32 %v11502_v4, %v15061_v35  ;;  %v15064_v19 = vld [vmem:[#allocation74_spill] sm:$0xff]  ;;  %v15065_v29 = vld [vmem:[#allocation48_spill] sm:$0xff] }
 0x627   :  { %15060 = vst [vmem:[#allocation117_spill] sm:$0xff] %v11746_v15  ;;  %15063 = vst [vmem:[#allocation43_spill] sm:$0xff] %v11754_v53  ;;  %v11758_v14 = vmul.f32 %v11484_v0, %v15064_v19  ;;  %v11762_v2 = vmul.f32 %v11487_v1, %v15065_v29  ;;  %v15069_v15 = vld [vmem:[#allocation30_spill] sm:$0xff]  ;;  %v15073_v53 = vld [vmem:[#allocation96_spill] sm:$0xff]  ;;  %v11782_v29 = vmul.f32 %v11502_v4, %v11354_v63 }
 0x628   :  { %15058 = vst [vmem:[#allocation88_spill] sm:$0xff] %v11742_v5  ;;  %15062 = vst [vmem:[#allocation118_spill] sm:$0xff] %v11750_v46  ;;  %v15067_v5 = vld [vmem:[#allocation35_spill] sm:$0xff]  ;;  %v11770_v35 = vmul.f32 %v11493_v18, %v15069_v15  ;;  %v11778_v19 = vmul.f32 %v11499_v21, %v15073_v53 }
 0x629   :  { %15066 = vst [vmem:[#allocation45_spill] sm:$0xff] %v11762_v2  ;;  %v11766_v52 = vmul.f32 %v11490_v50, %v15067_v5  ;;  %v15071_v46 = vld [vmem:[#allocation95_spill] sm:$0xff]  ;;  %15075 = vst [vmem:[#allocation44_spill] sm:$0xff] %v11782_v29  ;;  %v15076_v2 = vld [vmem:[#allocation120_spill] sm:$0xff] }
 0x62a   :  { %15070 = vst [vmem:[#allocation47_spill] sm:$0xff] %v11770_v35  ;;  %v11774_v41 = vmul.f32 %v11496_v30, %v15071_v46  ;;  %15074 = vst [vmem:[#allocation90_spill] sm:$0xff] %v11778_v19  ;;  %v11786_v5 = vmul.f32 %v11505_v37, %v15076_v2  ;;  %v15079_v35 = vld [vmem:[#allocation50_spill] sm:$0xff]  ;;  %v15082_v19 = vld [vmem:[#allocation59_spill] sm:$0xff] }
 0x62b   :  { %15068 = vst [vmem:[#allocation65_spill] sm:$0xff] %v11766_v52  ;;  %v15078_v52 = vld [vmem:[#allocation75_spill] sm:$0xff]  ;;  %v11794_v46 = vmul.f32 %v11487_v1, %v15079_v35  ;;  %v11802_v63 = vmul.f32 %v11493_v18, %v15082_v19  ;;  %v15084_v29 = vld [vmem:[#allocation97_spill] sm:$0xff]  ;;  %v11814_v35 = vmul.f32 %v11502_v4, %v11365_v16 }
 0x62c   :  { %15072 = vst [vmem:[#allocation89_spill] sm:$0xff] %v11774_v41  ;;  %15077 = vst [vmem:[#allocation46_spill] sm:$0xff] %v11786_v5  ;;  %v11790_v15 = vmul.f32 %v11484_v0, %v15078_v52  ;;  %v15080_v41 = vld [vmem:[#allocation38_spill] sm:$0xff]  ;;  %v11806_v2 = vmul.f32 %v11496_v30, %v15084_v29 }
 0x62d   :  { %v11798_v53 = vmul.f32 %v11490_v50, %v15080_v41  ;;  %15083 = vst [vmem:[#allocation77_spill] sm:$0xff] %v11802_v63  ;;  %v15086_v5 = vld [vmem:[#allocation22_spill] sm:$0xff]  ;;  %15088 = vst [vmem:[#allocation73_spill] sm:$0xff] %v11814_v35  ;;  %v11818_v41 = vmul.f32 %v11505_v37, %v11378_v62  ;;  %v15091_v63 = vld [vmem:[#allocation53_spill] sm:$0xff] }
 0x62e   :  { %15085 = vst [vmem:[#allocation91_spill] sm:$0xff] %v11806_v2  ;;  %v11810_v52 = vmul.f32 %v11499_v21, %v15086_v5  ;;  %v11826_v29 = vmul.f32 %v11487_v1, %v15091_v63  ;;  %v15092_v2 = vld [vmem:[#allocation33_spill] sm:$0xff]  ;;  %v15096_v35 = vld [vmem:[#allocation98_spill] sm:$0xff]  ;;  %v11846_v63 = vmul.f32 %v11502_v4, %v11374_v7 }
 0x62f   :  { %15081 = vst [vmem:[#allocation55_spill] sm:$0xff] %v11798_v53  ;;  %15089 = vst [vmem:[#allocation49_spill] sm:$0xff] %v11818_v41  ;;  %v15090_v53 = vld [vmem:[#allocation51_spill] sm:$0xff]  ;;  %v11830_v5 = vmul.f32 %v11490_v50, %v15092_v2  ;;  %v11838_v62 = vmul.f32 %v11496_v30, %v15096_v35  ;;  %v11850_v2 = vmul.f32 %v11505_v37, %v11392_v33 }
 0x630   :  { %15087 = vst [vmem:[#allocation92_spill] sm:$0xff] %v11810_v52  ;;  %v11822_v19 = vmul.f32 %v11484_v0, %v15090_v53  ;;  %v15094_v52 = vld [vmem:[#allocation29_spill] sm:$0xff]  ;;  %v15098_v41 = vld [vmem:[#allocation99_spill] sm:$0xff]  ;;  %15100 = vst [vmem:[#allocation119_spill] sm:$0xff] %v11846_v63 }
 0x631   :  { %15093 = vst [vmem:[#allocation26_spill] sm:$0xff] %v11830_v5  ;;  %v11834_v16 = vmul.f32 %v11493_v18, %v15094_v52  ;;  %15097 = vst [vmem:[#allocation93_spill] sm:$0xff] %v11838_v62  ;;  %v11842_v53 = vmul.f32 %v11499_v21, %v15098_v41  ;;  %v15102_v5 = vld [vmem:[#allocation52_spill] sm:$0xff] }
 0x632   :  { %15101 = vst [vmem:[#allocation74_spill] sm:$0xff] %v11850_v2  ;;  %v11854_v52 = vmul.f32 %v11484_v0, %v15102_v5  ;;  %v15105_v62 = vld [vmem:[#allocation36_spill] sm:$0xff]  ;;  %v15111_v2 = vld [vmem:[#allocation101_spill] sm:$0xff] }
 0x633   :  { %15095 = vst [vmem:[#allocation61_spill] sm:$0xff] %v11834_v16  ;;  %15099 = vst [vmem:[#allocation94_spill] sm:$0xff] %v11842_v53  ;;  %v15104_v16 = vld [vmem:[#allocation54_spill] sm:$0xff]  ;;  %v11862_v41 = vmul.f32 %v11490_v50, %v15105_v62  ;;  %v15107_v53 = vld [vmem:[#allocation64_spill] sm:$0xff]  ;;  %v11874_v5 = vmul.f32 %v11499_v21, %v15111_v2  ;;  %v11882_v62 = vmul.f32 %v11505_v37, %v11405_v3 }
 0x634   :  { %15103 = vst [vmem:[#allocation48_spill] sm:$0xff] %v11854_v52  ;;  %v11858_v35 = vmul.f32 %v11487_v1, %v15104_v16  ;;  %v11866_v7 = vmul.f32 %v11493_v18, %v15107_v53  ;;  %v15109_v63 = vld [vmem:[#allocation100_spill] sm:$0xff]  ;;  %v15113_v52 = vld [vmem:[#allocation121_spill] sm:$0xff] }
 0x635   :  { %15106 = vst [vmem:[#allocation35_spill] sm:$0xff] %v11862_v41  ;;  %v11870_v33 = vmul.f32 %v11496_v30, %v15109_v63  ;;  %15112 = vst [vmem:[#allocation96_spill] sm:$0xff] %v11874_v5  ;;  %v11878_v16 = vmul.f32 %v11502_v4, %v15113_v52  ;;  %v15116_v41 = vld [vmem:[#allocation57_spill] sm:$0xff]  ;;  %v15120_v5 = vld [vmem:[#allocation67_spill] sm:$0xff] }
 0x636   :  { %15108 = vst [vmem:[#allocation30_spill] sm:$0xff] %v11866_v7  ;;  %15115 = vst [vmem:[#allocation75_spill] sm:$0xff] %v11882_v62  ;;  %v11886_v53 = vmul.f32 %v11484_v0, %v15116_v41  ;;  %v15117_v7 = vld [vmem:[#allocation56_spill] sm:$0xff]  ;;  %v11898_v52 = vmul.f32 %v11493_v18, %v15120_v5  ;;  %v15124_v62 = vld [vmem:[#allocation103_spill] sm:$0xff] }
 0x637   :  { %15110 = vst [vmem:[#allocation95_spill] sm:$0xff] %v11870_v33  ;;  %15114 = vst [vmem:[#allocation120_spill] sm:$0xff] %v11878_v16  ;;  %v11890_v63 = vmul.f32 %v11487_v1, %v15117_v7  ;;  %v15118_v33 = vld [vmem:[#allocation66_spill] sm:$0xff]  ;;  %v11906_v41 = vmul.f32 %v11499_v21, %v15124_v62  ;;  %v11910_v7 = vmul.f32 %v11502_v4, %v11398_v24 }
 0x638   :  { %v11894_v2 = vmul.f32 %v11490_v50, %v15118_v33  ;;  %15121 = vst [vmem:[#allocation38_spill] sm:$0xff] %v11898_v52  ;;  %v15122_v16 = vld [vmem:[#allocation102_spill] sm:$0xff]  ;;  %v11914_v33 = vmul.f32 %v11505_v37, %v11416_v49 }
 0x639   :  { %v11902_v3 = vmul.f32 %v11496_v30, %v15122_v16  ;;  %15125 = vst [vmem:[#allocation97_spill] sm:$0xff] %v11906_v41  ;;  %15126 = vst [vmem:[#allocation22_spill] sm:$0xff] %v11910_v7  ;;  %v15130_v52 = vld [vmem:[#allocation62_spill] sm:$0xff]  ;;  %v15133_v41 = vld [vmem:[#allocation21_spill] sm:$0xff] }
 0x63a   :  { %15119 = vst [vmem:[#allocation50_spill] sm:$0xff] %v11894_v2  ;;  %15127 = vst [vmem:[#allocation51_spill] sm:$0xff] %v11914_v33  ;;  %v15128_v2 = vld [vmem:[#allocation58_spill] sm:$0xff]  ;;  %v11922_v16 = vmul.f32 %v11487_v1, %v15130_v52  ;;  %v11930_v24 = vmul.f32 %v11493_v18, %v15133_v41  ;;  %v15135_v7 = vld [vmem:[#allocation104_spill] sm:$0xff] }
 0x63b   :  { %15123 = vst [vmem:[#allocation59_spill] sm:$0xff] %v11902_v3  ;;  %v11918_v5 = vmul.f32 %v11484_v0, %v15128_v2  ;;  %v15131_v3 = vld [vmem:[#allocation20_spill] sm:$0xff]  ;;  %v11934_v49 = vmul.f32 %v11496_v30, %v15135_v7  ;;  %v15137_v33 = vld [vmem:[#allocation105_spill] sm:$0xff] }
 0x63c   :  { %v11926_v62 = vmul.f32 %v11490_v50, %v15131_v3  ;;  %15134 = vst [vmem:[#allocation29_spill] sm:$0xff] %v11930_v24  ;;  %v11938_v2 = vmul.f32 %v11499_v21, %v15137_v33  ;;  %v11946_v3 = vmul.f32 %v11505_v37, %v11426_v22  ;;  %v15144_v24 = vld [vmem:[#allocation27_spill] sm:$0xff] }
 0x63d   :  { %15129 = vst [vmem:[#allocation53_spill] sm:$0xff] %v11918_v5  ;;  %15136 = vst [vmem:[#allocation98_spill] sm:$0xff] %v11934_v49  ;;  %v15139_v5 = vld [vmem:[#allocation122_spill] sm:$0xff]  ;;  %v11954_v7 = vmul.f32 %v11487_v1, %v15144_v24  ;;  %v15146_v49 = vld [vmem:[#allocation23_spill] sm:$0xff] }
 0x63e   :  { %15132 = vst [vmem:[#allocation33_spill] sm:$0xff] %v11926_v62  ;;  %15138 = vst [vmem:[#allocation99_spill] sm:$0xff] %v11938_v2  ;;  %v11942_v52 = vmul.f32 %v11502_v4, %v15139_v5  ;;  %v15142_v62 = vld [vmem:[#allocation31_spill] sm:$0xff]  ;;  %v11958_v33 = vmul.f32 %v11490_v50, %v15146_v49  ;;  %v15148_v2 = vld [vmem:[#allocation24_spill] sm:$0xff] }
 0x63f   :  { %15141 = vst [vmem:[#allocation54_spill] sm:$0xff] %v11946_v3  ;;  %v11950_v41 = vmul.f32 %v11484_v0, %v15142_v62  ;;  %15145 = vst [vmem:[#allocation64_spill] sm:$0xff] %v11954_v7  ;;  %v11962_v5 = vmul.f32 %v11493_v18, %v15148_v2  ;;  %v15152_v3 = vld [vmem:[#allocation107_spill] sm:$0xff]  ;;  %v15156_v7 = vld [vmem:[#allocation124_spill] sm:$0xff] }
 0x640   :  { %15140 = vst [vmem:[#allocation52_spill] sm:$0xff] %v11942_v52  ;;  %15147 = vst [vmem:[#allocation100_spill] sm:$0xff] %v11958_v33  ;;  %v15150_v52 = vld [vmem:[#allocation106_spill] sm:$0xff]  ;;  %v11970_v62 = vmul.f32 %v11499_v21, %v15152_v3  ;;  %v11978_v49 = vmul.f32 %v11505_v37, %v15156_v7 }
 0x641   :  { %15143 = vst [vmem:[#allocation36_spill] sm:$0xff] %v11950_v41  ;;  %15149 = vst [vmem:[#allocation101_spill] sm:$0xff] %v11962_v5  ;;  %v11966_v22 = vmul.f32 %v11496_v30, %v15150_v52  ;;  %v15154_v41 = vld [vmem:[#allocation123_spill] sm:$0xff]  ;;  %v15158_v33 = vld [vmem:[#allocation34_spill] sm:$0xff] }
 0x642   :  { %15153 = vst [vmem:[#allocation57_spill] sm:$0xff] %v11970_v62  ;;  %v11974_v24 = vmul.f32 %v11502_v4, %v15154_v41  ;;  %15157 = vst [vmem:[#allocation66_spill] sm:$0xff] %v11978_v49  ;;  %v11982_v2 = vmul.f32 %v11484_v0, %v15158_v33  ;;  %v15160_v5 = vld [vmem:[#allocation60_spill] sm:$0xff]  ;;  %v15164_v62 = vld [vmem:[#allocation78_spill] sm:$0xff] }
 0x643   :  { %15151 = vst [vmem:[#allocation121_spill] sm:$0xff] %v11966_v22  ;;  %v11986_v52 = vmul.f32 %v11487_v1, %v15160_v5  ;;  %v15162_v22 = vld [vmem:[#allocation19_spill] sm:$0xff]  ;;  %v11994_v41 = vmul.f32 %v11493_v18, %v15164_v62  ;;  %v15168_v49 = vld [vmem:[#allocation109_spill] sm:$0xff] }
 0x644   :  { %15155 = vst [vmem:[#allocation56_spill] sm:$0xff] %v11974_v24  ;;  %15159 = vst [vmem:[#allocation67_spill] sm:$0xff] %v11982_v2  ;;  %v11990_v3 = vmul.f32 %v11490_v50, %v15162_v22  ;;  %v15166_v24 = vld [vmem:[#allocation108_spill] sm:$0xff]  ;;  %v12002_v33 = vmul.f32 %v11499_v21, %v15168_v49  ;;  %v15170_v2 = vld [vmem:[#allocation125_spill] sm:$0xff] }
 0x645   :  { %15161 = vst [vmem:[#allocation102_spill] sm:$0xff] %v11986_v52  ;;  %15165 = vst [vmem:[#allocation58_spill] sm:$0xff] %v11994_v41  ;;  %v11998_v7 = vmul.f32 %v11496_v30, %v15166_v24  ;;  %v12006_v5 = vmul.f32 %v11502_v4, %v15170_v2  ;;  %v15172_v52 = vld [vmem:[#allocation126_spill] sm:$0xff]  ;;  %v15175_v41 = vld [vmem:[#allocation25_spill] sm:$0xff] }
 0x646   :  { %15163 = vst [vmem:[#allocation103_spill] sm:$0xff] %v11990_v3  ;;  %15169 = vst [vmem:[#allocation20_spill] sm:$0xff] %v12002_v33  ;;  %v12010_v22 = vmul.f32 %v11505_v37, %v15172_v52  ;;  %v15174_v3 = vld [vmem:[#allocation28_spill] sm:$0xff]  ;;  %v12018_v24 = vmul.f32 %v11487_v1, %v15175_v41 }
 0x647   :  { %15167 = vst [vmem:[#allocation62_spill] sm:$0xff] %v11998_v7  ;;  %15171 = vst [vmem:[#allocation21_spill] sm:$0xff] %v12006_v5  ;;  %v12014_v62 = vmul.f32 %v11484_v0, %v15174_v3  ;;  %v15176_v7 = vld [vmem:[#allocation79_spill] sm:$0xff]  ;;  %v15177_v33 = vld [vmem:[#allocation80_spill] sm:$0xff] }
 0x648   :  { %15173 = vst [vmem:[#allocation104_spill] sm:$0xff] %v12010_v22  ;;  %v12022_v49 = vmul.f32 %v11490_v50, %v15176_v7  ;;  %v12026_v2 = vmul.f32 %v11493_v18, %v15177_v33  ;;  %v15178_v5 = vld [vmem:[#allocation110_spill] sm:$0xff]  ;;  %v15179_v22 = vld [vmem:[#allocation111_spill] sm:$0xff]  ;;  %v15181_v41 = vld [vmem:[#allocation128_spill] sm:$0xff]  ;;  %v12046_v18 = vrot.slane %v11654_v28, %v14869_v51  ;;  %v12066_v51 = vrot.slane %v11654_v28, %v10975_v10 }
 0x649   :  { %v12030_v52 = vmul.f32 %v11496_v30, %v15178_v5  ;;  %v12034_v0 = vmul.f32 %v11499_v21, %v15179_v22  ;;  %v15180_v3 = vld [vmem:[#allocation127_spill] sm:$0xff]  ;;  %v12042_v50 = vmul.f32 %v11505_v37, %v15181_v41  ;;  %v12050_v30 = vrot.slane %v11654_v28, %v14870_v48  ;;  %v15183_v7 = vld [vmem:[#allocation81_spill] sm:$0xff]  ;;  %v15184_v33 = vld [vmem:[#allocation82_spill] sm:$0xff] }
 0x64a   :  { %v12038_v1 = vmul.f32 %v11502_v4, %v15180_v3  ;;  %v12054_v21 = vrot.slane %v11654_v28, %v14898_v39  ;;  %v12058_v4 = vrot.slane %v11654_v28, %v14901_v56  ;;  %v12062_v37 = vrot.slane %v11654_v28, %v10935_v43  ;;  %v15185_v5 = vld [vmem:[#allocation113_spill] sm:$0xff]  ;;  %v15188_v3 = vld [vmem:[#allocation114_spill] sm:$0xff] }
 0x64b   :  { %v12070_v48 = vrot.slane %v11654_v28, %v11244_v25  ;;  %v12074_v39 = vrot.slane %v11654_v28, %v11247_v23  ;;  %v12078_v56 = vadd.f32 %v12046_v18, %v11523_v9  ;;  %v12082_v43 = vadd.f32 %v12050_v30, %v11527_v57  ;;  %v15182_v28 = vld [vmem:[#allocation32_spill] sm:$0xff] }
 0x64c   :  { %v12086_v10 = vadd.f32 %v12054_v21, %v11531_v31  ;;  %v12090_v25 = vadd.f32 %v12058_v4, %v11535_v26  ;;  %v12094_v23 = vadd.f32 %v12062_v37, %v11541_v47  ;;  %v12098_v9 = vadd.f32 %v12066_v51, %v11545_v61 }
 0x64d   :  { %v12102_v57 = vadd.f32 %v12070_v48, %v11551_v27  ;;  %v12106_v31 = vadd.f32 %v12074_v39, %v11555_v54  ;;  %v12110_v26 = vadd.f32 %v12046_v18, %v11559_v13  ;;  %v12114_v47 = vadd.f32 %v12050_v30, %v11563_v12 }
 0x64e   :  { %v12118_v61 = vadd.f32 %v12054_v21, %v11567_v32  ;;  %v12122_v27 = vadd.f32 %v12058_v4, %v11571_v60  ;;  %v12126_v54 = vadd.f32 %v12062_v37, %v11575_v8  ;;  %v12130_v13 = vadd.f32 %v12066_v51, %v11579_v42 }
 0x64f   :  { %v12134_v12 = vadd.f32 %v12070_v48, %v11584_v20  ;;  %v12138_v32 = vadd.f32 %v12074_v39, %v11588_v17  ;;  %v12142_v60 = vadd.f32 %v12046_v18, %v11592_v38  ;;  %v12146_v8 = vadd.f32 %v12050_v30, %v11597_v34 }
 0x650   :  { %v12150_v42 = vadd.f32 %v12054_v21, %v11601_v58  ;;  %v12154_v20 = vadd.f32 %v12058_v4, %v15182_v28  ;;  %v12158_v17 = vadd.f32 %v12062_v37, %v15183_v7  ;;  %v12162_v38 = vadd.f32 %v12066_v51, %v15184_v33  ;;  %v15190_v28 = vld [vmem:[#allocation68_spill] sm:$0xff]  ;;  %v15191_v33 = vld [vmem:[#allocation39_spill] sm:$0xff] }
 0x651   :  { %v12166_v34 = vadd.f32 %v12070_v48, %v15185_v5  ;;  %v12170_v58 = vadd.f32 %v12074_v39, %v11624_v6  ;;  %v12174_v22 = vadd.f32 %v12046_v18, %v11628_v44  ;;  %v12178_v41 = vadd.f32 %v12050_v30, %v15188_v3 }
 0x652   :  { %v12182_v7 = vadd.f32 %v12054_v21, %v15190_v28  ;;  %v12186_v5 = vadd.f32 %v12058_v4, %v15191_v33  ;;  %v12198_v3 = vadd.f32 %v12070_v48, %v11652_v45  ;;  %v12206_v33 = vadd.f32 %v12046_v18, %v11662_v11 }
 0x653   :  { %15186 = vst [vmem:[#allocation105_spill] sm:$0xff] %v12166_v34  ;;  %15187 = vst [vmem:[#allocation122_spill] sm:$0xff] %v12170_v58  ;;  %v15192_v34 = vld [vmem:[#allocation63_spill] sm:$0xff]  ;;  %v15194_v58 = vld [vmem:[#allocation72_spill] sm:$0xff]  ;;  %vm5754_vm5 = vcmp.gt.f32.partialorder %v12078_v56, 0.0  ;;  %vm5755_vm6 = vcmp.gt.f32.partialorder %v12082_v43, 0.0 }
 0x654   :  { %15189 = vst [vmem:[#allocation31_spill] sm:$0xff] %v12178_v41  ;;  %v12190_v6 = vadd.f32 %v12062_v37, %v15192_v34  ;;  %v12194_v44 = vadd.f32 %v12066_v51, %v15194_v58  ;;  %15196 = vst [vmem:[#allocation24_spill] sm:$0xff] %v12198_v3  ;;  %v15197_v41 = vld [vmem:[#allocation83_spill] sm:$0xff]  ;;  %v12210_v34 = vadd.f32 %v12050_v30, %v11666_v55  ;;  %vm5756_vm1 = vcmp.gt.f32.partialorder %v12086_v10, 0.0 }
 0x655   :  { %v12202_v28 = vadd.f32 %v12074_v39, %v15197_v41  ;;  %15199 = vst [vmem:[#allocation107_spill] sm:$0xff] %v12206_v33  ;;  %v15203_v3 = vld [vmem:[#allocation115_spill] sm:$0xff]  ;;  %v15207_v33 = vld [vmem:[#allocation40_spill] sm:$0xff]  ;;  %vm5757_vm2 = vcmp.gt.f32.partialorder %v12090_v25, 0.0  ;;  %vm5758_vm10 = vcmp.gt.f32.partialorder %v12094_v23, 0.0  ;;  %vm5759_vm13 = vcmp.gt.f32.partialorder %v12098_v9, 0.0 }
 0x656   :  { %15193 = vst [vmem:[#allocation27_spill] sm:$0xff] %v12190_v6  ;;  %15195 = vst [vmem:[#allocation23_spill] sm:$0xff] %v12194_v44  ;;  %v15201_v6 = vld [vmem:[#allocation84_spill] sm:$0xff]  ;;  %v12222_v41 = vadd.f32 %v12062_v37, %v15203_v3  ;;  %v12230_v55 = vadd.f32 %v12070_v48, %v15207_v33  ;;  %v12242_v3 = vadd.f32 %v12050_v30, %v11698_v59  ;;  %vm5760_vm4 = vcmp.gt.f32.partialorder %v12102_v57, 0.0 }
 0x657   :  { %15198 = vst [vmem:[#allocation106_spill] sm:$0xff] %v12202_v28  ;;  %15200 = vst [vmem:[#allocation123_spill] sm:$0xff] %v12210_v34  ;;  %v12214_v58 = vadd.f32 %v12054_v21, %v15201_v6  ;;  %v15202_v44 = vld [vmem:[#allocation112_spill] sm:$0xff]  ;;  %v15205_v28 = vld [vmem:[#allocation41_spill] sm:$0xff]  ;;  %vm5761_vm8 = vcmp.gt.f32.partialorder %v12106_v31, 0.0  ;;  %vm5762_vm14 = vcmp.gt.f32.partialorder %v12110_v26, 0.0 }
 0x658   :  { %v12218_v45 = vadd.f32 %v12058_v4, %v15202_v44  ;;  %15204 = vst [vmem:[#allocation124_spill] sm:$0xff] %v12222_v41  ;;  %v12226_v11 = vadd.f32 %v12066_v51, %v15205_v28  ;;  %15208 = vst [vmem:[#allocation60_spill] sm:$0xff] %v12230_v55  ;;  %v15209_v34 = vld [vmem:[#allocation69_spill] sm:$0xff]  ;;  %v12238_v44 = vadd.f32 %v12046_v18, %v11694_v40  ;;  %v15213_v41 = vld [vmem:[#allocation76_spill] sm:$0xff]  ;;  %vm5763_vm11 = vcmp.gt.f32.partialorder %v12114_v47, 0.0 }
 0x659   :  { %v12234_v6 = vadd.f32 %v12074_v39, %v15209_v34  ;;  %15212 = vst [vmem:[#allocation108_spill] sm:$0xff] %v12242_v3  ;;  %v12246_v28 = vadd.f32 %v12054_v21, %v15213_v41  ;;  %v15216_v55 = vld [vmem:[#allocation86_spill] sm:$0xff]  ;;  %vm5764_vm9 = vcmp.gt.f32.partialorder %v12118_v61, 0.0  ;;  %vm5765_vm15 = vcmp.gt.f32.partialorder %v12122_v27, 0.0 }
 0x65a   :  { %15206 = vst [vmem:[#allocation34_spill] sm:$0xff] %v12226_v11  ;;  %15211 = vst [vmem:[#allocation78_spill] sm:$0xff] %v12238_v44  ;;  %v15215_v11 = vld [vmem:[#allocation85_spill] sm:$0xff]  ;;  %v12254_v34 = vadd.f32 %v12062_v37, %v15216_v55  ;;  %v15220_v44 = vld [vmem:[#allocation70_spill] sm:$0xff]  ;;  %v12274_v55 = vadd.f32 %v12050_v30, %v11730_v36  ;;  %vm5766_vm3 = vcmp.gt.f32.partialorder %v12126_v54, 0.0  ;;  %vm5767_vm12 = vcmp.gt.f32.partialorder %v12130_v13, 0.0 }
 0x65b   :  { %15210 = vst [vmem:[#allocation19_spill] sm:$0xff] %v12234_v6  ;;  %15214 = vst [vmem:[#allocation109_spill] sm:$0xff] %v12246_v28  ;;  %v12250_v33 = vadd.f32 %v12058_v4, %v15215_v11  ;;  %v15218_v6 = vld [vmem:[#allocation116_spill] sm:$0xff]  ;;  %v12262_v59 = vadd.f32 %v12070_v48, %v15220_v44  ;;  %v15222_v3 = vld [vmem:[#allocation42_spill] sm:$0xff]  ;;  %vm5768_vm0 = vcmp.gt.f32.partialorder %v12134_v12, 0.0  ;;  %vm5769_vm7 = vcmp.gt.f32.partialorder %v12138_v32, 0.0 }
 0x65c   :  { %15217 = vst [vmem:[#allocation125_spill] sm:$0xff] %v12254_v34  ;;  %v12258_v40 = vadd.f32 %v12066_v51, %v15218_v6  ;;  %v12266_v41 = vadd.f32 %v12074_v39, %v15222_v3  ;;  %v15224_v28 = vld [vmem:[#allocation37_spill] sm:$0xff]  ;;  %15226 = vst [vmem:[#allocation80_spill] sm:$0xff] %v12274_v55  ;;  %v15227_v34 = vld [vmem:[#allocation71_spill] sm:$0xff] }
 0x65d   :  { %15221 = vst [vmem:[#allocation28_spill] sm:$0xff] %v12262_v59  ;;  %v12270_v11 = vadd.f32 %v12046_v18, %v15224_v28  ;;  %v12278_v6 = vadd.f32 %v12054_v21, %v15227_v34  ;;  %v15230_v59 = vld [vmem:[#allocation88_spill] sm:$0xff]  ;;  %v15236_v55 = vld [vmem:[#allocation43_spill] sm:$0xff] }
 0x65e   :  { %15219 = vst [vmem:[#allocation126_spill] sm:$0xff] %v12258_v40  ;;  %15223 = vst [vmem:[#allocation25_spill] sm:$0xff] %v12266_v41  ;;  %v15228_v40 = vld [vmem:[#allocation87_spill] sm:$0xff]  ;;  %v12286_v3 = vadd.f32 %v12062_v37, %v15230_v59  ;;  %v15232_v41 = vld [vmem:[#allocation117_spill] sm:$0xff]  ;;  %v12298_v34 = vadd.f32 %v12074_v39, %v15236_v55 }
 0x65f   :  { %15225 = vst [vmem:[#allocation79_spill] sm:$0xff] %v12270_v11  ;;  %v12282_v44 = vadd.f32 %v12058_v4, %v15228_v40  ;;  %v12290_v28 = vadd.f32 %v12066_v51, %v15232_v41  ;;  %v15234_v11 = vld [vmem:[#allocation118_spill] sm:$0xff]  ;;  %v12302_v40 = vadd.f32 %v12046_v18, %v11758_v14 }
 0x660   :  { %15231 = vst [vmem:[#allocation111_spill] sm:$0xff] %v12286_v3  ;;  %v12294_v36 = vadd.f32 %v12070_v48, %v15234_v11  ;;  %15237 = vst [vmem:[#allocation32_spill] sm:$0xff] %v12298_v34  ;;  %v15241_v3 = vld [vmem:[#allocation65_spill] sm:$0xff]  ;;  %v15245_v34 = vld [vmem:[#allocation90_spill] sm:$0xff] }
 0x661   :  { %15229 = vst [vmem:[#allocation110_spill] sm:$0xff] %v12282_v44  ;;  %15233 = vst [vmem:[#allocation127_spill] sm:$0xff] %v12290_v28  ;;  %v15239_v44 = vld [vmem:[#allocation45_spill] sm:$0xff]  ;;  %v12310_v41 = vadd.f32 %v12054_v21, %v15241_v3  ;;  %v15242_v28 = vld [vmem:[#allocation47_spill] sm:$0xff]  ;;  %v12322_v14 = vadd.f32 %v12066_v51, %v15245_v34 }
 0x662   :  { %15235 = vst [vmem:[#allocation128_spill] sm:$0xff] %v12294_v36  ;;  %15238 = vst [vmem:[#allocation81_spill] sm:$0xff] %v12302_v40  ;;  %v12306_v59 = vadd.f32 %v12050_v30, %v15239_v44  ;;  %v12314_v11 = vadd.f32 %v12058_v4, %v15242_v28  ;;  %v15243_v36 = vld [vmem:[#allocation89_spill] sm:$0xff]  ;;  %v15247_v40 = vld [vmem:[#allocation44_spill] sm:$0xff]  ;;  %v12334_v28 = vadd.f32 %v12046_v18, %v11790_v15 }
 0x663   :  { %v12318_v55 = vadd.f32 %v12062_v37, %v15243_v36  ;;  %15246 = vst [vmem:[#allocation114_spill] sm:$0xff] %v12322_v14  ;;  %v12326_v44 = vadd.f32 %v12070_v48, %v15247_v40  ;;  %v12338_v36 = vadd.f32 %v12050_v30, %v11794_v46  ;;  %v15254_v14 = vld [vmem:[#allocation77_spill] sm:$0xff] }
 0x664   :  { %15240 = vst [vmem:[#allocation82_spill] sm:$0xff] %v12306_v59  ;;  %v15249_v59 = vld [vmem:[#allocation46_spill] sm:$0xff]  ;;  %15251 = vst [vmem:[#allocation63_spill] sm:$0xff] %v12334_v28  ;;  %v12346_v40 = vadd.f32 %v12058_v4, %v15254_v14  ;;  %v15259_v28 = vld [vmem:[#allocation73_spill] sm:$0xff]  ;;  %v12366_v14 = vadd.f32 %v12046_v18, %v11822_v19 }
 0x665   :  { %15244 = vst [vmem:[#allocation113_spill] sm:$0xff] %v12318_v55  ;;  %15248 = vst [vmem:[#allocation68_spill] sm:$0xff] %v12326_v44  ;;  %v12330_v3 = vadd.f32 %v12074_v39, %v15249_v59  ;;  %v15253_v55 = vld [vmem:[#allocation55_spill] sm:$0xff]  ;;  %v12358_v46 = vadd.f32 %v12070_v48, %v15259_v28 }
 0x666   :  { %15252 = vst [vmem:[#allocation72_spill] sm:$0xff] %v12338_v36  ;;  %v12342_v34 = vadd.f32 %v12054_v21, %v15253_v55  ;;  %v15255_v44 = vld [vmem:[#allocation91_spill] sm:$0xff]  ;;  %v15261_v36 = vld [vmem:[#allocation49_spill] sm:$0xff]  ;;  %15263 = vst [vmem:[#allocation41_spill] sm:$0xff] %v12366_v14 }
 0x667   :  { %15250 = vst [vmem:[#allocation39_spill] sm:$0xff] %v12330_v3  ;;  %v12350_v59 = vadd.f32 %v12062_v37, %v15255_v44  ;;  %v15257_v3 = vld [vmem:[#allocation92_spill] sm:$0xff]  ;;  %15260 = vst [vmem:[#allocation112_spill] sm:$0xff] %v12358_v46  ;;  %v12362_v55 = vadd.f32 %v12074_v39, %v15261_v36  ;;  %v12370_v44 = vadd.f32 %v12050_v30, %v11826_v29  ;;  %v15269_v46 = vld [vmem:[#allocation93_spill] sm:$0xff] }
 0x668   :  { %v12354_v15 = vadd.f32 %v12066_v51, %v15257_v3  ;;  %v12382_v36 = vadd.f32 %v12062_v37, %v15269_v46  ;;  %v15273_v14 = vld [vmem:[#allocation119_spill] sm:$0xff]  ;;  %v12402_v46 = vadd.f32 %v12050_v30, %v11858_v35 }
 0x669   :  { %15256 = vst [vmem:[#allocation83_spill] sm:$0xff] %v12350_v59  ;;  %15262 = vst [vmem:[#allocation115_spill] sm:$0xff] %v12362_v55  ;;  %v15265_v59 = vld [vmem:[#allocation26_spill] sm:$0xff]  ;;  %v12390_v29 = vadd.f32 %v12070_v48, %v15273_v14 }
 0x66a   :  { %15258 = vst [vmem:[#allocation84_spill] sm:$0xff] %v12354_v15  ;;  %15264 = vst [vmem:[#allocation40_spill] sm:$0xff] %v12370_v44  ;;  %v12374_v3 = vadd.f32 %v12054_v21, %v15265_v59  ;;  %v15267_v15 = vld [vmem:[#allocation61_spill] sm:$0xff]  ;;  %v15271_v55 = vld [vmem:[#allocation94_spill] sm:$0xff] }
 0x66b   :  { %v12378_v28 = vadd.f32 %v12058_v4, %v15267_v15  ;;  %15270 = vst [vmem:[#allocation85_spill] sm:$0xff] %v12382_v36  ;;  %v12386_v19 = vadd.f32 %v12066_v51, %v15271_v55  ;;  %15274 = vst [vmem:[#allocation116_spill] sm:$0xff] %v12390_v29  ;;  %v15275_v44 = vld [vmem:[#allocation74_spill] sm:$0xff]  ;;  %v15280_v36 = vld [vmem:[#allocation35_spill] sm:$0xff] }
 0x66c   :  { %15266 = vst [vmem:[#allocation69_spill] sm:$0xff] %v12374_v3  ;;  %v12394_v59 = vadd.f32 %v12074_v39, %v15275_v44  ;;  %v15277_v3 = vld [vmem:[#allocation48_spill] sm:$0xff]  ;;  %15279 = vst [vmem:[#allocation37_spill] sm:$0xff] %v12402_v46  ;;  %v12406_v55 = vadd.f32 %v12054_v21, %v15280_v36  ;;  %v15282_v29 = vld [vmem:[#allocation95_spill] sm:$0xff] }
 0x66d   :  { %15268 = vst [vmem:[#allocation76_spill] sm:$0xff] %v12378_v28  ;;  %15272 = vst [vmem:[#allocation86_spill] sm:$0xff] %v12386_v19  ;;  %v12398_v15 = vadd.f32 %v12046_v18, %v15277_v3  ;;  %v15281_v19 = vld [vmem:[#allocation30_spill] sm:$0xff]  ;;  %v12414_v44 = vadd.f32 %v12062_v37, %v15282_v29  ;;  %v15288_v46 = vld [vmem:[#allocation75_spill] sm:$0xff]  ;;  %v12434_v29 = vadd.f32 %v12050_v30, %v11890_v63 }
 0x66e   :  { %15276 = vst [vmem:[#allocation70_spill] sm:$0xff] %v12394_v59  ;;  %v12410_v14 = vadd.f32 %v12058_v4, %v15281_v19  ;;  %v15284_v59 = vld [vmem:[#allocation96_spill] sm:$0xff]  ;;  %v12426_v36 = vadd.f32 %v12074_v39, %v15288_v46  ;;  %v12430_v19 = vadd.f32 %v12046_v18, %v11886_v53 }
 0x66f   :  { %15278 = vst [vmem:[#allocation42_spill] sm:$0xff] %v12398_v15  ;;  %15283 = vst [vmem:[#allocation71_spill] sm:$0xff] %v12414_v44  ;;  %v12418_v3 = vadd.f32 %v12066_v51, %v15284_v59  ;;  %v15286_v15 = vld [vmem:[#allocation120_spill] sm:$0xff]  ;;  %v15292_v44 = vld [vmem:[#allocation50_spill] sm:$0xff] }
 0x670   :  { %v12422_v35 = vadd.f32 %v12070_v48, %v15286_v15  ;;  %15289 = vst [vmem:[#allocation117_spill] sm:$0xff] %v12426_v36  ;;  %15290 = vst [vmem:[#allocation118_spill] sm:$0xff] %v12430_v19  ;;  %v12438_v59 = vadd.f32 %v12054_v21, %v15292_v44  ;;  %v15298_v36 = vld [vmem:[#allocation97_spill] sm:$0xff]  ;;  %v15300_v19 = vld [vmem:[#allocation22_spill] sm:$0xff] }
 0x671   :  { %15285 = vst [vmem:[#allocation87_spill] sm:$0xff] %v12418_v3  ;;  %15291 = vst [vmem:[#allocation43_spill] sm:$0xff] %v12434_v29  ;;  %v15294_v3 = vld [vmem:[#allocation38_spill] sm:$0xff]  ;;  %v12450_v53 = vadd.f32 %v12066_v51, %v15298_v36  ;;  %v12454_v63 = vadd.f32 %v12070_v48, %v15300_v19  ;;  %v15302_v29 = vld [vmem:[#allocation51_spill] sm:$0xff] }
 0x672   :  { %15287 = vst [vmem:[#allocation88_spill] sm:$0xff] %v12422_v35  ;;  %15293 = vst [vmem:[#allocation45_spill] sm:$0xff] %v12438_v59  ;;  %v12442_v15 = vadd.f32 %v12058_v4, %v15294_v3  ;;  %v15296_v35 = vld [vmem:[#allocation59_spill] sm:$0xff]  ;;  %v12458_v44 = vadd.f32 %v12074_v39, %v15302_v29  ;;  %v15304_v59 = vld [vmem:[#allocation53_spill] sm:$0xff] }
 0x673   :  { %v12446_v46 = vadd.f32 %v12062_v37, %v15296_v35  ;;  %15299 = vst [vmem:[#allocation89_spill] sm:$0xff] %v12450_v53  ;;  %15301 = vst [vmem:[#allocation90_spill] sm:$0xff] %v12454_v63  ;;  %v12462_v3 = vadd.f32 %v12046_v18, %v15304_v59  ;;  %v12466_v35 = vadd.f32 %v12050_v30, %v11922_v16  ;;  %v15309_v53 = vld [vmem:[#allocation29_spill] sm:$0xff]  ;;  %v15311_v63 = vld [vmem:[#allocation98_spill] sm:$0xff] }
 0x674   :  { %15295 = vst [vmem:[#allocation65_spill] sm:$0xff] %v12442_v15  ;;  %15303 = vst [vmem:[#allocation44_spill] sm:$0xff] %v12458_v44  ;;  %v12474_v19 = vadd.f32 %v12058_v4, %v15309_v53  ;;  %v12478_v29 = vadd.f32 %v12062_v37, %v15311_v63  ;;  %v15313_v44 = vld [vmem:[#allocation99_spill] sm:$0xff] }
 0x675   :  { %15297 = vst [vmem:[#allocation47_spill] sm:$0xff] %v12446_v46  ;;  %15305 = vst [vmem:[#allocation46_spill] sm:$0xff] %v12462_v3  ;;  %v15307_v46 = vld [vmem:[#allocation33_spill] sm:$0xff]  ;;  %v12482_v59 = vadd.f32 %v12066_v51, %v15313_v44  ;;  %v15315_v3 = vld [vmem:[#allocation52_spill] sm:$0xff] }
 0x676   :  { %15306 = vst [vmem:[#allocation55_spill] sm:$0xff] %v12466_v35  ;;  %v12470_v36 = vadd.f32 %v12054_v21, %v15307_v46  ;;  %15310 = vst [vmem:[#allocation91_spill] sm:$0xff] %v12474_v19  ;;  %v12486_v16 = vadd.f32 %v12070_v48, %v15315_v3  ;;  %v15317_v35 = vld [vmem:[#allocation54_spill] sm:$0xff]  ;;  %v15321_v19 = vld [vmem:[#allocation64_spill] sm:$0xff] }
 0x677   :  { %15312 = vst [vmem:[#allocation92_spill] sm:$0xff] %v12478_v29  ;;  %15314 = vst [vmem:[#allocation73_spill] sm:$0xff] %v12482_v59  ;;  %v12490_v46 = vadd.f32 %v12074_v39, %v15317_v35  ;;  %v12498_v63 = vadd.f32 %v12050_v30, %v15321_v19  ;;  %v15323_v29 = vld [vmem:[#allocation100_spill] sm:$0xff]  ;;  %v15325_v59 = vld [vmem:[#allocation101_spill] sm:$0xff] }
 0x678   :  { %15308 = vst [vmem:[#allocation77_spill] sm:$0xff] %v12470_v36  ;;  %15316 = vst [vmem:[#allocation49_spill] sm:$0xff] %v12486_v16  ;;  %v15319_v36 = vld [vmem:[#allocation36_spill] sm:$0xff]  ;;  %v12502_v44 = vadd.f32 %v12054_v21, %v15323_v29  ;;  %v12506_v3 = vadd.f32 %v12058_v4, %v15325_v59  ;;  %v15327_v16 = vld [vmem:[#allocation121_spill] sm:$0xff] }
 0x679   :  { %15318 = vst [vmem:[#allocation26_spill] sm:$0xff] %v12490_v46  ;;  %v12494_v53 = vadd.f32 %v12046_v18, %v15319_v36  ;;  %15322 = vst [vmem:[#allocation93_spill] sm:$0xff] %v12498_v63  ;;  %v12510_v35 = vadd.f32 %v12062_v37, %v15327_v16  ;;  %v15329_v46 = vld [vmem:[#allocation57_spill] sm:$0xff]  ;;  %v15333_v63 = vld [vmem:[#allocation66_spill] sm:$0xff] }
 0x67a   :  { %15324 = vst [vmem:[#allocation94_spill] sm:$0xff] %v12502_v44  ;;  %15326 = vst [vmem:[#allocation119_spill] sm:$0xff] %v12506_v3  ;;  %v12514_v36 = vadd.f32 %v12066_v51, %v15329_v46  ;;  %v12522_v29 = vadd.f32 %v12074_v39, %v15333_v63  ;;  %v15335_v44 = vld [vmem:[#allocation67_spill] sm:$0xff]  ;;  %v15337_v3 = vld [vmem:[#allocation102_spill] sm:$0xff] }
 0x67b   :  { %15320 = vst [vmem:[#allocation61_spill] sm:$0xff] %v12494_v53  ;;  %15328 = vst [vmem:[#allocation74_spill] sm:$0xff] %v12510_v35  ;;  %v15331_v53 = vld [vmem:[#allocation56_spill] sm:$0xff]  ;;  %v12526_v59 = vadd.f32 %v12046_v18, %v15335_v44  ;;  %v12530_v16 = vadd.f32 %v12050_v30, %v15337_v3  ;;  %v15339_v35 = vld [vmem:[#allocation103_spill] sm:$0xff] }
 0x67c   :  { %15330 = vst [vmem:[#allocation48_spill] sm:$0xff] %v12514_v36  ;;  %v12518_v19 = vadd.f32 %v12070_v48, %v15331_v53  ;;  %15334 = vst [vmem:[#allocation30_spill] sm:$0xff] %v12522_v29  ;;  %v12534_v46 = vadd.f32 %v12054_v21, %v15339_v35  ;;  %v15341_v36 = vld [vmem:[#allocation58_spill] sm:$0xff]  ;;  %v15345_v29 = vld [vmem:[#allocation20_spill] sm:$0xff] }
 0x67d   :  { %15336 = vst [vmem:[#allocation95_spill] sm:$0xff] %v12526_v59  ;;  %15338 = vst [vmem:[#allocation96_spill] sm:$0xff] %v12530_v16  ;;  %v12538_v53 = vadd.f32 %v12058_v4, %v15341_v36  ;;  %v12546_v44 = vadd.f32 %v12066_v51, %v15345_v29  ;;  %v15347_v59 = vld [vmem:[#allocation21_spill] sm:$0xff]  ;;  %v15349_v16 = vld [vmem:[#allocation104_spill] sm:$0xff]  ;;  %v12558_v36 = vadd.f32 %v12046_v18, %v12014_v62  ;;  %v5887_v18 = vmul.f32 0.2, %v12098_v9 }
 0x67e   :  { %15332 = vst [vmem:[#allocation35_spill] sm:$0xff] %v12518_v19  ;;  %15340 = vst [vmem:[#allocation120_spill] sm:$0xff] %v12534_v46  ;;  %v15343_v19 = vld [vmem:[#allocation62_spill] sm:$0xff]  ;;  %v12550_v3 = vadd.f32 %v12070_v48, %v15347_v59  ;;  %v12554_v35 = vadd.f32 %v12074_v39, %v15349_v16  ;;  %v12566_v29 = vadd.f32 %v12054_v21, %v12022_v49  ;;  %v5889_v21 = vmul.f32 0.2, %v12106_v31 }
 0x67f   :  { %15342 = vst [vmem:[#allocation75_spill] sm:$0xff] %v12538_v53  ;;  %v12542_v63 = vadd.f32 %v12062_v37, %v15343_v19  ;;  %15346 = vst [vmem:[#allocation38_spill] sm:$0xff] %v12546_v44  ;;  %v12562_v19 = vadd.f32 %v12050_v30, %v12018_v24  ;;  %v12570_v59 = vadd.f32 %v12058_v4, %v12026_v2  ;;  %v5882_v2 = vmul.f32 0.2, %v12078_v56 }
 0x680   :  { %15348 = vst [vmem:[#allocation59_spill] sm:$0xff] %v12550_v3  ;;  %15350 = vst [vmem:[#allocation97_spill] sm:$0xff] %v12554_v35  ;;  %v12574_v16 = vadd.f32 %v12062_v37, %v12030_v52  ;;  %v12578_v62 = vadd.f32 %v12066_v51, %v12034_v0  ;;  %v12582_v24 = vadd.f32 %v12070_v48, %v12038_v1  ;;  %v5883_v52 = vmul.f32 0.2, %v12082_v43 }
 0x681   :  { %15344 = vst [vmem:[#allocation50_spill] sm:$0xff] %v12542_v63  ;;  %15351 = vst [vmem:[#allocation22_spill] sm:$0xff] %v12558_v36  ;;  %v12586_v49 = vadd.f32 %v12074_v39, %v12042_v50  ;;  %v5884_v0 = vmul.f32 0.2, %v12086_v10  ;;  %v5885_v1 = vmul.f32 0.2, %v12090_v25  ;;  %v12611_v4 = vsel %vm5754_vm5, %v12078_v56, %v5882_v2 }
 0x682   :  { %15352 = vst [vmem:[#allocation51_spill] sm:$0xff] %v12562_v19  ;;  %15353 = vst [vmem:[#allocation53_spill] sm:$0xff] %v12566_v29  ;;  %v5886_v50 = vmul.f32 0.2, %v12094_v23  ;;  %v5888_v30 = vmul.f32 0.2, %v12102_v57  ;;  %v12620_v39 = vsel %vm5755_vm6, %v12082_v43, %v5883_v52  ;;  %v12702_v3 = vsel %vm5761_vm8, %v12106_v31, %v5889_v21 }
 0x683   :  { %15354 = vst [vmem:[#allocation33_spill] sm:$0xff] %v12570_v59  ;;  %15355 = vst [vmem:[#allocation29_spill] sm:$0xff] %v12574_v16  ;;  %v5890_v37 = vmul.f32 0.2, %v12110_v26  ;;  %v5891_v51 = vmul.f32 0.2, %v12114_v47  ;;  %v12672_v59 = vsel %vm5759_vm13, %v12098_v9, %v5887_v18 }
 0x684   :  { %15356 = vst [vmem:[#allocation98_spill] sm:$0xff] %v12578_v62  ;;  %15357 = vst [vmem:[#allocation99_spill] sm:$0xff] %v12582_v24  ;;  %v5892_v48 = vmul.f32 0.2, %v12118_v61  ;;  %v5894_v56 = vmul.f32 0.2, %v12126_v54  ;;  %v12657_v62 = vsel %vm5758_vm10, %v12094_v23, %v5886_v50  ;;  %v12687_v36 = vsel %vm5760_vm4, %v12102_v57, %v5888_v30 }
 0x685   :  { %15358 = vst [vmem:[#allocation52_spill] sm:$0xff] %v12586_v49  ;;  %15359 = vst [vmem:[#allocation54_spill] sm:$0xff] %v12611_v4  ;;  %v5893_v49 = vmul.f32 0.2, %v12122_v27  ;;  %v5895_v2 = vmul.f32 0.2, %v12130_v13  ;;  %v12629_v4 = vsel %vm5756_vm1, %v12086_v10, %v5884_v0  ;;  %v12717_v46 = vsel %vm5762_vm14, %v12110_v26, %v5890_v37 }
 0x686   :  { %15360 = vst [vmem:[#allocation36_spill] sm:$0xff] %v12620_v39  ;;  %15361 = vst [vmem:[#allocation64_spill] sm:$0xff] %v12629_v4  ;;  %v5896_v24 = vmul.f32 0.2, %v12134_v12  ;;  %v12634_v43 = vmul.f32 0.2, %v12138_v32  ;;  %v12642_v39 = vsel %vm5757_vm2, %v12090_v25, %v5885_v1 }
 0x687   :  { %v12637_v52 = vmul.f32 0.2, %v12142_v60  ;;  %15362 = vst [vmem:[#allocation100_spill] sm:$0xff] %v12642_v39  ;;  %v12646_v10 = vmul.f32 0.2, %v12146_v8  ;;  %15363 = vst [vmem:[#allocation101_spill] sm:$0xff] %v12657_v62 }
 0x688   :  { %v12649_v0 = vmul.f32 0.2, %v12150_v42  ;;  %v12652_v4 = vmul.f32 0.2, %v12154_v20  ;;  %vm5770_vm5 = vcmp.gt.f32.partialorder %v12142_v60, 0.0  ;;  %v15364_v39 = vld [vmem:[#allocation105_spill] sm:$0xff] }
 0x689   :  { %v12661_v25 = vmul.f32 0.2, %v12158_v17  ;;  %v12664_v1 = vmul.f32 0.2, %v12162_v38  ;;  %v12667_v16 = vmul.f32 0.2, %v15364_v39 }
 0x68a   :  { %15365 = vst [vmem:[#allocation121_spill] sm:$0xff] %v12672_v59  ;;  %vm5771_vm6 = vcmp.gt.f32.partialorder %v12146_v8, 0.0  ;;  %v15366_v23 = vld [vmem:[#allocation122_spill] sm:$0xff]  ;;  %v12679_v62 = vmul.f32 0.2, %v12174_v22  ;;  %v15367_v29 = vld [vmem:[#allocation31_spill] sm:$0xff] }
 0x68b   :  { %v12676_v50 = vmul.f32 0.2, %v15366_v23  ;;  %v12682_v19 = vmul.f32 0.2, %v15367_v29  ;;  %15368 = vst [vmem:[#allocation57_spill] sm:$0xff] %v12687_v36  ;;  %vm5772_vm1 = vcmp.gt.f32.partialorder %v12150_v42, 0.0 }
 0x68c   :  { %v12691_v9 = vmul.f32 0.2, %v12182_v7  ;;  %v12694_v18 = vmul.f32 0.2, %v12186_v5  ;;  %v15369_v59 = vld [vmem:[#allocation27_spill] sm:$0xff]  ;;  %15371 = vst [vmem:[#allocation66_spill] sm:$0xff] %v12702_v3 }
 0x68d   :  { %v12697_v35 = vmul.f32 0.2, %v15369_v59  ;;  %vm5773_vm2 = vcmp.gt.f32.partialorder %v12154_v20, 0.0  ;;  %v15372_v57 = vld [vmem:[#allocation23_spill] sm:$0xff]  ;;  %v15374_v36 = vld [vmem:[#allocation24_spill] sm:$0xff]  ;;  %v15376_v63 = vld [vmem:[#allocation106_spill] sm:$0xff] }
 0x68e   :  { %v12706_v30 = vmul.f32 0.2, %v15372_v57  ;;  %v12709_v44 = vmul.f32 0.2, %v15374_v36  ;;  %v12712_v53 = vmul.f32 0.2, %v15376_v63 }
 0x68f   :  { %15370 = vst [vmem:[#allocation56_spill] sm:$0xff] %v12697_v35  ;;  %15378 = vst [vmem:[#allocation58_spill] sm:$0xff] %v12717_v46  ;;  %vm5774_vm10 = vcmp.gt.f32.partialorder %v12158_v17, 0.0  ;;  %v15379_v31 = vld [vmem:[#allocation107_spill] sm:$0xff]  ;;  %vm5775_vm13 = vcmp.gt.f32.partialorder %v12162_v38, 0.0  ;;  %v15386_v37 = vld [vmem:[#allocation124_spill] sm:$0xff] }
 0x690   :  { %15373 = vst [vmem:[#allocation67_spill] sm:$0xff] %v12706_v30  ;;  %15375 = vst [vmem:[#allocation102_spill] sm:$0xff] %v12709_v44  ;;  %v12721_v21 = vmul.f32 0.2, %v15379_v31  ;;  %v15381_v3 = vld [vmem:[#allocation123_spill] sm:$0xff]  ;;  %vm5776_vm4 = vcmp.gt.f32.partialorder %v15364_v39, 0.0 }
 0x691   :  { %15377 = vst [vmem:[#allocation103_spill] sm:$0xff] %v12712_v53  ;;  %v12724_v35 = vmul.f32 0.2, %v15381_v3  ;;  %v12727_v30 = vmul.f32 0.2, %v12214_v58  ;;  %v12732_v53 = vsel %vm5763_vm11, %v12114_v47, %v5891_v51  ;;  %v15391_v47 = vld [vmem:[#allocation60_spill] sm:$0xff] }
 0x692   :  { %15380 = vst [vmem:[#allocation62_spill] sm:$0xff] %v12721_v21  ;;  %15384 = vst [vmem:[#allocation104_spill] sm:$0xff] %v12732_v53  ;;  %v12736_v26 = vmul.f32 0.2, %v12218_v45  ;;  %v12739_v46 = vmul.f32 0.2, %v15386_v37 }
 0x693   :  { %15382 = vst [vmem:[#allocation20_spill] sm:$0xff] %v12724_v35  ;;  %15383 = vst [vmem:[#allocation21_spill] sm:$0xff] %v12727_v30  ;;  %v15388_v21 = vld [vmem:[#allocation34_spill] sm:$0xff]  ;;  %v12747_v30 = vsel %vm5764_vm9, %v12118_v61, %v5892_v48  ;;  %v12751_v51 = vmul.f32 0.2, %v15391_v47  ;;  %v15393_v53 = vld [vmem:[#allocation19_spill] sm:$0xff] }
 0x694   :  { %15385 = vst [vmem:[#allocation105_spill] sm:$0xff] %v12736_v26  ;;  %15387 = vst [vmem:[#allocation122_spill] sm:$0xff] %v12739_v46  ;;  %v12742_v44 = vmul.f32 0.2, %v15388_v21  ;;  %v12754_v35 = vmul.f32 0.2, %v15393_v53 }
 0x695   :  { %15390 = vst [vmem:[#allocation27_spill] sm:$0xff] %v12747_v30  ;;  %15392 = vst [vmem:[#allocation23_spill] sm:$0xff] %v12751_v51  ;;  %v15395_v26 = vld [vmem:[#allocation78_spill] sm:$0xff]  ;;  %vm5777_vm8 = vcmp.gt.f32.partialorder %v15366_v23, 0.0  ;;  %v15398_v61 = vld [vmem:[#allocation108_spill] sm:$0xff]  ;;  %vm5778_vm14 = vcmp.gt.f32.partialorder %v12174_v22, 0.0 }
 0x696   :  { %15389 = vst [vmem:[#allocation31_spill] sm:$0xff] %v12742_v44  ;;  %15394 = vst [vmem:[#allocation24_spill] sm:$0xff] %v12754_v35  ;;  %v12757_v15 = vmul.f32 0.2, %v15395_v26  ;;  %v12762_v44 = vsel %vm5765_vm15, %v12122_v27, %v5893_v49  ;;  %v12766_v48 = vmul.f32 0.2, %v15398_v61 }
 0x697   :  { %15397 = vst [vmem:[#allocation107_spill] sm:$0xff] %v12762_v44  ;;  %v15400_v30 = vld [vmem:[#allocation109_spill] sm:$0xff]  ;;  %v12772_v51 = vmul.f32 0.2, %v12250_v33  ;;  %v15406_v44 = vld [vmem:[#allocation126_spill] sm:$0xff]  ;;  %vm5779_vm11 = vcmp.gt.f32.partialorder %v15367_v29, 0.0 }
 0x698   :  { %15396 = vst [vmem:[#allocation106_spill] sm:$0xff] %v12757_v15  ;;  %15399 = vst [vmem:[#allocation123_spill] sm:$0xff] %v12766_v48  ;;  %v12769_v46 = vmul.f32 0.2, %v15400_v30  ;;  %v12777_v15 = vsel %vm5766_vm3, %v12126_v54, %v5894_v56  ;;  %v15404_v27 = vld [vmem:[#allocation125_spill] sm:$0xff]  ;;  %v15408_v48 = vld [vmem:[#allocation28_spill] sm:$0xff] }
 0x699   :  { %15402 = vst [vmem:[#allocation34_spill] sm:$0xff] %v12772_v51  ;;  %15403 = vst [vmem:[#allocation60_spill] sm:$0xff] %v12777_v15  ;;  %v12781_v49 = vmul.f32 0.2, %v15404_v27  ;;  %v12784_v35 = vmul.f32 0.2, %v15406_v44  ;;  %v12792_v51 = vsel %vm5767_vm12, %v12130_v13, %v5895_v2 }
 0x69a   :  { %15401 = vst [vmem:[#allocation124_spill] sm:$0xff] %v12769_v46  ;;  %v12787_v61 = vmul.f32 0.2, %v15408_v48  ;;  %15410 = vst [vmem:[#allocation126_spill] sm:$0xff] %v12792_v51  ;;  %v15411_v54 = vld [vmem:[#allocation25_spill] sm:$0xff]  ;;  %v15413_v15 = vld [vmem:[#allocation79_spill] sm:$0xff] }
 0x69b   :  { %15405 = vst [vmem:[#allocation19_spill] sm:$0xff] %v12781_v49  ;;  %15407 = vst [vmem:[#allocation78_spill] sm:$0xff] %v12784_v35  ;;  %v12796_v56 = vmul.f32 0.2, %v15411_v54  ;;  %v12799_v46 = vmul.f32 0.2, %v15413_v15 }
 0x69c   :  { %15409 = vst [vmem:[#allocation109_spill] sm:$0xff] %v12787_v61  ;;  %v15415_v49 = vld [vmem:[#allocation80_spill] sm:$0xff]  ;;  %v12807_v61 = vsel %vm5768_vm0, %v12134_v12, %v5896_v24  ;;  %vm5780_vm9 = vcmp.gt.f32.partialorder %v12182_v7, 0.0  ;;  %v12811_v13 = vmul.f32 0.2, %v12278_v6  ;;  %v15419_v2 = vld [vmem:[#allocation110_spill] sm:$0xff] }
 0x69d   :  { %15412 = vst [vmem:[#allocation28_spill] sm:$0xff] %v12796_v56  ;;  %15414 = vst [vmem:[#allocation25_spill] sm:$0xff] %v12799_v46  ;;  %v12802_v27 = vmul.f32 0.2, %v15415_v49  ;;  %v12814_v51 = vmul.f32 0.2, %v15419_v2 }
 0x69e   :  { %15417 = vst [vmem:[#allocation80_spill] sm:$0xff] %v12807_v61  ;;  %15418 = vst [vmem:[#allocation129_spill] sm:$0xff] %v12811_v13  ;;  %v15421_v56 = vld [vmem:[#allocation111_spill] sm:$0xff]  ;;  %vm5781_vm15 = vcmp.gt.f32.partialorder %v12186_v5, 0.0  ;;  %v15426_v61 = vld [vmem:[#allocation128_spill] sm:$0xff]  ;;  %vm5782_vm3 = vcmp.gt.f32.partialorder %v15369_v59, 0.0 }
 0x69f   :  { %15416 = vst [vmem:[#allocation79_spill] sm:$0xff] %v12802_v27  ;;  %15420 = vst [vmem:[#allocation130_spill] sm:$0xff] %v12814_v51  ;;  %v12817_v35 = vmul.f32 0.2, %v15421_v56  ;;  %v12823_v27 = vsel %vm5769_vm7, %v12138_v32, %v12634_v43  ;;  %v15424_v12 = vld [vmem:[#allocation127_spill] sm:$0xff]  ;;  %v15428_v13 = vld [vmem:[#allocation32_spill] sm:$0xff] }
 0x6a0   :  { %15423 = vst [vmem:[#allocation131_spill] sm:$0xff] %v12823_v27  ;;  %v12827_v24 = vmul.f32 0.2, %v15424_v12  ;;  %v12830_v46 = vmul.f32 0.2, %v15426_v61  ;;  %v15431_v32 = vld [vmem:[#allocation81_spill] sm:$0xff] }
 0x6a1   :  { %15422 = vst [vmem:[#allocation111_spill] sm:$0xff] %v12817_v35  ;;  %v12833_v2 = vmul.f32 0.2, %v15428_v13  ;;  %v12839_v35 = vsel %vm5770_vm5, %v12142_v60, %v12637_v52  ;;  %v12843_v43 = vmul.f32 0.2, %v15431_v32  ;;  %v15433_v27 = vld [vmem:[#allocation82_spill] sm:$0xff] }
 0x6a2   :  { %15425 = vst [vmem:[#allocation127_spill] sm:$0xff] %v12827_v24  ;;  %15427 = vst [vmem:[#allocation128_spill] sm:$0xff] %v12830_v46  ;;  %v12846_v51 = vmul.f32 0.2, %v15433_v27  ;;  %v12849_v24 = vmul.f32 0.2, %v12310_v41 }
 0x6a3   :  { %15429 = vst [vmem:[#allocation32_spill] sm:$0xff] %v12833_v2  ;;  %15430 = vst [vmem:[#allocation132_spill] sm:$0xff] %v12839_v35  ;;  %v12855_v2 = vsel %vm5771_vm6, %v12146_v8, %v12646_v10  ;;  %vm5783_vm12 = vcmp.gt.f32.partialorder %v15372_v57, 0.0  ;;  %v12859_v60 = vmul.f32 0.2, %v12314_v11  ;;  %v15438_v52 = vld [vmem:[#allocation113_spill] sm:$0xff] }
 0x6a4   :  { %15432 = vst [vmem:[#allocation81_spill] sm:$0xff] %v12843_v43  ;;  %15434 = vst [vmem:[#allocation82_spill] sm:$0xff] %v12846_v51  ;;  %v12862_v35 = vmul.f32 0.2, %v15438_v52  ;;  %v15440_v43 = vld [vmem:[#allocation114_spill] sm:$0xff]  ;;  %vm5784_vm0 = vcmp.gt.f32.partialorder %v15374_v36, 0.0 }
 0x6a5   :  { %15435 = vst [vmem:[#allocation133_spill] sm:$0xff] %v12849_v24  ;;  %15436 = vst [vmem:[#allocation134_spill] sm:$0xff] %v12855_v2  ;;  %v12865_v46 = vmul.f32 0.2, %v15440_v43  ;;  %v12871_v24 = vsel %vm5772_vm1, %v12150_v42, %v12649_v0  ;;  %v15443_v8 = vld [vmem:[#allocation68_spill] sm:$0xff]  ;;  %v15445_v2 = vld [vmem:[#allocation39_spill] sm:$0xff] }
 0x6a6   :  { %15437 = vst [vmem:[#allocation135_spill] sm:$0xff] %v12859_v60  ;;  %15439 = vst [vmem:[#allocation136_spill] sm:$0xff] %v12862_v35  ;;  %v12875_v10 = vmul.f32 0.2, %v15443_v8  ;;  %v12878_v51 = vmul.f32 0.2, %v15445_v2 }
 0x6a7   :  { %15441 = vst [vmem:[#allocation114_spill] sm:$0xff] %v12865_v46  ;;  %15442 = vst [vmem:[#allocation137_spill] sm:$0xff] %v12871_v24  ;;  %v15447_v60 = vld [vmem:[#allocation63_spill] sm:$0xff]  ;;  %v12887_v46 = vsel %vm5773_vm2, %v12154_v20, %v12652_v4  ;;  %vm5785_vm7 = vcmp.gt.f32.partialorder %v15376_v63, 0.0  ;;  %v15450_v42 = vld [vmem:[#allocation72_spill] sm:$0xff]  ;;  %vm5786_vm5 = vcmp.gt.f32.partialorder %v15379_v31, 0.0 }
 0x6a8   :  { %15444 = vst [vmem:[#allocation68_spill] sm:$0xff] %v12875_v10  ;;  %15446 = vst [vmem:[#allocation39_spill] sm:$0xff] %v12878_v51  ;;  %v12881_v52 = vmul.f32 0.2, %v15447_v60  ;;  %v12891_v0 = vmul.f32 0.2, %v15450_v42 }
 0x6a9   :  { %15449 = vst [vmem:[#allocation138_spill] sm:$0xff] %v12887_v46  ;;  %v12894_v24 = vmul.f32 0.2, %v12342_v34  ;;  %v12897_v10 = vmul.f32 0.2, %v12346_v40  ;;  %v15455_v20 = vld [vmem:[#allocation83_spill] sm:$0xff] }
 0x6aa   :  { %15448 = vst [vmem:[#allocation63_spill] sm:$0xff] %v12881_v52  ;;  %15451 = vst [vmem:[#allocation72_spill] sm:$0xff] %v12891_v0  ;;  %v12903_v52 = vsel %vm5774_vm10, %v12158_v17, %v12661_v25  ;;  %v12907_v4 = vmul.f32 0.2, %v15455_v20  ;;  %v15457_v46 = vld [vmem:[#allocation84_spill] sm:$0xff]  ;;  %vm5787_vm6 = vcmp.gt.f32.partialorder %v15381_v3, 0.0 }
 0x6ab   :  { %15452 = vst [vmem:[#allocation139_spill] sm:$0xff] %v12894_v24  ;;  %15453 = vst [vmem:[#allocation140_spill] sm:$0xff] %v12897_v10  ;;  %v12910_v51 = vmul.f32 0.2, %v15457_v46  ;;  %v15459_v0 = vld [vmem:[#allocation112_spill] sm:$0xff]  ;;  %v12919_v10 = vsel %vm5775_vm13, %v12162_v38, %v12664_v1  ;;  %v15462_v17 = vld [vmem:[#allocation115_spill] sm:$0xff] }
 0x6ac   :  { %15454 = vst [vmem:[#allocation141_spill] sm:$0xff] %v12903_v52  ;;  %15456 = vst [vmem:[#allocation83_spill] sm:$0xff] %v12907_v4  ;;  %v12913_v35 = vmul.f32 0.2, %v15459_v0  ;;  %v12923_v25 = vmul.f32 0.2, %v15462_v17 }
 0x6ad   :  { %15458 = vst [vmem:[#allocation142_spill] sm:$0xff] %v12910_v51  ;;  %15461 = vst [vmem:[#allocation143_spill] sm:$0xff] %v12919_v10  ;;  %v15464_v52 = vld [vmem:[#allocation41_spill] sm:$0xff]  ;;  %v15466_v4 = vld [vmem:[#allocation40_spill] sm:$0xff]  ;;  %vm5788_vm1 = vcmp.gt.f32.partialorder %v12214_v58, 0.0  ;;  %vm5789_vm2 = vcmp.gt.f32.partialorder %v12218_v45, 0.0 }
 0x6ae   :  { %15460 = vst [vmem:[#allocation112_spill] sm:$0xff] %v12913_v35  ;;  %15463 = vst [vmem:[#allocation115_spill] sm:$0xff] %v12923_v25  ;;  %v12926_v24 = vmul.f32 0.2, %v15464_v52  ;;  %v12929_v46 = vmul.f32 0.2, %v15466_v4  ;;  %v12935_v35 = vsel %vm5776_vm4, %v15364_v39, %v12667_v16 }
 0x6af   :  { %15468 = vst [vmem:[#allocation145_spill] sm:$0xff] %v12935_v35  ;;  %v15469_v38 = vld [vmem:[#allocation69_spill] sm:$0xff]  ;;  %v12942_v10 = vmul.f32 0.2, %v12378_v28  ;;  %v15475_v16 = vld [vmem:[#allocation86_spill] sm:$0xff]  ;;  %v15477_v35 = vld [vmem:[#allocation116_spill] sm:$0xff] }
 0x6b0   :  { %15465 = vst [vmem:[#allocation144_spill] sm:$0xff] %v12926_v24  ;;  %15467 = vst [vmem:[#allocation40_spill] sm:$0xff] %v12929_v46  ;;  %v12939_v1 = vmul.f32 0.2, %v15469_v38  ;;  %v15472_v25 = vld [vmem:[#allocation85_spill] sm:$0xff]  ;;  %v12951_v46 = vsel %vm5777_vm8, %v15366_v23, %v12676_v50  ;;  %vm5790_vm10 = vcmp.gt.f32.partialorder %v15386_v37, 0.0 }
 0x6b1   :  { %15471 = vst [vmem:[#allocation146_spill] sm:$0xff] %v12942_v10  ;;  %v12945_v51 = vmul.f32 0.2, %v15472_v25  ;;  %15474 = vst [vmem:[#allocation148_spill] sm:$0xff] %v12951_v46  ;;  %v12955_v39 = vmul.f32 0.2, %v15475_v16 }
 0x6b2   :  { %15470 = vst [vmem:[#allocation69_spill] sm:$0xff] %v12939_v1  ;;  %v12958_v24 = vmul.f32 0.2, %v15477_v35  ;;  %v15479_v1 = vld [vmem:[#allocation70_spill] sm:$0xff]  ;;  %v15484_v46 = vld [vmem:[#allocation37_spill] sm:$0xff]  ;;  %vm5791_vm13 = vcmp.gt.f32.partialorder %v15388_v21, 0.0 }
 0x6b3   :  { %15473 = vst [vmem:[#allocation147_spill] sm:$0xff] %v12945_v51  ;;  %15476 = vst [vmem:[#allocation86_spill] sm:$0xff] %v12955_v39  ;;  %v12961_v28 = vmul.f32 0.2, %v15479_v1  ;;  %v12967_v51 = vsel %vm5778_vm14, %v12174_v22, %v12679_v62  ;;  %v15482_v23 = vld [vmem:[#allocation42_spill] sm:$0xff]  ;;  %v15489_v62 = vld [vmem:[#allocation71_spill] sm:$0xff] }
 0x6b4   :  { %15478 = vst [vmem:[#allocation149_spill] sm:$0xff] %v12958_v24  ;;  %15481 = vst [vmem:[#allocation151_spill] sm:$0xff] %v12967_v51  ;;  %v12971_v50 = vmul.f32 0.2, %v15482_v23  ;;  %v12974_v10 = vmul.f32 0.2, %v15484_v46 }
 0x6b5   :  { %15480 = vst [vmem:[#allocation150_spill] sm:$0xff] %v12961_v28  ;;  %v12977_v39 = vmul.f32 0.2, %v12406_v55  ;;  %v12983_v28 = vsel %vm5779_vm11, %v15367_v29, %v12682_v19  ;;  %v12987_v22 = vmul.f32 0.2, %v12410_v14  ;;  %vm5792_vm4 = vcmp.gt.f32.partialorder %v15391_v47, 0.0 }
 0x6b6   :  { %15483 = vst [vmem:[#allocation152_spill] sm:$0xff] %v12971_v50  ;;  %15485 = vst [vmem:[#allocation37_spill] sm:$0xff] %v12974_v10  ;;  %v12990_v51 = vmul.f32 0.2, %v15489_v62  ;;  %v15491_v50 = vld [vmem:[#allocation87_spill] sm:$0xff]  ;;  %v15494_v19 = vld [vmem:[#allocation88_spill] sm:$0xff] }
 0x6b7   :  { %15486 = vst [vmem:[#allocation153_spill] sm:$0xff] %v12977_v39  ;;  %15487 = vst [vmem:[#allocation154_spill] sm:$0xff] %v12983_v28  ;;  %v12993_v24 = vmul.f32 0.2, %v15491_v50  ;;  %v12999_v39 = vsel %vm5780_vm9, %v12182_v7, %v12691_v9  ;;  %v13003_v29 = vmul.f32 0.2, %v15494_v19 }
 0x6b8   :  { %15488 = vst [vmem:[#allocation155_spill] sm:$0xff] %v12987_v22  ;;  %15490 = vst [vmem:[#allocation156_spill] sm:$0xff] %v12990_v51  ;;  %v15496_v28 = vld [vmem:[#allocation117_spill] sm:$0xff]  ;;  %v15498_v22 = vld [vmem:[#allocation118_spill] sm:$0xff]  ;;  %vm5793_vm8 = vcmp.gt.f32.partialorder %v15393_v53, 0.0  ;;  %vm5794_vm14 = vcmp.gt.f32.partialorder %v15395_v26, 0.0 }
 0x6b9   :  { %15492 = vst [vmem:[#allocation87_spill] sm:$0xff] %v12993_v24  ;;  %15493 = vst [vmem:[#allocation157_spill] sm:$0xff] %v12999_v39  ;;  %v13006_v10 = vmul.f32 0.2, %v15496_v28  ;;  %v13009_v62 = vmul.f32 0.2, %v15498_v22  ;;  %v13015_v24 = vsel %vm5781_vm15, %v12186_v5, %v12694_v18 }
 0x6ba   :  { %15495 = vst [vmem:[#allocation88_spill] sm:$0xff] %v13003_v29  ;;  %15500 = vst [vmem:[#allocation160_spill] sm:$0xff] %v13015_v24  ;;  %v15501_v7 = vld [vmem:[#allocation43_spill] sm:$0xff]  ;;  %v15503_v39 = vld [vmem:[#allocation45_spill] sm:$0xff] }
 0x6bb   :  { %15497 = vst [vmem:[#allocation158_spill] sm:$0xff] %v13006_v10  ;;  %15499 = vst [vmem:[#allocation159_spill] sm:$0xff] %v13009_v62  ;;  %v13019_v9 = vmul.f32 0.2, %v15501_v7  ;;  %v13022_v51 = vmul.f32 0.2, %v15503_v39 }
 0x6bc   :  { %v15505_v29 = vld [vmem:[#allocation65_spill] sm:$0xff]  ;;  %v15507_v10 = vld [vmem:[#allocation56_spill] sm:$0xff]  ;;  %v15509_v5 = vld [vmem:[#allocation47_spill] sm:$0xff] }
 0x6bd   :  { %15502 = vst [vmem:[#allocation161_spill] sm:$0xff] %v13019_v9  ;;  %15504 = vst [vmem:[#allocation162_spill] sm:$0xff] %v13022_v51  ;;  %v13025_v28 = vmul.f32 0.2, %v15505_v29  ;;  %v13031_v62 = vsel %vm5782_vm3, %v15369_v59, %v15507_v10  ;;  %v13035_v18 = vmul.f32 0.2, %v15509_v5 }
 0x6be   :  { %15508 = vst [vmem:[#allocation56_spill] sm:$0xff] %v13031_v62  ;;  %v15511_v24 = vld [vmem:[#allocation89_spill] sm:$0xff]  ;;  %v15513_v9 = vld [vmem:[#allocation90_spill] sm:$0xff]  ;;  %v15515_v51 = vld [vmem:[#allocation67_spill] sm:$0xff] }
 0x6bf   :  { %15506 = vst [vmem:[#allocation163_spill] sm:$0xff] %v13025_v28  ;;  %15510 = vst [vmem:[#allocation47_spill] sm:$0xff] %v13035_v18  ;;  %v13038_v7 = vmul.f32 0.2, %v15511_v24  ;;  %v13041_v39 = vmul.f32 0.2, %v15513_v9  ;;  %v13047_v28 = vsel %vm5783_vm12, %v15372_v57, %v15515_v51 }
 0x6c0   :  { %15516 = vst [vmem:[#allocation67_spill] sm:$0xff] %v13047_v28  ;;  %v15517_v29 = vld [vmem:[#allocation108_spill] sm:$0xff]  ;;  %v15518_v59 = vld [vmem:[#allocation125_spill] sm:$0xff]  ;;  %v15525_v24 = vld [vmem:[#allocation102_spill] sm:$0xff]  ;;  %vm5799_vm12 = vcmp.gt.f32.partialorder %v15406_v44, 0.0 }
 0x6c1   :  { %15512 = vst [vmem:[#allocation164_spill] sm:$0xff] %v13038_v7  ;;  %15514 = vst [vmem:[#allocation165_spill] sm:$0xff] %v13041_v39  ;;  %vm5795_vm11 = vcmp.gt.f32.partialorder %v15517_v29, 0.0  ;;  %v15519_v10 = vld [vmem:[#allocation44_spill] sm:$0xff]  ;;  %v15521_v7 = vld [vmem:[#allocation46_spill] sm:$0xff]  ;;  %v13066_v57 = vsel %vm5784_vm0, %v15374_v36, %v15525_v24  ;;  %vm5803_vm0 = vcmp.gt.f32.partialorder %v15415_v49, 0.0 }
 0x6c2   :  { %v13054_v62 = vmul.f32 0.2, %v15519_v10  ;;  %v13057_v18 = vmul.f32 0.2, %v15521_v7  ;;  %v15523_v39 = vld [vmem:[#allocation55_spill] sm:$0xff]  ;;  %15526 = vst [vmem:[#allocation102_spill] sm:$0xff] %v13066_v57 }
 0x6c3   :  { %v13060_v9 = vmul.f32 0.2, %v15523_v39  ;;  %v15527_v51 = vld [vmem:[#allocation77_spill] sm:$0xff]  ;;  %v15533_v7 = vld [vmem:[#allocation103_spill] sm:$0xff]  ;;  %v15535_v24 = vld [vmem:[#allocation110_spill] sm:$0xff]  ;;  %vm15621_vm15 = vcmp.gt.f32.partialorder %v15518_v59, 0.0 }
 0x6c4   :  { %15520 = vst [vmem:[#allocation108_spill] sm:$0xff] %v13054_v62  ;;  %15522 = vst [vmem:[#allocation125_spill] sm:$0xff] %v13057_v18  ;;  %v13073_v28 = vmul.f32 0.2, %v15527_v51  ;;  %v15529_v18 = vld [vmem:[#allocation91_spill] sm:$0xff]  ;;  %v13085_v36 = vsel %vm5785_vm7, %v15376_v63, %v15533_v7  ;;  %v15536_v57 = vld [vmem:[#allocation73_spill] sm:$0xff] }
 0x6c5   :  { %15524 = vst [vmem:[#allocation44_spill] sm:$0xff] %v13060_v9  ;;  %v13076_v62 = vmul.f32 0.2, %v15529_v18  ;;  %v15531_v9 = vld [vmem:[#allocation92_spill] sm:$0xff]  ;;  %15534 = vst [vmem:[#allocation103_spill] sm:$0xff] %v13085_v36  ;;  %v15542_v51 = vld [vmem:[#allocation62_spill] sm:$0xff] }
 0x6c6   :  { %15528 = vst [vmem:[#allocation166_spill] sm:$0xff] %v13073_v28  ;;  %v13079_v39 = vmul.f32 0.2, %v15531_v9  ;;  %v13092_v28 = vmul.f32 0.2, %v15536_v57  ;;  %v13104_v63 = vsel %vm5786_vm5, %v15379_v31, %v15542_v51  ;;  %vm5807_vm7 = vcmp.gt.f32.partialorder %v15424_v12, 0.0 }
 0x6c7   :  { %15530 = vst [vmem:[#allocation167_spill] sm:$0xff] %v13076_v62  ;;  %v15538_v62 = vld [vmem:[#allocation49_spill] sm:$0xff]  ;;  %15543 = vst [vmem:[#allocation62_spill] sm:$0xff] %v13104_v63  ;;  %vm5811_vm5 = vcmp.gt.f32.partialorder %v15433_v27, 0.0  ;;  %v15553_v63 = vld [vmem:[#allocation119_spill] sm:$0xff] }
 0x6c8   :  { %15532 = vst [vmem:[#allocation168_spill] sm:$0xff] %v13079_v39  ;;  %15537 = vst [vmem:[#allocation110_spill] sm:$0xff] %v13092_v28  ;;  %v13095_v9 = vmul.f32 0.2, %v15538_v62  ;;  %v15540_v39 = vld [vmem:[#allocation26_spill] sm:$0xff]  ;;  %v15544_v7 = vld [vmem:[#allocation61_spill] sm:$0xff] }
 0x6c9   :  { %v13098_v18 = vmul.f32 0.2, %v15540_v39  ;;  %v13111_v36 = vmul.f32 0.2, %v15544_v7  ;;  %v15550_v62 = vld [vmem:[#allocation20_spill] sm:$0xff]  ;;  %v15552_v51 = vld [vmem:[#allocation113_spill] sm:$0xff] }
 0x6ca   :  { %15539 = vst [vmem:[#allocation73_spill] sm:$0xff] %v13095_v9  ;;  %v15546_v9 = vld [vmem:[#allocation93_spill] sm:$0xff]  ;;  %v13123_v31 = vsel %vm5787_vm6, %v15381_v3, %v15550_v62  ;;  %vm5815_vm6 = vcmp.gt.f32.partialorder %v15440_v43, 0.0  ;;  %v15561_v62 = vld [vmem:[#allocation35_spill] sm:$0xff]  ;;  %v15601_v25 = vld [vmem:[#allocation24_spill] sm:$0xff] }
 0x6cb   :  { %15541 = vst [vmem:[#allocation169_spill] sm:$0xff] %v13098_v18  ;;  %15545 = vst [vmem:[#allocation170_spill] sm:$0xff] %v13111_v36  ;;  %v13114_v28 = vmul.f32 0.2, %v15546_v9  ;;  %v15548_v18 = vld [vmem:[#allocation94_spill] sm:$0xff]  ;;  %v15559_v7 = vld [vmem:[#allocation21_spill] sm:$0xff] }
 0x6cc   :  { %v13117_v39 = vmul.f32 0.2, %v15548_v18  ;;  %15551 = vst [vmem:[#allocation20_spill] sm:$0xff] %v13123_v31  ;;  %v13130_v36 = vmul.f32 0.2, %v15553_v63  ;;  %v13142_v3 = vsel %vm5788_vm1, %v12214_v58, %v15559_v7  ;;  %vm5819_vm1 = vcmp.gt.f32.partialorder %v15450_v42, 0.0 }
 0x6cd   :  { %15547 = vst [vmem:[#allocation171_spill] sm:$0xff] %v13114_v28  ;;  %v15555_v28 = vld [vmem:[#allocation74_spill] sm:$0xff]  ;;  %15560 = vst [vmem:[#allocation21_spill] sm:$0xff] %v13142_v3  ;;  %v13149_v31 = vmul.f32 0.2, %v15561_v62  ;;  %v15569_v7 = vld [vmem:[#allocation96_spill] sm:$0xff] }
 0x6ce   :  { %15549 = vst [vmem:[#allocation172_spill] sm:$0xff] %v13117_v39  ;;  %15554 = vst [vmem:[#allocation113_spill] sm:$0xff] %v13130_v36  ;;  %v13133_v18 = vmul.f32 0.2, %v15555_v28  ;;  %v15557_v39 = vld [vmem:[#allocation48_spill] sm:$0xff]  ;;  %v15567_v28 = vld [vmem:[#allocation105_spill] sm:$0xff] }
 0x6cf   :  { %v13136_v9 = vmul.f32 0.2, %v15557_v39  ;;  %15562 = vst [vmem:[#allocation35_spill] sm:$0xff] %v13149_v31  ;;  %v13161_v58 = vsel %vm5789_vm2, %v12218_v45, %v15567_v28  ;;  %v13168_v3 = vmul.f32 0.2, %v15569_v7  ;;  %v15577_v28 = vld [vmem:[#allocation84_spill] sm:$0xff] }
 0x6d0   :  { %15556 = vst [vmem:[#allocation119_spill] sm:$0xff] %v13133_v18  ;;  %v15563_v18 = vld [vmem:[#allocation30_spill] sm:$0xff]  ;;  %15568 = vst [vmem:[#allocation105_spill] sm:$0xff] %v13161_v58  ;;  %vm5823_vm2 = vcmp.gt.f32.partialorder %v15577_v28, 0.0  ;;  %v15584_v7 = vld [vmem:[#allocation31_spill] sm:$0xff] }
 0x6d1   :  { %15558 = vst [vmem:[#allocation173_spill] sm:$0xff] %v13136_v9  ;;  %v13152_v36 = vmul.f32 0.2, %v15563_v18  ;;  %v15565_v9 = vld [vmem:[#allocation95_spill] sm:$0xff]  ;;  %15570 = vst [vmem:[#allocation176_spill] sm:$0xff] %v13168_v3  ;;  %v15575_v18 = vld [vmem:[#allocation122_spill] sm:$0xff] }
 0x6d2   :  { %v13155_v39 = vmul.f32 0.2, %v15565_v9  ;;  %v13180_v45 = vsel %vm5790_vm10, %v15386_v37, %v15575_v18  ;;  %v15578_v58 = vld [vmem:[#allocation50_spill] sm:$0xff]  ;;  %v13199_v37 = vsel %vm5791_vm13, %v15388_v21, %v15584_v7  ;;  %vm5827_vm10 = vcmp.gt.f32.partialorder %v15466_v4, 0.0  ;;  %v15586_v18 = vld [vmem:[#allocation76_spill] sm:$0xff]  ;;  %v15593_v52 = vld [vmem:[#allocation23_spill] sm:$0xff] }
 0x6d3   :  { %15564 = vst [vmem:[#allocation174_spill] sm:$0xff] %v13152_v36  ;;  %v15571_v36 = vld [vmem:[#allocation120_spill] sm:$0xff]  ;;  %15576 = vst [vmem:[#allocation122_spill] sm:$0xff] %v13180_v45  ;;  %v13187_v3 = vmul.f32 0.2, %v15578_v58  ;;  %v15587_v45 = vld [vmem:[#allocation97_spill] sm:$0xff]  ;;  %v13218_v21 = vsel %vm5792_vm4, %v15391_v47, %v15593_v52  ;;  %v13237_v47 = vsel %vm5793_vm8, %v15393_v53, %v15601_v25 }
 0x6d4   :  { %15566 = vst [vmem:[#allocation175_spill] sm:$0xff] %v13155_v39  ;;  %v13171_v31 = vmul.f32 0.2, %v15571_v36  ;;  %v15573_v39 = vld [vmem:[#allocation75_spill] sm:$0xff]  ;;  %15585 = vst [vmem:[#allocation31_spill] sm:$0xff] %v13199_v37  ;;  %vm5831_vm13 = vcmp.gt.f32.partialorder %v15475_v16, 0.0 }
 0x6d5   :  { %v13174_v9 = vmul.f32 0.2, %v15573_v39  ;;  %15579 = vst [vmem:[#allocation84_spill] sm:$0xff] %v13187_v3  ;;  %v13206_v3 = vmul.f32 0.2, %v15587_v45  ;;  %15594 = vst [vmem:[#allocation23_spill] sm:$0xff] %v13218_v21 }
 0x6d6   :  { %15572 = vst [vmem:[#allocation177_spill] sm:$0xff] %v13171_v31  ;;  %v15580_v31 = vld [vmem:[#allocation38_spill] sm:$0xff]  ;;  %v15595_v7 = vld [vmem:[#allocation53_spill] sm:$0xff]  ;;  %15602 = vst [vmem:[#allocation24_spill] sm:$0xff] %v13237_v47  ;;  %vm5839_vm8 = vcmp.gt.f32.partialorder %v15491_v50, 0.0  ;;  %vm15616_vm4 = vcmp.gt.f32.partialorder %v15400_v30, 0.0 }
 0x6d7   :  { %15574 = vst [vmem:[#allocation178_spill] sm:$0xff] %v13174_v9  ;;  %v13190_v39 = vmul.f32 0.2, %v15580_v31  ;;  %v15582_v9 = vld [vmem:[#allocation59_spill] sm:$0xff]  ;;  %15588 = vst [vmem:[#allocation76_spill] sm:$0xff] %v13206_v3  ;;  %v15604_v21 = vld [vmem:[#allocation98_spill] sm:$0xff] }
 0x6d8   :  { %v13193_v36 = vmul.f32 0.2, %v15582_v9  ;;  %v13225_v37 = vmul.f32 0.2, %v15595_v7  ;;  %v15603_v52 = vld [vmem:[#allocation71_spill] sm:$0xff]  ;;  %v15610_v35 = vld [vmem:[#allocation106_spill] sm:$0xff] }
 0x6d9   :  { %15581 = vst [vmem:[#allocation50_spill] sm:$0xff] %v13190_v39  ;;  %v15589_v39 = vld [vmem:[#allocation22_spill] sm:$0xff]  ;;  %v13256_v53 = vsel %vm5794_vm14, %v15395_v26, %v15610_v35  ;;  %v15612_v25 = vld [vmem:[#allocation117_spill] sm:$0xff]  ;;  %v15613_v47 = vld [vmem:[#allocation123_spill] sm:$0xff]  ;;  %vm15619_vm14 = vcmp.gt.f32.partialorder %v12250_v33, 0.0  ;;  %vm15750_vm9 = vcmp.gt.f32.partialorder %v15603_v52, 0.0 }
 0x6da   :  { %15583 = vst [vmem:[#allocation179_spill] sm:$0xff] %v13193_v36  ;;  %v13209_v9 = vmul.f32 0.2, %v15589_v39  ;;  %v15591_v36 = vld [vmem:[#allocation51_spill] sm:$0xff]  ;;  %15596 = vst [vmem:[#allocation53_spill] sm:$0xff] %v13225_v37  ;;  %v15618_v26 = vld [vmem:[#allocation34_spill] sm:$0xff] }
 0x6db   :  { %v13212_v31 = vmul.f32 0.2, %v15591_v36  ;;  %v13244_v37 = vmul.f32 0.2, %v15604_v21 }
 0x6dc   :  { %15590 = vst [vmem:[#allocation97_spill] sm:$0xff] %v13209_v9  ;;  %v15597_v9 = vld [vmem:[#allocation33_spill] sm:$0xff] }
 0x6dd   :  { %15592 = vst [vmem:[#allocation22_spill] sm:$0xff] %v13212_v31  ;;  %v13228_v3 = vmul.f32 0.2, %v15597_v9  ;;  %v15599_v31 = vld [vmem:[#allocation29_spill] sm:$0xff]  ;;  %15605 = vst [vmem:[#allocation71_spill] sm:$0xff] %v13244_v37  ;;  %v15620_v37 = vld [vmem:[#allocation19_spill] sm:$0xff] }
 0x6de   :  { %v13231_v36 = vmul.f32 0.2, %v15599_v31  ;;  %v13284_v22 = vsel %vm15621_vm15, %v15518_v59, %v15620_v37  ;;  %v15631_v37 = vld [vmem:[#allocation28_spill] sm:$0xff]  ;;  %vm15632_vm15 = vcmp.gt.f32.partialorder %v15411_v54, 0.0 }
 0x6df   :  { %15598 = vst [vmem:[#allocation33_spill] sm:$0xff] %v13228_v3  ;;  %v15606_v3 = vld [vmem:[#allocation99_spill] sm:$0xff]  ;;  %15622 = vst [vmem:[#allocation123_spill] sm:$0xff] %v13284_v22  ;;  %v15634_v22 = vld [vmem:[#allocation25_spill] sm:$0xff] }
 0x6e0   :  { %15600 = vst [vmem:[#allocation29_spill] sm:$0xff] %v13231_v36  ;;  %v13247_v23 = vmul.f32 0.2, %v15606_v3  ;;  %v15608_v36 = vld [vmem:[#allocation52_spill] sm:$0xff]  ;;  %vm5880_vm3 = vcmp.gt.f32.partialorder %v15606_v3, 0.0 }
 0x6e1   :  { %v13250_v1 = vmul.f32 0.2, %v15608_v36  ;;  %15611 = vst [vmem:[#allocation52_spill] sm:$0xff] %v13256_v53  ;;  %v13278_v53 = vsel %vm15619_vm14, %v12250_v33, %v15618_v26  ;;  %vm15629_vm14 = vcmp.gt.f32.partialorder %v15408_v48, 0.0  ;;  %v13306_v26 = vsel %vm15632_vm15, %v15411_v54, %v15631_v37  ;;  %v15641_v37 = vld [vmem:[#allocation129_spill] sm:$0xff] }
 0x6e2   :  { %15607 = vst [vmem:[#allocation98_spill] sm:$0xff] %v13247_v23  ;;  %v13266_v23 = vsel %vm5795_vm11, %v15517_v29, %v15613_v47  ;;  %v15623_v29 = vld [vmem:[#allocation43_spill] sm:$0xff]  ;;  %v15624_v47 = vld [vmem:[#allocation45_spill] sm:$0xff]  ;;  %15633 = vst [vmem:[#allocation19_spill] sm:$0xff] %v13306_v26  ;;  %vm15642_vm15 = vcmp.gt.f32.partialorder %v12278_v6, 0.0 }
 0x6e3   :  { %15609 = vst [vmem:[#allocation99_spill] sm:$0xff] %v13250_v1  ;;  %15614 = vst [vmem:[#allocation106_spill] sm:$0xff] %v13266_v23  ;;  %v15615_v1 = vld [vmem:[#allocation124_spill] sm:$0xff]  ;;  %vm5843_vm11 = vcmp.gt.f32.partialorder %v15623_v29, 0.0  ;;  %v15625_v23 = vld [vmem:[#allocation65_spill] sm:$0xff] }
 0x6e4   :  { %v13272_v35 = vsel %vm15616_vm4, %v15400_v30, %v15615_v1  ;;  %v15626_v30 = vld [vmem:[#allocation78_spill] sm:$0xff]  ;;  %v15628_v1 = vld [vmem:[#allocation109_spill] sm:$0xff]  ;;  %vm15635_vm4 = vcmp.gt.f32.partialorder %v15413_v15, 0.0 }
 0x6e5   :  { %15617 = vst [vmem:[#allocation117_spill] sm:$0xff] %v13272_v35  ;;  %v13294_v33 = vsel %vm5799_vm12, %v15406_v44, %v15626_v30  ;;  %v13300_v59 = vsel %vm15629_vm14, %v15408_v48, %v15628_v1  ;;  %v13312_v35 = vsel %vm15635_vm4, %v15413_v15, %v15634_v22  ;;  %v15637_v44 = vld [vmem:[#allocation89_spill] sm:$0xff]  ;;  %v15638_v30 = vld [vmem:[#allocation90_spill] sm:$0xff]  ;;  %v15640_v1 = vld [vmem:[#allocation79_spill] sm:$0xff]  ;;  %v13328_v15 = vsel %vm15642_vm15, %v12278_v6, %v15641_v37 }
 0x6e6   :  { %15627 = vst [vmem:[#allocation124_spill] sm:$0xff] %v13294_v33  ;;  %15630 = vst [vmem:[#allocation34_spill] sm:$0xff] %v13300_v59  ;;  %vm5847_vm12 = vcmp.gt.f32.partialorder %v15637_v44, 0.0  ;;  %v15639_v48 = vld [vmem:[#allocation46_spill] sm:$0xff]  ;;  %v13322_v54 = vsel %vm5803_vm0, %v15415_v49, %v15640_v1  ;;  %vm15645_vm4 = vcmp.gt.f32.partialorder %v15535_v24, 0.0  ;;  %v15647_v33 = vld [vmem:[#allocation111_spill] sm:$0xff] }
 0x6e7   :  { %15636 = vst [vmem:[#allocation43_spill] sm:$0xff] %v13312_v35  ;;  %15643 = vst [vmem:[#allocation45_spill] sm:$0xff] %v13328_v15  ;;  %v15644_v22 = vld [vmem:[#allocation130_spill] sm:$0xff]  ;;  %vm15648_vm14 = vcmp.gt.f32.partialorder %v15421_v56, 0.0  ;;  %v15650_v49 = vld [vmem:[#allocation55_spill] sm:$0xff]  ;;  %vm15663_vm15 = vcmp.gt.f32.partialorder %v15431_v32, 0.0 }
 0x6e8   :  { %v13334_v59 = vsel %vm15645_vm4, %v15535_v24, %v15644_v22  ;;  %v13340_v26 = vsel %vm15648_vm14, %v15421_v56, %v15647_v33  ;;  %vm5851_vm0 = vcmp.gt.f32.partialorder %v15650_v49, 0.0  ;;  %v15651_v1 = vld [vmem:[#allocation77_spill] sm:$0xff]  ;;  %v15652_v35 = vld [vmem:[#allocation91_spill] sm:$0xff]  ;;  %v15653_v6 = vld [vmem:[#allocation92_spill] sm:$0xff]  ;;  %vm15657_vm4 = vcmp.gt.f32.partialorder %v15426_v61, 0.0 }
 0x6e9   :  { %15646 = vst [vmem:[#allocation65_spill] sm:$0xff] %v13334_v59  ;;  %15649 = vst [vmem:[#allocation78_spill] sm:$0xff] %v13340_v26  ;;  %v15654_v37 = vld [vmem:[#allocation127_spill] sm:$0xff]  ;;  %v15656_v22 = vld [vmem:[#allocation128_spill] sm:$0xff]  ;;  %vm15660_vm14 = vcmp.gt.f32.partialorder %v15428_v13, 0.0 }
 0x6ea   :  { %v13350_v24 = vsel %vm5807_vm7, %v15424_v12, %v15654_v37  ;;  %v13356_v56 = vsel %vm15657_vm4, %v15426_v61, %v15656_v22  ;;  %v15659_v33 = vld [vmem:[#allocation32_spill] sm:$0xff]  ;;  %v15662_v15 = vld [vmem:[#allocation81_spill] sm:$0xff]  ;;  %vm5855_vm7 = vcmp.gt.f32.partialorder %v15536_v57, 0.0  ;;  %v15666_v37 = vld [vmem:[#allocation26_spill] sm:$0xff]  ;;  %vm15675_vm4 = vcmp.gt.f32.partialorder %v15552_v51, 0.0 }
 0x6eb   :  { %15655 = vst [vmem:[#allocation109_spill] sm:$0xff] %v13350_v24  ;;  %15658 = vst [vmem:[#allocation28_spill] sm:$0xff] %v13356_v56  ;;  %v13362_v26 = vsel %vm15660_vm14, %v15428_v13, %v15659_v33  ;;  %v13368_v59 = vsel %vm15663_vm15, %v15431_v32, %v15662_v15  ;;  %v15665_v12 = vld [vmem:[#allocation49_spill] sm:$0xff]  ;;  %v15668_v22 = vld [vmem:[#allocation82_spill] sm:$0xff]  ;;  %vm15670_vm14 = vcmp.gt.f32.partialorder %v12310_v41, 0.0  ;;  %vm15673_vm15 = vcmp.gt.f32.partialorder %v12314_v11, 0.0 }
 0x6ec   :  { %15661 = vst [vmem:[#allocation25_spill] sm:$0xff] %v13362_v26  ;;  %15664 = vst [vmem:[#allocation89_spill] sm:$0xff] %v13368_v59  ;;  %v15667_v61 = vld [vmem:[#allocation61_spill] sm:$0xff]  ;;  %v13378_v13 = vsel %vm5811_vm5, %v15433_v27, %v15668_v22  ;;  %v15672_v15 = vld [vmem:[#allocation135_spill] sm:$0xff] }
 0x6ed   :  { %v15669_v33 = vld [vmem:[#allocation133_spill] sm:$0xff]  ;;  %v13390_v56 = vsel %vm15673_vm15, %v12314_v11, %v15672_v15  ;;  %v15674_v24 = vld [vmem:[#allocation136_spill] sm:$0xff]  ;;  %v15678_v22 = vld [vmem:[#allocation94_spill] sm:$0xff]  ;;  %vm15683_vm15 = vcmp.gt.f32.partialorder %v15443_v8, 0.0 }
 0x6ee   :  { %v13384_v32 = vsel %vm15670_vm14, %v12310_v41, %v15669_v33  ;;  %v13396_v26 = vsel %vm15675_vm4, %v15552_v51, %v15674_v24  ;;  %v15677_v27 = vld [vmem:[#allocation93_spill] sm:$0xff]  ;;  %v15679_v41 = vld [vmem:[#allocation74_spill] sm:$0xff]  ;;  %v15682_v15 = vld [vmem:[#allocation68_spill] sm:$0xff]  ;;  %vm15686_vm4 = vcmp.gt.f32.partialorder %v15445_v2, 0.0  ;;  %vm15689_vm14 = vcmp.gt.f32.partialorder %v15447_v60, 0.0 }
 0x6ef   :  { %15671 = vst [vmem:[#allocation90_spill] sm:$0xff] %v13384_v32  ;;  %15676 = vst [vmem:[#allocation46_spill] sm:$0xff] %v13396_v26  ;;  %vm5859_vm5 = vcmp.gt.f32.partialorder %v15677_v27, 0.0  ;;  %v15680_v33 = vld [vmem:[#allocation114_spill] sm:$0xff]  ;;  %v13412_v51 = vsel %vm15683_vm15, %v15443_v8, %v15682_v15  ;;  %v15685_v24 = vld [vmem:[#allocation39_spill] sm:$0xff]  ;;  %vm15702_vm15 = vcmp.gt.f32.partialorder %v15455_v20, 0.0 }
 0x6f0   :  { %v13406_v11 = vsel %vm5815_vm6, %v15440_v43, %v15680_v33  ;;  %15684 = vst [vmem:[#allocation129_spill] sm:$0xff] %v13412_v51  ;;  %v13418_v26 = vsel %vm15686_vm4, %v15445_v2, %v15685_v24  ;;  %v15688_v32 = vld [vmem:[#allocation63_spill] sm:$0xff]  ;;  %v15691_v43 = vld [vmem:[#allocation48_spill] sm:$0xff]  ;;  %v15692_v33 = vld [vmem:[#allocation30_spill] sm:$0xff]  ;;  %vm15696_vm4 = vcmp.gt.f32.partialorder %v12342_v34, 0.0 }
 0x6f1   :  { %15681 = vst [vmem:[#allocation79_spill] sm:$0xff] %v13406_v11  ;;  %15687 = vst [vmem:[#allocation130_spill] sm:$0xff] %v13418_v26  ;;  %v13424_v59 = vsel %vm15689_vm14, %v15447_v60, %v15688_v32  ;;  %vm5863_vm6 = vcmp.gt.f32.partialorder %v15691_v43, 0.0  ;;  %v15693_v8 = vld [vmem:[#allocation95_spill] sm:$0xff]  ;;  %v15694_v15 = vld [vmem:[#allocation72_spill] sm:$0xff]  ;;  %vm15699_vm14 = vcmp.gt.f32.partialorder %v12346_v40, 0.0 }
 0x6f2   :  { %15690 = vst [vmem:[#allocation111_spill] sm:$0xff] %v13424_v59  ;;  %v13434_v2 = vsel %vm5819_vm1, %v15450_v42, %v15694_v15  ;;  %v15695_v24 = vld [vmem:[#allocation139_spill] sm:$0xff]  ;;  %v15698_v32 = vld [vmem:[#allocation140_spill] sm:$0xff] }
 0x6f3   :  { %v13440_v60 = vsel %vm15696_vm4, %v12342_v34, %v15695_v24  ;;  %v13446_v51 = vsel %vm15699_vm14, %v12346_v40, %v15698_v32  ;;  %v15701_v11 = vld [vmem:[#allocation83_spill] sm:$0xff]  ;;  %v15704_v42 = vld [vmem:[#allocation96_spill] sm:$0xff]  ;;  %v15707_v34 = vld [vmem:[#allocation142_spill] sm:$0xff]  ;;  %vm15710_vm14 = vcmp.gt.f32.partialorder %v15459_v0, 0.0 }
 0x6f4   :  { %15697 = vst [vmem:[#allocation55_spill] sm:$0xff] %v13440_v60  ;;  %15700 = vst [vmem:[#allocation77_spill] sm:$0xff] %v13446_v51  ;;  %v13452_v26 = vsel %vm15702_vm15, %v15455_v20, %v15701_v11  ;;  %vm5867_vm1 = vcmp.gt.f32.partialorder %v15704_v42, 0.0  ;;  %v15705_v15 = vld [vmem:[#allocation120_spill] sm:$0xff]  ;;  %v15706_v59 = vld [vmem:[#allocation75_spill] sm:$0xff]  ;;  %v13462_v40 = vsel %vm5823_vm2, %v15577_v28, %v15707_v34  ;;  %vm15713_vm15 = vcmp.gt.f32.partialorder %v15462_v17, 0.0 }
 0x6f5   :  { %15703 = vst [vmem:[#allocation91_spill] sm:$0xff] %v13452_v26  ;;  %15708 = vst [vmem:[#allocation92_spill] sm:$0xff] %v13462_v40  ;;  %v15709_v24 = vld [vmem:[#allocation112_spill] sm:$0xff]  ;;  %v15712_v11 = vld [vmem:[#allocation115_spill] sm:$0xff] }
 0x6f6   :  { %v13468_v20 = vsel %vm15710_vm14, %v15459_v0, %v15709_v24  ;;  %v13474_v32 = vsel %vm15713_vm15, %v15462_v17, %v15712_v11  ;;  %v15715_v26 = vld [vmem:[#allocation144_spill] sm:$0xff]  ;;  %v15716_v60 = vld [vmem:[#allocation41_spill] sm:$0xff]  ;;  %v15719_v28 = vld [vmem:[#allocation38_spill] sm:$0xff]  ;;  %vm15723_vm15 = vcmp.gt.f32.partialorder %v15469_v38, 0.0 }
 0x6f7   :  { %15711 = vst [vmem:[#allocation127_spill] sm:$0xff] %v13468_v20  ;;  %15714 = vst [vmem:[#allocation128_spill] sm:$0xff] %v13474_v32  ;;  %vm15717_vm4 = vcmp.gt.f32.partialorder %v15716_v60, 0.0  ;;  %vm5871_vm2 = vcmp.gt.f32.partialorder %v15719_v28, 0.0  ;;  %v15720_v34 = vld [vmem:[#allocation59_spill] sm:$0xff]  ;;  %v15721_v0 = vld [vmem:[#allocation40_spill] sm:$0xff] }
 0x6f8   :  { %v13480_v51 = vsel %vm15717_vm4, %v15716_v60, %v15715_v26  ;;  %v13490_v17 = vsel %vm5827_vm10, %v15466_v4, %v15721_v0  ;;  %v15722_v24 = vld [vmem:[#allocation69_spill] sm:$0xff]  ;;  %v15725_v60 = vld [vmem:[#allocation146_spill] sm:$0xff]  ;;  %vm15726_vm4 = vcmp.gt.f32.partialorder %v15586_v18, 0.0  ;;  %v15728_v20 = vld [vmem:[#allocation147_spill] sm:$0xff] }
 0x6f9   :  { %15718 = vst [vmem:[#allocation32_spill] sm:$0xff] %v13480_v51  ;;  %v13496_v26 = vsel %vm15723_vm15, %v15469_v38, %v15722_v24  ;;  %v13502_v11 = vsel %vm15726_vm4, %v15586_v18, %v15725_v60  ;;  %v15729_v40 = vld [vmem:[#allocation85_spill] sm:$0xff]  ;;  %v15732_v4 = vld [vmem:[#allocation51_spill] sm:$0xff]  ;;  %v15733_v38 = vld [vmem:[#allocation86_spill] sm:$0xff] }
 0x6fa   :  { %15724 = vst [vmem:[#allocation81_spill] sm:$0xff] %v13496_v26  ;;  %15727 = vst [vmem:[#allocation49_spill] sm:$0xff] %v13502_v11  ;;  %vm15730_vm14 = vcmp.gt.f32.partialorder %v15729_v40, 0.0  ;;  %vm5875_vm10 = vcmp.gt.f32.partialorder %v15732_v4, 0.0  ;;  %v13518_v18 = vsel %vm5831_vm13, %v15475_v16, %v15733_v38  ;;  %v15734_v0 = vld [vmem:[#allocation149_spill] sm:$0xff]  ;;  %v15735_v24 = vld [vmem:[#allocation116_spill] sm:$0xff] }
 0x6fb   :  { %v13508_v32 = vsel %vm15730_vm14, %v15729_v40, %v15728_v20  ;;  %vm15736_vm4 = vcmp.gt.f32.partialorder %v15735_v24, 0.0  ;;  %v15737_v20 = vld [vmem:[#allocation150_spill] sm:$0xff]  ;;  %v15740_v26 = vld [vmem:[#allocation152_spill] sm:$0xff]  ;;  %vm5879_vm13 = vcmp.gt.f32.partialorder %v15604_v21, 0.0  ;;  %v15743_v16 = vld [vmem:[#allocation37_spill] sm:$0xff] }
 0x6fc   :  { %15731 = vst [vmem:[#allocation26_spill] sm:$0xff] %v13508_v32  ;;  %v13524_v40 = vsel %vm15736_vm4, %v15735_v24, %v15734_v0  ;;  %v15738_v60 = vld [vmem:[#allocation70_spill] sm:$0xff]  ;;  %vm15744_vm4 = vcmp.gt.f32.partialorder %v15484_v46, 0.0  ;;  %v15745_v0 = vld [vmem:[#allocation153_spill] sm:$0xff] }
 0x6fd   :  { %vm15739_vm14 = vcmp.gt.f32.partialorder %v15738_v60, 0.0  ;;  %v15741_v51 = vld [vmem:[#allocation42_spill] sm:$0xff]  ;;  %v13545_v38 = vsel %vm15744_vm4, %v15484_v46, %v15743_v16  ;;  %v15752_v46 = vld [vmem:[#allocation87_spill] sm:$0xff]  ;;  %vm15754_vm4 = vcmp.gt.f32.partialorder %v15494_v19, 0.0 }
 0x6fe   :  { %v13530_v32 = vsel %vm15739_vm14, %v15738_v60, %v15737_v20  ;;  %vm15742_vm15 = vcmp.gt.f32.partialorder %v15741_v51, 0.0  ;;  %vm15746_vm14 = vcmp.gt.f32.partialorder %v12406_v55, 0.0  ;;  %v15749_v20 = vld [vmem:[#allocation156_spill] sm:$0xff]  ;;  %v13569_v16 = vsel %vm5839_vm8, %v15491_v50, %v15752_v46  ;;  %v15760_v50 = vld [vmem:[#allocation161_spill] sm:$0xff] }
 0x6ff   :  { %v13536_v11 = vsel %vm15742_vm15, %v15741_v51, %v15740_v26  ;;  %v13551_v24 = vsel %vm15746_vm14, %v12406_v55, %v15745_v0  ;;  %v15747_v51 = vld [vmem:[#allocation155_spill] sm:$0xff]  ;;  %vm15748_vm15 = vcmp.gt.f32.partialorder %v12410_v14, 0.0  ;;  %v13563_v60 = vsel %vm15750_vm9, %v15603_v52, %v15749_v20  ;;  %v15753_v55 = vld [vmem:[#allocation88_spill] sm:$0xff]  ;;  %v15758_v20 = vld [vmem:[#allocation118_spill] sm:$0xff] }
 0x700   :  { %v13557_v26 = vsel %vm15748_vm15, %v12410_v14, %v15747_v51  ;;  %15751 = vst [vmem:[#allocation61_spill] sm:$0xff] %v13563_v60  ;;  %v13575_v0 = vsel %vm15754_vm4, %v15494_v19, %v15753_v55  ;;  %v15755_v14 = vld [vmem:[#allocation158_spill] sm:$0xff]  ;;  %vm15756_vm14 = vcmp.gt.f32.partialorder %v15612_v25, 0.0  ;;  %v15757_v52 = vld [vmem:[#allocation159_spill] sm:$0xff]  ;;  %vm15759_vm9 = vcmp.gt.f32.partialorder %v15758_v20, 0.0 }
 0x701   :  { %v13581_v51 = vsel %vm15756_vm14, %v15612_v25, %v15755_v14  ;;  %v13587_v60 = vsel %vm15759_vm9, %v15758_v20, %v15757_v52  ;;  %v13593_v46 = vsel %vm5843_vm11, %v15623_v29, %v15760_v50  ;;  %v15761_v19 = vld [vmem:[#allocation162_spill] sm:$0xff]  ;;  %vm15762_vm8 = vcmp.gt.f32.partialorder %v15624_v47, 0.0  ;;  %v15763_v25 = vld [vmem:[#allocation163_spill] sm:$0xff]  ;;  %v15767_v29 = vld [vmem:[#allocation164_spill] sm:$0xff] }
 0x702   :  { %v13599_v55 = vsel %vm15762_vm8, %v15624_v47, %v15761_v19  ;;  %vm15764_vm15 = vcmp.gt.f32.partialorder %v15625_v23, 0.0  ;;  %v15765_v52 = vld [vmem:[#allocation47_spill] sm:$0xff]  ;;  %vm15766_vm4 = vcmp.gt.f32.partialorder %v15509_v5, 0.0  ;;  %v13617_v50 = vsel %vm5847_vm12, %v15637_v44, %v15767_v29  ;;  %v15768_v47 = vld [vmem:[#allocation165_spill] sm:$0xff]  ;;  %v15774_v44 = vld [vmem:[#allocation44_spill] sm:$0xff] }
 0x703   :  { %v13605_v14 = vsel %vm15764_vm15, %v15625_v23, %v15763_v25  ;;  %v13611_v20 = vsel %vm15766_vm4, %v15509_v5, %v15765_v52  ;;  %vm15769_vm11 = vcmp.gt.f32.partialorder %v15638_v30, 0.0  ;;  %v15770_v23 = vld [vmem:[#allocation108_spill] sm:$0xff]  ;;  %vm15771_vm14 = vcmp.gt.f32.partialorder %v15519_v10, 0.0  ;;  %v15772_v5 = vld [vmem:[#allocation125_spill] sm:$0xff] }
 0x704   :  { %v13623_v19 = vsel %vm15769_vm11, %v15638_v30, %v15768_v47  ;;  %v13629_v25 = vsel %vm15771_vm14, %v15519_v10, %v15770_v23  ;;  %vm15773_vm9 = vcmp.gt.f32.partialorder %v15639_v48, 0.0  ;;  %v13641_v29 = vsel %vm5851_vm0, %v15650_v49, %v15774_v44  ;;  %v15775_v30 = vld [vmem:[#allocation166_spill] sm:$0xff]  ;;  %v15777_v10 = vld [vmem:[#allocation167_spill] sm:$0xff] }
 0x705   :  { %v13635_v52 = vsel %vm15773_vm9, %v15639_v48, %v15772_v5  ;;  %vm15776_vm12 = vcmp.gt.f32.partialorder %v15651_v1, 0.0  ;;  %vm15778_vm8 = vcmp.gt.f32.partialorder %v15652_v35, 0.0  ;;  %v15779_v48 = vld [vmem:[#allocation168_spill] sm:$0xff]  ;;  %vm15780_vm15 = vcmp.gt.f32.partialorder %v15653_v6, 0.0  ;;  %v15782_v49 = vld [vmem:[#allocation110_spill] sm:$0xff] }
 0x706   :  { %v13647_v47 = vsel %vm15776_vm12, %v15651_v1, %v15775_v30  ;;  %v13653_v23 = vsel %vm15778_vm8, %v15652_v35, %v15777_v10  ;;  %v13659_v5 = vsel %vm15780_vm15, %v15653_v6, %v15779_v48  ;;  %v13665_v44 = vsel %vm5855_vm7, %v15536_v57, %v15782_v49  ;;  %v15783_v1 = vld [vmem:[#allocation73_spill] sm:$0xff]  ;;  %v15788_v6 = vld [vmem:[#allocation170_spill] sm:$0xff]  ;;  %v15790_v57 = vld [vmem:[#allocation171_spill] sm:$0xff] }
 0x707   :  { %15781 = vst [vmem:[#allocation82_spill] sm:$0xff] %v13659_v5  ;;  %vm15784_vm0 = vcmp.gt.f32.partialorder %v15665_v12, 0.0  ;;  %v15786_v35 = vld [vmem:[#allocation169_spill] sm:$0xff]  ;;  %vm15787_vm4 = vcmp.gt.f32.partialorder %v15666_v37, 0.0  ;;  %vm15789_vm11 = vcmp.gt.f32.partialorder %v15667_v61, 0.0  ;;  %v13689_v49 = vsel %vm5859_vm5, %v15677_v27, %v15790_v57 }
 0x708   :  { %v13671_v30 = vsel %vm15784_vm0, %v15665_v12, %v15783_v1  ;;  %v13677_v10 = vsel %vm15787_vm4, %v15666_v37, %v15786_v35  ;;  %v13683_v48 = vsel %vm15789_vm11, %v15667_v61, %v15788_v6  ;;  %v15791_v12 = vld [vmem:[#allocation172_spill] sm:$0xff]  ;;  %vm15792_vm7 = vcmp.gt.f32.partialorder %v15678_v22, 0.0  ;;  %v15793_v37 = vld [vmem:[#allocation113_spill] sm:$0xff]  ;;  %v15795_v61 = vld [vmem:[#allocation119_spill] sm:$0xff] }
 0x709   :  { %15785 = vst [vmem:[#allocation133_spill] sm:$0xff] %v13671_v30  ;;  %v13695_v1 = vsel %vm15792_vm7, %v15678_v22, %v15791_v12  ;;  %vm15794_vm14 = vcmp.gt.f32.partialorder %v15553_v63, 0.0  ;;  %vm15796_vm9 = vcmp.gt.f32.partialorder %v15679_v41, 0.0  ;;  %v15798_v27 = vld [vmem:[#allocation173_spill] sm:$0xff]  ;;  %v15799_v22 = vld [vmem:[#allocation35_spill] sm:$0xff]  ;;  %vm15800_vm5 = vcmp.gt.f32.partialorder %v15561_v62, 0.0 }
 0x70a   :  { %v13701_v35 = vsel %vm15794_vm14, %v15553_v63, %v15793_v37  ;;  %v13707_v6 = vsel %vm15796_vm9, %v15679_v41, %v15795_v61  ;;  %v13713_v57 = vsel %vm5863_vm6, %v15691_v43, %v15798_v27  ;;  %v13719_v12 = vsel %vm15800_vm5, %v15561_v62, %v15799_v22  ;;  %v15802_v63 = vld [vmem:[#allocation174_spill] sm:$0xff]  ;;  %v15804_v41 = vld [vmem:[#allocation175_spill] sm:$0xff]  ;;  %v15806_v43 = vld [vmem:[#allocation176_spill] sm:$0xff] }
 0x70b   :  { %15797 = vst [vmem:[#allocation135_spill] sm:$0xff] %v13707_v6  ;;  %15801 = vst [vmem:[#allocation136_spill] sm:$0xff] %v13719_v12  ;;  %vm15803_vm12 = vcmp.gt.f32.partialorder %v15692_v33, 0.0  ;;  %vm15805_vm8 = vcmp.gt.f32.partialorder %v15693_v8, 0.0  ;;  %v13737_v27 = vsel %vm5867_vm1, %v15704_v42, %v15806_v43  ;;  %v15807_v62 = vld [vmem:[#allocation177_spill] sm:$0xff]  ;;  %vm15808_vm6 = vcmp.gt.f32.partialorder %v15705_v15, 0.0 }
 0x70c   :  { %v13725_v37 = vsel %vm15803_vm12, %v15692_v33, %v15802_v63  ;;  %v13731_v61 = vsel %vm15805_vm8, %v15693_v8, %v15804_v41  ;;  %v13743_v22 = vsel %vm15808_vm6, %v15705_v15, %v15807_v62  ;;  %v15809_v33 = vld [vmem:[#allocation178_spill] sm:$0xff]  ;;  %vm15810_vm15 = vcmp.gt.f32.partialorder %v15706_v59, 0.0  ;;  %v15811_v8 = vld [vmem:[#allocation84_spill] sm:$0xff]  ;;  %v15816_v15 = vld [vmem:[#allocation179_spill] sm:$0xff] }
 0x70d   :  { %v13749_v63 = vsel %vm15810_vm15, %v15706_v59, %v15809_v33  ;;  %vm15812_vm0 = vcmp.gt.f32.partialorder %v15578_v58, 0.0  ;;  %v15814_v42 = vld [vmem:[#allocation50_spill] sm:$0xff]  ;;  %vm15817_vm1 = vcmp.gt.f32.partialorder %v15720_v34, 0.0  ;;  %v15819_v59 = vld [vmem:[#allocation76_spill] sm:$0xff]  ;;  %vm15820_vm4 = vcmp.gt.f32.partialorder %v15587_v45, 0.0 }
 0x70e   :  { %v13755_v41 = vsel %vm15812_vm0, %v15578_v58, %v15811_v8  ;;  %v13761_v43 = vsel %vm5871_vm2, %v15719_v28, %v15814_v42  ;;  %v13767_v62 = vsel %vm15817_vm1, %v15720_v34, %v15816_v15  ;;  %v13773_v33 = vsel %vm15820_vm4, %v15587_v45, %v15819_v59  ;;  %v15822_v58 = vld [vmem:[#allocation97_spill] sm:$0xff]  ;;  %v15824_v28 = vld [vmem:[#allocation22_spill] sm:$0xff] }
 0x70f   :  { %15813 = vst [vmem:[#allocation93_spill] sm:$0xff] %v13755_v41  ;;  %15815 = vst [vmem:[#allocation94_spill] sm:$0xff] %v13761_v43  ;;  %vm15823_vm11 = vcmp.gt.f32.partialorder %v15589_v39, 0.0  ;;  %v13785_v42 = vsel %vm5875_vm10, %v15732_v4, %v15824_v28  ;;  %v15825_v34 = vld [vmem:[#allocation53_spill] sm:$0xff]  ;;  %vm15826_vm2 = vcmp.gt.f32.partialorder %v15595_v7, 0.0  ;;  %vm15828_vm7 = vcmp.gt.f32.partialorder %v15597_v9, 0.0 }
 0x710   :  { %15818 = vst [vmem:[#allocation74_spill] sm:$0xff] %v13767_v62  ;;  %15821 = vst [vmem:[#allocation114_spill] sm:$0xff] %v13773_v33  ;;  %v13779_v8 = vsel %vm15823_vm11, %v15589_v39, %v15822_v58  ;;  %v13791_v15 = vsel %vm15826_vm2, %v15595_v7, %v15825_v34  ;;  %v15827_v45 = vld [vmem:[#allocation33_spill] sm:$0xff]  ;;  %vm15830_vm14 = vcmp.gt.f32.partialorder %v15599_v31, 0.0  ;;  %v15832_v4 = vld [vmem:[#allocation71_spill] sm:$0xff]  ;;  %vm15837_vm10 = vcmp.gt.f32.partialorder %v15608_v36, 0.0 }
 0x711   :  { %v13797_v59 = vsel %vm15828_vm7, %v15597_v9, %v15827_v45  ;;  %v15829_v39 = vld [vmem:[#allocation29_spill] sm:$0xff]  ;;  %v13809_v28 = vsel %vm5879_vm13, %v15604_v21, %v15832_v4  ;;  %v15834_v7 = vld [vmem:[#allocation98_spill] sm:$0xff]  ;;  %v15836_v9 = vld [vmem:[#allocation99_spill] sm:$0xff] }
 0x712   :  { %v13803_v58 = vsel %vm15830_vm14, %v15599_v31, %v15829_v39  ;;  %15833 = vst [vmem:[#allocation39_spill] sm:$0xff] %v13809_v28  ;;  %v13815_v34 = vsel %vm5880_vm3, %v15606_v3, %v15834_v7  ;;  %v13821_v45 = vsel %vm15837_vm10, %v15608_v36, %v15836_v9 }
 0x713   :  { %15831 = vst [vmem:[#allocation68_spill] sm:$0xff] %v13803_v58  ;;  %15835 = vst [vmem:[#allocation63_spill] sm:$0xff] %v13815_v34 }
 0x714   :  { %15838 = vst [vmem:[#allocation48_spill] sm:$0xff] %v13821_v45 }
 0x715   :  { %8262 = dma.done.wait [#allocation4 + $0x1], 8192 }
 0x716   :  { %8263 = vsyncadd [#allocation4 + $0x1], 4294959104  ;;  %v15839_v31 = vld [vmem:[#allocation36_spill] sm:$0xff]  ;;  %v15842_v21 = vld [vmem:[#allocation107_spill] sm:$0xff] }
 0x717   :  { %v15840_v39 = vld [vmem:[#allocation104_spill] sm:$0xff]  ;;  %v8082_v62 = vld [vmem:[#allocation3 + $0x78] sm:$0xff]   ;;  %v8086_v34 = vld [vmem:[#allocation3 + $0x70] sm:$0xff]  }
 0x718   :  { %v6143_v58 = vpack.c.bf16 %v15840_v39, %v15839_v31  ;;  %v15841_v41 = vld [vmem:[#allocation100_spill] sm:$0xff]  ;;  %v8083_v28 = vld [vmem:[#allocation3 + $0x38] sm:$0xff]   ;;  %7615 = vmatprep.subr.bf16.mxu0 %v8082_v62  ;;  %v8087_v36 = vld [vmem:[#allocation3 + $0x30] sm:$0xff]  }
 0x719   :  { %v6145_v4 = vpack.c.bf16 %v15842_v21, %v15841_v41  ;;  %v8084_v3 = vld [vmem:[#allocation3 + $0xf8] sm:$0xff]   ;;  %7616 = vmatpush3.bf16.msra.mxu0 %v8083_v28  ;;  %v8088_v9 = vld [vmem:[#allocation3 + $0xf0] sm:$0xff]   ;;  %v8090_v31 = vld [vmem:[#allocation3 + $0x68] sm:$0xff]  }
 0x71a   :  { %6757 = vmatprep.mubr.bf16.mxu0 %v6143_v58  ;;  %v8085_v7 = vld [vmem:[#allocation3 + $0xb8] sm:$0xff]   ;;  %7679 = vmatprep.subr.bf16.mxu1 %v8084_v3  ;;  %v8089_v43 = vld [vmem:[#allocation3 + $0xb0] sm:$0xff]   ;;  %v8091_v41 = vld [vmem:[#allocation3 + $0x28] sm:$0xff]  }
 0x71b   :  { %6854 = vmatprep.mubr.bf16.mxu1 %v6145_v4  ;;  %7680 = vmatpush3.bf16.msra.mxu1 %v8085_v7  ;;  %v8092_v58 = vld [vmem:[#allocation3 + $0xe8] sm:$0xff]   ;;  %v8094_v62 = vld [vmem:[#allocation3 + $0x60] sm:$0xff]   ;;  %v8099_v3 = vld [vmem:[#allocation3 + $0x18] sm:$0xff]  }
 0x71c   :  { %7617 = vmatprep.subr.bf16.mxu0 %v8086_v34  ;;  %7681 = vmatprep.subr.bf16.mxu1 %v8088_v9  ;;  %v8093_v39 = vld [vmem:[#allocation3 + $0xa8] sm:$0xff]   ;;  %v8095_v28 = vld [vmem:[#allocation3 + $0x20] sm:$0xff]   ;;  %v8098_v34 = vld [vmem:[#allocation3 + $0x58] sm:$0xff]  }
 0x71d   :  { %7618 = vmatpush3.bf16.msra.mxu0 %v8087_v36  ;;  %v8096_v21 = vld [vmem:[#allocation3 + $0xe0] sm:$0xff]   ;;  %v8100_v7 = vld [vmem:[#allocation3 + $0xd8] sm:$0xff]   ;;  %v8102_v36 = vld [vmem:[#allocation3 + $0x50] sm:$0xff]  }
 0x71e   :  { %7619 = vmatprep.subr.bf16.mxu0 %v8090_v31  ;;  %v8097_v4 = vld [vmem:[#allocation3 + $0xa0] sm:$0xff]   ;;  %v8103_v9 = vld [vmem:[#allocation3 + $0x10] sm:$0xff]   ;;  %v15849_v45 = vld [vmem:[#allocation138_spill] sm:$0xff] }
 0x71f   :  { %7682 = vmatpush3.bf16.msra.mxu1 %v8089_v43  ;;  %v8101_v43 = vld [vmem:[#allocation3 + $0x98] sm:$0xff]   ;;  %v8104_v31 = vld [vmem:[#allocation3 + $0xd0] sm:$0xff]   ;;  %v15848_v5 = vld [vmem:[#allocation27_spill] sm:$0xff] }
 0x720   :  { %7683 = vmatprep.subr.bf16.mxu1 %v8092_v58  ;;  %v8106_v58 = vld [vmem:[#allocation3 + $0x48] sm:$0xff]   ;;  %v15868_v12 = vld [vmem:[#allocation49_spill] sm:$0xff] }
 0x721   :  { %7620 = vmatpush3.bf16.msra.mxu0 %v8091_v41  ;;  %v8105_v41 = vld [vmem:[#allocation3 + $0x90] sm:$0xff]  }
 0x722   :  { %7621 = vmatprep.subr.bf16.mxu0 %v8094_v62  ;;  %v8108_v62 = vld [vmem:[#allocation3 + $0xc8] sm:$0xff]  }
 0x723   :  { %7684 = vmatpush3.bf16.msra.mxu1 %v8093_v39  ;;  %v8107_v39 = vld [vmem:[#allocation3 + $0x8] sm:$0xff]  }
 0x724   :  { %7685 = vmatprep.subr.bf16.mxu1 %v8096_v21  ;;  %v8110_v21 = vld [vmem:[#allocation3 + $0x40] sm:$0xff]  }
 0x725   :  { %7622 = vmatpush3.bf16.msra.mxu0 %v8095_v28  ;;  %v8109_v28 = vld [vmem:[#allocation3 + $0x88] sm:$0xff]  }
 0x726   :  { %7623 = vmatprep.subr.bf16.mxu0 %v8098_v34  ;;  %v8112_v34 = vld [vmem:[#allocation3 + $0xc0] sm:$0xff]  }
 0x727   :  { %7686 = vmatpush3.bf16.msra.mxu1 %v8097_v4  ;;  %v8111_v4 = vld [vmem:[#allocation3] sm:$0xff]  }
 0x728   :  { %7687 = vmatprep.subr.bf16.mxu1 %v8100_v7  ;;  %v15844_v7 = vld [vmem:[#allocation58_spill] sm:$0xff] }
 0x729   :  { %7624 = vmatpush3.bf16.msra.mxu0 %v8099_v3  ;;  %v15843_v3 = vld [vmem:[#allocation54_spill] sm:$0xff] }
 0x72a   :  { %7625 = vmatprep.subr.bf16.mxu0 %v8102_v36  ;;  %v8113_v36 = vld [vmem:[#allocation3 + $0x80] sm:$0xff]  }
 0x72b   :  { %7688 = vmatpush3.bf16.msra.mxu1 %v8101_v43  ;;  %v6142_v43 = vpack.c.bf16 %v15844_v7, %v15843_v3  ;;  %v8118_v3 = vld [vmem:[#allocation3 + $0x168] sm:$0xff]  }
 0x72c   :  { %7689 = vmatprep.subr.bf16.mxu1 %v8104_v31  ;;  %v15846_v31 = vld [vmem:[#allocation154_spill] sm:$0xff]  ;;  %v15851_v7 = vld [vmem:[#allocation132_spill] sm:$0xff] }
 0x72d   :  { %7626 = vmatpush3.bf16.msra.mxu0 %v8103_v9  ;;  %v15845_v9 = vld [vmem:[#allocation134_spill] sm:$0xff] }
 0x72e   :  { %7627 = vmatprep.subr.bf16.mxu0 %v8106_v58  ;;  %v6151_v6 = vpack.c.bf16 %v15846_v31, %v15845_v9  ;;  %v15847_v58 = vld [vmem:[#allocation64_spill] sm:$0xff]  ;;  %v15852_v9 = vld [vmem:[#allocation151_spill] sm:$0xff] }
 0x72f   :  { %7690 = vmatpush3.bf16.msra.mxu1 %v8105_v41  ;;  %v8114_v41 = vld [vmem:[#allocation3 + $0x178] sm:$0xff]   ;;  %v15853_v31 = vld [vmem:[#allocation20_spill] sm:$0xff] }
 0x730   :  { %7691 = vmatprep.subr.bf16.mxu1 %v8108_v62  ;;  %v8115_v62 = vld [vmem:[#allocation3 + $0x138] sm:$0xff]  }
 0x731   :  { %7628 = vmatpush3.bf16.msra.mxu0 %v8107_v39  ;;  %v6144_v39 = vpack.c.bf16 %v15848_v5, %v15847_v58  ;;  %v6150_v5 = vpack.c.bf16 %v15852_v9, %v15851_v7  ;;  %v15854_v58 = vld [vmem:[#allocation106_spill] sm:$0xff]  ;;  %v13851_v7 = vld [vmem:[#allocation3 + $0x1b0] sm:$0xff]  }
 0x732   :  { %7629 = vmatprep.subr.bf16.mxu0 %v8110_v21  ;;  %v8116_v21 = vld [vmem:[#allocation3 + $0x170] sm:$0xff]   ;;  %v8126_v9 = vld [vmem:[#allocation3 + $0x158] sm:$0xff]  }
 0x733   :  { %7692 = vmatpush3.bf16.msra.mxu1 %v8109_v28  ;;  %v15850_v28 = vld [vmem:[#allocation160_spill] sm:$0xff] }
 0x734   :  { %7693 = vmatprep.subr.bf16.mxu1 %v8112_v34  ;;  %v6153_v33 = vpack.c.bf16 %v15850_v28, %v15849_v45  ;;  %v13835_v34 = vld [vmem:[#allocation3 + $0x1f8] sm:$0xff]   ;;  %v6159_v45 = vpack.c.bf16 %v15854_v58, %v15853_v31 }
 0x735   :  { %7630 = vmatpush3.bf16.msra.mxu0 %v8111_v4  ;;  %v8117_v4 = vld [vmem:[#allocation3 + $0x130] sm:$0xff]   ;;  %v15858_v31 = vld [vmem:[#allocation62_spill] sm:$0xff] }
 0x736   :  { %7743 = vmatprep.subr.bf16.mxu0 %v8114_v41  ;;  %v15856_v41 = vld [vmem:[#allocation157_spill] sm:$0xff] }
 0x737   :  { %7694 = vmatpush3.bf16.msra.mxu1 %v8113_v36  ;;  %v8120_v36 = vld [vmem:[#allocation3 + $0x128] sm:$0xff]  }
 0x738   :  { %6758 = vmatmul.mubr.bf16.vlgmr.msra.gmra.mxu0 %v6142_v43  ;;  %7895 = vmatprep.subr.bf16.mxu1 %v13835_v34  ;;  %v13842_v43 = vld [vmem:[#allocation3 + $0x1b8] sm:$0xff]  }
 0x739   :  { %7744 = vmatpush3.bf16.msra.mxu0 %v8115_v62  ;;  %6765 = vmatprep.mubr.bf16.mxu0 %v6151_v6  ;;  %v15855_v6 = vld [vmem:[#allocation137_spill] sm:$0xff]  ;;  %v8122_v62 = vld [vmem:[#allocation3 + $0x160] sm:$0xff]  }
 0x73a   :  { %6855 = vmatmul.mubr.bf16.vlgmr.msra.gmra.mxu1 %v6144_v39  ;;  %7745 = vmatprep.subr.bf16.mxu0 %v8116_v21  ;;  %v6152_v39 = vpack.c.bf16 %v15856_v41, %v15855_v6  ;;  %v13849_v21 = vld [vmem:[#allocation3 + $0x1f0] sm:$0xff]   ;;  %v8128_v6 = vld [vmem:[#allocation3 + $0x118] sm:$0xff]  }
 0x73b   :  { %6862 = vmatprep.mubr.bf16.mxu1 %v6153_v33  ;;  %v15857_v33 = vld [vmem:[#allocation105_spill] sm:$0xff]  ;;  %7903 = vmatpush3.bf16.msra.mxu1 %v13842_v43 }
 0x73c   :  { %v6161_v28 = vpack.c.bf16 %v13278_v53, %v15857_v33  ;;  %7896 = vmatprep.subr.bf16.mxu1 %v13849_v21  ;;  %v15859_v53 = vld [vmem:[#allocation52_spill] sm:$0xff]  ;;  %v15861_v41 = vld [vmem:[#allocation117_spill] sm:$0xff] }
 0x73d   :  { %7746 = vmatpush3.bf16.msra.mxu0 %v8117_v4  ;;  %v8124_v4 = vld [vmem:[#allocation3 + $0x120] sm:$0xff]   ;;  %v6158_v58 = vpack.c.bf16 %v15859_v53, %v15858_v31  ;;  %v15862_v33 = vld [vmem:[#allocation65_spill] sm:$0xff] }
 0x73e   :  { %7747 = vmatprep.subr.bf16.mxu0 %v8118_v3  ;;  %v13854_v3 = vld [vmem:[#allocation3 + $0x1e8] sm:$0xff]   ;;  %v13868_v31 = vld [vmem:[#allocation3 + $0x1e0] sm:$0xff]   ;;  %v8132_v53 = vld [vmem:[#allocation3 + $0x110] sm:$0xff]  }
 0x73f   :  { %7904 = vmatpush3.bf16.msra.mxu1 %v13851_v7 }
 0x740   :  { %6766 = vmatmul.mubr.bf16.gmra.mxu0 %v6150_v5  ;;  %v6167_v5 = vpack.c.bf16 %v13378_v13, %v13322_v54  ;;  %7897 = vmatprep.subr.bf16.mxu1 %v13854_v3  ;;  %v13871_v54 = vld [vmem:[#allocation3 + $0x1a0] sm:$0xff]   ;;  %v8134_v13 = vld [vmem:[#allocation3 + $0x148] sm:$0xff]  }
 0x741   :  { %6773 = vmatprep.mubr.bf16.mxu0 %v6159_v45  ;;  %7748 = vmatpush3.bf16.msra.mxu0 %v8120_v36  ;;  %v13862_v36 = vld [vmem:[#allocation3 + $0x1a8] sm:$0xff]   ;;  %v15860_v45 = vld [vmem:[#allocation21_spill] sm:$0xff] }
 0x742   :  { %6863 = vmatmul.mubr.bf16.gmra.mxu1 %v6152_v39  ;;  %7749 = vmatprep.subr.bf16.mxu0 %v8122_v62  ;;  %v6160_v39 = vpack.c.bf16 %v15861_v41, %v15860_v45  ;;  %v8130_v62 = vld [vmem:[#allocation3 + $0x150] sm:$0xff]  }
 0x743   :  { %6870 = vmatprep.mubr.bf16.mxu1 %v6161_v28  ;;  %v6169_v28 = vpack.c.bf16 %v13390_v56, %v15862_v33  ;;  %7905 = vmatpush3.bf16.msra.mxu1 %v13862_v36  ;;  %v15864_v56 = vld [vmem:[#allocation89_spill] sm:$0xff]  ;;  %v8138_v33 = vld [vmem:[#allocation3 + $0x140] sm:$0xff]  }
 0x744   :  { %7898 = vmatprep.subr.bf16.mxu1 %v13868_v31  ;;  %v15865_v41 = vld [vmem:[#allocation45_spill] sm:$0xff] }
 0x745   :  { %7750 = vmatpush3.bf16.msra.mxu0 %v8124_v4  ;;  %v13874_v4 = vld [vmem:[#allocation3 + $0x1d8] sm:$0xff]  }
 0x746   :  { %7751 = vmatprep.subr.bf16.mxu0 %v8126_v9  ;;  %v15863_v9 = vld [vmem:[#allocation43_spill] sm:$0xff] }
 0x747   :  { %v6166_v45 = vpack.c.bf16 %v15864_v56, %v15863_v9  ;;  %7906 = vmatpush3.bf16.msra.mxu1 %v13871_v54  ;;  %v13888_v9 = vld [vmem:[#allocation3 + $0x1d0] sm:$0xff]   ;;  %v8140_v56 = vld [vmem:[#allocation3 + $0x100] sm:$0xff]  }
 0x748   :  { %6774 = vmatmul.mubr.bf16.gmra.mxu0 %v6158_v58  ;;  %v8136_v58 = vld [vmem:[#allocation3 + $0x108] sm:$0xff]   ;;  %7899 = vmatprep.subr.bf16.mxu1 %v13874_v4 }
 0x749   :  { %6781 = vmatprep.mubr.bf16.mxu0 %v6167_v5  ;;  %7752 = vmatpush3.bf16.msra.mxu0 %v8128_v6  ;;  %v6175_v5 = vpack.c.bf16 %v13490_v17, %v13434_v2  ;;  %v13882_v6 = vld [vmem:[#allocation3 + $0x198] sm:$0xff]   ;;  %v13891_v2 = vld [vmem:[#allocation3 + $0x190] sm:$0xff]   ;;  %v13893_v17 = vld [vmem:[#allocation3 + $0x1c8] sm:$0xff]  }
 0x74a   :  { %6871 = vmatmul.mubr.bf16.gmra.mxu1 %v6160_v39  ;;  %7753 = vmatprep.subr.bf16.mxu0 %v8130_v62  ;;  %v15866_v39 = vld [vmem:[#allocation90_spill] sm:$0xff] }
 0x74b   :  { %6878 = vmatprep.mubr.bf16.mxu1 %v6169_v28  ;;  %v6168_v62 = vpack.c.bf16 %v15866_v39, %v15865_v41  ;;  %v15867_v28 = vld [vmem:[#allocation77_spill] sm:$0xff]  ;;  %7907 = vmatpush3.bf16.msra.mxu1 %v13882_v6  ;;  %v15871_v41 = vld [vmem:[#allocation55_spill] sm:$0xff] }
 0x74c   :  { %v6177_v30 = vpack.c.bf16 %v15868_v12, %v15867_v28  ;;  %7900 = vmatprep.subr.bf16.mxu1 %v13888_v9  ;;  %v15872_v39 = vld [vmem:[#allocation81_spill] sm:$0xff] }
 0x74d   :  { %7754 = vmatpush3.bf16.msra.mxu0 %v8132_v53  ;;  %v15869_v53 = vld [vmem:[#allocation111_spill] sm:$0xff] }
 0x74e   :  { %7755 = vmatprep.subr.bf16.mxu0 %v8134_v13  ;;  %v15870_v13 = vld [vmem:[#allocation32_spill] sm:$0xff] }
 0x74f   :  { %v6174_v12 = vpack.c.bf16 %v15870_v13, %v15869_v53  ;;  %7908 = vmatpush3.bf16.msra.mxu1 %v13891_v2  ;;  %v15883_v53 = vld [vmem:[#allocation24_spill] sm:$0xff]  ;;  %v15884_v13 = vld [vmem:[#allocation19_spill] sm:$0xff] }
 0x750   :  { %6782 = vmatmul.mubr.bf16.gmra.mxu0 %v6166_v45  ;;  %v13899_v45 = vld [vmem:[#allocation3 + $0x188] sm:$0xff]   ;;  %7901 = vmatprep.subr.bf16.mxu1 %v13893_v17 }
 0x751   :  { %6789 = vmatprep.mubr.bf16.mxu0 %v6175_v5  ;;  %7756 = vmatpush3.bf16.msra.mxu0 %v8136_v58  ;;  %v6183_v5 = vpack.c.bf16 %v13593_v46, %v13545_v38  ;;  %v13904_v58 = vld [vmem:[#allocation3 + $0x1c0] sm:$0xff]   ;;  %v6182_v38 = vpack.c.bf16 %v13587_v60, %v13536_v11  ;;  %v6191_v46 = vpack.c.bf16 %v13689_v49, %v13641_v29 }
 0x752   :  { %6879 = vmatmul.mubr.bf16.gmra.mxu1 %v6168_v62  ;;  %7757 = vmatprep.subr.bf16.mxu0 %v8138_v33  ;;  %v6185_v62 = vpack.c.bf16 %v13605_v14, %v13557_v26  ;;  %v13912_v33 = vld [vmem:[#allocation3 + $0x180] sm:$0xff]   ;;  %v6184_v26 = vpack.c.bf16 %v13599_v55, %v13551_v24  ;;  %v6193_v14 = vpack.c.bf16 %v13701_v35, %v13653_v23  ;;  %v15873_v55 = vld [vmem:[#allocation121_spill] sm:$0xff]  ;;  %v15874_v23 = vld [vmem:[#allocation126_spill] sm:$0xff] }
 0x753   :  { %6886 = vmatprep.mubr.bf16.mxu1 %v6177_v30  ;;  %v6176_v30 = vpack.c.bf16 %v15872_v39, %v15871_v41  ;;  %7909 = vmatpush3.bf16.msra.mxu1 %v13899_v45  ;;  %v6199_v11 = vpack.c.bf16 %v13785_v42, %v13737_v27  ;;  %v6192_v60 = vpack.c.bf16 %v13695_v1, %v13647_v47  ;;  %v15876_v35 = vld [vmem:[#allocation103_spill] sm:$0xff]  ;;  %v15877_v47 = vld [vmem:[#allocation101_spill] sm:$0xff]  ;;  %v15878_v1 = vld [vmem:[#allocation60_spill] sm:$0xff] }
 0x754   :  { %7902 = vmatprep.subr.bf16.mxu1 %v13904_v58  ;;  %v6201_v29 = vpack.c.bf16 %v13797_v59, %v13749_v63  ;;  %v6198_v24 = vpack.c.bf16 %v13779_v8, %v13731_v61  ;;  %v6147_v49 = vpack.c.bf16 %v15874_v23, %v15873_v55  ;;  %v6146_v63 = vpack.c.bf16 %v15878_v1, %v15877_v47  ;;  %v15879_v42 = vld [vmem:[#allocation143_spill] sm:$0xff]  ;;  %v15881_v61 = vld [vmem:[#allocation145_spill] sm:$0xff]  ;;  %v15882_v8 = vld [vmem:[#allocation102_spill] sm:$0xff] }
 0x755   :  { %7758 = vmatpush3.bf16.msra.mxu0 %v8140_v56  ;;  %v15880_v59 = vld [vmem:[#allocation67_spill] sm:$0xff]  ;;  %v6156_v56 = vpack.c.bf16 %v15882_v8, %v15881_v61  ;;  %v15888_v39 = vld [vmem:[#allocation124_spill] sm:$0xff]  ;;  %v15919_v61 = vld [vmem:[#allocation66_spill] sm:$0xff] }
 0x756   :  { %7807 = vmatprep.subr.bf16.mxu0 %v13835_v34  ;;  %v6190_v34 = vpack.c.bf16 %v13683_v48, %v13635_v52  ;;  %v6200_v52 = vpack.c.bf16 %v13791_v15, %v13743_v22  ;;  %v15875_v48 = vld [vmem:[#allocation148_spill] sm:$0xff]  ;;  %v6155_v28 = vpack.c.bf16 %v15880_v59, %v15879_v42  ;;  %v15885_v22 = vld [vmem:[#allocation141_spill] sm:$0xff]  ;;  %v15887_v41 = vld [vmem:[#allocation31_spill] sm:$0xff] }
 0x757   :  { %7910 = vmatpush3.bf16.msra.mxu1 %v13912_v33  ;;  %v6157_v27 = vpack.c.bf16 %v15876_v35, %v15875_v48  ;;  %v15886_v15 = vld [vmem:[#allocation56_spill] sm:$0xff]  ;;  %v15914_v1 = vld [vmem:[#allocation39_spill] sm:$0xff] }
 0x758   :  { %6790 = vmatmul.mubr.bf16.gmra.mxu0 %v6174_v12  ;;  %v6165_v12 = vpack.c.bf16 %v15884_v13, %v15883_v53  ;;  %v15899_v23 = vld [vmem:[#allocation128_spill] sm:$0xff]  ;;  %v15916_v42 = vld [vmem:[#allocation63_spill] sm:$0xff]  ;;  %v15921_v53 = vld [vmem:[#allocation57_spill] sm:$0xff] }
 0x759   :  { %6797 = vmatprep.mubr.bf16.mxu0 %v6183_v5  ;;  %v6154_v5 = vpack.c.bf16 %v15886_v15, %v15885_v22  ;;  %v15920_v8 = vld [vmem:[#allocation131_spill] sm:$0xff]  ;;  %v15922_v13 = vld [vmem:[#allocation80_spill] sm:$0xff] }
 0x75a   :  { %6887 = vmatmul.mubr.bf16.gmra.mxu1 %v6176_v30  ;;  %v6163_v30 = vpack.c.bf16 %v15888_v39, %v15887_v41  ;;  %v14018_v15 = vld [vmem:[%s14273_s6 + $0x1] ss:$0 sm:$0xff]  ;;  %s8273_s6 = smov [#allocation8]  }
 0x75b   :  { %6894 = vmatprep.mubr.bf16.mxu1 %v6185_v62  ;;  %v15889_v62 = vld [vmem:[#allocation23_spill] sm:$0xff]  ;;  %s7152_s23 = sshll.u32 %s8273_s6, 4  ;;  %s7153_s23 = int_to_ptr.vmem [resolvable:$true] %s7152_s23 }
 0x75c   :  { %s8238_s24 = scalar_lea.vmem %s7153_s23, 2048  ;;  %p8243_p2 = scmp.lt.s32.totalorder %s7153_s23, %s7153_s23 }
 0x75d   :  { %p8239_p1 = scmp.ne.s32.totalorder %s7153_s23, %s8238_s24  ;;  %p8244_p3 = scmp.lt.s32.totalorder %s8238_s24, %s8238_s24 }
 0x75f   :  { %p8245_p4 = por %p8244_p3, %p8243_p2 }
 0x760   :  { %6798 = vmatmul.mubr.bf16.gmra.mxu0 %v6182_v38  ;;  %v15890_v38 = vld [vmem:[#allocation34_spill] sm:$0xff] }
 0x761   :  { %6805 = vmatprep.mubr.bf16.mxu0 %v6191_v46  ;;  %v6164_v46 = vpack.c.bf16 %v15890_v38, %v15889_v62  ;;  %p8246_p5 = pnand %p8245_p4, %p8239_p1 }
 0x762   :  { %6895 = vmatmul.mubr.bf16.gmra.mxu1 %v6184_v26  ;;  %v15891_v26 = vld [vmem:[#allocation25_spill] sm:$0xff] }
 0x763   :  { %6902 = vmatprep.mubr.bf16.mxu1 %v6193_v14 }
 0x768   :  { %6806 = vmatmul.mubr.bf16.gmra.mxu0 %v6190_v34 }
 0x769   :  { %6813 = vmatprep.mubr.bf16.mxu0 %v6199_v11  ;;  %v15895_v11 = vld [vmem:[#allocation109_spill] sm:$0xff] }
 0x76a   :  { %6903 = vmatmul.mubr.bf16.gmra.mxu1 %v6192_v60  ;;  %v15896_v60 = vld [vmem:[#allocation79_spill] sm:$0xff] }
 0x76b   :  { %6910 = vmatprep.mubr.bf16.mxu1 %v6201_v29  ;;  %v15897_v29 = vld [vmem:[#allocation28_spill] sm:$0xff] }
 0x770   :  { %6814 = vmatmul.mubr.bf16.gmra.mxu0 %v6198_v24  ;;  %v15898_v24 = vld [vmem:[#allocation129_spill] sm:$0xff] }
 0x771   :  { %6951 = vmatprep.mubr.bf16.mxu0 %v6147_v49  ;;  %v6172_v55 = vpack.c.bf16 %v15898_v24, %v15897_v29  ;;  %v15901_v49 = vld [vmem:[#allocation46_spill] sm:$0xff] }
 0x772   :  { %6911 = vmatmul.mubr.bf16.gmra.mxu1 %v6200_v52 }
 0x773   :  { %7056 = vmatprep.mubr.bf16.mxu1 %v6157_v27  ;;  %v15910_v27 = vld [vmem:[#allocation48_spill] sm:$0xff] }
 0x778   :  { %6952 = vmatmul.mubr.bf16.vlgmr.msra.gmra.mxu0 %v6146_v63 }
 0x779   :  { %7808 = vmatpush3.bf16.msra.mxu0 %v13842_v43  ;;  %6959 = vmatprep.mubr.bf16.mxu0 %v6155_v28  ;;  %v15892_v43 = vld [vmem:[#allocation130_spill] sm:$0xff] }
 0x77a   :  { %7809 = vmatprep.subr.bf16.mxu0 %v13849_v21  ;;  %7057 = vmatmul.mubr.bf16.vlgmr.msra.gmra.mxu1 %v6156_v56  ;;  %v6173_v14 = vpack.c.bf16 %v15892_v43, %v15891_v26  ;;  %v15893_v21 = vld [vmem:[#allocation122_spill] sm:$0xff]  ;;  %v6149_v56 = vpack.c.bf16 %v15920_v8, %v15919_v61 }
 0x77b   :  { %7064 = vmatprep.mubr.bf16.mxu1 %v6165_v12  ;;  %v6148_v12 = vpack.c.bf16 %v15922_v13, %v15921_v53 }
 0x77d   :  { %7810 = vmatpush3.bf16.msra.mxu0 %v13851_v7  ;;  %v15894_v7 = vld [vmem:[#allocation123_spill] sm:$0xff] }
 0x77e   :  { %7811 = vmatprep.subr.bf16.mxu0 %v13854_v3  ;;  %v6162_v34 = vpack.c.bf16 %v15894_v7, %v15893_v21  ;;  %v6171_v3 = vpack.c.bf16 %v15896_v60, %v15895_v11 }
 0x780   :  { %6960 = vmatmul.mubr.bf16.gmra.mxu0 %v6154_v5 }
 0x781   :  { %6967 = vmatprep.mubr.bf16.mxu0 %v6163_v30  ;;  %7812 = vmatpush3.bf16.msra.mxu0 %v13862_v36  ;;  %v6181_v36 = vpack.c.bf16 %v13530_v32, %v15899_v23  ;;  %v6189_v32 = vpack.c.bf16 %v13629_v25, %v13581_v51  ;;  %v6197_v51 = vpack.c.bf16 %v13725_v37, %v13677_v10  ;;  %v15906_v25 = vld [vmem:[#allocation61_spill] sm:$0xff]  ;;  %v15913_v37 = vld [vmem:[#allocation94_spill] sm:$0xff] }
 0x782   :  { %7065 = vmatmul.mubr.bf16.gmra.mxu1 %v6164_v46  ;;  %7813 = vmatprep.subr.bf16.mxu0 %v13868_v31  ;;  %v15900_v31 = vld [vmem:[#allocation78_spill] sm:$0xff]  ;;  %v6203_v63 = vpack.c.bf16 %v15914_v1, %v15913_v37 }
 0x783   :  { %7072 = vmatprep.mubr.bf16.mxu1 %v6173_v14  ;;  %v6170_v52 = vpack.c.bf16 %v15901_v49, %v15900_v31 }
 0x785   :  { %7814 = vmatpush3.bf16.msra.mxu0 %v13871_v54  ;;  %v15902_v54 = vld [vmem:[#allocation92_spill] sm:$0xff] }
 0x786   :  { %7815 = vmatprep.subr.bf16.mxu0 %v13874_v4  ;;  %v6179_v48 = vpack.c.bf16 %v13518_v18, %v15902_v54  ;;  %v15903_v4 = vld [vmem:[#allocation127_spill] sm:$0xff]  ;;  %v15905_v18 = vld [vmem:[#allocation26_spill] sm:$0xff] }
 0x787   :  { %v6180_v35 = vpack.c.bf16 %v13524_v40, %v15903_v4  ;;  %v6188_v40 = vpack.c.bf16 %v13623_v19, %v13575_v0  ;;  %v15911_v0 = vld [vmem:[#allocation82_spill] sm:$0xff]  ;;  %v15912_v19 = vld [vmem:[#allocation135_spill] sm:$0xff] }
 0x788   :  { %6968 = vmatmul.mubr.bf16.gmra.mxu0 %v6162_v34  ;;  %v6194_v10 = vpack.c.bf16 %v15912_v19, %v15911_v0 }
 0x789   :  { %6975 = vmatprep.mubr.bf16.mxu0 %v6171_v3  ;;  %7816 = vmatpush3.bf16.msra.mxu0 %v13882_v6  ;;  %v15904_v6 = vld [vmem:[#allocation91_spill] sm:$0xff] }
 0x78a   :  { %7073 = vmatmul.mubr.bf16.gmra.mxu1 %v6172_v55  ;;  %7817 = vmatprep.subr.bf16.mxu0 %v13888_v9  ;;  %v6178_v9 = vpack.c.bf16 %v15905_v18, %v15904_v6 }
 0x78b   :  { %7080 = vmatprep.mubr.bf16.mxu1 %v6181_v36 }
 0x78d   :  { %7818 = vmatpush3.bf16.msra.mxu0 %v13891_v2  ;;  %v6187_v2 = vpack.c.bf16 %v13617_v50, %v13569_v16  ;;  %v15908_v16 = vld [vmem:[#allocation136_spill] sm:$0xff] }
 0x78e   :  { %7819 = vmatprep.subr.bf16.mxu0 %v13893_v17  ;;  %v6186_v17 = vpack.c.bf16 %v13611_v20, %v15906_v25  ;;  %v15915_v20 = vld [vmem:[#allocation74_spill] sm:$0xff] }
 0x78f   :  { %v6204_v59 = vpack.c.bf16 %v15916_v42, %v15915_v20 }
 0x790   :  { %6976 = vmatmul.mubr.bf16.gmra.mxu0 %v6170_v52 }
 0x791   :  { %6983 = vmatprep.mubr.bf16.mxu0 %v6179_v48  ;;  %7820 = vmatpush3.bf16.msra.mxu0 %v13899_v45  ;;  %v6195_v45 = vpack.c.bf16 %v13713_v57, %v13665_v44  ;;  %v15917_v44 = vld [vmem:[#allocation93_spill] sm:$0xff]  ;;  %v15918_v57 = vld [vmem:[#allocation68_spill] sm:$0xff] }
 0x792   :  { %7081 = vmatmul.mubr.bf16.gmra.mxu1 %v6180_v35  ;;  %7821 = vmatprep.subr.bf16.mxu0 %v13904_v58  ;;  %v15907_v58 = vld [vmem:[#allocation133_spill] sm:$0xff]  ;;  %v6202_v28 = vpack.c.bf16 %v15918_v57, %v15917_v44 }
 0x793   :  { %7088 = vmatprep.mubr.bf16.mxu1 %v6189_v32  ;;  %v6196_v50 = vpack.c.bf16 %v15908_v16, %v15907_v58 }
 0x795   :  { %7822 = vmatpush3.bf16.msra.mxu0 %v13912_v33  ;;  %v15909_v33 = vld [vmem:[#allocation114_spill] sm:$0xff] }
 0x796   :  { %v6205_v47 = vpack.c.bf16 %v15910_v27, %v15909_v33 }
 0x798   :  { %6984 = vmatmul.mubr.bf16.gmra.mxu0 %v6178_v9 }
 0x799   :  { %6991 = vmatprep.mubr.bf16.mxu0 %v6187_v2 }
 0x79a   :  { %7089 = vmatmul.mubr.bf16.gmra.mxu1 %v6188_v40 }
 0x79b   :  { %7096 = vmatprep.mubr.bf16.mxu1 %v6197_v51 }
 0x7a0   :  { %6992 = vmatmul.mubr.bf16.gmra.mxu0 %v6186_v17 }
 0x7a1   :  { %6999 = vmatprep.mubr.bf16.mxu0 %v6195_v45 }
 0x7a2   :  { %7097 = vmatmul.mubr.bf16.gmra.mxu1 %v6196_v50 }
 0x7a3   :  { %7104 = vmatprep.mubr.bf16.mxu1 %v6205_v47 }
 0x7a8   :  { %7000 = vmatmul.mubr.bf16.gmra.mxu0 %v6194_v10 }
 0x7a9   :  { %7007 = vmatprep.mubr.bf16.mxu0 %v6203_v63 }
 0x7aa   :  { %7105 = vmatmul.mubr.bf16.gmra.mxu1 %v6204_v59 }
 0x7b0   :  { %7008 = vmatmul.mubr.bf16.gmra.mxu0 %v6202_v28 }
 0x7b1   :  { %7048 = vmatprep.mubr.bf16.mxu0 %v6149_v56 }
 0x7b8   :  { %7049 = vmatmul.mubr.bf16.vlgmr.msra.gmra.mxu0 %v6148_v12 }
 0x7f8   :  { %v7631_v22 = vpop.f32.mrf.mxu0 }
 0x7fa   :  { %v7632_v5 = vpop.f32.mrf.mxu0  ;;  %v7695_v41 = vpop.f32.mrf.mxu1 }
 0x7fb   :  { %v7633_v39 = vadd.f32 %v7632_v5, %v7631_v22 }
 0x7fc   :  { %v7634_v30 = vpop.f32.mrf.mxu0  ;;  %v7696_v62 = vpop.f32.mrf.mxu1 }
 0x7fd   :  { %v6760_v38 = vadd.f32 %v7633_v39, %v14018_v15  ;;  %v7697_v46 = vadd.f32 %v7696_v62, %v7695_v41 }
 0x7fe   :  { %v7635_v26 = vpop.f32.mrf.mxu0  ;;  %v7698_v43 = vpop.f32.mrf.mxu1 }
 0x7ff   :  { %v14021_v14 = vadd.f32 %v7697_v46, %v6760_v38  ;;  %v7636_v21 = vadd.f32 %v7635_v26, %v7634_v30 }
 0x800   :  { %v14023_v7 = vpop.f32.mrf.mxu0  ;;  %v7699_v34 = vpop.f32.mrf.mxu1 }
 0x801   :  { %v6763_v11 = vadd.f32 %v7636_v21, %v14018_v15  ;;  %v7700_v60 = vadd.f32 %v7699_v34, %v7698_v43 }
 0x802   :  { %v14026_v3 = vpop.f32.mrf.mxu0  ;;  %v14028_v29 = vpop.f32.mrf.mxu1 }
 0x803   :  { %v14030_v24 = vadd.f32 %v7700_v60, %v6763_v11 }
 0x804   :  { %v14032_v55 = vpop.f32.mrf.mxu0  ;;  %v14034_v23 = vpop.f32.mrf.mxu1 }
 0x806   :  { %v14036_v36 = vpop.f32.mrf.mxu0  ;;  %v14038_v31 = vpop.f32.mrf.mxu1 }
 0x808   :  { %v14040_v49 = vpop.f32.mrf.mxu0  ;;  %v14042_v52 = vpop.f32.mrf.mxu1 }
 0x80a   :  { %v14044_v54 = vpop.f32.mrf.mxu0  ;;  %v14046_v48 = vpop.f32.mrf.mxu1 }
 0x80c   :  { %v14048_v4 = vpop.f32.mrf.mxu0  ;;  %v14050_v35 = vpop.f32.mrf.mxu1 }
 0x80e   :  { %v14052_v32 = vpop.f32.mrf.mxu0  ;;  %v14054_v6 = vpop.f32.mrf.mxu1 }
 0x810   :  { %v14056_v18 = vpop.f32.mrf.mxu0  ;;  %v14058_v9 = vpop.f32.mrf.mxu1 }
 0x812   :  { %v14060_v2 = vpop.f32.mrf.mxu0  ;;  %v14062_v40 = vpop.f32.mrf.mxu1 }
 0x813   :  { %8249 = shalt.err (!%p8246_p5)
}
 0x814   :  { %s8274_s25 = smov 128   ;;  %s8275_s26 = smov 8   ;;  %v14067_v51 = vpop.f32.mrf.mxu0  ;;  %v14069_v25 = vpop.f32.mrf.mxu1  ;;  %v7639_v21 = vadd.f32 %v14026_v3, %v14023_v7 }
 0x815   :  { %7158 = dma.vmem_to_hbm [thread:$0]  %s7153_s23, 2048, %s14275_s8, [#allocation7], %s8274_s25, %s8274_s25, %s8275_s26  }
 0x816   :  { %v14071_v17 = vpop.f32.mrf.mxu0  ;;  %v14073_v45 = vpop.f32.mrf.mxu1 }
 0x818   :  { %v14075_v58 = vpop.f32.mrf.mxu0  ;;  %v14077_v16 = vpop.f32.mrf.mxu1 }
 0x81a   :  { %v14079_v50 = vpop.f32.mrf.mxu0  ;;  %v14081_v33 = vpop.f32.mrf.mxu1 }
 0x81c   :  { %v14083_v27 = vpop.f32.mrf.mxu0  ;;  %v14085_v47 = vpop.f32.mrf.mxu1 }
 0x81e   :  { %v14087_v0 = vpop.f32.mrf.mxu0  ;;  %v14089_v19 = vpop.f32.mrf.mxu1 }
 0x820   :  { %v14091_v10 = vpop.f32.mrf.mxu0  ;;  %v14093_v37 = vpop.f32.mrf.mxu1 }
 0x822   :  { %v14095_v1 = vpop.f32.mrf.mxu0  ;;  %v14097_v63 = vpop.f32.mrf.mxu1 }
 0x824   :  { %v14099_v20 = vpop.f32.mrf.mxu0  ;;  %v14101_v42 = vpop.f32.mrf.mxu1 }
 0x826   :  { %v14103_v59 = vpop.f32.mrf.mxu0  ;;  %v14105_v44 = vpop.f32.mrf.mxu1 }
 0x828   :  { %v14107_v57 = vpop.f32.mrf.mxu0  ;;  %v14109_v28 = vpop.f32.mrf.mxu1 }
 0x82a   :  { %v14111_v61 = vpop.f32.mrf.mxu0  ;;  %v14113_v8 = vpop.f32.mrf.mxu1 }
 0x82c   :  { %v14115_v56 = vpop.f32.mrf.mxu0  ;;  %v14117_v53 = vpop.f32.mrf.mxu1 }
 0x82e   :  { %v14119_v13 = vpop.f32.mrf.mxu0  ;;  %v14121_v12 = vpop.f32.mrf.mxu1 }
 0x82f   :  { %15923 = vst [vmem:[#allocation30_spill] sm:$0xff] %v14121_v12 }
 0x830   :  { %v14123_v22 = vpop.f32.mrf.mxu0  ;;  %v14125_v5 = vpop.f32.mrf.mxu1 }
 0x831   :  { %15924 = vst [vmem:[#allocation95_spill] sm:$0xff] %v14123_v22  ;;  %15925 = vst [vmem:[#allocation72_spill] sm:$0xff] %v14125_v5 }
 0x832   :  { %v14127_v41 = vpop.f32.mrf.mxu0  ;;  %v14129_v39 = vpop.f32.mrf.mxu1 }
 0x833   :  { %15926 = vst [vmem:[#allocation139_spill] sm:$0xff] %v14127_v41  ;;  %15927 = vst [vmem:[#allocation140_spill] sm:$0xff] %v14129_v39 }
 0x834   :  { %v14131_v30 = vpop.f32.mrf.mxu0  ;;  %v14133_v62 = vpop.f32.mrf.mxu1 }
 0x835   :  { %15928 = vst [vmem:[#allocation83_spill] sm:$0xff] %v14131_v30  ;;  %15929 = vst [vmem:[#allocation96_spill] sm:$0xff] %v14133_v62  ;;  %v6768_v30 = vadd.f32 %v7639_v21, %v14018_v15 }
 0x836   :  { %v14135_v38 = vpop.f32.mrf.mxu0  ;;  %v14137_v46 = vpop.f32.mrf.mxu1 }
 0x837   :  { %15930 = vst [vmem:[#allocation120_spill] sm:$0xff] %v14135_v38  ;;  %15931 = vst [vmem:[#allocation75_spill] sm:$0xff] %v14137_v46  ;;  %v7703_v38 = vadd.f32 %v14034_v23, %v14028_v29  ;;  %v7706_v29 = vadd.f32 %v14042_v52, %v14038_v31 }
 0x838   :  { %v14139_v26 = vpop.f32.mrf.mxu1  ;;  %v7759_v43 = vpop.f32.mrf.mxu0 }
 0x839   :  { %15932 = vst [vmem:[#allocation142_spill] sm:$0xff] %v14139_v26  ;;  %v7642_v26 = vadd.f32 %v14036_v36, %v14032_v55 }
 0x83a   :  { %v7760_v34 = vpop.f32.mrf.mxu0  ;;  %v7829_v11 = vpop.f32.mrf.mxu1 }
 0x83b   :  { %v7761_v60 = vadd.f32 %v7760_v34, %v7759_v43  ;;  %v6865_v34 = vadd.f32 %v7703_v38, %v6768_v30 }
 0x83c   :  { %v7762_v5 = vpop.f32.mrf.mxu0  ;;  %v7830_v12 = vpop.f32.mrf.mxu1 }
 0x83d   :  { %v14144_v39 = vadd.f32 %v7761_v60, %v14021_v14  ;;  %v7645_v14 = vadd.f32 %v14044_v54, %v14040_v49  ;;  %v7831_v22 = vadd.f32 %v7830_v12, %v7829_v11  ;;  %v7648_v49 = vadd.f32 %v14052_v32, %v14048_v4 }
 0x83e   :  { %v7763_v46 = vpop.f32.mrf.mxu0  ;;  %v7832_v62 = vpop.f32.mrf.mxu1  ;;  %v7712_v4 = vadd.f32 %v14058_v9, %v14054_v6 }
 0x83f   :  { %15933 = vst [vmem:[#allocation112_spill] sm:$0xff] %v14144_v39  ;;  %v7764_v41 = vadd.f32 %v7763_v46, %v7762_v5  ;;  %v6771_v39 = vadd.f32 %v7642_v26, %v14018_v15  ;;  %v6776_v46 = vadd.f32 %v7645_v14, %v14018_v15 }
 0x840   :  { %v7765_v7 = vpop.f32.mrf.mxu0  ;;  %v7833_v3 = vpop.f32.mrf.mxu1 }
 0x841   :  { %v14152_v43 = vadd.f32 %v7764_v41, %v14030_v24  ;;  %v7709_v24 = vadd.f32 %v14050_v35, %v14046_v48  ;;  %v6868_v30 = vadd.f32 %v7706_v29, %v6771_v39  ;;  %v7715_v29 = vadd.f32 %v14069_v25, %v14062_v40 }
 0x842   :  { %v7766_v60 = vpop.f32.mrf.mxu0  ;;  %v7835_v21 = vpop.f32.mrf.mxu1 }
 0x843   :  { %15934 = vst [vmem:[#allocation115_spill] sm:$0xff] %v14152_v43  ;;  %v7767_v23 = vadd.f32 %v7766_v60, %v7765_v7  ;;  %v7834_v43 = vadd.f32 %v7833_v3, %v7832_v62  ;;  %v6873_v11 = vadd.f32 %v7709_v24, %v6776_v46  ;;  %v6779_v7 = vadd.f32 %v7648_v49, %v14018_v15 }
 0x844   :  { %v7768_v55 = vpop.f32.mrf.mxu0  ;;  %v7836_v36 = vpop.f32.mrf.mxu1  ;;  %v7657_v49 = vadd.f32 %v14079_v50, %v14075_v58  ;;  %v7660_v58 = vadd.f32 %v14087_v0, %v14083_v27  ;;  %v7663_v27 = vadd.f32 %v14095_v1, %v14091_v10  ;;  %v7727_v10 = vadd.f32 %v14101_v42, %v14097_v63 }
 0x845   :  { %v6962_v5 = vadd.f32 %v7767_v23, %v6865_v34  ;;  %v7651_v34 = vadd.f32 %v14060_v2, %v14056_v18  ;;  %v7654_v18 = vadd.f32 %v14071_v17, %v14067_v51  ;;  %v7718_v51 = vadd.f32 %v14077_v16, %v14073_v45 }
 0x846   :  { %v7769_v54 = vpop.f32.mrf.mxu0  ;;  %v7838_v41 = vpop.f32.mrf.mxu1 }
 0x847   :  { %v7059_v38 = vadd.f32 %v7831_v22, %v6962_v5  ;;  %v7770_v26 = vadd.f32 %v7769_v54, %v7768_v55  ;;  %v7837_v22 = vadd.f32 %v7836_v36, %v7835_v21  ;;  %v6784_v60 = vadd.f32 %v7651_v34, %v14018_v15 }
 0x848   :  { %v7771_v31 = vpop.f32.mrf.mxu0  ;;  %v7839_v52 = vpop.f32.mrf.mxu1  ;;  %v6876_v55 = vadd.f32 %v7712_v4, %v6779_v7  ;;  %v6787_v24 = vadd.f32 %v7654_v18, %v14018_v15 }
 0x849   :  { %8146 = vtanh.f32 %v7059_v38  ;;  %v6965_v12 = vadd.f32 %v7770_v26, %v6868_v30  ;;  %v7840_v9 = vadd.f32 %v7839_v52, %v7838_v41  ;;  %v6881_v46 = vadd.f32 %v7715_v29, %v6784_v60 }
 0x84a   :  { %v7772_v48 = vpop.f32.mrf.mxu0  ;;  %v7841_v35 = vpop.f32.mrf.mxu1  ;;  %v6792_v52 = vadd.f32 %v7657_v49, %v14018_v15  ;;  %v6884_v7 = vadd.f32 %v7718_v51, %v6787_v24  ;;  %v7730_v49 = vadd.f32 %v14109_v28, %v14105_v44  ;;  %v7672_v44 = vadd.f32 %v14119_v13, %v14115_v56  ;;  %v15936_v56 = vld [vmem:[#allocation139_spill] sm:$0xff] }
 0x84b   :  { %v7062_v32 = vadd.f32 %v7834_v43, %v6965_v12  ;;  %v7773_v39 = vadd.f32 %v7772_v48, %v7771_v31  ;;  %v7721_v12 = vadd.f32 %v14085_v47, %v14081_v33  ;;  %v6795_v33 = vadd.f32 %v7660_v58, %v14018_v15 }
 0x84c   :  { %v7774_v14 = vpop.f32.mrf.mxu0  ;;  %v7842_v62 = vpop.f32.mrf.mxu1 }
 0x84d   :  { %8148 = vtanh.f32 %v7062_v32  ;;  %v6970_v3 = vadd.f32 %v7773_v39, %v6873_v11  ;;  %v7843_v30 = vadd.f32 %v7842_v62, %v7841_v35  ;;  %v6889_v39 = vadd.f32 %v7721_v12, %v6792_v52 }
 0x84e   :  { %v7775_v2 = vpop.f32.mrf.mxu0  ;;  %v7844_v23 = vpop.f32.mrf.mxu1 }
 0x84f   :  { %v7067_v5 = vadd.f32 %v7837_v22, %v6970_v3  ;;  %v7776_v6 = vadd.f32 %v7775_v2, %v7774_v14  ;;  %v7724_v22 = vadd.f32 %v14093_v37, %v14089_v19  ;;  %v7666_v19 = vadd.f32 %v14103_v59, %v14099_v20 }
 0x850   :  { %v7777_v43 = vpop.f32.mrf.mxu0  ;;  %v7845_v21 = vpop.f32.mrf.mxu1  ;;  %v7669_v20 = vadd.f32 %v14111_v61, %v14107_v57  ;;  %v7733_v57 = vadd.f32 %v14117_v53, %v14113_v8  ;;  %v6811_v8 = vadd.f32 %v7672_v44, %v14018_v15  ;;  %v15935_v53 = vld [vmem:[#allocation95_spill] sm:$0xff] }
 0x851   :  { %8150 = vtanh.f32 %v7067_v5  ;;  %v6973_v36 = vadd.f32 %v7776_v6, %v6876_v55  ;;  %v7846_v34 = vadd.f32 %v7845_v21, %v7844_v23  ;;  %v6800_v23 = vadd.f32 %v7663_v27, %v14018_v15 }
 0x852   :  { %v7778_v40 = vpop.f32.mrf.mxu0  ;;  %v7847_v25 = vpop.f32.mrf.mxu1  ;;  %v6892_v55 = vadd.f32 %v7724_v22, %v6795_v33  ;;  %v6803_v63 = vadd.f32 %v7666_v19, %v14018_v15  ;;  %v7675_v13 = vadd.f32 %v15936_v56, %v15935_v53 }
 0x853   :  { %v7070_v17 = vadd.f32 %v7840_v9, %v6973_v36  ;;  %v7779_v54 = vadd.f32 %v7778_v40, %v7777_v43  ;;  %v6897_v24 = vadd.f32 %v7727_v10, %v6800_v23 }
 0x854   :  { %v7780_v38 = vpop.f32.mrf.mxu0  ;;  %v7848_v41 = vpop.f32.mrf.mxu1 }
 0x855   :  { %8152 = vtanh.f32 %v7070_v17  ;;  %v6978_v26 = vadd.f32 %v7779_v54, %v6881_v46  ;;  %v7849_v3 = vadd.f32 %v7848_v41, %v7847_v25  ;;  %v6808_v41 = vadd.f32 %v7669_v20, %v14018_v15 }
 0x856   :  { %v8147_v31 = vpop.eup %8146  ;;  %v7781_v50 = vpop.f32.mrf.mxu0 }
 0x857   :  { %v7850_v11 = vpop.f32.mrf.mxu1  ;;  %7131 = vst [vmem:[%s14274_s7 + $0x10] sm:$0xff] %v8147_v31  ;;  %v7075_v45 = vadd.f32 %v7843_v30, %v6978_v26  ;;  %v7782_v16 = vadd.f32 %v7781_v50, %v7780_v38  ;;  %v6900_v26 = vadd.f32 %v7730_v49, %v6803_v63 }
 0x858   :  { %v7783_v48 = vpop.f32.mrf.mxu0 }
 0x859   :  { %v7851_v35 = vpop.f32.mrf.mxu1  ;;  %8154 = vtanh.f32 %v7075_v45  ;;  %v6981_v4 = vadd.f32 %v7782_v16, %v6884_v7  ;;  %v6905_v45 = vadd.f32 %v7733_v57, %v6808_v41 }
 0x85a   :  { %v8149_v32 = vpop.eup %8148  ;;  %v7784_v47 = vpop.f32.mrf.mxu0  ;;  %v7852_v9 = vadd.f32 %v7851_v35, %v7850_v11  ;;  %v15938_v35 = vld [vmem:[#allocation72_spill] sm:$0xff] }
 0x85b   :  { %v7853_v0 = vpop.f32.mrf.mxu1  ;;  %7132 = vst [vmem:[%s14274_s7 + $0x18] sm:$0xff] %v8149_v32  ;;  %v7078_v14 = vadd.f32 %v7846_v34, %v6981_v4  ;;  %v7785_v62 = vadd.f32 %v7784_v47, %v7783_v48  ;;  %v15937_v48 = vld [vmem:[#allocation30_spill] sm:$0xff] }
 0x85c   :  { %v7786_v60 = vpop.f32.mrf.mxu0  ;;  %v7736_v4 = vadd.f32 %v15938_v35, %v15937_v48 }
 0x85d   :  { %v7854_v29 = vpop.f32.mrf.mxu1  ;;  %8156 = vtanh.f32 %v7078_v14  ;;  %v6986_v18 = vadd.f32 %v7785_v62, %v6889_v39  ;;  %v6816_v14 = vadd.f32 %v7675_v13, %v14018_v15  ;;  %v15939_v62 = vld [vmem:[#allocation140_spill] sm:$0xff] }
 0x85e   :  { %v8151_v2 = vpop.eup %8150  ;;  %v7787_v37 = vpop.f32.mrf.mxu0  ;;  %v7855_v51 = vadd.f32 %v7854_v29, %v7853_v0  ;;  %v15941_v29 = vld [vmem:[#allocation83_spill] sm:$0xff]  ;;  %v6908_v10 = vadd.f32 %v7736_v4, %v6811_v8 }
 0x85f   :  { %v7856_v1 = vpop.f32.mrf.mxu1  ;;  %7133 = vst [vmem:[%s14274_s7 + $0x20] sm:$0xff] %v8151_v2  ;;  %v7083_v5 = vadd.f32 %v7849_v3, %v6986_v18  ;;  %v7788_v6 = vadd.f32 %v7787_v37, %v7786_v60  ;;  %v15940_v3 = vld [vmem:[#allocation96_spill] sm:$0xff] }
 0x860   :  { %v7789_v43 = vpop.f32.mrf.mxu0  ;;  %v7739_v60 = vadd.f32 %v15940_v3, %v15939_v62  ;;  %v15942_v18 = vld [vmem:[#allocation120_spill] sm:$0xff] }
 0x861   :  { %v7857_v21 = vpop.f32.mrf.mxu1  ;;  %8158 = vtanh.f32 %v7083_v5  ;;  %v6989_v36 = vadd.f32 %v7788_v6, %v6892_v55  ;;  %v7678_v2 = vadd.f32 %v15942_v18, %v15941_v29 }
 0x862   :  { %v8153_v46 = vpop.eup %8152  ;;  %v7790_v42 = vpop.f32.mrf.mxu0  ;;  %v7858_v12 = vadd.f32 %v7857_v21, %v7856_v1 }
 0x863   :  { %v7859_v59 = vpop.f32.mrf.mxu1  ;;  %7134 = vst [vmem:[%s14274_s7 + $0x28] sm:$0xff] %v8153_v46  ;;  %v7086_v40 = vadd.f32 %v7852_v9, %v6989_v36  ;;  %v7791_v25 = vadd.f32 %v7790_v42, %v7789_v43  ;;  %v6913_v43 = vadd.f32 %v7739_v60, %v6816_v14  ;;  %v6819_v21 = vadd.f32 %v7678_v2, %v14018_v15  ;;  %v15943_v46 = vld [vmem:[#allocation75_spill] sm:$0xff] }
 0x864   :  { %v7792_v17 = vpop.f32.mrf.mxu0 }
 0x865   :  { %v7860_v54 = vpop.f32.mrf.mxu1  ;;  %8160 = vtanh.f32 %v7086_v40  ;;  %v6994_v30 = vadd.f32 %v7791_v25, %v6897_v24  ;;  %v15944_v24 = vld [vmem:[#allocation142_spill] sm:$0xff] }
 0x866   :  { %v8155_v38 = vpop.eup %8154  ;;  %v7793_v28 = vpop.f32.mrf.mxu0  ;;  %v7861_v33 = vadd.f32 %v7860_v54, %v7859_v59  ;;  %v7742_v63 = vadd.f32 %v15944_v24, %v15943_v46 }
 0x867   :  { %v7862_v61 = vpop.f32.mrf.mxu1  ;;  %7135 = vst [vmem:[%s14274_s7 + $0x30] sm:$0xff] %v8155_v38  ;;  %v7091_v31 = vadd.f32 %v7855_v51, %v6994_v30  ;;  %v7794_v52 = vadd.f32 %v7793_v28, %v7792_v17 }
 0x868   :  { %v7795_v58 = vpop.f32.mrf.mxu0  ;;  %v6916_v54 = vadd.f32 %v7742_v63, %v6819_v21 }
 0x869   :  { %v7863_v50 = vpop.f32.mrf.mxu1  ;;  %8162 = vtanh.f32 %v7091_v31  ;;  %v6997_v11 = vadd.f32 %v7794_v52, %v6900_v26  ;;  %v15945_v52 = vld [vmem:[#allocation112_spill] sm:$0xff] }
 0x86a   :  { %v8157_v7 = vpop.eup %8156  ;;  %v7796_v16 = vpop.f32.mrf.mxu0  ;;  %v7864_v1 = vadd.f32 %v7863_v50, %v7862_v61 }
 0x86b   :  { %v7865_v34 = vpop.f32.mrf.mxu1  ;;  %7136 = vst [vmem:[%s14274_s7 + $0x38] sm:$0xff] %v8157_v7  ;;  %v7094_v32 = vadd.f32 %v7858_v12, %v6997_v11  ;;  %v7797_v39 = vadd.f32 %v7796_v16, %v7795_v58  ;;  %v15946_v7 = vld [vmem:[#allocation115_spill] sm:$0xff] }
 0x86c   :  { %v7798_v27 = vpop.f32.mrf.mxu0 }
 0x86d   :  { %v7866_v47 = vpop.f32.mrf.mxu1  ;;  %8164 = vtanh.f32 %v7094_v32  ;;  %v7002_v0 = vadd.f32 %v7797_v39, %v6905_v45 }
 0x86e   :  { %v8159_v22 = vpop.eup %8158  ;;  %v7799_v23 = vpop.f32.mrf.mxu0  ;;  %v7867_v59 = vadd.f32 %v7866_v47, %v7865_v34 }
 0x86f   :  { %7137 = vst [vmem:[%s14274_s7 + $0x40] sm:$0xff] %v8159_v22  ;;  %v7099_v19 = vadd.f32 %v7861_v33, %v7002_v0  ;;  %v7800_v37 = vadd.f32 %v7799_v23, %v7798_v27  ;;  %v7868_v5 = vpop.f32.mrf.mxu1 }
 0x870   :  { %v7801_v55 = vpop.f32.mrf.mxu0 }
 0x871   :  { %8166 = vtanh.f32 %v7099_v19  ;;  %v7005_v6 = vadd.f32 %v7800_v37, %v6908_v10  ;;  %v7869_v40 = vpop.f32.mrf.mxu1 }
 0x872   :  { %v8161_v9 = vpop.eup %8160  ;;  %v7802_v36 = vpop.f32.mrf.mxu0  ;;  %v7870_v38 = vadd.f32 %v7869_v40, %v7868_v5 }
 0x873   :  { %7138 = vst [vmem:[%s14274_s7 + $0x48] sm:$0xff] %v8161_v9  ;;  %v7102_v20 = vadd.f32 %v7864_v1, %v7005_v6  ;;  %v7803_v42 = vadd.f32 %v7802_v36, %v7801_v55 }
 0x874   :  { %v7804_v49 = vpop.f32.mrf.mxu0 }
 0x875   :  { %8168 = vtanh.f32 %v7102_v20  ;;  %v7010_v25 = vadd.f32 %v7803_v42, %v6913_v43 }
 0x876   :  { %v8163_v51 = vpop.eup %8162  ;;  %v7805_v17 = vpop.f32.mrf.mxu0 }
 0x877   :  { %7139 = vst [vmem:[%s14274_s7 + $0x50] sm:$0xff] %v8163_v51  ;;  %v7107_v15 = vadd.f32 %v7867_v59, %v7010_v25  ;;  %v7806_v30 = vadd.f32 %v7805_v17, %v7804_v49 }
 0x878   :  { %v7823_v41 = vpop.f32.mrf.mxu0 }
 0x879   :  { %8170 = vtanh.f32 %v7107_v15  ;;  %v7013_v57 = vadd.f32 %v7806_v30, %v6916_v54 }
 0x87a   :  { %v8165_v44 = vpop.eup %8164  ;;  %v7824_v28 = vpop.f32.mrf.mxu0 }
 0x87b   :  { %7140 = vst [vmem:[%s14274_s7 + $0x58] sm:$0xff] %v8165_v44  ;;  %v7110_v61 = vadd.f32 %v7870_v38, %v7013_v57  ;;  %v7825_v26 = vadd.f32 %v7824_v28, %v7823_v41 }
 0x87c   :  { %v7826_v31 = vpop.f32.mrf.mxu0 }
 0x87d   :  { %8172 = vtanh.f32 %v7110_v61  ;;  %v7051_v12 = vadd.f32 %v7825_v26, %v15945_v52 }
 0x87e   :  { %v8167_v58 = vpop.eup %8166  ;;  %v7827_v50 = vpop.f32.mrf.mxu0 }
 0x87f   :  { %7141 = vst [vmem:[%s14274_s7 + $0x60] sm:$0xff] %v8167_v58  ;;  %8174 = vtanh.f32 %v7051_v12  ;;  %v7828_v11 = vadd.f32 %v7827_v50, %v7826_v31 }
 0x881   :  { %v7054_v45 = vadd.f32 %v7828_v11, %v15946_v7 }
 0x882   :  { %v8169_v8 = vpop.eup %8168 }
 0x883   :  { %7142 = vst [vmem:[%s14274_s7 + $0x68] sm:$0xff] %v8169_v8  ;;  %8176 = vtanh.f32 %v7054_v45 }
 0x886   :  { %v8171_v53 = vpop.eup %8170 }
 0x887   :  { %7143 = vst [vmem:[%s14274_s7 + $0x70] sm:$0xff] %v8171_v53 }
 0x88a   :  { %v8173_v56 = vpop.eup %8172 }
 0x88b   :  { %7144 = vst [vmem:[%s14274_s7 + $0x78] sm:$0xff] %v8173_v56 }
 0x88c   :  { %v8175_v13 = vpop.eup %8174 }
 0x88d   :  { %7129 = vst [vmem:[%s14274_s7] sm:$0xff] %v8175_v13 }
 0x890   :  { %v8177_v16 = vpop.eup %8176 }
 0x891   :  { %7130 = vst [vmem:[%s14274_s7 + $0x8] sm:$0xff] %v8177_v16 }
 0x892   :  { %8264 = dma.done.wait [#allocation7], 2048  }
 0x893   :  { %8265 = vsyncadd [#allocation7], 4294965248 }
 0x894   :  { %7164 = vsyncpa [#allocation6], 1 }
 0x895   :  { %7165 = vsyncpa [#allocation7], 1 }
 0x896   :  { %7166 = vsyncmov [#allocation4] }
 0x899   :  { %s7167_s29 = vpop.sfrf %7166 }
 0x89a   :  { %p7601_p6 = scmp.ne.s32.totalorder %s7167_s29, 0 }
 0x89c   :  { %7171 = shalt.err (%p7601_p6)  }
 0x89d   :  { %7173 = vsyncmov [#allocation4 + $0x1] }
 0x8a0   :  { %s7174_s30 = vpop.sfrf %7173 }
 0x8a1   :  { %p7602_p7 = scmp.ne.s32.totalorder %s7174_s30, 0 }
 0x8a3   :  { %7178 = shalt.err (%p7602_p7)  }

</bundles_post_ra>
